<compile_context>
chip_gen: v7x
topology: tpu7x:2x2x1
jax: 0.10.0
libtpu: 0.0.40
codegen_flags: <defaults>
</compile_context>

<pallas_src>
import functools

import numpy as np
import jax
import jax.numpy as jnp
from jax.experimental import pallas as pl
from jax.experimental.pallas import tpu as pltpu

# ----------------------------- configuration --------------------------------
VIS_DIM = 64                       # rgb token dim
DEPTH_DIM = 48                     # depth token dim
PATCH_NUM = 4                      # patch grid (h = w = 4)
N_TOKENS = PATCH_NUM * PATCH_NUM   # 16 tokens per image
CIN = VIS_DIM + DEPTH_DIM          # 112 conv input channels
C_PAD = 128                        # lane-aligned padded channel dim (in AND out)
COUT = VIS_DIM                     # 64 real output channels
FLAT = N_TOKENS * C_PAD            # 2048 = token-flattened feature width
MAX_TILE_B = 128                   # <= 2048 token rows per grid step


def _round_up(x, m):
    return (x + m - 1) // m * m


# ============================== Pallas kernel ================================

def _conv_fuser_kernel(x_ref, bigw_ref, bconv_ref, wsel_ref, bsel_ref, out_ref,
                       *, n_tokens, c_pad):
    """Fused ConvFuser on one batch tile.

    x:     (TILE_B, 16*128) bf16   token-flattened, channel-padded activations
    bigw:  (16*128, 16*128) bf16   conv pre-packed as a block matrix (resident)
    bconv: (1, 16*128) f32         conv bias tiled per token (resident)
    wsel:  (128, 128) f32          channel-selection weight, (In, Out), padded
    bsel:  (1, 128) f32
    out:   (TILE_B, 16*128) f32    gated features (channels >= 64 are zero)
    """
    # 3x3 conv over the whole 4x4 patch grid as ONE MXU matmul (bf16 in, f32 acc).
    feat = jnp.dot(x_ref[...], bigw_ref[...],
                   preferred_element_type=jnp.float32) + bconv_ref[...]

    # Mean over tokens: 16 statically lane-aligned 128-wide chunk adds
    # (no reshape / relayout, no membership matrices).
    acc = feat[:, 0:c_pad]
    for t in range(1, n_tokens):
        acc = acc + feat[:, t * c_pad:(t + 1) * c_pad]
    mean = acc * (1.0 / n_tokens)                                   # (TILE_B, 128)

    # channel_selection = Sigmoid(Linear(mean))  (tiny f32 matmul, EUP sigmoid)
    sel = jax.nn.sigmoid(
        jnp.dot(mean, wsel_ref[...], preferred_element_type=jnp.float32)
        + bsel_ref[...])                                            # (TILE_B, 128)

    # Gate every token chunk with the per-batch selection weights; each store is
    # a full 128-lane, (8,128)-tile-aligned unmasked vst.
    for t in range(n_tokens):
        sl = slice(t * c_pad, (t + 1) * c_pad)
        out_ref[:, sl] = feat[:, sl] * sel


# ================================ wrappers ===================================

def conv_fuser(prepared, inputs_rgb, inputs_depth):
    """ConvFuser.forward.

    inputs_rgb: (B, N, VIS_DIM), inputs_depth: (B, N, DEPTH_DIM) -> (B, N, COUT).
    B may already contain the folded time dimension (B*T) -> one kernel launch.
    """
    x = jnp.concatenate([inputs_rgb, inputs_depth], axis=-1).astype(jnp.float32)
    B, N, cin = x.shape

    # Channel pad 112 -> 128 (lane aligned), cast to bf16 (MXU operand), then
    # token-flatten.  The (B, 16, 128) -> (B, 2048) reshape is row-major contiguous
    # (free in HBM); this plumbing is the ONLY host-side layout work -- no im2col.
    x = jnp.pad(x, ((0, 0), (0, 0), (0, C_PAD - cin))).astype(jnp.bfloat16)
    x = x.reshape(B, FLAT)

    tile_b = MAX_TILE_B if B >= MAX_TILE_B else _round_up(B, 8)
    b_pad = _round_up(B, tile_b)
    if b_pad != B:
        # Zero rows -> garbage (but finite) outputs, sliced away below.
        x = jnp.pad(x, ((0, b_pad - B), (0, 0)))

    out = pl.pallas_call(
        functools.partial(_conv_fuser_kernel, n_tokens=N, c_pad=C_PAD),
        out_shape=jax.ShapeDtypeStruct((b_pad, FLAT), jnp.float32),
        grid=(b_pad // tile_b,),
        in_specs=[
            pl.BlockSpec((tile_b, FLAT), lambda i: (i, 0)),   # activations (streamed)
            pl.BlockSpec((FLAT, FLAT), lambda i: (0, 0)),     # BigW (resident)
            pl.BlockSpec((1, FLAT), lambda i: (0, 0)),        # conv bias (resident)
            pl.BlockSpec((C_PAD, C_PAD), lambda i: (0, 0)),   # selection weight
            pl.BlockSpec((1, C_PAD), lambda i: (0, 0)),       # selection bias
        ],
        out_specs=pl.BlockSpec((tile_b, FLAT), lambda i: (i, 0)),
        compiler_params=pltpu.CompilerParams(
            dimension_semantics=("parallel",),                # 2 TCs on v7x
            vmem_limit_bytes=40 * 1024 * 1024),
    )(x, prepared["conv_w_big"], prepared["conv_b_row"],
      prepared["sel_w_pad"], prepared["sel_b_row"])

    # Drop padded batch rows and padded channels.
    return out[:B].reshape(B, N, C_PAD)[:, :, :COUT]


def prepare_params(raw):
    """One-time pre-pack.

    The 3x3 conv (padding=1) on the fixed 4x4 token grid is folded into a single
    block matrix BigW of shape (16*128, 16*128):
        BigW[t_in*128 + c_in, t_out*128 + c_out] = W[c_out, c_in, ky, kx]
    whenever token t_in sits at spatial offset (ky-1, kx-1) from token t_out.
    Channels are zero-padded to 128 on both sides so all matmuls/stores are
    lane-dense.  No transposes / gathers in the traced forward.
    """
    wc = np.asarray(raw["conv_w"], np.float32)       # (Cout, Cin, 3, 3)
    cout, cin = wc.shape[0], wc.shape[1]

    big = np.zeros((FLAT, FLAT), np.float32)
    for yo in range(PATCH_NUM):
        for xo in range(PATCH_NUM):
            t_out = yo * PATCH_NUM + xo
            for ky in range(3):
                for kx in range(3):
                    yi, xi = yo + ky - 1, xo + kx - 1
                    if 0 <= yi < PATCH_NUM and 0 <= xi < PATCH_NUM:
                        t_in = yi * PATCH_NUM + xi
                        big[t_in * C_PAD:t_in * C_PAD + cin,
                            t_out * C_PAD:t_out * C_PAD + cout] = wc[:, :, ky, kx].T

    bconv = np.zeros((C_PAD,), np.float32)
    bconv[:cout] = np.asarray(raw["conv_b"], np.float32)
    bconv_row = np.tile(bconv, N_TOKENS).reshape(1, FLAT)

    wsel = np.zeros((C_PAD, C_PAD), np.float32)
    wsel[:cout, :cout] = np.asarray(raw["sel_w"], np.float32).T   # (In, Out)
    bsel = np.zeros((1, C_PAD), np.float32)
    bsel[0, :cout] = np.asarray(raw["sel_b"], np.float32)

    return dict(
        conv_w_big=jnp.asarray(big, jnp.bfloat16),
        conv_b_row=jnp.asarray(bconv_row, jnp.float32),
        sel_w_pad=jnp.asarray(wsel, jnp.float32),
        sel_b_row=jnp.asarray(bsel, jnp.float32),
    )


def init_params(key):
    """Torch-layout parameters: Conv2d(112, 64, 3, padding=1) + Linear(64, 64)."""
    k1, k2, k3, k4 = jax.random.split(key, 4)
    std = 0.02
    return dict(
        conv_w=std * jax.random.normal(k1, (COUT, CIN, 3, 3), jnp.float32),
        conv_b=std * jax.random.normal(k2, (COUT,), jnp.float32),
        sel_w=std * jax.random.normal(k3, (COUT, COUT), jnp.float32),
        sel_b=std * jax.random.normal(k4, (COUT,), jnp.float32),
    )


def conv_fuser_reference(raw, inputs_rgb, inputs_depth):
    """Pure-JAX reference matching the PyTorch module (f32 everywhere)."""
    x = jnp.concatenate([inputs_rgb, inputs_depth], axis=-1)       # (B, N, Cin)
    B, N, cin = x.shape
    h = w = PATCH_NUM
    img = x.reshape(B, h, w, cin).transpose(0, 3, 1, 2)            # 'b (h w) d -> b d h w'
    feat = jax.lax.conv_general_dilated(
        img, raw["conv_w"], window_strides=(1, 1), padding=((1, 1), (1, 1)),
        dimension_numbers=("NCHW", "OIHW", "NCHW"))
    feat = feat + raw["conv_b"][None, :, None, None]
    feat = feat.transpose(0, 2, 3, 1).reshape(B, N, -1)            # 'b d h w -> b (h w) d'
    sel = jax.nn.sigmoid(feat.mean(axis=1) @ raw["sel_w"].T + raw["sel_b"])
    return feat * sel[:, None, :]


# ==================================== main ===================================

if __name__ == "__main__":
    key = jax.random.PRNGKey(0)
    kp, kr, kd = jax.random.split(key, 3)

    raw = init_params(kp)
    prepared = prepare_params(raw)

    B, T = 2, 3
    rgb = jax.random.normal(kr, (B, T, N_TOKENS, VIS_DIM), jnp.float32)
    depth = jax.random.normal(kd, (B, T, N_TOKENS, DEPTH_DIM), jnp.float32)

    # Fold the time dimension into the batch: one ConvFuser kernel launch for all
    # B*T timesteps instead of T separate calls.
    rgb_bt = rgb.reshape(B * T, N_TOKENS, VIS_DIM)
    depth_bt = depth.reshape(B * T, N_TOKENS, DEPTH_DIM)

    fuser = jax.jit(conv_fuser)
    out = fuser(prepared, rgb_bt, depth_bt)
    jax.block_until_ready(out)
    out = out.reshape(B, T, N_TOKENS, COUT)

    ref = conv_fuser_reference(raw, rgb_bt, depth_bt).reshape(B, T, N_TOKENS, COUT)

    assert out.shape == (B, T, N_TOKENS, COUT)
    assert bool(jnp.all(jnp.isfinite(out)))
    # bf16 conv-matmul operands vs f32 reference -> loose but meaningful tolerance.
    np.testing.assert_allclose(np.asarray(out), np.asarray(ref), rtol=5e-2, atol=5e-2)
    print("KERNEL_OK")
</pallas_src>

<mosaic_0001>
module attributes {stable_mosaic.version = 11 : i64} {
  func.func @_conv_fuser_kernel(%arg0: i32, %arg1: memref<8x2048xbf16, #tpu.memory_space<vmem>>, %arg2: memref<2048x2048xbf16, #tpu.memory_space<vmem>>, %arg3: memref<1x2048xf32, #tpu.memory_space<vmem>>, %arg4: memref<128x128xf32, #tpu.memory_space<vmem>>, %arg5: memref<1x128xf32, #tpu.memory_space<vmem>>, %arg6: memref<8x2048xf32, #tpu.memory_space<vmem>>) attributes {dimension_semantics = [#tpu.dimension_semantics<parallel>], iteration_bounds = array<i64: 1>, scalar_prefetch = 0 : i64, scratch_operands = 0 : i64, tpu.core_type = #tpu.core_type<tc>, window_params = [{transform_indices = @transform_0, window_bounds = array<i64: 8, 2048>}, {pipeline_mode = #tpu.pipeline_mode<synchronous>, transform_indices = @transform_1, window_bounds = array<i64: 2048, 2048>}, {pipeline_mode = #tpu.pipeline_mode<synchronous>, transform_indices = @transform_2, window_bounds = array<i64: 1, 2048>}, {pipeline_mode = #tpu.pipeline_mode<synchronous>, transform_indices = @transform_3, window_bounds = array<i64: 128, 128>}, {pipeline_mode = #tpu.pipeline_mode<synchronous>, transform_indices = @transform_4, window_bounds = array<i64: 1, 128>}, {transform_indices = @transform_5, window_bounds = array<i64: 8, 2048>}]} {
    %c0 = arith.constant 0 : index
    %c0_0 = arith.constant 0 : index
    %0 = vector.load %arg1[%c0, %c0_0] : memref<8x2048xbf16, #tpu.memory_space<vmem>>, vector<8x2048xbf16>
    %c0_1 = arith.constant 0 : index
    %c0_2 = arith.constant 0 : index
    %1 = vector.load %arg2[%c0_1, %c0_2] : memref<2048x2048xbf16, #tpu.memory_space<vmem>>, vector<2048x2048xbf16>
    %cst = arith.constant dense<0.000000e+00> : vector<8x2048xf32>
    %2 = tpu.matmul %0, %1, %cst {dimension_numbers = #tpu.dot_dimension_numbers<[1], [0], [0], [1], [0, 0, 1, 1], [], []>} : vector<8x2048xbf16>, vector<2048x2048xbf16>, vector<8x2048xf32> -> vector<8x2048xf32>
    %c0_3 = arith.constant 0 : index
    %c0_4 = arith.constant 0 : index
    %3 = vector.load %arg3[%c0_3, %c0_4] : memref<1x2048xf32, #tpu.memory_space<vmem>>, vector<1x2048xf32>
    %4 = vector.broadcast %3 : vector<1x2048xf32> to vector<8x2048xf32>
    %5 = arith.addf %2, %4 : vector<8x2048xf32>
    %6 = vector.extract_strided_slice %5 {offsets = [0, 0], sizes = [8, 128], strides = [1, 1]} : vector<8x2048xf32> to vector<8x128xf32>
    %7 = vector.extract_strided_slice %5 {offsets = [0, 128], sizes = [8, 128], strides = [1, 1]} : vector<8x2048xf32> to vector<8x128xf32>
    %8 = arith.addf %6, %7 : vector<8x128xf32>
    %9 = vector.extract_strided_slice %5 {offsets = [0, 256], sizes = [8, 128], strides = [1, 1]} : vector<8x2048xf32> to vector<8x128xf32>
    %10 = arith.addf %8, %9 : vector<8x128xf32>
    %11 = vector.extract_strided_slice %5 {offsets = [0, 384], sizes = [8, 128], strides = [1, 1]} : vector<8x2048xf32> to vector<8x128xf32>
    %12 = arith.addf %10, %11 : vector<8x128xf32>
    %13 = vector.extract_strided_slice %5 {offsets = [0, 512], sizes = [8, 128], strides = [1, 1]} : vector<8x2048xf32> to vector<8x128xf32>
    %14 = arith.addf %12, %13 : vector<8x128xf32>
    %15 = vector.extract_strided_slice %5 {offsets = [0, 640], sizes = [8, 128], strides = [1, 1]} : vector<8x2048xf32> to vector<8x128xf32>
    %16 = arith.addf %14, %15 : vector<8x128xf32>
    %17 = vector.extract_strided_slice %5 {offsets = [0, 768], sizes = [8, 128], strides = [1, 1]} : vector<8x2048xf32> to vector<8x128xf32>
    %18 = arith.addf %16, %17 : vector<8x128xf32>
    %19 = vector.extract_strided_slice %5 {offsets = [0, 896], sizes = [8, 128], strides = [1, 1]} : vector<8x2048xf32> to vector<8x128xf32>
    %20 = arith.addf %18, %19 : vector<8x128xf32>
    %21 = vector.extract_strided_slice %5 {offsets = [0, 1024], sizes = [8, 128], strides = [1, 1]} : vector<8x2048xf32> to vector<8x128xf32>
    %22 = arith.addf %20, %21 : vector<8x128xf32>
    %23 = vector.extract_strided_slice %5 {offsets = [0, 1152], sizes = [8, 128], strides = [1, 1]} : vector<8x2048xf32> to vector<8x128xf32>
    %24 = arith.addf %22, %23 : vector<8x128xf32>
    %25 = vector.extract_strided_slice %5 {offsets = [0, 1280], sizes = [8, 128], strides = [1, 1]} : vector<8x2048xf32> to vector<8x128xf32>
    %26 = arith.addf %24, %25 : vector<8x128xf32>
    %27 = vector.extract_strided_slice %5 {offsets = [0, 1408], sizes = [8, 128], strides = [1, 1]} : vector<8x2048xf32> to vector<8x128xf32>
    %28 = arith.addf %26, %27 : vector<8x128xf32>
    %29 = vector.extract_strided_slice %5 {offsets = [0, 1536], sizes = [8, 128], strides = [1, 1]} : vector<8x2048xf32> to vector<8x128xf32>
    %30 = arith.addf %28, %29 : vector<8x128xf32>
    %31 = vector.extract_strided_slice %5 {offsets = [0, 1664], sizes = [8, 128], strides = [1, 1]} : vector<8x2048xf32> to vector<8x128xf32>
    %32 = arith.addf %30, %31 : vector<8x128xf32>
    %33 = vector.extract_strided_slice %5 {offsets = [0, 1792], sizes = [8, 128], strides = [1, 1]} : vector<8x2048xf32> to vector<8x128xf32>
    %34 = arith.addf %32, %33 : vector<8x128xf32>
    %35 = vector.extract_strided_slice %5 {offsets = [0, 1920], sizes = [8, 128], strides = [1, 1]} : vector<8x2048xf32> to vector<8x128xf32>
    %36 = arith.addf %34, %35 : vector<8x128xf32>
    %cst_5 = arith.constant 6.250000e-02 : f32
    %37 = vector.broadcast %cst_5 : f32 to vector<8x128xf32>
    %38 = arith.mulf %36, %37 : vector<8x128xf32>
    %c0_6 = arith.constant 0 : index
    %c0_7 = arith.constant 0 : index
    %39 = vector.load %arg4[%c0_6, %c0_7] : memref<128x128xf32, #tpu.memory_space<vmem>>, vector<128x128xf32>
    %cst_8 = arith.constant dense<0.000000e+00> : vector<8x128xf32>
    %40 = tpu.matmul %38, %39, %cst_8 {dimension_numbers = #tpu.dot_dimension_numbers<[1], [0], [0], [1], [0, 0, 1, 1], [], []>} : vector<8x128xf32>, vector<128x128xf32>, vector<8x128xf32> -> vector<8x128xf32>
    %c0_9 = arith.constant 0 : index
    %c0_10 = arith.constant 0 : index
    %41 = vector.load %arg5[%c0_9, %c0_10] : memref<1x128xf32, #tpu.memory_space<vmem>>, vector<1x128xf32>
    %42 = vector.broadcast %41 : vector<1x128xf32> to vector<8x128xf32>
    %43 = arith.addf %40, %42 : vector<8x128xf32>
    %44 = arith.negf %43 : vector<8x128xf32>
    %45 = math.exp %44 : vector<8x128xf32>
    %cst_11 = arith.constant 1.000000e+00 : f32
    %46 = vector.broadcast %cst_11 : f32 to vector<8x128xf32>
    %47 = arith.addf %46, %45 : vector<8x128xf32>
    %48 = arith.divf %46, %47 : vector<8x128xf32>
    %49 = vector.extract_strided_slice %5 {offsets = [0, 0], sizes = [8, 128], strides = [1, 1]} : vector<8x2048xf32> to vector<8x128xf32>
    %50 = arith.mulf %49, %48 : vector<8x128xf32>
    %c0_12 = arith.constant 0 : index
    %c0_13 = arith.constant 0 : index
    %51 = vector.load %arg6[%c0_12, %c0_13] : memref<8x2048xf32, #tpu.memory_space<vmem>>, vector<8x128xf32>
    tpu.vector_store %arg6[%c0_12, %c0_13], %50 {strides = array<i32>} : memref<8x2048xf32, #tpu.memory_space<vmem>>, vector<8x128xf32>,
    %52 = vector.extract_strided_slice %5 {offsets = [0, 128], sizes = [8, 128], strides = [1, 1]} : vector<8x2048xf32> to vector<8x128xf32>
    %53 = arith.mulf %52, %48 : vector<8x128xf32>
    %c0_14 = arith.constant 0 : index
    %c128 = arith.constant 128 : index
    %54 = vector.load %arg6[%c0_14, %c128] : memref<8x2048xf32, #tpu.memory_space<vmem>>, vector<8x128xf32>
    tpu.vector_store %arg6[%c0_14, %c128], %53 {strides = array<i32>} : memref<8x2048xf32, #tpu.memory_space<vmem>>, vector<8x128xf32>,
    %55 = vector.extract_strided_slice %5 {offsets = [0, 256], sizes = [8, 128], strides = [1, 1]} : vector<8x2048xf32> to vector<8x128xf32>
    %56 = arith.mulf %55, %48 : vector<8x128xf32>
    %c0_15 = arith.constant 0 : index
    %c256 = arith.constant 256 : index
    %57 = vector.load %arg6[%c0_15, %c256] : memref<8x2048xf32, #tpu.memory_space<vmem>>, vector<8x128xf32>
    tpu.vector_store %arg6[%c0_15, %c256], %56 {strides = array<i32>} : memref<8x2048xf32, #tpu.memory_space<vmem>>, vector<8x128xf32>,
    %58 = vector.extract_strided_slice %5 {offsets = [0, 384], sizes = [8, 128], strides = [1, 1]} : vector<8x2048xf32> to vector<8x128xf32>
    %59 = arith.mulf %58, %48 : vector<8x128xf32>
    %c0_16 = arith.constant 0 : index
    %c384 = arith.constant 384 : index
    %60 = vector.load %arg6[%c0_16, %c384] : memref<8x2048xf32, #tpu.memory_space<vmem>>, vector<8x128xf32>
    tpu.vector_store %arg6[%c0_16, %c384], %59 {strides = array<i32>} : memref<8x2048xf32, #tpu.memory_space<vmem>>, vector<8x128xf32>,
    %61 = vector.extract_strided_slice %5 {offsets = [0, 512], sizes = [8, 128], strides = [1, 1]} : vector<8x2048xf32> to vector<8x128xf32>
    %62 = arith.mulf %61, %48 : vector<8x128xf32>
    %c0_17 = arith.constant 0 : index
    %c512 = arith.constant 512 : index
    %63 = vector.load %arg6[%c0_17, %c512] : memref<8x2048xf32, #tpu.memory_space<vmem>>, vector<8x128xf32>
    tpu.vector_store %arg6[%c0_17, %c512], %62 {strides = array<i32>} : memref<8x2048xf32, #tpu.memory_space<vmem>>, vector<8x128xf32>,
    %64 = vector.extract_strided_slice %5 {offsets = [0, 640], sizes = [8, 128], strides = [1, 1]} : vector<8x2048xf32> to vector<8x128xf32>
    %65 = arith.mulf %64, %48 : vector<8x128xf32>
    %c0_18 = arith.constant 0 : index
    %c640 = arith.constant 640 : index
    %66 = vector.load %arg6[%c0_18, %c640] : memref<8x2048xf32, #tpu.memory_space<vmem>>, vector<8x128xf32>
    tpu.vector_store %arg6[%c0_18, %c640], %65 {strides = array<i32>} : memref<8x2048xf32, #tpu.memory_space<vmem>>, vector<8x128xf32>,
    %67 = vector.extract_strided_slice %5 {offsets = [0, 768], sizes = [8, 128], strides = [1, 1]} : vector<8x2048xf32> to vector<8x128xf32>
    %68 = arith.mulf %67, %48 : vector<8x128xf32>
    %c0_19 = arith.constant 0 : index
    %c768 = arith.constant 768 : index
    %69 = vector.load %arg6[%c0_19, %c768] : memref<8x2048xf32, #tpu.memory_space<vmem>>, vector<8x128xf32>
    tpu.vector_store %arg6[%c0_19, %c768], %68 {strides = array<i32>} : memref<8x2048xf32, #tpu.memory_space<vmem>>, vector<8x128xf32>,
    %70 = vector.extract_strided_slice %5 {offsets = [0, 896], sizes = [8, 128], strides = [1, 1]} : vector<8x2048xf32> to vector<8x128xf32>
    %71 = arith.mulf %70, %48 : vector<8x128xf32>
    %c0_20 = arith.constant 0 : index
    %c896 = arith.constant 896 : index
    %72 = vector.load %arg6[%c0_20, %c896] : memref<8x2048xf32, #tpu.memory_space<vmem>>, vector<8x128xf32>
    tpu.vector_store %arg6[%c0_20, %c896], %71 {strides = array<i32>} : memref<8x2048xf32, #tpu.memory_space<vmem>>, vector<8x128xf32>,
    %73 = vector.extract_strided_slice %5 {offsets = [0, 1024], sizes = [8, 128], strides = [1, 1]} : vector<8x2048xf32> to vector<8x128xf32>
    %74 = arith.mulf %73, %48 : vector<8x128xf32>
    %c0_21 = arith.constant 0 : index
    %c1024 = arith.constant 1024 : index
    %75 = vector.load %arg6[%c0_21, %c1024] : memref<8x2048xf32, #tpu.memory_space<vmem>>, vector<8x128xf32>
    tpu.vector_store %arg6[%c0_21, %c1024], %74 {strides = array<i32>} : memref<8x2048xf32, #tpu.memory_space<vmem>>, vector<8x128xf32>,
    %76 = vector.extract_strided_slice %5 {offsets = [0, 1152], sizes = [8, 128], strides = [1, 1]} : vector<8x2048xf32> to vector<8x128xf32>
    %77 = arith.mulf %76, %48 : vector<8x128xf32>
    %c0_22 = arith.constant 0 : index
    %c1152 = arith.constant 1152 : index
    %78 = vector.load %arg6[%c0_22, %c1152] : memref<8x2048xf32, #tpu.memory_space<vmem>>, vector<8x128xf32>
    tpu.vector_store %arg6[%c0_22, %c1152], %77 {strides = array<i32>} : memref<8x2048xf32, #tpu.memory_space<vmem>>, vector<8x128xf32>,
    %79 = vector.extract_strided_slice %5 {offsets = [0, 1280], sizes = [8, 128], strides = [1, 1]} : vector<8x2048xf32> to vector<8x128xf32>
    %80 = arith.mulf %79, %48 : vector<8x128xf32>
    %c0_23 = arith.constant 0 : index
    %c1280 = arith.constant 1280 : index
    %81 = vector.load %arg6[%c0_23, %c1280] : memref<8x2048xf32, #tpu.memory_space<vmem>>, vector<8x128xf32>
    tpu.vector_store %arg6[%c0_23, %c1280], %80 {strides = array<i32>} : memref<8x2048xf32, #tpu.memory_space<vmem>>, vector<8x128xf32>,
    %82 = vector.extract_strided_slice %5 {offsets = [0, 1408], sizes = [8, 128], strides = [1, 1]} : vector<8x2048xf32> to vector<8x128xf32>
    %83 = arith.mulf %82, %48 : vector<8x128xf32>
    %c0_24 = arith.constant 0 : index
    %c1408 = arith.constant 1408 : index
    %84 = vector.load %arg6[%c0_24, %c1408] : memref<8x2048xf32, #tpu.memory_space<vmem>>, vector<8x128xf32>
    tpu.vector_store %arg6[%c0_24, %c1408], %83 {strides = array<i32>} : memref<8x2048xf32, #tpu.memory_space<vmem>>, vector<8x128xf32>,
    %85 = vector.extract_strided_slice %5 {offsets = [0, 1536], sizes = [8, 128], strides = [1, 1]} : vector<8x2048xf32> to vector<8x128xf32>
    %86 = arith.mulf %85, %48 : vector<8x128xf32>
    %c0_25 = arith.constant 0 : index
    %c1536 = arith.constant 1536 : index
    %87 = vector.load %arg6[%c0_25, %c1536] : memref<8x2048xf32, #tpu.memory_space<vmem>>, vector<8x128xf32>
    tpu.vector_store %arg6[%c0_25, %c1536], %86 {strides = array<i32>} : memref<8x2048xf32, #tpu.memory_space<vmem>>, vector<8x128xf32>,
    %88 = vector.extract_strided_slice %5 {offsets = [0, 1664], sizes = [8, 128], strides = [1, 1]} : vector<8x2048xf32> to vector<8x128xf32>
    %89 = arith.mulf %88, %48 : vector<8x128xf32>
    %c0_26 = arith.constant 0 : index
    %c1664 = arith.constant 1664 : index
    %90 = vector.load %arg6[%c0_26, %c1664] : memref<8x2048xf32, #tpu.memory_space<vmem>>, vector<8x128xf32>
    tpu.vector_store %arg6[%c0_26, %c1664], %89 {strides = array<i32>} : memref<8x2048xf32, #tpu.memory_space<vmem>>, vector<8x128xf32>,
    %91 = vector.extract_strided_slice %5 {offsets = [0, 1792], sizes = [8, 128], strides = [1, 1]} : vector<8x2048xf32> to vector<8x128xf32>
    %92 = arith.mulf %91, %48 : vector<8x128xf32>
    %c0_27 = arith.constant 0 : index
    %c1792 = arith.constant 1792 : index
    %93 = vector.load %arg6[%c0_27, %c1792] : memref<8x2048xf32, #tpu.memory_space<vmem>>, vector<8x128xf32>
    tpu.vector_store %arg6[%c0_27, %c1792], %92 {strides = array<i32>} : memref<8x2048xf32, #tpu.memory_space<vmem>>, vector<8x128xf32>,
    %94 = vector.extract_strided_slice %5 {offsets = [0, 1920], sizes = [8, 128], strides = [1, 1]} : vector<8x2048xf32> to vector<8x128xf32>
    %95 = arith.mulf %94, %48 : vector<8x128xf32>
    %c0_28 = arith.constant 0 : index
    %c1920 = arith.constant 1920 : index
    %96 = vector.load %arg6[%c0_28, %c1920] : memref<8x2048xf32, #tpu.memory_space<vmem>>, vector<8x128xf32>
    tpu.vector_store %arg6[%c0_28, %c1920], %95 {strides = array<i32>} : memref<8x2048xf32, #tpu.memory_space<vmem>>, vector<8x128xf32>,
    return
  }
  func.func @transform_0(%arg0: i32) -> (i32, i32) {
    %c0_i32 = arith.constant 0 : i32
    %c0_i32_0 = arith.constant 0 : i32
    return %arg0, %c0_i32 : i32, i32
  }
  func.func @transform_1(%arg0: i32) -> (i32, i32) {
    %c0_i32 = arith.constant 0 : i32
    %c0_i32_0 = arith.constant 0 : i32
    %c0_i32_1 = arith.constant 0 : i32
    return %c0_i32, %c0_i32_0 : i32, i32
  }
  func.func @transform_2(%arg0: i32) -> (i32, i32) {
    %c0_i32 = arith.constant 0 : i32
    %c0_i32_0 = arith.constant 0 : i32
    %c0_i32_1 = arith.constant 0 : i32
    return %c0_i32, %c0_i32_0 : i32, i32
  }
  func.func @transform_3(%arg0: i32) -> (i32, i32) {
    %c0_i32 = arith.constant 0 : i32
    %c0_i32_0 = arith.constant 0 : i32
    %c0_i32_1 = arith.constant 0 : i32
    return %c0_i32, %c0_i32_0 : i32, i32
  }
  func.func @transform_4(%arg0: i32) -> (i32, i32) {
    %c0_i32 = arith.constant 0 : i32
    %c0_i32_0 = arith.constant 0 : i32
    %c0_i32_1 = arith.constant 0 : i32
    return %c0_i32, %c0_i32_0 : i32, i32
  }
  func.func @transform_5(%arg0: i32) -> (i32, i32) {
    %c0_i32 = arith.constant 0 : i32
    %c0_i32_0 = arith.constant 0 : i32
    return %arg0, %c0_i32 : i32, i32
  }
}

</mosaic_0001>

<bundles_post_ra>
// kernel: conv_fuser.1
= control target key start
LH: loop header
LB: loop body
LE: loop exit
PB: predicated region body
PF: predicated region fallthrough
CT: control target
= control target key end

     0   :  { %10 = vsyncpa [#allocation3], 0  ;;  %s18224_s0 = inlined_call_operand.vmem [shape: bf16[8,2048], index: 0, kind: input, shape index: {}]   ;;  %s18225_s1 = inlined_call_operand.hbm [shape: bf16[2048,2048], index: 1, kind: input, shape index: {}]   ;;  %s18226_s2 = inlined_call_operand.hbm [shape: f32[1,2048], index: 2, kind: input, shape index: {}]   ;;  %s18227_s3 = inlined_call_operand.hbm [shape: f32[128,128], index: 3, kind: input, shape index: {}]   ;;  %s18228_s4 = inlined_call_operand.hbm [shape: f32[1,128], index: 4, kind: input, shape index: {}]   ;;  %s18229_s5 = inlined_call_operand.vmem [shape: f32[8,2048], index: 5, kind: output, shape index: {}]  }
   0x1   :  { %11 = vsyncpa [#allocation5], 0 }
   0x2   :  { %12 = vsyncpa [#allocation8], 0  ;;  %s17792_s18 = smov [#allocation4]   ;;  %s17793_s20 = smov [#allocation2]  }
   0x3   :  { %s33_s19 = sshll.u32 %s17792_s18, 4  ;;  %s20_s21 = sshll.u32 %s17793_s20, 4  ;;  %s34_s19 = int_to_ptr.vmem [resolvable:$true] %s33_s19  ;;  %s17833_s21 = int_to_ptr.vmem [resolvable:$true] %s20_s21 }
   0x4   :  { %s17698_s24 = scalar_lea.hbm %s18226_s2, 256 }
   0x5   :  { %p17699_p0 = scmp.ne.s32.totalorder %s18226_s2, %s17698_s24  ;;  %p17702_p1 = scmp.lt.u32.totalorder %s17698_s24, %s18226_s2 }
   0x7   :  { %p17704_p2 = pnand %p17702_p1, %p17699_p0 }
   0x9   :  { %17707 = shalt.err (!%p17704_p2)
}
   0xa   :  { %s17708_s29 = scalar_lea.vmem %s34_s19, 256  ;;  %p17713_p4 = scmp.lt.s32.totalorder %s34_s19, %s34_s19 }
   0xb   :  { %p17709_p3 = scmp.ne.s32.totalorder %s34_s19, %s17708_s29  ;;  %p17714_p5 = scmp.lt.s32.totalorder %s17708_s29, %s17708_s29 }
   0xd   :  { %p17715_p6 = por %p17714_p5, %p17713_p4 }
   0xf   :  { %p17716_p7 = pnand %p17715_p6, %p17709_p3 }
  0x11   :  { %17719 = shalt.err (!%p17716_p7)
}
  0x12   :  { %36 = dma.hbm_to_vmem [thread:$0]  %s18226_s2, 256, %s34_s19, [#allocation5]  }
  0x13   :  { %s17720_s9 = scalar_lea.hbm %s18225_s1, 262144 }
  0x14   :  { %p17721_p8 = scmp.ne.s32.totalorder %s18225_s1, %s17720_s9  ;;  %p17724_p9 = scmp.lt.u32.totalorder %s17720_s9, %s18225_s1 }
  0x16   :  { %p17726_p10 = pnand %p17724_p9, %p17721_p8 }
  0x18   :  { %17729 = shalt.err (!%p17726_p10)
}
  0x19   :  { %s17730_s14 = scalar_lea.vmem %s17833_s21, 262144  ;;  %p17735_p12 = scmp.lt.s32.totalorder %s17833_s21, %s17833_s21 }
  0x1a   :  { %p17731_p11 = scmp.ne.s32.totalorder %s17833_s21, %s17730_s14  ;;  %p17736_p13 = scmp.lt.s32.totalorder %s17730_s14, %s17730_s14 }
  0x1c   :  { %p17737_p0 = por %p17736_p13, %p17735_p12 }
  0x1e   :  { %p17738_p1 = pnand %p17737_p0, %p17731_p11 }
  0x20   :  { %17741 = shalt.err (!%p17738_p1)
}
  0x21   :  { %s17794_s2 = smov 1024   ;;  %s17795_s15 = smov 64  }
  0x22   :  { %26 = dma.hbm_to_vmem [thread:$0]  %s18225_s1, 262144, %s17833_s21, [#allocation3], %s17794_s2, %s17794_s2, %s17795_s15  }
  0x23   :  { %s17796_s18 = smov [#allocation6]   ;;  %s17742_s23 = scalar_lea.hbm %s18227_s3, 2048 }
  0x24   :  { %s42_s19 = sshll.u32 %s17796_s18, 4  ;;  %p17743_p2 = scmp.ne.s32.totalorder %s18227_s3, %s17742_s23  ;;  %s43_s19 = int_to_ptr.vmem [resolvable:$true] %s42_s19 }
  0x25   :  { %p17746_p3 = scmp.lt.u32.totalorder %s17742_s23, %s18227_s3 }
  0x27   :  { %p17748_p4 = pnand %p17746_p3, %p17743_p2 }
  0x29   :  { %17751 = shalt.err (!%p17748_p4)
}
  0x2a   :  { %s17752_s28 = scalar_lea.vmem %s43_s19, 2048  ;;  %p17757_p6 = scmp.lt.s32.totalorder %s43_s19, %s43_s19 }
  0x2b   :  { %p17753_p5 = scmp.ne.s32.totalorder %s43_s19, %s17752_s28  ;;  %p17758_p7 = scmp.lt.s32.totalorder %s17752_s28, %s17752_s28 }
  0x2d   :  { %p17759_p8 = por %p17758_p7, %p17757_p6 }
  0x2f   :  { %p17760_p9 = pnand %p17759_p8, %p17753_p5 }
  0x31   :  { %17763 = shalt.err (!%p17760_p9)
}
  0x32   :  { %s17797_s1 = smov 128   ;;  %s17798_s21 = smov 8  }
  0x33   :  { %48 = dma.hbm_to_vmem [thread:$0]  %s18227_s3, 2048, %s43_s19, [#allocation5], %s17797_s1, %s17797_s1, %s17798_s21  }
  0x34   :  { %s17799_s6 = smov [#allocation7]   ;;  %s17764_s10 = scalar_lea.hbm %s18228_s4, 16 }
  0x35   :  { %s55_s7 = sshll.u32 %s17799_s6, 4  ;;  %p17765_p10 = scmp.ne.s32.totalorder %s18228_s4, %s17764_s10  ;;  %s56_s7 = int_to_ptr.vmem [resolvable:$true] %s55_s7 }
  0x36   :  { %p17768_p11 = scmp.lt.u32.totalorder %s17764_s10, %s18228_s4 }
  0x38   :  { %p17770_p12 = pnand %p17768_p11, %p17765_p10 }
  0x3a   :  { %17773 = shalt.err (!%p17770_p12)
}
  0x3b   :  { %s17774_s2 = scalar_lea.vmem %s56_s7, 16  ;;  %s17778_s3 = scalar_lea.vmem %s56_s7, 32 }
  0x3c   :  { %p17775_p13 = scmp.ne.s32.totalorder %s56_s7, %s17774_s2  ;;  %p17779_p0 = scmp.lt.s32.totalorder %s56_s7, %s56_s7 }
  0x3d   :  { %p17780_p1 = scmp.lt.s32.totalorder %s17778_s3, %s17774_s2 }
  0x3f   :  { %p17781_p2 = por %p17780_p1, %p17779_p0 }
  0x41   :  { %p17782_p3 = pnand %p17781_p2, %p17775_p13 }
  0x43   :  { %17785 = shalt.err (!%p17782_p3)
}
  0x44   :  { %58 = dma.hbm_to_vmem [thread:$0]  %s18228_s4, 16, %s56_s7, [#allocation8]  }
  0x45   :  { %17786 = dma.done.wait [#allocation3], 262144  }
  0x46   :  { %17787 = vsyncadd [#allocation3], 4294705152 }
  0x47   :  { %17788 = dma.done.wait [#allocation5], 2304  }
  0x48   :  { %17789 = vsyncadd [#allocation5], 4294964992 }
  0x49   :  { %17790 = dma.done.wait [#allocation8], 16  }
  0x4a   :  { %17791 = vsyncadd [#allocation8], 4294967280  ;;  %v79_v0 = vld [vmem:[#allocation2] sm:$0xff]  ;;  %v80_v2 = vld [vmem:[#allocation2 + $0x8] sm:$0xff]  ;;  %vm17801_vm0 = vmmov 0  }
  0x4b   :  { %v87_v1 = vld [vmem:[#allocation2 + $0x40] sm:$0xff]  ;;  %v88_v4 = vld [vmem:[#allocation2 + $0x48] sm:$0xff] }
  0x4c   :  { %v15302_v3 = vcombine.high %v79_v0, %v87_v1  ;;  %v15301_v5 = vcombine.low %v79_v0, %v87_v1  ;;  %v95_v6 = vld [vmem:[#allocation2 + $0x80] sm:$0xff]  ;;  %v15304_v8 = vcombine.high %v80_v2, %v88_v4  ;;  %v15303_v9 = vcombine.low %v80_v2, %v88_v4  ;;  %v96_v11 = vld [vmem:[#allocation2 + $0x88] sm:$0xff] }
  0x4d   :  { %v103_v7 = vld [vmem:[#allocation2 + $0xc0] sm:$0xff]  ;;  %v104_v12 = vld [vmem:[#allocation2 + $0xc8] sm:$0xff] }
  0x4e   :  { %v15318_v10 = vcombine.high %v95_v6, %v103_v7  ;;  %v111_v13 = vld [vmem:[#allocation2 + $0x100] sm:$0xff]  ;;  %12507 = vmatprep.subr.bf16.mxu0 %v15302_v3  ;;  %v15320_v14 = vcombine.high %v96_v11, %v104_v12  ;;  %v112_v16 = vld [vmem:[#allocation2 + $0x108] sm:$0xff]  ;;  %12835 = vmatprep.subr.bf16.mxu1 %v15304_v8  ;;  %v15317_v18 = vcombine.low %v95_v6, %v103_v7 }
  0x4f   :  { %v119_v15 = vld [vmem:[#allocation2 + $0x140] sm:$0xff]  ;;  %v120_v17 = vld [vmem:[#allocation2 + $0x148] sm:$0xff]  ;;  %12508 = vmatpush1.bf16.msra.mxu0 %v15301_v5  ;;  %12836 = vmatpush1.bf16.msra.mxu1 %v15303_v9  ;;  %v15319_v19 = vcombine.low %v96_v11, %v104_v12 }
  0x50   :  { %12509 = vmatprep.subr.bf16.mxu0 %v15318_v10  ;;  %v15334_v20 = vcombine.high %v111_v13, %v119_v15  ;;  %12837 = vmatprep.subr.bf16.mxu1 %v15320_v14  ;;  %v15336_v21 = vcombine.high %v112_v16, %v120_v17  ;;  %v127_v22 = vld [vmem:[#allocation2 + $0x180] sm:$0xff]  ;;  %v128_v24 = vld [vmem:[#allocation2 + $0x188] sm:$0xff]  ;;  %v15333_v26 = vcombine.low %v111_v13, %v119_v15 }
  0x51   :  { %v135_v23 = vld [vmem:[#allocation2 + $0x1c0] sm:$0xff]  ;;  %v136_v25 = vld [vmem:[#allocation2 + $0x1c8] sm:$0xff]  ;;  %v15335_v27 = vcombine.low %v112_v16, %v120_v17 }
  0x52   :  { %v15350_v28 = vcombine.high %v127_v22, %v135_v23  ;;  %v15352_v29 = vcombine.high %v128_v24, %v136_v25  ;;  %v143_v30 = vld [vmem:[#allocation2 + $0x200] sm:$0xff]  ;;  %v144_v32 = vld [vmem:[#allocation2 + $0x208] sm:$0xff]  ;;  %v15349_v34 = vcombine.low %v127_v22, %v135_v23  ;;  %v15351_v35 = vcombine.low %v128_v24, %v136_v25 }
  0x53   :  { %12510 = vmatpush1.bf16.msra.mxu0 %v15317_v18  ;;  %12838 = vmatpush1.bf16.msra.mxu1 %v15319_v19  ;;  %v151_v31 = vld [vmem:[#allocation2 + $0x240] sm:$0xff]  ;;  %v152_v33 = vld [vmem:[#allocation2 + $0x248] sm:$0xff] }
  0x54   :  { %12511 = vmatprep.subr.bf16.mxu0 %v15334_v20  ;;  %12839 = vmatprep.subr.bf16.mxu1 %v15336_v21  ;;  %v15366_v36 = vcombine.high %v143_v30, %v151_v31  ;;  %v15368_v37 = vcombine.high %v144_v32, %v152_v33  ;;  %v159_v38 = vld [vmem:[#allocation2 + $0x280] sm:$0xff]  ;;  %v160_v40 = vld [vmem:[#allocation2 + $0x288] sm:$0xff]  ;;  %v15365_v42 = vcombine.low %v143_v30, %v151_v31 }
  0x55   :  { %v167_v39 = vld [vmem:[#allocation2 + $0x2c0] sm:$0xff]  ;;  %v168_v41 = vld [vmem:[#allocation2 + $0x2c8] sm:$0xff]  ;;  %v15367_v43 = vcombine.low %v144_v32, %v152_v33 }
  0x56   :  { %v15382_v44 = vcombine.high %v159_v38, %v167_v39  ;;  %v15384_v45 = vcombine.high %v160_v40, %v168_v41  ;;  %v175_v46 = vld [vmem:[#allocation2 + $0x300] sm:$0xff]  ;;  %v176_v48 = vld [vmem:[#allocation2 + $0x308] sm:$0xff]  ;;  %v15381_v50 = vcombine.low %v159_v38, %v167_v39  ;;  %v15383_v51 = vcombine.low %v160_v40, %v168_v41 }
  0x57   :  { %12512 = vmatpush1.bf16.msra.mxu0 %v15333_v26  ;;  %12840 = vmatpush1.bf16.msra.mxu1 %v15335_v27  ;;  %v183_v47 = vld [vmem:[#allocation2 + $0x340] sm:$0xff]  ;;  %v184_v49 = vld [vmem:[#allocation2 + $0x348] sm:$0xff] }
  0x58   :  { %12513 = vmatprep.subr.bf16.mxu0 %v15350_v28  ;;  %12841 = vmatprep.subr.bf16.mxu1 %v15352_v29  ;;  %v15398_v52 = vcombine.high %v175_v46, %v183_v47  ;;  %v17891_v53 = vld [vmem:[%s18224_s0] sm:$0xff]  ;;  %v15400_v54 = vcombine.high %v176_v48, %v184_v49  ;;  %v192_v58 = vld [vmem:[#allocation2 + $0x388] sm:$0xff]  ;;  %v15397_v60 = vcombine.low %v175_v46, %v183_v47 }
  0x59   :  { %v191_v55 = vld [vmem:[#allocation2 + $0x380] sm:$0xff]  ;;  %v17895_v57 = vcombine.high %v17891_v53, %v17891_v53  ;;  %v200_v59 = vld [vmem:[#allocation2 + $0x3c8] sm:$0xff]  ;;  %v15399_v61 = vcombine.low %v176_v48, %v184_v49 }
  0x5a   :  { %v199_v56 = vld [vmem:[#allocation2 + $0x3c0] sm:$0xff]  ;;  %v15416_v63 = vcombine.high %v192_v58, %v200_v59  ;;  %v208_v2 = vld [vmem:[#allocation2 + $0x408] sm:$0xff]  ;;  %v15415_v5 = vcombine.low %v192_v58, %v200_v59 }
  0x5b   :  { %12514 = vmatpush1.bf16.msra.mxu0 %v15349_v34  ;;  %12842 = vmatpush1.bf16.msra.mxu1 %v15351_v35  ;;  %v15414_v62 = vcombine.high %v191_v55, %v199_v56  ;;  %v207_v0 = vld [vmem:[#allocation2 + $0x400] sm:$0xff]  ;;  %v216_v3 = vld [vmem:[#allocation2 + $0x448] sm:$0xff]  ;;  %v15413_v4 = vcombine.low %v191_v55, %v199_v56 }
  0x5c   :  { %12515 = vmatprep.subr.bf16.mxu0 %v15366_v36  ;;  %12843 = vmatprep.subr.bf16.mxu1 %v15368_v37  ;;  %v215_v1 = vld [vmem:[#allocation2 + $0x440] sm:$0xff]  ;;  %v15432_v7 = vcombine.high %v208_v2, %v216_v3  ;;  %v224_v10 = vld [vmem:[#allocation2 + $0x488] sm:$0xff]  ;;  %v15431_v13 = vcombine.low %v208_v2, %v216_v3 }
  0x5d   :  { %12539 = vmatprep.mubr.bf16.mxu0 %v17895_v57  ;;  %12867 = vmatprep.mubr.bf16.mxu1 %v17895_v57  ;;  %v15430_v6 = vcombine.high %v207_v0, %v215_v1  ;;  %v223_v8 = vld [vmem:[#allocation2 + $0x480] sm:$0xff]  ;;  %v232_v11 = vld [vmem:[#allocation2 + $0x4c8] sm:$0xff]  ;;  %v15429_v12 = vcombine.low %v207_v0, %v215_v1 }
  0x5e   :  { %v231_v9 = vld [vmem:[#allocation2 + $0x4c0] sm:$0xff]  ;;  %v15448_v15 = vcombine.high %v224_v10, %v232_v11  ;;  %v240_v18 = vld [vmem:[#allocation2 + $0x508] sm:$0xff]  ;;  %v15447_v21 = vcombine.low %v224_v10, %v232_v11 }
  0x5f   :  { %12516 = vmatpush1.bf16.msra.mxu0 %v15365_v42  ;;  %12844 = vmatpush1.bf16.msra.mxu1 %v15367_v43  ;;  %v15446_v14 = vcombine.high %v223_v8, %v231_v9  ;;  %v239_v16 = vld [vmem:[#allocation2 + $0x500] sm:$0xff]  ;;  %v248_v19 = vld [vmem:[#allocation2 + $0x548] sm:$0xff]  ;;  %v15445_v20 = vcombine.low %v223_v8, %v231_v9 }
  0x60   :  { %12517 = vmatprep.subr.bf16.mxu0 %v15382_v44  ;;  %12845 = vmatprep.subr.bf16.mxu1 %v15384_v45  ;;  %v247_v17 = vld [vmem:[#allocation2 + $0x540] sm:$0xff]  ;;  %v15464_v23 = vcombine.high %v240_v18, %v248_v19  ;;  %v256_v26 = vld [vmem:[#allocation2 + $0x588] sm:$0xff]  ;;  %v15463_v29 = vcombine.low %v240_v18, %v248_v19 }
  0x61   :  { %v15462_v22 = vcombine.high %v239_v16, %v247_v17  ;;  %v255_v24 = vld [vmem:[#allocation2 + $0x580] sm:$0xff]  ;;  %v264_v27 = vld [vmem:[#allocation2 + $0x5c8] sm:$0xff]  ;;  %v15461_v28 = vcombine.low %v239_v16, %v247_v17 }
  0x62   :  { %v263_v25 = vld [vmem:[#allocation2 + $0x5c0] sm:$0xff]  ;;  %v15480_v31 = vcombine.high %v256_v26, %v264_v27  ;;  %v272_v34 = vld [vmem:[#allocation2 + $0x608] sm:$0xff]  ;;  %v15479_v37 = vcombine.low %v256_v26, %v264_v27 }
  0x63   :  { %12518 = vmatpush1.bf16.msra.mxu0 %v15381_v50  ;;  %12846 = vmatpush1.bf16.msra.mxu1 %v15383_v51  ;;  %v15478_v30 = vcombine.high %v255_v24, %v263_v25  ;;  %v271_v32 = vld [vmem:[#allocation2 + $0x600] sm:$0xff]  ;;  %v280_v35 = vld [vmem:[#allocation2 + $0x648] sm:$0xff]  ;;  %v15477_v36 = vcombine.low %v255_v24, %v263_v25 }
  0x64   :  { %12519 = vmatprep.subr.bf16.mxu0 %v15398_v52  ;;  %12847 = vmatprep.subr.bf16.mxu1 %v15400_v54  ;;  %v279_v33 = vld [vmem:[#allocation2 + $0x640] sm:$0xff]  ;;  %v15496_v39 = vcombine.high %v272_v34, %v280_v35  ;;  %v288_v42 = vld [vmem:[#allocation2 + $0x688] sm:$0xff]  ;;  %v15495_v45 = vcombine.low %v272_v34, %v280_v35 }
  0x65   :  { %v15494_v38 = vcombine.high %v271_v32, %v279_v33  ;;  %v287_v40 = vld [vmem:[#allocation2 + $0x680] sm:$0xff]  ;;  %v296_v43 = vld [vmem:[#allocation2 + $0x6c8] sm:$0xff]  ;;  %v15493_v44 = vcombine.low %v271_v32, %v279_v33 }
  0x66   :  { %v295_v41 = vld [vmem:[#allocation2 + $0x6c0] sm:$0xff]  ;;  %v15512_v47 = vcombine.high %v288_v42, %v296_v43  ;;  %v304_v50 = vld [vmem:[#allocation2 + $0x708] sm:$0xff]  ;;  %v15511_v54 = vcombine.low %v288_v42, %v296_v43 }
  0x67   :  { %12520 = vmatpush1.bf16.msra.mxu0 %v15397_v60  ;;  %12848 = vmatpush1.bf16.msra.mxu1 %v15399_v61  ;;  %v15510_v46 = vcombine.high %v287_v40, %v295_v41  ;;  %v303_v48 = vld [vmem:[#allocation2 + $0x700] sm:$0xff]  ;;  %v312_v51 = vld [vmem:[#allocation2 + $0x748] sm:$0xff]  ;;  %v15509_v52 = vcombine.low %v287_v40, %v295_v41 }
  0x68   :  { %12521 = vmatprep.subr.bf16.mxu0 %v15414_v62  ;;  %12849 = vmatprep.subr.bf16.mxu1 %v15416_v63  ;;  %v311_v49 = vld [vmem:[#allocation2 + $0x740] sm:$0xff]  ;;  %v15528_v56 = vcombine.high %v304_v50, %v312_v51  ;;  %v320_v60 = vld [vmem:[#allocation2 + $0x788] sm:$0xff]  ;;  %v15527_v63 = vcombine.low %v304_v50, %v312_v51 }
  0x69   :  { %v15526_v55 = vcombine.high %v303_v48, %v311_v49  ;;  %v319_v58 = vld [vmem:[#allocation2 + $0x780] sm:$0xff]  ;;  %v328_v61 = vld [vmem:[#allocation2 + $0x7c8] sm:$0xff]  ;;  %v15525_v62 = vcombine.low %v303_v48, %v311_v49 }
  0x6a   :  { %v327_v59 = vld [vmem:[#allocation2 + $0x7c0] sm:$0xff]  ;;  %v15544_v1 = vcombine.high %v320_v60, %v328_v61 }
  0x6b   :  { %12522 = vmatpush1.bf16.msra.mxu0 %v15413_v4  ;;  %12850 = vmatpush1.bf16.msra.mxu1 %v15415_v5  ;;  %v15542_v0 = vcombine.high %v319_v58, %v327_v59  ;;  %v335_v2 = vld [vmem:[#allocation2 + $0x800] sm:$0xff]  ;;  %v336_v4 = vld [vmem:[#allocation2 + $0x808] sm:$0xff] }
  0x6c   :  { %12523 = vmatprep.subr.bf16.mxu0 %v15430_v6  ;;  %12851 = vmatprep.subr.bf16.mxu1 %v15432_v7  ;;  %v343_v3 = vld [vmem:[#allocation2 + $0x840] sm:$0xff]  ;;  %v344_v5 = vld [vmem:[#allocation2 + $0x848] sm:$0xff]  ;;  %v15541_v6 = vcombine.low %v319_v58, %v327_v59  ;;  %v15543_v7 = vcombine.low %v320_v60, %v328_v61 }
  0x6d   :  { %v15558_v8 = vcombine.high %v335_v2, %v343_v3  ;;  %v15560_v9 = vcombine.high %v336_v4, %v344_v5  ;;  %v351_v10 = vld [vmem:[#allocation2 + $0x880] sm:$0xff]  ;;  %v15557_v16 = vcombine.low %v335_v2, %v343_v3  ;;  %v15559_v17 = vcombine.low %v336_v4, %v344_v5 }
  0x6e   :  { %v359_v11 = vld [vmem:[#allocation2 + $0x8c0] sm:$0xff] }
  0x6f   :  { %12524 = vmatpush1.bf16.msra.mxu0 %v15429_v12  ;;  %12852 = vmatpush1.bf16.msra.mxu1 %v15431_v13  ;;  %v17901_v12 = vcombine.low %v17891_v53, %v17891_v53  ;;  %v352_v13 = vld [vmem:[#allocation2 + $0x888] sm:$0xff]  ;;  %v15574_v18 = vcombine.high %v351_v10, %v359_v11  ;;  %v15573_v24 = vcombine.low %v351_v10, %v359_v11 }
  0x70   :  { %12525 = vmatprep.subr.bf16.mxu0 %v15446_v14  ;;  %12853 = vmatprep.subr.bf16.mxu1 %v15448_v15  ;;  %v360_v14 = vld [vmem:[#allocation2 + $0x8c8] sm:$0xff] }
  0x71   :  { %v17906_v15 = vld [vmem:[%s18224_s0 + $0x8] sm:$0xff]  ;;  %v15576_v19 = vcombine.high %v352_v13, %v360_v14  ;;  %v15575_v25 = vcombine.low %v352_v13, %v360_v14 }
  0x72   :  { %v17910_v53 = vcombine.high %v17906_v15, %v17906_v15 }
  0x73   :  { %12526 = vmatpush1.bf16.msra.mxu0 %v15445_v20  ;;  %12854 = vmatpush1.bf16.msra.mxu1 %v15447_v21  ;;  %v367_v20 = vld [vmem:[#allocation2 + $0x900] sm:$0xff] }
  0x74   :  { %12527 = vmatprep.subr.bf16.mxu0 %v15462_v22  ;;  %12855 = vmatprep.subr.bf16.mxu1 %v15464_v23  ;;  %v375_v21 = vld [vmem:[#allocation2 + $0x940] sm:$0xff]  ;;  %v368_v22 = vld [vmem:[#allocation2 + $0x908] sm:$0xff] }
  0x75   :  { %v376_v23 = vld [vmem:[#allocation2 + $0x948] sm:$0xff]  ;;  %v15590_v26 = vcombine.high %v367_v20, %v375_v21  ;;  %v15589_v32 = vcombine.low %v367_v20, %v375_v21 }
  0x76   :  { %v15592_v27 = vcombine.high %v368_v22, %v376_v23  ;;  %v15591_v33 = vcombine.low %v368_v22, %v376_v23 }
  0x77   :  { %12528 = vmatpush1.bf16.msra.mxu0 %v15461_v28  ;;  %12856 = vmatpush1.bf16.msra.mxu1 %v15463_v29  ;;  %v383_v28 = vld [vmem:[#allocation2 + $0x980] sm:$0xff] }
  0x78   :  { %12529 = vmatprep.subr.bf16.mxu0 %v15478_v30  ;;  %12857 = vmatprep.subr.bf16.mxu1 %v15480_v31  ;;  %v391_v29 = vld [vmem:[#allocation2 + $0x9c0] sm:$0xff]  ;;  %v384_v30 = vld [vmem:[#allocation2 + $0x988] sm:$0xff] }
  0x79   :  { %v392_v31 = vld [vmem:[#allocation2 + $0x9c8] sm:$0xff]  ;;  %v15606_v34 = vcombine.high %v383_v28, %v391_v29  ;;  %v15605_v40 = vcombine.low %v383_v28, %v391_v29 }
  0x7a   :  { %v15608_v35 = vcombine.high %v384_v30, %v392_v31  ;;  %v15607_v41 = vcombine.low %v384_v30, %v392_v31 }
  0x7b   :  { %12530 = vmatpush1.bf16.msra.mxu0 %v15477_v36  ;;  %12858 = vmatpush1.bf16.msra.mxu1 %v15479_v37  ;;  %v399_v36 = vld [vmem:[#allocation2 + $0xa00] sm:$0xff] }
  0x7c   :  { %12531 = vmatprep.subr.bf16.mxu0 %v15494_v38  ;;  %12859 = vmatprep.subr.bf16.mxu1 %v15496_v39  ;;  %v407_v37 = vld [vmem:[#allocation2 + $0xa40] sm:$0xff]  ;;  %v400_v38 = vld [vmem:[#allocation2 + $0xa08] sm:$0xff] }
  0x7d   :  { %v408_v39 = vld [vmem:[#allocation2 + $0xa48] sm:$0xff]  ;;  %v15622_v42 = vcombine.high %v399_v36, %v407_v37  ;;  %v15621_v48 = vcombine.low %v399_v36, %v407_v37 }
  0x7e   :  { %v15624_v43 = vcombine.high %v400_v38, %v408_v39  ;;  %v15623_v49 = vcombine.low %v400_v38, %v408_v39 }
  0x7f   :  { %12532 = vmatpush1.bf16.msra.mxu0 %v15493_v44  ;;  %12860 = vmatpush1.bf16.msra.mxu1 %v15495_v45  ;;  %v415_v44 = vld [vmem:[#allocation2 + $0xa80] sm:$0xff] }
  0x80   :  { %12533 = vmatprep.subr.bf16.mxu0 %v15510_v46  ;;  %12861 = vmatprep.subr.bf16.mxu1 %v15512_v47  ;;  %v423_v45 = vld [vmem:[#allocation2 + $0xac0] sm:$0xff]  ;;  %v416_v46 = vld [vmem:[#allocation2 + $0xa88] sm:$0xff] }
  0x81   :  { %v424_v47 = vld [vmem:[#allocation2 + $0xac8] sm:$0xff]  ;;  %v15638_v50 = vcombine.high %v415_v44, %v423_v45  ;;  %v15637_v58 = vcombine.low %v415_v44, %v423_v45 }
  0x82   :  { %v15640_v51 = vcombine.high %v416_v46, %v424_v47  ;;  %v15639_v59 = vcombine.low %v416_v46, %v424_v47 }
  0x83   :  { %12534 = vmatpush1.bf16.msra.mxu0 %v15509_v52  ;;  %12862 = vmatpush1.bf16.msra.mxu1 %v15511_v54  ;;  %v431_v52 = vld [vmem:[#allocation2 + $0xb00] sm:$0xff] }
  0x84   :  { %12535 = vmatprep.subr.bf16.mxu0 %v15526_v55  ;;  %12863 = vmatprep.subr.bf16.mxu1 %v15528_v56  ;;  %v439_v54 = vld [vmem:[#allocation2 + $0xb40] sm:$0xff]  ;;  %v432_v55 = vld [vmem:[#allocation2 + $0xb08] sm:$0xff] }
  0x85   :  { %v440_v56 = vld [vmem:[#allocation2 + $0xb48] sm:$0xff]  ;;  %v15654_v60 = vcombine.high %v431_v52, %v439_v54  ;;  %v15653_v2 = vcombine.low %v431_v52, %v439_v54 }
  0x86   :  { %v15656_v61 = vcombine.high %v432_v55, %v440_v56  ;;  %v15655_v3 = vcombine.low %v432_v55, %v440_v56 }
  0x87   :  { %12536 = vmatpush1.bf16.msra.mxu0 %v15525_v62  ;;  %12864 = vmatpush1.bf16.msra.mxu1 %v15527_v63  ;;  %v447_v62 = vld [vmem:[#allocation2 + $0xb80] sm:$0xff] }
  0x88   :  { %12537 = vmatprep.subr.bf16.mxu0 %v15542_v0  ;;  %12865 = vmatprep.subr.bf16.mxu1 %v15544_v1  ;;  %v455_v63 = vld [vmem:[#allocation2 + $0xbc0] sm:$0xff]  ;;  %v448_v0 = vld [vmem:[#allocation2 + $0xb88] sm:$0xff] }
  0x89   :  { %v456_v1 = vld [vmem:[#allocation2 + $0xbc8] sm:$0xff]  ;;  %v15670_v4 = vcombine.high %v447_v62, %v455_v63  ;;  %v15669_v10 = vcombine.low %v447_v62, %v455_v63 }
  0x8a   :  { %v15672_v5 = vcombine.high %v448_v0, %v456_v1  ;;  %v15671_v11 = vcombine.low %v448_v0, %v456_v1 }
  0x8b   :  { %12538 = vmatpush1.bf16.msra.mxu0 %v15541_v6  ;;  %12866 = vmatpush1.bf16.msra.mxu1 %v15543_v7  ;;  %v463_v6 = vld [vmem:[#allocation2 + $0xc00] sm:$0xff] }
  0x8c   :  { %12548 = vmatprep.subr.bf16.mxu0 %v15558_v8  ;;  %12876 = vmatprep.subr.bf16.mxu1 %v15560_v9  ;;  %v471_v7 = vld [vmem:[#allocation2 + $0xc40] sm:$0xff]  ;;  %v464_v8 = vld [vmem:[#allocation2 + $0xc08] sm:$0xff] }
  0x8d   :  { %v472_v9 = vld [vmem:[#allocation2 + $0xc48] sm:$0xff]  ;;  %v15686_v13 = vcombine.high %v463_v6, %v471_v7  ;;  %v15685_v20 = vcombine.low %v463_v6, %v471_v7 }
  0x8e   :  { %12540 = vmatmul.mubr.bf16.vlgmr.msra.gmra.mrb[0].mxu0 %v17901_v12  ;;  %12868 = vmatmul.mubr.bf16.vlgmr.msra.gmra.mrb[0].mxu1 %v17901_v12  ;;  %v15688_v14 = vcombine.high %v464_v8, %v472_v9  ;;  %v15687_v21 = vcombine.low %v464_v8, %v472_v9 }
  0x8f   :  { %12549 = vmatpush1.bf16.msra.mxu0 %v15557_v16  ;;  %12877 = vmatpush1.bf16.msra.mxu1 %v15559_v17  ;;  %v479_v16 = vld [vmem:[#allocation2 + $0xc80] sm:$0xff] }
  0x90   :  { %12550 = vmatprep.subr.bf16.mxu0 %v15574_v18  ;;  %12878 = vmatprep.subr.bf16.mxu1 %v15576_v19  ;;  %v487_v17 = vld [vmem:[#allocation2 + $0xcc0] sm:$0xff]  ;;  %v480_v18 = vld [vmem:[#allocation2 + $0xc88] sm:$0xff] }
  0x91   :  { %12580 = vmatprep.mubr.bf16.mxu0 %v17910_v53  ;;  %12908 = vmatprep.mubr.bf16.mxu1 %v17910_v53  ;;  %v488_v19 = vld [vmem:[#allocation2 + $0xcc8] sm:$0xff]  ;;  %v15702_v22 = vcombine.high %v479_v16, %v487_v17  ;;  %v15701_v28 = vcombine.low %v479_v16, %v487_v17 }
  0x92   :  { %v15704_v23 = vcombine.high %v480_v18, %v488_v19  ;;  %v15703_v29 = vcombine.low %v480_v18, %v488_v19 }
  0x93   :  { %12551 = vmatpush1.bf16.msra.mxu0 %v15573_v24  ;;  %12879 = vmatpush1.bf16.msra.mxu1 %v15575_v25  ;;  %v495_v24 = vld [vmem:[#allocation2 + $0xd00] sm:$0xff] }
  0x94   :  { %12552 = vmatprep.subr.bf16.mxu0 %v15590_v26  ;;  %12880 = vmatprep.subr.bf16.mxu1 %v15592_v27  ;;  %v503_v25 = vld [vmem:[#allocation2 + $0xd40] sm:$0xff]  ;;  %v496_v26 = vld [vmem:[#allocation2 + $0xd08] sm:$0xff] }
  0x95   :  { %v504_v27 = vld [vmem:[#allocation2 + $0xd48] sm:$0xff]  ;;  %v15718_v30 = vcombine.high %v495_v24, %v503_v25  ;;  %v15717_v36 = vcombine.low %v495_v24, %v503_v25  ;;  %v17923_v25 = vld [vmem:[%s18224_s0 + $0x10] sm:$0xff] }
  0x96   :  { %v15720_v31 = vcombine.high %v496_v26, %v504_v27  ;;  %v15719_v37 = vcombine.low %v496_v26, %v504_v27  ;;  %v616_v24 = vld [vmem:[#allocation2 + $0x10c8] sm:$0xff] }
  0x97   :  { %12553 = vmatpush1.bf16.msra.mxu0 %v15589_v32  ;;  %12881 = vmatpush1.bf16.msra.mxu1 %v15591_v33  ;;  %v511_v32 = vld [vmem:[#allocation2 + $0xd80] sm:$0xff] }
  0x98   :  { %12554 = vmatprep.subr.bf16.mxu0 %v15606_v34  ;;  %12882 = vmatprep.subr.bf16.mxu1 %v15608_v35  ;;  %v519_v33 = vld [vmem:[#allocation2 + $0xdc0] sm:$0xff]  ;;  %v512_v34 = vld [vmem:[#allocation2 + $0xd88] sm:$0xff] }
  0x99   :  { %v520_v35 = vld [vmem:[#allocation2 + $0xdc8] sm:$0xff]  ;;  %v15734_v38 = vcombine.high %v511_v32, %v519_v33  ;;  %v15733_v44 = vcombine.low %v511_v32, %v519_v33 }
  0x9a   :  { %v15736_v39 = vcombine.high %v512_v34, %v520_v35  ;;  %v15735_v45 = vcombine.low %v512_v34, %v520_v35  ;;  %v624_v32 = vld [vmem:[#allocation2 + $0x1108] sm:$0xff] }
  0x9b   :  { %12555 = vmatpush1.bf16.msra.mxu0 %v15605_v40  ;;  %12883 = vmatpush1.bf16.msra.mxu1 %v15607_v41  ;;  %v527_v40 = vld [vmem:[#allocation2 + $0xe00] sm:$0xff]  ;;  %v632_v33 = vld [vmem:[#allocation2 + $0x1148] sm:$0xff] }
  0x9c   :  { %12556 = vmatprep.subr.bf16.mxu0 %v15622_v42  ;;  %12884 = vmatprep.subr.bf16.mxu1 %v15624_v43  ;;  %v535_v41 = vld [vmem:[#allocation2 + $0xe40] sm:$0xff]  ;;  %v528_v42 = vld [vmem:[#allocation2 + $0xe08] sm:$0xff] }
  0x9d   :  { %v536_v43 = vld [vmem:[#allocation2 + $0xe48] sm:$0xff]  ;;  %v15750_v46 = vcombine.high %v527_v40, %v535_v41  ;;  %v15749_v52 = vcombine.low %v527_v40, %v535_v41 }
  0x9e   :  { %v15752_v47 = vcombine.high %v528_v42, %v536_v43  ;;  %v15751_v54 = vcombine.low %v528_v42, %v536_v43  ;;  %v640_v40 = vld [vmem:[#allocation2 + $0x1188] sm:$0xff]  ;;  %v15847_v43 = vcombine.low %v624_v32, %v632_v33 }
  0x9f   :  { %12557 = vmatpush1.bf16.msra.mxu0 %v15621_v48  ;;  %12885 = vmatpush1.bf16.msra.mxu1 %v15623_v49  ;;  %v543_v48 = vld [vmem:[#allocation2 + $0xe80] sm:$0xff]  ;;  %v648_v41 = vld [vmem:[#allocation2 + $0x11c8] sm:$0xff] }
  0xa0   :  { %12558 = vmatprep.subr.bf16.mxu0 %v15638_v50  ;;  %12886 = vmatprep.subr.bf16.mxu1 %v15640_v51  ;;  %v551_v49 = vld [vmem:[#allocation2 + $0xec0] sm:$0xff]  ;;  %v544_v50 = vld [vmem:[#allocation2 + $0xe88] sm:$0xff] }
  0xa1   :  { %v552_v51 = vld [vmem:[#allocation2 + $0xec8] sm:$0xff]  ;;  %v15766_v55 = vcombine.high %v543_v48, %v551_v49  ;;  %v15765_v62 = vcombine.low %v543_v48, %v551_v49 }
  0xa2   :  { %v15768_v56 = vcombine.high %v544_v50, %v552_v51  ;;  %v15767_v63 = vcombine.low %v544_v50, %v552_v51  ;;  %v656_v48 = vld [vmem:[#allocation2 + $0x1208] sm:$0xff]  ;;  %v15863_v51 = vcombine.low %v640_v40, %v648_v41 }
  0xa3   :  { %12559 = vmatpush1.bf16.msra.mxu0 %v15637_v58  ;;  %12887 = vmatpush1.bf16.msra.mxu1 %v15639_v59  ;;  %v559_v58 = vld [vmem:[#allocation2 + $0xf00] sm:$0xff]  ;;  %v664_v49 = vld [vmem:[#allocation2 + $0x1248] sm:$0xff] }
  0xa4   :  { %12560 = vmatprep.subr.bf16.mxu0 %v15654_v60  ;;  %12888 = vmatprep.subr.bf16.mxu1 %v15656_v61  ;;  %v567_v59 = vld [vmem:[#allocation2 + $0xf40] sm:$0xff]  ;;  %v560_v60 = vld [vmem:[#allocation2 + $0xf08] sm:$0xff] }
  0xa5   :  { %v568_v61 = vld [vmem:[#allocation2 + $0xf48] sm:$0xff]  ;;  %v15782_v0 = vcombine.high %v559_v58, %v567_v59  ;;  %v15781_v6 = vcombine.low %v559_v58, %v567_v59 }
  0xa6   :  { %v15784_v1 = vcombine.high %v560_v60, %v568_v61  ;;  %v15783_v7 = vcombine.low %v560_v60, %v568_v61  ;;  %v672_v58 = vld [vmem:[#allocation2 + $0x1288] sm:$0xff]  ;;  %v15879_v61 = vcombine.low %v656_v48, %v664_v49 }
  0xa7   :  { %12561 = vmatpush1.bf16.msra.mxu0 %v15653_v2  ;;  %12889 = vmatpush1.bf16.msra.mxu1 %v15655_v3  ;;  %v575_v2 = vld [vmem:[#allocation2 + $0xf80] sm:$0xff]  ;;  %v680_v59 = vld [vmem:[#allocation2 + $0x12c8] sm:$0xff] }
  0xa8   :  { %12562 = vmatprep.subr.bf16.mxu0 %v15670_v4  ;;  %12890 = vmatprep.subr.bf16.mxu1 %v15672_v5  ;;  %v583_v3 = vld [vmem:[#allocation2 + $0xfc0] sm:$0xff]  ;;  %v576_v4 = vld [vmem:[#allocation2 + $0xf88] sm:$0xff] }
  0xa9   :  { %v584_v5 = vld [vmem:[#allocation2 + $0xfc8] sm:$0xff]  ;;  %v15798_v8 = vcombine.high %v575_v2, %v583_v3  ;;  %v15797_v16 = vcombine.low %v575_v2, %v583_v3 }
  0xaa   :  { %v15800_v9 = vcombine.high %v576_v4, %v584_v5  ;;  %v15799_v17 = vcombine.low %v576_v4, %v584_v5  ;;  %v688_v2 = vld [vmem:[#allocation2 + $0x1308] sm:$0xff]  ;;  %v15895_v5 = vcombine.low %v672_v58, %v680_v59 }
  0xab   :  { %12563 = vmatpush1.bf16.msra.mxu0 %v15669_v10  ;;  %12891 = vmatpush1.bf16.msra.mxu1 %v15671_v11  ;;  %v591_v10 = vld [vmem:[#allocation2 + $0x1000] sm:$0xff]  ;;  %v696_v3 = vld [vmem:[#allocation2 + $0x1348] sm:$0xff] }
  0xac   :  { %12564 = vmatprep.subr.bf16.mxu0 %v15686_v13  ;;  %12892 = vmatprep.subr.bf16.mxu1 %v15688_v14  ;;  %v599_v11 = vld [vmem:[#allocation2 + $0x1040] sm:$0xff]  ;;  %v592_v13 = vld [vmem:[#allocation2 + $0x1008] sm:$0xff] }
  0xad   :  { %v600_v14 = vld [vmem:[#allocation2 + $0x1048] sm:$0xff]  ;;  %v15814_v18 = vcombine.high %v591_v10, %v599_v11  ;;  %v15813_v26 = vcombine.low %v591_v10, %v599_v11 }
  0xae   :  { %v15816_v19 = vcombine.high %v592_v13, %v600_v14  ;;  %v15815_v27 = vcombine.low %v592_v13, %v600_v14  ;;  %v704_v10 = vld [vmem:[#allocation2 + $0x1388] sm:$0xff]  ;;  %v15911_v14 = vcombine.low %v688_v2, %v696_v3 }
  0xaf   :  { %12565 = vmatpush1.bf16.msra.mxu0 %v15685_v20  ;;  %12893 = vmatpush1.bf16.msra.mxu1 %v15687_v21  ;;  %v607_v20 = vld [vmem:[#allocation2 + $0x1080] sm:$0xff]  ;;  %v712_v11 = vld [vmem:[#allocation2 + $0x13c8] sm:$0xff] }
  0xb0   :  { %12566 = vmatprep.subr.bf16.mxu0 %v15702_v22  ;;  %12894 = vmatprep.subr.bf16.mxu1 %v15704_v23  ;;  %v615_v21 = vld [vmem:[#allocation2 + $0x10c0] sm:$0xff]  ;;  %v17918_v22 = vcombine.low %v17906_v15, %v17906_v15  ;;  %v608_v23 = vld [vmem:[#allocation2 + $0x1088] sm:$0xff]  ;;  %v17927_v15 = vcombine.high %v17923_v25, %v17923_v25 }
  0xb1   :  { %v15829_v34 = vcombine.low %v607_v20, %v615_v21  ;;  %v15831_v35 = vcombine.low %v608_v23, %v616_v24 }
  0xb3   :  { %12567 = vmatpush1.bf16.msra.mxu0 %v15701_v28  ;;  %12895 = vmatpush1.bf16.msra.mxu1 %v15703_v29  ;;  %v15830_v28 = vcombine.high %v607_v20, %v615_v21  ;;  %v15832_v29 = vcombine.high %v608_v23, %v616_v24  ;;  %v720_v20 = vld [vmem:[#allocation2 + $0x1408] sm:$0xff]  ;;  %v15927_v24 = vcombine.low %v704_v10, %v712_v11 }
  0xb4   :  { %12568 = vmatprep.subr.bf16.mxu0 %v15718_v30  ;;  %12896 = vmatprep.subr.bf16.mxu1 %v15720_v31  ;;  %v623_v30 = vld [vmem:[#allocation2 + $0x1100] sm:$0xff]  ;;  %v728_v21 = vld [vmem:[#allocation2 + $0x1448] sm:$0xff] }
  0xb5   :  { %v631_v31 = vld [vmem:[#allocation2 + $0x1140] sm:$0xff] }
  0xb6   :  { %v15845_v42 = vcombine.low %v623_v30, %v631_v31 }
  0xb7   :  { %12569 = vmatpush1.bf16.msra.mxu0 %v15717_v36  ;;  %12897 = vmatpush1.bf16.msra.mxu1 %v15719_v37  ;;  %v15846_v36 = vcombine.high %v623_v30, %v631_v31  ;;  %v15848_v37 = vcombine.high %v624_v32, %v632_v33  ;;  %v736_v30 = vld [vmem:[#allocation2 + $0x1488] sm:$0xff]  ;;  %v15943_v33 = vcombine.low %v720_v20, %v728_v21 }
  0xb8   :  { %12570 = vmatprep.subr.bf16.mxu0 %v15734_v38  ;;  %12898 = vmatprep.subr.bf16.mxu1 %v15736_v39  ;;  %v639_v38 = vld [vmem:[#allocation2 + $0x1180] sm:$0xff]  ;;  %v744_v31 = vld [vmem:[#allocation2 + $0x14c8] sm:$0xff] }
  0xb9   :  { %v647_v39 = vld [vmem:[#allocation2 + $0x11c0] sm:$0xff] }
  0xba   :  { %v15861_v50 = vcombine.low %v639_v38, %v647_v39 }
  0xbb   :  { %12571 = vmatpush1.bf16.msra.mxu0 %v15733_v44  ;;  %12899 = vmatpush1.bf16.msra.mxu1 %v15735_v45  ;;  %v15862_v44 = vcombine.high %v639_v38, %v647_v39  ;;  %v15864_v45 = vcombine.high %v640_v40, %v648_v41  ;;  %v752_v38 = vld [vmem:[#allocation2 + $0x1508] sm:$0xff]  ;;  %v15959_v41 = vcombine.low %v736_v30, %v744_v31 }
  0xbc   :  { %12572 = vmatprep.subr.bf16.mxu0 %v15750_v46  ;;  %12900 = vmatprep.subr.bf16.mxu1 %v15752_v47  ;;  %v655_v46 = vld [vmem:[#allocation2 + $0x1200] sm:$0xff]  ;;  %v760_v39 = vld [vmem:[#allocation2 + $0x1548] sm:$0xff] }
  0xbd   :  { %v663_v47 = vld [vmem:[#allocation2 + $0x1240] sm:$0xff] }
  0xbe   :  { %v15877_v60 = vcombine.low %v655_v46, %v663_v47 }
  0xbf   :  { %12573 = vmatpush1.bf16.msra.mxu0 %v15749_v52  ;;  %12901 = vmatpush1.bf16.msra.mxu1 %v15751_v54  ;;  %v15878_v52 = vcombine.high %v655_v46, %v663_v47  ;;  %v15880_v54 = vcombine.high %v656_v48, %v664_v49  ;;  %v768_v46 = vld [vmem:[#allocation2 + $0x1588] sm:$0xff]  ;;  %v15975_v49 = vcombine.low %v752_v38, %v760_v39 }
  0xc0   :  { %12574 = vmatprep.subr.bf16.mxu0 %v15766_v55  ;;  %12902 = vmatprep.subr.bf16.mxu1 %v15768_v56  ;;  %v671_v55 = vld [vmem:[#allocation2 + $0x1280] sm:$0xff]  ;;  %v776_v47 = vld [vmem:[#allocation2 + $0x15c8] sm:$0xff] }
  0xc1   :  { %v679_v56 = vld [vmem:[#allocation2 + $0x12c0] sm:$0xff] }
  0xc2   :  { %v15893_v4 = vcombine.low %v671_v55, %v679_v56 }
  0xc3   :  { %12575 = vmatpush1.bf16.msra.mxu0 %v15765_v62  ;;  %12903 = vmatpush1.bf16.msra.mxu1 %v15767_v63  ;;  %v15894_v62 = vcombine.high %v671_v55, %v679_v56  ;;  %v15896_v63 = vcombine.high %v672_v58, %v680_v59  ;;  %v784_v55 = vld [vmem:[#allocation2 + $0x1608] sm:$0xff]  ;;  %v15991_v59 = vcombine.low %v768_v46, %v776_v47 }
  0xc4   :  { %12576 = vmatprep.subr.bf16.mxu0 %v15782_v0  ;;  %12904 = vmatprep.subr.bf16.mxu1 %v15784_v1  ;;  %v687_v0 = vld [vmem:[#allocation2 + $0x1300] sm:$0xff]  ;;  %v792_v56 = vld [vmem:[#allocation2 + $0x1648] sm:$0xff] }
  0xc5   :  { %v695_v1 = vld [vmem:[#allocation2 + $0x1340] sm:$0xff] }
  0xc6   :  { %v15909_v13 = vcombine.low %v687_v0, %v695_v1 }
  0xc7   :  { %12577 = vmatpush1.bf16.msra.mxu0 %v15781_v6  ;;  %12905 = vmatpush1.bf16.msra.mxu1 %v15783_v7  ;;  %v15910_v6 = vcombine.high %v687_v0, %v695_v1  ;;  %v15912_v7 = vcombine.high %v688_v2, %v696_v3  ;;  %v800_v0 = vld [vmem:[#allocation2 + $0x1688] sm:$0xff]  ;;  %v16007_v3 = vcombine.low %v784_v55, %v792_v56 }
  0xc8   :  { %12578 = vmatprep.subr.bf16.mxu0 %v15798_v8  ;;  %12906 = vmatprep.subr.bf16.mxu1 %v15800_v9  ;;  %v703_v8 = vld [vmem:[#allocation2 + $0x1380] sm:$0xff]  ;;  %v808_v1 = vld [vmem:[#allocation2 + $0x16c8] sm:$0xff] }
  0xc9   :  { %v711_v9 = vld [vmem:[#allocation2 + $0x13c0] sm:$0xff] }
  0xca   :  { %v15925_v23 = vcombine.low %v703_v8, %v711_v9 }
  0xcb   :  { %12579 = vmatpush1.bf16.msra.mxu0 %v15797_v16  ;;  %12907 = vmatpush1.bf16.msra.mxu1 %v15799_v17  ;;  %v15926_v16 = vcombine.high %v703_v8, %v711_v9  ;;  %v15928_v17 = vcombine.high %v704_v10, %v712_v11  ;;  %v816_v8 = vld [vmem:[#allocation2 + $0x1708] sm:$0xff]  ;;  %v16023_v11 = vcombine.low %v800_v0, %v808_v1 }
  0xcc   :  { %12589 = vmatprep.subr.bf16.mxu0 %v15814_v18  ;;  %12917 = vmatprep.subr.bf16.mxu1 %v15816_v19  ;;  %v719_v18 = vld [vmem:[#allocation2 + $0x1400] sm:$0xff]  ;;  %v824_v9 = vld [vmem:[#allocation2 + $0x1748] sm:$0xff] }
  0xcd   :  { %v727_v19 = vld [vmem:[#allocation2 + $0x1440] sm:$0xff] }
  0xce   :  { %12581 = vmatmul.mubr.bf16.vlgmr.msra.gmra.mrb[0].mxu0 %v17918_v22  ;;  %12909 = vmatmul.mubr.bf16.vlgmr.msra.gmra.mrb[0].mxu1 %v17918_v22  ;;  %v15941_v32 = vcombine.low %v719_v18, %v727_v19 }
  0xcf   :  { %12590 = vmatpush1.bf16.msra.mxu0 %v15813_v26  ;;  %12918 = vmatpush1.bf16.msra.mxu1 %v15815_v27  ;;  %v15942_v26 = vcombine.high %v719_v18, %v727_v19  ;;  %v15944_v27 = vcombine.high %v720_v20, %v728_v21  ;;  %v832_v18 = vld [vmem:[#allocation2 + $0x1788] sm:$0xff]  ;;  %v16039_v21 = vcombine.low %v816_v8, %v824_v9 }
  0xd0   :  { %12591 = vmatprep.subr.bf16.mxu0 %v15830_v28  ;;  %12919 = vmatprep.subr.bf16.mxu1 %v15832_v29  ;;  %v735_v28 = vld [vmem:[#allocation2 + $0x1480] sm:$0xff]  ;;  %v840_v19 = vld [vmem:[#allocation2 + $0x17c8] sm:$0xff] }
  0xd1   :  { %12621 = vmatprep.mubr.bf16.mxu0 %v17927_v15  ;;  %12949 = vmatprep.mubr.bf16.mxu1 %v17927_v15  ;;  %v743_v29 = vld [vmem:[#allocation2 + $0x14c0] sm:$0xff] }
  0xd2   :  { %v15957_v40 = vcombine.low %v735_v28, %v743_v29 }
  0xd3   :  { %12592 = vmatpush1.bf16.msra.mxu0 %v15829_v34  ;;  %12920 = vmatpush1.bf16.msra.mxu1 %v15831_v35  ;;  %v15958_v34 = vcombine.high %v735_v28, %v743_v29  ;;  %v15960_v35 = vcombine.high %v736_v30, %v744_v31  ;;  %v848_v28 = vld [vmem:[#allocation2 + $0x1808] sm:$0xff]  ;;  %v16055_v31 = vcombine.low %v832_v18, %v840_v19 }
  0xd4   :  { %12593 = vmatprep.subr.bf16.mxu0 %v15846_v36  ;;  %12921 = vmatprep.subr.bf16.mxu1 %v15848_v37  ;;  %v751_v36 = vld [vmem:[#allocation2 + $0x1500] sm:$0xff]  ;;  %v856_v29 = vld [vmem:[#allocation2 + $0x1848] sm:$0xff] }
  0xd5   :  { %v759_v37 = vld [vmem:[#allocation2 + $0x1540] sm:$0xff] }
  0xd6   :  { %v15973_v48 = vcombine.low %v751_v36, %v759_v37 }
  0xd7   :  { %12594 = vmatpush1.bf16.msra.mxu0 %v15845_v42  ;;  %12922 = vmatpush1.bf16.msra.mxu1 %v15847_v43  ;;  %v15974_v42 = vcombine.high %v751_v36, %v759_v37  ;;  %v15976_v43 = vcombine.high %v752_v38, %v760_v39  ;;  %v17935_v36 = vcombine.low %v17923_v25, %v17923_v25  ;;  %v864_v37 = vld [vmem:[#allocation2 + $0x1888] sm:$0xff]  ;;  %v17940_v39 = vld [vmem:[%s18224_s0 + $0x18] sm:$0xff] }
  0xd8   :  { %12595 = vmatprep.subr.bf16.mxu0 %v15862_v44  ;;  %12923 = vmatprep.subr.bf16.mxu1 %v15864_v45  ;;  %v767_v44 = vld [vmem:[#allocation2 + $0x1580] sm:$0xff]  ;;  %v872_v38 = vld [vmem:[#allocation2 + $0x18c8] sm:$0xff]  ;;  %v17944_v25 = vcombine.high %v17940_v39, %v17940_v39 }
  0xd9   :  { %v775_v45 = vld [vmem:[#allocation2 + $0x15c0] sm:$0xff] }
  0xda   :  { %v15989_v58 = vcombine.low %v767_v44, %v775_v45 }
  0xdb   :  { %12596 = vmatpush1.bf16.msra.mxu0 %v15861_v50  ;;  %12924 = vmatpush1.bf16.msra.mxu1 %v15863_v51  ;;  %v15990_v50 = vcombine.high %v767_v44, %v775_v45  ;;  %v15992_v51 = vcombine.high %v768_v46, %v776_v47  ;;  %v879_v44 = vld [vmem:[#allocation2 + $0x1900] sm:$0xff]  ;;  %v880_v46 = vld [vmem:[#allocation2 + $0x1908] sm:$0xff] }
  0xdc   :  { %12597 = vmatprep.subr.bf16.mxu0 %v15878_v52  ;;  %12925 = vmatprep.subr.bf16.mxu1 %v15880_v54  ;;  %v783_v52 = vld [vmem:[#allocation2 + $0x1600] sm:$0xff]  ;;  %v888_v47 = vld [vmem:[#allocation2 + $0x1948] sm:$0xff] }
  0xdd   :  { %v791_v54 = vld [vmem:[#allocation2 + $0x1640] sm:$0xff] }
  0xde   :  { %v16005_v2 = vcombine.low %v783_v52, %v791_v54  ;;  %v887_v45 = vld [vmem:[#allocation2 + $0x1940] sm:$0xff] }
  0xdf   :  { %12598 = vmatpush1.bf16.msra.mxu0 %v15877_v60  ;;  %12926 = vmatpush1.bf16.msra.mxu1 %v15879_v61  ;;  %v16006_v60 = vcombine.high %v783_v52, %v791_v54  ;;  %v16008_v61 = vcombine.high %v784_v55, %v792_v56  ;;  %v895_v52 = vld [vmem:[#allocation2 + $0x1980] sm:$0xff]  ;;  %v896_v55 = vld [vmem:[#allocation2 + $0x1988] sm:$0xff] }
  0xe0   :  { %12599 = vmatprep.subr.bf16.mxu0 %v15894_v62  ;;  %12927 = vmatprep.subr.bf16.mxu1 %v15896_v63  ;;  %v799_v62 = vld [vmem:[#allocation2 + $0x1680] sm:$0xff]  ;;  %v904_v56 = vld [vmem:[#allocation2 + $0x19c8] sm:$0xff] }
  0xe1   :  { %v807_v63 = vld [vmem:[#allocation2 + $0x16c0] sm:$0xff] }
  0xe2   :  { %v16021_v10 = vcombine.low %v799_v62, %v807_v63  ;;  %v903_v54 = vld [vmem:[#allocation2 + $0x19c0] sm:$0xff] }
  0xe3   :  { %12600 = vmatpush1.bf16.msra.mxu0 %v15893_v4  ;;  %12928 = vmatpush1.bf16.msra.mxu1 %v15895_v5  ;;  %v16022_v4 = vcombine.high %v799_v62, %v807_v63  ;;  %v16024_v5 = vcombine.high %v800_v0, %v808_v1  ;;  %v911_v62 = vld [vmem:[#allocation2 + $0x1a00] sm:$0xff]  ;;  %v912_v0 = vld [vmem:[#allocation2 + $0x1a08] sm:$0xff] }
  0xe4   :  { %12601 = vmatprep.subr.bf16.mxu0 %v15910_v6  ;;  %12929 = vmatprep.subr.bf16.mxu1 %v15912_v7  ;;  %v815_v6 = vld [vmem:[#allocation2 + $0x1700] sm:$0xff]  ;;  %v920_v1 = vld [vmem:[#allocation2 + $0x1a48] sm:$0xff] }
  0xe5   :  { %v823_v7 = vld [vmem:[#allocation2 + $0x1740] sm:$0xff] }
  0xe6   :  { %v16037_v20 = vcombine.low %v815_v6, %v823_v7  ;;  %v919_v63 = vld [vmem:[#allocation2 + $0x1a40] sm:$0xff] }
  0xe7   :  { %12602 = vmatpush1.bf16.msra.mxu0 %v15909_v13  ;;  %12930 = vmatpush1.bf16.msra.mxu1 %v15911_v14  ;;  %v16038_v13 = vcombine.high %v815_v6, %v823_v7  ;;  %v16040_v14 = vcombine.high %v816_v8, %v824_v9  ;;  %v927_v6 = vld [vmem:[#allocation2 + $0x1a80] sm:$0xff]  ;;  %v928_v8 = vld [vmem:[#allocation2 + $0x1a88] sm:$0xff] }
  0xe8   :  { %12603 = vmatprep.subr.bf16.mxu0 %v15926_v16  ;;  %12931 = vmatprep.subr.bf16.mxu1 %v15928_v17  ;;  %v831_v16 = vld [vmem:[#allocation2 + $0x1780] sm:$0xff]  ;;  %v936_v9 = vld [vmem:[#allocation2 + $0x1ac8] sm:$0xff] }
  0xe9   :  { %v839_v17 = vld [vmem:[#allocation2 + $0x17c0] sm:$0xff] }
  0xea   :  { %v16053_v30 = vcombine.low %v831_v16, %v839_v17  ;;  %v935_v7 = vld [vmem:[#allocation2 + $0x1ac0] sm:$0xff] }
  0xeb   :  { %12604 = vmatpush1.bf16.msra.mxu0 %v15925_v23  ;;  %12932 = vmatpush1.bf16.msra.mxu1 %v15927_v24  ;;  %v16054_v23 = vcombine.high %v831_v16, %v839_v17  ;;  %v16056_v24 = vcombine.high %v832_v18, %v840_v19  ;;  %v943_v16 = vld [vmem:[#allocation2 + $0x1b00] sm:$0xff]  ;;  %v944_v18 = vld [vmem:[#allocation2 + $0x1b08] sm:$0xff] }
  0xec   :  { %12605 = vmatprep.subr.bf16.mxu0 %v15942_v26  ;;  %12933 = vmatprep.subr.bf16.mxu1 %v15944_v27  ;;  %v847_v26 = vld [vmem:[#allocation2 + $0x1800] sm:$0xff]  ;;  %v952_v19 = vld [vmem:[#allocation2 + $0x1b48] sm:$0xff] }
  0xed   :  { %v855_v27 = vld [vmem:[#allocation2 + $0x1840] sm:$0xff] }
  0xee   :  { %v951_v17 = vld [vmem:[#allocation2 + $0x1b40] sm:$0xff] }
  0xef   :  { %12606 = vmatpush1.bf16.msra.mxu0 %v15941_v32  ;;  %12934 = vmatpush1.bf16.msra.mxu1 %v15943_v33  ;;  %v16070_v32 = vcombine.high %v847_v26, %v855_v27  ;;  %v16072_v33 = vcombine.high %v848_v28, %v856_v29 }
  0xf0   :  { %12607 = vmatprep.subr.bf16.mxu0 %v15958_v34  ;;  %12935 = vmatprep.subr.bf16.mxu1 %v15960_v35  ;;  %v863_v34 = vld [vmem:[#allocation2 + $0x1880] sm:$0xff] }
  0xf1   :  { %v871_v35 = vld [vmem:[#allocation2 + $0x18c0] sm:$0xff] }
  0xf3   :  { %12608 = vmatpush1.bf16.msra.mxu0 %v15957_v40  ;;  %12936 = vmatpush1.bf16.msra.mxu1 %v15959_v41  ;;  %v16069_v40 = vcombine.low %v847_v26, %v855_v27  ;;  %v16071_v41 = vcombine.low %v848_v28, %v856_v29  ;;  %v959_v26 = vld [vmem:[#allocation2 + $0x1b80] sm:$0xff]  ;;  %v960_v28 = vld [vmem:[#allocation2 + $0x1b88] sm:$0xff] }
  0xf4   :  { %12609 = vmatprep.subr.bf16.mxu0 %v15974_v42  ;;  %12937 = vmatprep.subr.bf16.mxu1 %v15976_v43  ;;  %v16086_v42 = vcombine.high %v863_v34, %v871_v35  ;;  %v16088_v43 = vcombine.high %v864_v37, %v872_v38  ;;  %v967_v27 = vld [vmem:[#allocation2 + $0x1bc0] sm:$0xff]  ;;  %v968_v29 = vld [vmem:[#allocation2 + $0x1bc8] sm:$0xff] }
  0xf7   :  { %12610 = vmatpush1.bf16.msra.mxu0 %v15973_v48  ;;  %12938 = vmatpush1.bf16.msra.mxu1 %v15975_v49  ;;  %v16085_v48 = vcombine.low %v863_v34, %v871_v35  ;;  %v16087_v49 = vcombine.low %v864_v37, %v872_v38  ;;  %v975_v34 = vld [vmem:[#allocation2 + $0x1c00] sm:$0xff]  ;;  %v976_v37 = vld [vmem:[#allocation2 + $0x1c08] sm:$0xff] }
  0xf8   :  { %12611 = vmatprep.subr.bf16.mxu0 %v15990_v50  ;;  %12939 = vmatprep.subr.bf16.mxu1 %v15992_v51  ;;  %v16102_v50 = vcombine.high %v879_v44, %v887_v45  ;;  %v16104_v51 = vcombine.high %v880_v46, %v888_v47  ;;  %v983_v35 = vld [vmem:[#allocation2 + $0x1c40] sm:$0xff]  ;;  %v984_v38 = vld [vmem:[#allocation2 + $0x1c48] sm:$0xff] }
  0xfb   :  { %12612 = vmatpush1.bf16.msra.mxu0 %v15989_v58  ;;  %12940 = vmatpush1.bf16.msra.mxu1 %v15991_v59  ;;  %v16101_v58 = vcombine.low %v879_v44, %v887_v45  ;;  %v16103_v59 = vcombine.low %v880_v46, %v888_v47  ;;  %v991_v44 = vld [vmem:[#allocation2 + $0x1c80] sm:$0xff]  ;;  %v992_v46 = vld [vmem:[#allocation2 + $0x1c88] sm:$0xff] }
  0xfc   :  { %12613 = vmatprep.subr.bf16.mxu0 %v16006_v60  ;;  %12941 = vmatprep.subr.bf16.mxu1 %v16008_v61  ;;  %v16118_v60 = vcombine.high %v895_v52, %v903_v54  ;;  %v16120_v61 = vcombine.high %v896_v55, %v904_v56  ;;  %v999_v45 = vld [vmem:[#allocation2 + $0x1cc0] sm:$0xff]  ;;  %v1000_v47 = vld [vmem:[#allocation2 + $0x1cc8] sm:$0xff] }
  0xff   :  { %12614 = vmatpush1.bf16.msra.mxu0 %v16005_v2  ;;  %12942 = vmatpush1.bf16.msra.mxu1 %v16007_v3  ;;  %v16117_v2 = vcombine.low %v895_v52, %v903_v54  ;;  %v16119_v3 = vcombine.low %v896_v55, %v904_v56  ;;  %v1007_v52 = vld [vmem:[#allocation2 + $0x1d00] sm:$0xff]  ;;  %v1008_v55 = vld [vmem:[#allocation2 + $0x1d08] sm:$0xff] }
 0x100   :  { %12615 = vmatprep.subr.bf16.mxu0 %v16022_v4  ;;  %12943 = vmatprep.subr.bf16.mxu1 %v16024_v5  ;;  %v16134_v4 = vcombine.high %v911_v62, %v919_v63  ;;  %v16136_v5 = vcombine.high %v912_v0, %v920_v1  ;;  %v1015_v54 = vld [vmem:[#allocation2 + $0x1d40] sm:$0xff]  ;;  %v1016_v56 = vld [vmem:[#allocation2 + $0x1d48] sm:$0xff] }
 0x103   :  { %12616 = vmatpush1.bf16.msra.mxu0 %v16021_v10  ;;  %12944 = vmatpush1.bf16.msra.mxu1 %v16023_v11  ;;  %v16133_v10 = vcombine.low %v911_v62, %v919_v63  ;;  %v16135_v11 = vcombine.low %v912_v0, %v920_v1  ;;  %v1023_v62 = vld [vmem:[#allocation2 + $0x1d80] sm:$0xff]  ;;  %v1024_v0 = vld [vmem:[#allocation2 + $0x1d88] sm:$0xff] }
 0x104   :  { %12617 = vmatprep.subr.bf16.mxu0 %v16038_v13  ;;  %12945 = vmatprep.subr.bf16.mxu1 %v16040_v14  ;;  %v16150_v13 = vcombine.high %v927_v6, %v935_v7  ;;  %v16152_v14 = vcombine.high %v928_v8, %v936_v9  ;;  %v1031_v63 = vld [vmem:[#allocation2 + $0x1dc0] sm:$0xff]  ;;  %v1032_v1 = vld [vmem:[#allocation2 + $0x1dc8] sm:$0xff] }
 0x107   :  { %12618 = vmatpush1.bf16.msra.mxu0 %v16037_v20  ;;  %12946 = vmatpush1.bf16.msra.mxu1 %v16039_v21  ;;  %v16149_v20 = vcombine.low %v927_v6, %v935_v7  ;;  %v16151_v21 = vcombine.low %v928_v8, %v936_v9  ;;  %v1039_v6 = vld [vmem:[#allocation2 + $0x1e00] sm:$0xff]  ;;  %v1040_v8 = vld [vmem:[#allocation2 + $0x1e08] sm:$0xff] }
 0x108   :  { %12619 = vmatprep.subr.bf16.mxu0 %v16054_v23  ;;  %12947 = vmatprep.subr.bf16.mxu1 %v16056_v24  ;;  %v16166_v23 = vcombine.high %v943_v16, %v951_v17  ;;  %v16168_v24 = vcombine.high %v944_v18, %v952_v19  ;;  %v1047_v7 = vld [vmem:[#allocation2 + $0x1e40] sm:$0xff]  ;;  %v1048_v9 = vld [vmem:[#allocation2 + $0x1e48] sm:$0xff] }
 0x10b   :  { %12620 = vmatpush1.bf16.msra.mxu0 %v16053_v30  ;;  %12948 = vmatpush1.bf16.msra.mxu1 %v16055_v31  ;;  %v16165_v30 = vcombine.low %v943_v16, %v951_v17  ;;  %v16167_v31 = vcombine.low %v944_v18, %v952_v19  ;;  %v1055_v16 = vld [vmem:[#allocation2 + $0x1e80] sm:$0xff]  ;;  %v1056_v18 = vld [vmem:[#allocation2 + $0x1e88] sm:$0xff] }
 0x10c   :  { %12630 = vmatprep.subr.bf16.mxu0 %v16070_v32  ;;  %12958 = vmatprep.subr.bf16.mxu1 %v16072_v33  ;;  %v16182_v32 = vcombine.high %v959_v26, %v967_v27  ;;  %v16184_v33 = vcombine.high %v960_v28, %v968_v29  ;;  %v1063_v17 = vld [vmem:[#allocation2 + $0x1ec0] sm:$0xff]  ;;  %v1064_v19 = vld [vmem:[#allocation2 + $0x1ec8] sm:$0xff] }
 0x10e   :  { %12622 = vmatmul.mubr.bf16.vlgmr.msra.gmra.mrb[0].mxu0 %v17935_v36  ;;  %12950 = vmatmul.mubr.bf16.vlgmr.msra.gmra.mrb[0].mxu1 %v17935_v36 }
 0x10f   :  { %12631 = vmatpush1.bf16.msra.mxu0 %v16069_v40  ;;  %12959 = vmatpush1.bf16.msra.mxu1 %v16071_v41  ;;  %v16181_v40 = vcombine.low %v959_v26, %v967_v27  ;;  %v16183_v41 = vcombine.low %v960_v28, %v968_v29  ;;  %v1071_v26 = vld [vmem:[#allocation2 + $0x1f00] sm:$0xff]  ;;  %v1072_v28 = vld [vmem:[#allocation2 + $0x1f08] sm:$0xff] }
 0x110   :  { %12632 = vmatprep.subr.bf16.mxu0 %v16086_v42  ;;  %12960 = vmatprep.subr.bf16.mxu1 %v16088_v43  ;;  %v16198_v42 = vcombine.high %v975_v34, %v983_v35  ;;  %v16200_v43 = vcombine.high %v976_v37, %v984_v38  ;;  %v1079_v27 = vld [vmem:[#allocation2 + $0x1f40] sm:$0xff]  ;;  %v1080_v29 = vld [vmem:[#allocation2 + $0x1f48] sm:$0xff] }
 0x111   :  { %12662 = vmatprep.mubr.bf16.mxu0 %v17944_v25  ;;  %12990 = vmatprep.mubr.bf16.mxu1 %v17944_v25 }
 0x113   :  { %12633 = vmatpush1.bf16.msra.mxu0 %v16085_v48  ;;  %12961 = vmatpush1.bf16.msra.mxu1 %v16087_v49  ;;  %v16197_v48 = vcombine.low %v975_v34, %v983_v35  ;;  %v16199_v49 = vcombine.low %v976_v37, %v984_v38  ;;  %v1087_v34 = vld [vmem:[#allocation2 + $0x1f80] sm:$0xff]  ;;  %v1088_v37 = vld [vmem:[#allocation2 + $0x1f88] sm:$0xff] }
 0x114   :  { %12634 = vmatprep.subr.bf16.mxu0 %v16102_v50  ;;  %12962 = vmatprep.subr.bf16.mxu1 %v16104_v51  ;;  %v16214_v50 = vcombine.high %v991_v44, %v999_v45  ;;  %v16216_v51 = vcombine.high %v992_v46, %v1000_v47  ;;  %v1095_v35 = vld [vmem:[#allocation2 + $0x1fc0] sm:$0xff]  ;;  %v1096_v38 = vld [vmem:[#allocation2 + $0x1fc8] sm:$0xff] }
 0x117   :  { %12635 = vmatpush1.bf16.msra.mxu0 %v16101_v58  ;;  %12963 = vmatpush1.bf16.msra.mxu1 %v16103_v59  ;;  %v16213_v58 = vcombine.low %v991_v44, %v999_v45  ;;  %v16215_v59 = vcombine.low %v992_v46, %v1000_v47  ;;  %v1103_v44 = vld [vmem:[#allocation2 + $0x2000] sm:$0xff]  ;;  %v1104_v46 = vld [vmem:[#allocation2 + $0x2008] sm:$0xff] }
 0x118   :  { %12636 = vmatprep.subr.bf16.mxu0 %v16118_v60  ;;  %12964 = vmatprep.subr.bf16.mxu1 %v16120_v61  ;;  %v16230_v60 = vcombine.high %v1007_v52, %v1015_v54  ;;  %v16232_v61 = vcombine.high %v1008_v55, %v1016_v56  ;;  %v1111_v45 = vld [vmem:[#allocation2 + $0x2040] sm:$0xff]  ;;  %v1112_v47 = vld [vmem:[#allocation2 + $0x2048] sm:$0xff] }
 0x11b   :  { %12637 = vmatpush1.bf16.msra.mxu0 %v16117_v2  ;;  %12965 = vmatpush1.bf16.msra.mxu1 %v16119_v3  ;;  %v16229_v2 = vcombine.low %v1007_v52, %v1015_v54  ;;  %v16231_v3 = vcombine.low %v1008_v55, %v1016_v56  ;;  %v1119_v52 = vld [vmem:[#allocation2 + $0x2080] sm:$0xff]  ;;  %v17952_v55 = vcombine.low %v17940_v39, %v17940_v39  ;;  %v1120_v56 = vld [vmem:[#allocation2 + $0x2088] sm:$0xff] }
 0x11c   :  { %12638 = vmatprep.subr.bf16.mxu0 %v16134_v4  ;;  %12966 = vmatprep.subr.bf16.mxu1 %v16136_v5  ;;  %v16246_v4 = vcombine.high %v1023_v62, %v1031_v63  ;;  %v16248_v5 = vcombine.high %v1024_v0, %v1032_v1  ;;  %v1127_v54 = vld [vmem:[#allocation2 + $0x20c0] sm:$0xff] }
 0x11f   :  { %12639 = vmatpush1.bf16.msra.mxu0 %v16133_v10  ;;  %12967 = vmatpush1.bf16.msra.mxu1 %v16135_v11  ;;  %v16245_v10 = vcombine.low %v1023_v62, %v1031_v63  ;;  %v16247_v11 = vcombine.low %v1024_v0, %v1032_v1  ;;  %v16342_v62 = vcombine.high %v1119_v52, %v1127_v54  ;;  %v1135_v0 = vld [vmem:[#allocation2 + $0x2100] sm:$0xff] }
 0x120   :  { %12640 = vmatprep.subr.bf16.mxu0 %v16150_v13  ;;  %12968 = vmatprep.subr.bf16.mxu1 %v16152_v14  ;;  %v16262_v13 = vcombine.high %v1039_v6, %v1047_v7  ;;  %v16264_v14 = vcombine.high %v1040_v8, %v1048_v9  ;;  %v1143_v1 = vld [vmem:[#allocation2 + $0x2140] sm:$0xff] }
 0x123   :  { %12641 = vmatpush1.bf16.msra.mxu0 %v16149_v20  ;;  %12969 = vmatpush1.bf16.msra.mxu1 %v16151_v21  ;;  %v16261_v20 = vcombine.low %v1039_v6, %v1047_v7  ;;  %v16263_v21 = vcombine.low %v1040_v8, %v1048_v9  ;;  %v16358_v6 = vcombine.high %v1135_v0, %v1143_v1  ;;  %v1151_v8 = vld [vmem:[#allocation2 + $0x2180] sm:$0xff] }
 0x124   :  { %12642 = vmatprep.subr.bf16.mxu0 %v16166_v23  ;;  %12970 = vmatprep.subr.bf16.mxu1 %v16168_v24  ;;  %v16278_v23 = vcombine.high %v1055_v16, %v1063_v17  ;;  %v16280_v24 = vcombine.high %v1056_v18, %v1064_v19  ;;  %v1159_v9 = vld [vmem:[#allocation2 + $0x21c0] sm:$0xff] }
 0x127   :  { %12643 = vmatpush1.bf16.msra.mxu0 %v16165_v30  ;;  %12971 = vmatpush1.bf16.msra.mxu1 %v16167_v31  ;;  %v16277_v30 = vcombine.low %v1055_v16, %v1063_v17  ;;  %v16279_v31 = vcombine.low %v1056_v18, %v1064_v19  ;;  %v16374_v16 = vcombine.high %v1151_v8, %v1159_v9  ;;  %v1167_v18 = vld [vmem:[#allocation2 + $0x2200] sm:$0xff] }
 0x128   :  { %12644 = vmatprep.subr.bf16.mxu0 %v16182_v32  ;;  %12972 = vmatprep.subr.bf16.mxu1 %v16184_v33  ;;  %v16294_v32 = vcombine.high %v1071_v26, %v1079_v27  ;;  %v16296_v33 = vcombine.high %v1072_v28, %v1080_v29  ;;  %v1175_v19 = vld [vmem:[#allocation2 + $0x2240] sm:$0xff] }
 0x12b   :  { %12645 = vmatpush1.bf16.msra.mxu0 %v16181_v40  ;;  %12973 = vmatpush1.bf16.msra.mxu1 %v16183_v41  ;;  %v16293_v40 = vcombine.low %v1071_v26, %v1079_v27  ;;  %v16295_v41 = vcombine.low %v1072_v28, %v1080_v29  ;;  %v16390_v26 = vcombine.high %v1167_v18, %v1175_v19  ;;  %v1183_v28 = vld [vmem:[#allocation2 + $0x2280] sm:$0xff] }
 0x12c   :  { %12646 = vmatprep.subr.bf16.mxu0 %v16198_v42  ;;  %12974 = vmatprep.subr.bf16.mxu1 %v16200_v43  ;;  %v16310_v42 = vcombine.high %v1087_v34, %v1095_v35  ;;  %v16312_v43 = vcombine.high %v1088_v37, %v1096_v38  ;;  %v1191_v29 = vld [vmem:[#allocation2 + $0x22c0] sm:$0xff] }
 0x12f   :  { %12647 = vmatpush1.bf16.msra.mxu0 %v16197_v48  ;;  %12975 = vmatpush1.bf16.msra.mxu1 %v16199_v49  ;;  %v16309_v48 = vcombine.low %v1087_v34, %v1095_v35  ;;  %v16311_v49 = vcombine.low %v1088_v37, %v1096_v38  ;;  %v16406_v34 = vcombine.high %v1183_v28, %v1191_v29  ;;  %v1199_v37 = vld [vmem:[#allocation2 + $0x2300] sm:$0xff] }
 0x130   :  { %12648 = vmatprep.subr.bf16.mxu0 %v16214_v50  ;;  %12976 = vmatprep.subr.bf16.mxu1 %v16216_v51  ;;  %v16326_v50 = vcombine.high %v1103_v44, %v1111_v45  ;;  %v16328_v51 = vcombine.high %v1104_v46, %v1112_v47  ;;  %v1207_v38 = vld [vmem:[#allocation2 + $0x2340] sm:$0xff] }
 0x133   :  { %12649 = vmatpush1.bf16.msra.mxu0 %v16213_v58  ;;  %12977 = vmatpush1.bf16.msra.mxu1 %v16215_v59  ;;  %v1128_v58 = vld [vmem:[#allocation2 + $0x20c8] sm:$0xff]  ;;  %v17957_v59 = vld [vmem:[%s18224_s0 + $0x20] sm:$0xff] }
 0x134   :  { %12650 = vmatprep.subr.bf16.mxu0 %v16230_v60  ;;  %12978 = vmatprep.subr.bf16.mxu1 %v16232_v61  ;;  %v16325_v60 = vcombine.low %v1103_v44, %v1111_v45  ;;  %v16327_v61 = vcombine.low %v1104_v46, %v1112_v47  ;;  %v16344_v63 = vcombine.high %v1120_v56, %v1128_v58  ;;  %v1215_v46 = vld [vmem:[#allocation2 + $0x2380] sm:$0xff] }
 0x135   :  { %v17961_v39 = vcombine.high %v17957_v59, %v17957_v59  ;;  %v16422_v44 = vcombine.high %v1199_v37, %v1207_v38  ;;  %v1223_v47 = vld [vmem:[#allocation2 + $0x23c0] sm:$0xff] }
 0x137   :  { %12651 = vmatpush1.bf16.msra.mxu0 %v16229_v2  ;;  %12979 = vmatpush1.bf16.msra.mxu1 %v16231_v3  ;;  %v1136_v2 = vld [vmem:[#allocation2 + $0x2108] sm:$0xff] }
 0x138   :  { %12652 = vmatprep.subr.bf16.mxu0 %v16246_v4  ;;  %12980 = vmatprep.subr.bf16.mxu1 %v16248_v5  ;;  %v1144_v3 = vld [vmem:[#allocation2 + $0x2148] sm:$0xff]  ;;  %v16341_v4 = vcombine.low %v1119_v52, %v1127_v54  ;;  %v16343_v5 = vcombine.low %v1120_v56, %v1128_v58  ;;  %v16438_v52 = vcombine.high %v1215_v46, %v1223_v47  ;;  %v1231_v56 = vld [vmem:[#allocation2 + $0x2400] sm:$0xff] }
 0x139   :  { %v16360_v7 = vcombine.high %v1136_v2, %v1144_v3  ;;  %v1239_v58 = vld [vmem:[#allocation2 + $0x2440] sm:$0xff] }
 0x13b   :  { %12653 = vmatpush1.bf16.msra.mxu0 %v16245_v10  ;;  %12981 = vmatpush1.bf16.msra.mxu1 %v16247_v11  ;;  %v1152_v10 = vld [vmem:[#allocation2 + $0x2188] sm:$0xff] }
 0x13c   :  { %12654 = vmatprep.subr.bf16.mxu0 %v16262_v13  ;;  %12982 = vmatprep.subr.bf16.mxu1 %v16264_v14  ;;  %v1160_v11 = vld [vmem:[#allocation2 + $0x21c8] sm:$0xff]  ;;  %v16357_v13 = vcombine.low %v1135_v0, %v1143_v1  ;;  %v16359_v14 = vcombine.low %v1136_v2, %v1144_v3  ;;  %v16454_v0 = vcombine.high %v1231_v56, %v1239_v58  ;;  %v1247_v2 = vld [vmem:[#allocation2 + $0x2480] sm:$0xff] }
 0x13d   :  { %v16376_v17 = vcombine.high %v1152_v10, %v1160_v11  ;;  %v1255_v3 = vld [vmem:[#allocation2 + $0x24c0] sm:$0xff] }
 0x13f   :  { %12655 = vmatpush1.bf16.msra.mxu0 %v16261_v20  ;;  %12983 = vmatpush1.bf16.msra.mxu1 %v16263_v21  ;;  %v1168_v20 = vld [vmem:[#allocation2 + $0x2208] sm:$0xff] }
 0x140   :  { %12656 = vmatprep.subr.bf16.mxu0 %v16278_v23  ;;  %12984 = vmatprep.subr.bf16.mxu1 %v16280_v24  ;;  %v1176_v21 = vld [vmem:[#allocation2 + $0x2248] sm:$0xff]  ;;  %v16373_v23 = vcombine.low %v1151_v8, %v1159_v9  ;;  %v16375_v24 = vcombine.low %v1152_v10, %v1160_v11  ;;  %v16470_v8 = vcombine.high %v1247_v2, %v1255_v3  ;;  %v1263_v10 = vld [vmem:[#allocation2 + $0x2500] sm:$0xff] }
 0x141   :  { %v16392_v27 = vcombine.high %v1168_v20, %v1176_v21  ;;  %v1271_v11 = vld [vmem:[#allocation2 + $0x2540] sm:$0xff] }
 0x143   :  { %12657 = vmatpush1.bf16.msra.mxu0 %v16277_v30  ;;  %12985 = vmatpush1.bf16.msra.mxu1 %v16279_v31  ;;  %v1184_v30 = vld [vmem:[#allocation2 + $0x2288] sm:$0xff] }
 0x144   :  { %12658 = vmatprep.subr.bf16.mxu0 %v16294_v32  ;;  %12986 = vmatprep.subr.bf16.mxu1 %v16296_v33  ;;  %v1192_v31 = vld [vmem:[#allocation2 + $0x22c8] sm:$0xff]  ;;  %v16389_v32 = vcombine.low %v1167_v18, %v1175_v19  ;;  %v16391_v33 = vcombine.low %v1168_v20, %v1176_v21  ;;  %v16486_v18 = vcombine.high %v1263_v10, %v1271_v11  ;;  %v1279_v20 = vld [vmem:[#allocation2 + $0x2580] sm:$0xff] }
 0x145   :  { %v16408_v35 = vcombine.high %v1184_v30, %v1192_v31  ;;  %v1287_v21 = vld [vmem:[#allocation2 + $0x25c0] sm:$0xff] }
 0x147   :  { %12659 = vmatpush1.bf16.msra.mxu0 %v16293_v40  ;;  %12987 = vmatpush1.bf16.msra.mxu1 %v16295_v41  ;;  %v1200_v40 = vld [vmem:[#allocation2 + $0x2308] sm:$0xff] }
 0x148   :  { %12660 = vmatprep.subr.bf16.mxu0 %v16310_v42  ;;  %12988 = vmatprep.subr.bf16.mxu1 %v16312_v43  ;;  %v1208_v41 = vld [vmem:[#allocation2 + $0x2348] sm:$0xff]  ;;  %v16405_v42 = vcombine.low %v1183_v28, %v1191_v29  ;;  %v16407_v43 = vcombine.low %v1184_v30, %v1192_v31  ;;  %v16502_v28 = vcombine.high %v1279_v20, %v1287_v21  ;;  %v1295_v30 = vld [vmem:[#allocation2 + $0x2600] sm:$0xff] }
 0x149   :  { %v16424_v45 = vcombine.high %v1200_v40, %v1208_v41  ;;  %v1303_v31 = vld [vmem:[#allocation2 + $0x2640] sm:$0xff] }
 0x14b   :  { %12661 = vmatpush1.bf16.msra.mxu0 %v16309_v48  ;;  %12989 = vmatpush1.bf16.msra.mxu1 %v16311_v49  ;;  %v1216_v48 = vld [vmem:[#allocation2 + $0x2388] sm:$0xff] }
 0x14c   :  { %12671 = vmatprep.subr.bf16.mxu0 %v16326_v50  ;;  %12999 = vmatprep.subr.bf16.mxu1 %v16328_v51  ;;  %v1224_v49 = vld [vmem:[#allocation2 + $0x23c8] sm:$0xff]  ;;  %v16421_v50 = vcombine.low %v1199_v37, %v1207_v38  ;;  %v16423_v51 = vcombine.low %v1200_v40, %v1208_v41  ;;  %v16518_v37 = vcombine.high %v1295_v30, %v1303_v31  ;;  %v1311_v40 = vld [vmem:[#allocation2 + $0x2680] sm:$0xff] }
 0x14d   :  { %v16440_v54 = vcombine.high %v1216_v48, %v1224_v49  ;;  %v1319_v41 = vld [vmem:[#allocation2 + $0x26c0] sm:$0xff] }
 0x14e   :  { %12663 = vmatmul.mubr.bf16.vlgmr.msra.gmra.mrb[0].mxu0 %v17952_v55  ;;  %12991 = vmatmul.mubr.bf16.vlgmr.msra.gmra.mrb[0].mxu1 %v17952_v55 }
 0x14f   :  { %12672 = vmatpush1.bf16.msra.mxu0 %v16325_v60  ;;  %13000 = vmatpush1.bf16.msra.mxu1 %v16327_v61  ;;  %v1232_v60 = vld [vmem:[#allocation2 + $0x2408] sm:$0xff] }
 0x150   :  { %12673 = vmatprep.subr.bf16.mxu0 %v16342_v62  ;;  %13001 = vmatprep.subr.bf16.mxu1 %v16344_v63  ;;  %v1240_v61 = vld [vmem:[#allocation2 + $0x2448] sm:$0xff]  ;;  %v16437_v62 = vcombine.low %v1215_v46, %v1223_v47  ;;  %v16439_v63 = vcombine.low %v1216_v48, %v1224_v49  ;;  %v16534_v46 = vcombine.high %v1311_v40, %v1319_v41  ;;  %v1327_v48 = vld [vmem:[#allocation2 + $0x2700] sm:$0xff] }
 0x151   :  { %12703 = vmatprep.mubr.bf16.mxu0 %v17961_v39  ;;  %13031 = vmatprep.mubr.bf16.mxu1 %v17961_v39  ;;  %v16456_v1 = vcombine.high %v1232_v60, %v1240_v61  ;;  %v1335_v49 = vld [vmem:[#allocation2 + $0x2740] sm:$0xff] }
 0x153   :  { %12674 = vmatpush1.bf16.msra.mxu0 %v16341_v4  ;;  %13002 = vmatpush1.bf16.msra.mxu1 %v16343_v5  ;;  %v1248_v4 = vld [vmem:[#allocation2 + $0x2488] sm:$0xff] }
 0x154   :  { %12675 = vmatprep.subr.bf16.mxu0 %v16358_v6  ;;  %13003 = vmatprep.subr.bf16.mxu1 %v16360_v7  ;;  %v1256_v5 = vld [vmem:[#allocation2 + $0x24c8] sm:$0xff]  ;;  %v16453_v6 = vcombine.low %v1231_v56, %v1239_v58  ;;  %v16455_v7 = vcombine.low %v1232_v60, %v1240_v61  ;;  %v16550_v56 = vcombine.high %v1327_v48, %v1335_v49  ;;  %v1343_v60 = vld [vmem:[#allocation2 + $0x2780] sm:$0xff] }
 0x155   :  { %v16472_v9 = vcombine.high %v1248_v4, %v1256_v5  ;;  %v1351_v61 = vld [vmem:[#allocation2 + $0x27c0] sm:$0xff] }
 0x157   :  { %12676 = vmatpush1.bf16.msra.mxu0 %v16357_v13  ;;  %13004 = vmatpush1.bf16.msra.mxu1 %v16359_v14  ;;  %v1264_v13 = vld [vmem:[#allocation2 + $0x2508] sm:$0xff] }
 0x158   :  { %12677 = vmatprep.subr.bf16.mxu0 %v16374_v16  ;;  %13005 = vmatprep.subr.bf16.mxu1 %v16376_v17  ;;  %v1272_v14 = vld [vmem:[#allocation2 + $0x2548] sm:$0xff]  ;;  %v16469_v16 = vcombine.low %v1247_v2, %v1255_v3  ;;  %v16471_v17 = vcombine.low %v1248_v4, %v1256_v5  ;;  %v16566_v2 = vcombine.high %v1343_v60, %v1351_v61  ;;  %v1359_v4 = vld [vmem:[#allocation2 + $0x2800] sm:$0xff] }
 0x159   :  { %v16488_v19 = vcombine.high %v1264_v13, %v1272_v14  ;;  %v1367_v5 = vld [vmem:[#allocation2 + $0x2840] sm:$0xff] }
 0x15b   :  { %12678 = vmatpush1.bf16.msra.mxu0 %v16373_v23  ;;  %13006 = vmatpush1.bf16.msra.mxu1 %v16375_v24  ;;  %v1280_v23 = vld [vmem:[#allocation2 + $0x2588] sm:$0xff] }
 0x15c   :  { %12679 = vmatprep.subr.bf16.mxu0 %v16390_v26  ;;  %13007 = vmatprep.subr.bf16.mxu1 %v16392_v27  ;;  %v1288_v24 = vld [vmem:[#allocation2 + $0x25c8] sm:$0xff]  ;;  %v16485_v26 = vcombine.low %v1263_v10, %v1271_v11  ;;  %v16487_v27 = vcombine.low %v1264_v13, %v1272_v14  ;;  %v16582_v10 = vcombine.high %v1359_v4, %v1367_v5  ;;  %v1375_v13 = vld [vmem:[#allocation2 + $0x2880] sm:$0xff] }
 0x15d   :  { %v16504_v29 = vcombine.high %v1280_v23, %v1288_v24  ;;  %v1383_v14 = vld [vmem:[#allocation2 + $0x28c0] sm:$0xff] }
 0x15f   :  { %12680 = vmatpush1.bf16.msra.mxu0 %v16389_v32  ;;  %13008 = vmatpush1.bf16.msra.mxu1 %v16391_v33  ;;  %v1296_v32 = vld [vmem:[#allocation2 + $0x2608] sm:$0xff] }
 0x160   :  { %12681 = vmatprep.subr.bf16.mxu0 %v16406_v34  ;;  %13009 = vmatprep.subr.bf16.mxu1 %v16408_v35  ;;  %v1304_v33 = vld [vmem:[#allocation2 + $0x2648] sm:$0xff]  ;;  %v16501_v34 = vcombine.low %v1279_v20, %v1287_v21  ;;  %v16503_v35 = vcombine.low %v1280_v23, %v1288_v24  ;;  %v16581_v20 = vcombine.low %v1359_v4, %v1367_v5 }
 0x161   :  { %v16520_v38 = vcombine.high %v1296_v32, %v1304_v33  ;;  %v16598_v23 = vcombine.high %v1375_v13, %v1383_v14 }
 0x163   :  { %12682 = vmatpush1.bf16.msra.mxu0 %v16405_v42  ;;  %13010 = vmatpush1.bf16.msra.mxu1 %v16407_v43  ;;  %v1312_v42 = vld [vmem:[#allocation2 + $0x2688] sm:$0xff] }
 0x164   :  { %12683 = vmatprep.subr.bf16.mxu0 %v16422_v44  ;;  %13011 = vmatprep.subr.bf16.mxu1 %v16424_v45  ;;  %v1320_v43 = vld [vmem:[#allocation2 + $0x26c8] sm:$0xff]  ;;  %v16517_v44 = vcombine.low %v1295_v30, %v1303_v31  ;;  %v16519_v45 = vcombine.low %v1296_v32, %v1304_v33  ;;  %v16597_v30 = vcombine.low %v1375_v13, %v1383_v14 }
 0x165   :  { %v16536_v47 = vcombine.high %v1312_v42, %v1320_v43 }
 0x167   :  { %12684 = vmatpush1.bf16.msra.mxu0 %v16421_v50  ;;  %13012 = vmatpush1.bf16.msra.mxu1 %v16423_v51  ;;  %v1328_v50 = vld [vmem:[#allocation2 + $0x2708] sm:$0xff] }
 0x168   :  { %12685 = vmatprep.subr.bf16.mxu0 %v16438_v52  ;;  %13013 = vmatprep.subr.bf16.mxu1 %v16440_v54  ;;  %v1336_v51 = vld [vmem:[#allocation2 + $0x2748] sm:$0xff]  ;;  %v16533_v52 = vcombine.low %v1311_v40, %v1319_v41  ;;  %v16535_v54 = vcombine.low %v1312_v42, %v1320_v43 }
 0x169   :  { %v16552_v58 = vcombine.high %v1328_v50, %v1336_v51 }
 0x16b   :  { %12686 = vmatpush1.bf16.msra.mxu0 %v16437_v62  ;;  %13014 = vmatpush1.bf16.msra.mxu1 %v16439_v63  ;;  %v1344_v62 = vld [vmem:[#allocation2 + $0x2788] sm:$0xff] }
 0x16c   :  { %12687 = vmatprep.subr.bf16.mxu0 %v16454_v0  ;;  %13015 = vmatprep.subr.bf16.mxu1 %v16456_v1  ;;  %v1352_v63 = vld [vmem:[#allocation2 + $0x27c8] sm:$0xff]  ;;  %v16549_v0 = vcombine.low %v1327_v48, %v1335_v49  ;;  %v16551_v1 = vcombine.low %v1328_v50, %v1336_v51 }
 0x16d   :  { %v16568_v3 = vcombine.high %v1344_v62, %v1352_v63 }
 0x16f   :  { %12688 = vmatpush1.bf16.msra.mxu0 %v16453_v6  ;;  %13016 = vmatpush1.bf16.msra.mxu1 %v16455_v7  ;;  %v1360_v6 = vld [vmem:[#allocation2 + $0x2808] sm:$0xff] }
 0x170   :  { %12689 = vmatprep.subr.bf16.mxu0 %v16470_v8  ;;  %13017 = vmatprep.subr.bf16.mxu1 %v16472_v9  ;;  %v1368_v7 = vld [vmem:[#allocation2 + $0x2848] sm:$0xff]  ;;  %v16565_v8 = vcombine.low %v1343_v60, %v1351_v61  ;;  %v16567_v9 = vcombine.low %v1344_v62, %v1352_v63 }
 0x171   :  { %v16584_v11 = vcombine.high %v1360_v6, %v1368_v7  ;;  %v16583_v21 = vcombine.low %v1360_v6, %v1368_v7 }
 0x173   :  { %12690 = vmatpush1.bf16.msra.mxu0 %v16469_v16  ;;  %13018 = vmatpush1.bf16.msra.mxu1 %v16471_v17  ;;  %v17969_v16 = vcombine.low %v17957_v59, %v17957_v59  ;;  %v1376_v17 = vld [vmem:[#allocation2 + $0x2888] sm:$0xff] }
 0x174   :  { %12691 = vmatprep.subr.bf16.mxu0 %v16486_v18  ;;  %13019 = vmatprep.subr.bf16.mxu1 %v16488_v19  ;;  %v1384_v18 = vld [vmem:[#allocation2 + $0x28c8] sm:$0xff] }
 0x175   :  { %v17974_v19 = vld [vmem:[%s18224_s0 + $0x28] sm:$0xff]  ;;  %v16600_v24 = vcombine.high %v1376_v17, %v1384_v18  ;;  %v16599_v31 = vcombine.low %v1376_v17, %v1384_v18 }
 0x176   :  { %v17978_v59 = vcombine.high %v17974_v19, %v17974_v19 }
 0x177   :  { %12692 = vmatpush1.bf16.msra.mxu0 %v16485_v26  ;;  %13020 = vmatpush1.bf16.msra.mxu1 %v16487_v27  ;;  %v1391_v26 = vld [vmem:[#allocation2 + $0x2900] sm:$0xff] }
 0x178   :  { %12693 = vmatprep.subr.bf16.mxu0 %v16502_v28  ;;  %13021 = vmatprep.subr.bf16.mxu1 %v16504_v29  ;;  %v1399_v27 = vld [vmem:[#allocation2 + $0x2940] sm:$0xff]  ;;  %v1392_v28 = vld [vmem:[#allocation2 + $0x2908] sm:$0xff] }
 0x179   :  { %v1400_v29 = vld [vmem:[#allocation2 + $0x2948] sm:$0xff]  ;;  %v16614_v32 = vcombine.high %v1391_v26, %v1399_v27  ;;  %v16613_v40 = vcombine.low %v1391_v26, %v1399_v27 }
 0x17a   :  { %v16616_v33 = vcombine.high %v1392_v28, %v1400_v29  ;;  %v16615_v41 = vcombine.low %v1392_v28, %v1400_v29 }
 0x17b   :  { %12694 = vmatpush1.bf16.msra.mxu0 %v16501_v34  ;;  %13022 = vmatpush1.bf16.msra.mxu1 %v16503_v35  ;;  %v1407_v34 = vld [vmem:[#allocation2 + $0x2980] sm:$0xff] }
 0x17c   :  { %12695 = vmatprep.subr.bf16.mxu0 %v16518_v37  ;;  %13023 = vmatprep.subr.bf16.mxu1 %v16520_v38  ;;  %v1415_v35 = vld [vmem:[#allocation2 + $0x29c0] sm:$0xff]  ;;  %v1408_v37 = vld [vmem:[#allocation2 + $0x2988] sm:$0xff] }
 0x17d   :  { %v1416_v38 = vld [vmem:[#allocation2 + $0x29c8] sm:$0xff]  ;;  %v16630_v42 = vcombine.high %v1407_v34, %v1415_v35  ;;  %v16629_v48 = vcombine.low %v1407_v34, %v1415_v35 }
 0x17e   :  { %v16632_v43 = vcombine.high %v1408_v37, %v1416_v38  ;;  %v16631_v49 = vcombine.low %v1408_v37, %v1416_v38 }
 0x17f   :  { %12696 = vmatpush1.bf16.msra.mxu0 %v16517_v44  ;;  %13024 = vmatpush1.bf16.msra.mxu1 %v16519_v45  ;;  %v1423_v44 = vld [vmem:[#allocation2 + $0x2a00] sm:$0xff] }
 0x180   :  { %12697 = vmatprep.subr.bf16.mxu0 %v16534_v46  ;;  %13025 = vmatprep.subr.bf16.mxu1 %v16536_v47  ;;  %v1431_v45 = vld [vmem:[#allocation2 + $0x2a40] sm:$0xff]  ;;  %v1424_v46 = vld [vmem:[#allocation2 + $0x2a08] sm:$0xff] }
 0x181   :  { %v1432_v47 = vld [vmem:[#allocation2 + $0x2a48] sm:$0xff]  ;;  %v16646_v50 = vcombine.high %v1423_v44, %v1431_v45  ;;  %v16645_v60 = vcombine.low %v1423_v44, %v1431_v45 }
 0x182   :  { %v16648_v51 = vcombine.high %v1424_v46, %v1432_v47  ;;  %v16647_v61 = vcombine.low %v1424_v46, %v1432_v47 }
 0x183   :  { %12698 = vmatpush1.bf16.msra.mxu0 %v16533_v52  ;;  %13026 = vmatpush1.bf16.msra.mxu1 %v16535_v54  ;;  %v1439_v52 = vld [vmem:[#allocation2 + $0x2a80] sm:$0xff] }
 0x184   :  { %12699 = vmatprep.subr.bf16.mxu0 %v16550_v56  ;;  %13027 = vmatprep.subr.bf16.mxu1 %v16552_v58  ;;  %v1447_v54 = vld [vmem:[#allocation2 + $0x2ac0] sm:$0xff]  ;;  %v1440_v56 = vld [vmem:[#allocation2 + $0x2a88] sm:$0xff] }
 0x185   :  { %v1448_v58 = vld [vmem:[#allocation2 + $0x2ac8] sm:$0xff]  ;;  %v16662_v62 = vcombine.high %v1439_v52, %v1447_v54  ;;  %v16661_v4 = vcombine.low %v1439_v52, %v1447_v54 }
 0x186   :  { %v16664_v63 = vcombine.high %v1440_v56, %v1448_v58  ;;  %v16663_v5 = vcombine.low %v1440_v56, %v1448_v58 }
 0x187   :  { %12700 = vmatpush1.bf16.msra.mxu0 %v16549_v0  ;;  %13028 = vmatpush1.bf16.msra.mxu1 %v16551_v1  ;;  %v1455_v0 = vld [vmem:[#allocation2 + $0x2b00] sm:$0xff] }
 0x188   :  { %12701 = vmatprep.subr.bf16.mxu0 %v16566_v2  ;;  %13029 = vmatprep.subr.bf16.mxu1 %v16568_v3  ;;  %v1463_v1 = vld [vmem:[#allocation2 + $0x2b40] sm:$0xff]  ;;  %v1456_v2 = vld [vmem:[#allocation2 + $0x2b08] sm:$0xff] }
 0x189   :  { %v1464_v3 = vld [vmem:[#allocation2 + $0x2b48] sm:$0xff]  ;;  %v16678_v6 = vcombine.high %v1455_v0, %v1463_v1  ;;  %v16677_v13 = vcombine.low %v1455_v0, %v1463_v1 }
 0x18a   :  { %v16680_v7 = vcombine.high %v1456_v2, %v1464_v3  ;;  %v16679_v14 = vcombine.low %v1456_v2, %v1464_v3 }
 0x18b   :  { %12702 = vmatpush1.bf16.msra.mxu0 %v16565_v8  ;;  %13030 = vmatpush1.bf16.msra.mxu1 %v16567_v9  ;;  %v1471_v8 = vld [vmem:[#allocation2 + $0x2b80] sm:$0xff] }
 0x18c   :  { %12712 = vmatprep.subr.bf16.mxu0 %v16582_v10  ;;  %13040 = vmatprep.subr.bf16.mxu1 %v16584_v11  ;;  %v1479_v9 = vld [vmem:[#allocation2 + $0x2bc0] sm:$0xff]  ;;  %v1472_v10 = vld [vmem:[#allocation2 + $0x2b88] sm:$0xff] }
 0x18d   :  { %v1480_v11 = vld [vmem:[#allocation2 + $0x2bc8] sm:$0xff]  ;;  %v16694_v17 = vcombine.high %v1471_v8, %v1479_v9  ;;  %v16693_v26 = vcombine.low %v1471_v8, %v1479_v9 }
 0x18e   :  { %12704 = vmatmul.mubr.bf16.vlgmr.msra.gmra.mrb[0].mxu0 %v17969_v16  ;;  %13032 = vmatmul.mubr.bf16.vlgmr.msra.gmra.mrb[0].mxu1 %v17969_v16  ;;  %v16696_v18 = vcombine.high %v1472_v10, %v1480_v11  ;;  %v16695_v27 = vcombine.low %v1472_v10, %v1480_v11 }
 0x18f   :  { %12713 = vmatpush1.bf16.msra.mxu0 %v16581_v20  ;;  %13041 = vmatpush1.bf16.msra.mxu1 %v16583_v21  ;;  %v1487_v20 = vld [vmem:[#allocation2 + $0x2c00] sm:$0xff] }
 0x190   :  { %12714 = vmatprep.subr.bf16.mxu0 %v16598_v23  ;;  %13042 = vmatprep.subr.bf16.mxu1 %v16600_v24  ;;  %v1495_v21 = vld [vmem:[#allocation2 + $0x2c40] sm:$0xff]  ;;  %v1488_v23 = vld [vmem:[#allocation2 + $0x2c08] sm:$0xff] }
 0x191   :  { %12744 = vmatprep.mubr.bf16.mxu0 %v17978_v59  ;;  %13072 = vmatprep.mubr.bf16.mxu1 %v17978_v59  ;;  %v1496_v24 = vld [vmem:[#allocation2 + $0x2c48] sm:$0xff]  ;;  %v16710_v28 = vcombine.high %v1487_v20, %v1495_v21  ;;  %v16709_v34 = vcombine.low %v1487_v20, %v1495_v21 }
 0x192   :  { %v16712_v29 = vcombine.high %v1488_v23, %v1496_v24  ;;  %v16711_v35 = vcombine.low %v1488_v23, %v1496_v24 }
 0x193   :  { %12715 = vmatpush1.bf16.msra.mxu0 %v16597_v30  ;;  %13043 = vmatpush1.bf16.msra.mxu1 %v16599_v31  ;;  %v1503_v30 = vld [vmem:[#allocation2 + $0x2c80] sm:$0xff] }
 0x194   :  { %12716 = vmatprep.subr.bf16.mxu0 %v16614_v32  ;;  %13044 = vmatprep.subr.bf16.mxu1 %v16616_v33  ;;  %v1511_v31 = vld [vmem:[#allocation2 + $0x2cc0] sm:$0xff]  ;;  %v1504_v32 = vld [vmem:[#allocation2 + $0x2c88] sm:$0xff] }
 0x195   :  { %v1512_v33 = vld [vmem:[#allocation2 + $0x2cc8] sm:$0xff]  ;;  %v16726_v37 = vcombine.high %v1503_v30, %v1511_v31  ;;  %v16725_v44 = vcombine.low %v1503_v30, %v1511_v31 }
 0x196   :  { %v16728_v38 = vcombine.high %v1504_v32, %v1512_v33  ;;  %v16727_v45 = vcombine.low %v1504_v32, %v1512_v33 }
 0x197   :  { %12717 = vmatpush1.bf16.msra.mxu0 %v16613_v40  ;;  %13045 = vmatpush1.bf16.msra.mxu1 %v16615_v41  ;;  %v1519_v40 = vld [vmem:[#allocation2 + $0x2d00] sm:$0xff] }
 0x198   :  { %12718 = vmatprep.subr.bf16.mxu0 %v16630_v42  ;;  %13046 = vmatprep.subr.bf16.mxu1 %v16632_v43  ;;  %v1527_v41 = vld [vmem:[#allocation2 + $0x2d40] sm:$0xff]  ;;  %v1520_v42 = vld [vmem:[#allocation2 + $0x2d08] sm:$0xff] }
 0x199   :  { %v1528_v43 = vld [vmem:[#allocation2 + $0x2d48] sm:$0xff]  ;;  %v16742_v46 = vcombine.high %v1519_v40, %v1527_v41  ;;  %v16741_v52 = vcombine.low %v1519_v40, %v1527_v41 }
 0x19a   :  { %v16744_v47 = vcombine.high %v1520_v42, %v1528_v43  ;;  %v16743_v54 = vcombine.low %v1520_v42, %v1528_v43 }
 0x19b   :  { %12719 = vmatpush1.bf16.msra.mxu0 %v16629_v48  ;;  %13047 = vmatpush1.bf16.msra.mxu1 %v16631_v49  ;;  %v1535_v48 = vld [vmem:[#allocation2 + $0x2d80] sm:$0xff] }
 0x19c   :  { %12720 = vmatprep.subr.bf16.mxu0 %v16646_v50  ;;  %13048 = vmatprep.subr.bf16.mxu1 %v16648_v51  ;;  %v1543_v49 = vld [vmem:[#allocation2 + $0x2dc0] sm:$0xff]  ;;  %v1536_v50 = vld [vmem:[#allocation2 + $0x2d88] sm:$0xff] }
 0x19d   :  { %v1544_v51 = vld [vmem:[#allocation2 + $0x2dc8] sm:$0xff]  ;;  %v16758_v56 = vcombine.high %v1535_v48, %v1543_v49  ;;  %v16757_v0 = vcombine.low %v1535_v48, %v1543_v49  ;;  %v17991_v49 = vld [vmem:[%s18224_s0 + $0x30] sm:$0xff] }
 0x19e   :  { %v16760_v58 = vcombine.high %v1536_v50, %v1544_v51  ;;  %v16759_v1 = vcombine.low %v1536_v50, %v1544_v51  ;;  %v1640_v48 = vld [vmem:[#allocation2 + $0x30c8] sm:$0xff] }
 0x19f   :  { %12721 = vmatpush1.bf16.msra.mxu0 %v16645_v60  ;;  %13049 = vmatpush1.bf16.msra.mxu1 %v16647_v61  ;;  %v1551_v60 = vld [vmem:[#allocation2 + $0x2e00] sm:$0xff] }
 0x1a0   :  { %12722 = vmatprep.subr.bf16.mxu0 %v16662_v62  ;;  %13050 = vmatprep.subr.bf16.mxu1 %v16664_v63  ;;  %v1559_v61 = vld [vmem:[#allocation2 + $0x2e40] sm:$0xff]  ;;  %v1552_v62 = vld [vmem:[#allocation2 + $0x2e08] sm:$0xff] }
 0x1a1   :  { %v1560_v63 = vld [vmem:[#allocation2 + $0x2e48] sm:$0xff]  ;;  %v16774_v2 = vcombine.high %v1551_v60, %v1559_v61  ;;  %v16773_v8 = vcombine.low %v1551_v60, %v1559_v61 }
 0x1a2   :  { %v16776_v3 = vcombine.high %v1552_v62, %v1560_v63  ;;  %v16775_v9 = vcombine.low %v1552_v62, %v1560_v63  ;;  %v1648_v60 = vld [vmem:[#allocation2 + $0x3108] sm:$0xff] }
 0x1a3   :  { %12723 = vmatpush1.bf16.msra.mxu0 %v16661_v4  ;;  %13051 = vmatpush1.bf16.msra.mxu1 %v16663_v5  ;;  %v1567_v4 = vld [vmem:[#allocation2 + $0x2e80] sm:$0xff]  ;;  %v1656_v61 = vld [vmem:[#allocation2 + $0x3148] sm:$0xff] }
 0x1a4   :  { %12724 = vmatprep.subr.bf16.mxu0 %v16678_v6  ;;  %13052 = vmatprep.subr.bf16.mxu1 %v16680_v7  ;;  %v1575_v5 = vld [vmem:[#allocation2 + $0x2ec0] sm:$0xff]  ;;  %v1568_v6 = vld [vmem:[#allocation2 + $0x2e88] sm:$0xff] }
 0x1a5   :  { %v1576_v7 = vld [vmem:[#allocation2 + $0x2ec8] sm:$0xff]  ;;  %v16790_v10 = vcombine.high %v1567_v4, %v1575_v5  ;;  %v16789_v20 = vcombine.low %v1567_v4, %v1575_v5 }
 0x1a6   :  { %v16792_v11 = vcombine.high %v1568_v6, %v1576_v7  ;;  %v16791_v21 = vcombine.low %v1568_v6, %v1576_v7  ;;  %v1664_v4 = vld [vmem:[#allocation2 + $0x3188] sm:$0xff]  ;;  %v16871_v7 = vcombine.low %v1648_v60, %v1656_v61 }
 0x1a7   :  { %12725 = vmatpush1.bf16.msra.mxu0 %v16677_v13  ;;  %13053 = vmatpush1.bf16.msra.mxu1 %v16679_v14  ;;  %v1583_v13 = vld [vmem:[#allocation2 + $0x2f00] sm:$0xff]  ;;  %v1672_v5 = vld [vmem:[#allocation2 + $0x31c8] sm:$0xff] }
 0x1a8   :  { %12726 = vmatprep.subr.bf16.mxu0 %v16694_v17  ;;  %13054 = vmatprep.subr.bf16.mxu1 %v16696_v18  ;;  %v1591_v14 = vld [vmem:[#allocation2 + $0x2f40] sm:$0xff]  ;;  %v1584_v17 = vld [vmem:[#allocation2 + $0x2f08] sm:$0xff] }
 0x1a9   :  { %v1592_v18 = vld [vmem:[#allocation2 + $0x2f48] sm:$0xff]  ;;  %v16806_v23 = vcombine.high %v1583_v13, %v1591_v14  ;;  %v16805_v30 = vcombine.low %v1583_v13, %v1591_v14 }
 0x1aa   :  { %v16808_v24 = vcombine.high %v1584_v17, %v1592_v18  ;;  %v16807_v31 = vcombine.low %v1584_v17, %v1592_v18  ;;  %v1680_v13 = vld [vmem:[#allocation2 + $0x3208] sm:$0xff]  ;;  %v16887_v18 = vcombine.low %v1664_v4, %v1672_v5 }
 0x1ab   :  { %12727 = vmatpush1.bf16.msra.mxu0 %v16693_v26  ;;  %13055 = vmatpush1.bf16.msra.mxu1 %v16695_v27  ;;  %v1599_v26 = vld [vmem:[#allocation2 + $0x2f80] sm:$0xff]  ;;  %v1688_v14 = vld [vmem:[#allocation2 + $0x3248] sm:$0xff] }
 0x1ac   :  { %12728 = vmatprep.subr.bf16.mxu0 %v16710_v28  ;;  %13056 = vmatprep.subr.bf16.mxu1 %v16712_v29  ;;  %v1607_v27 = vld [vmem:[#allocation2 + $0x2fc0] sm:$0xff]  ;;  %v1600_v28 = vld [vmem:[#allocation2 + $0x2f88] sm:$0xff] }
 0x1ad   :  { %v1608_v29 = vld [vmem:[#allocation2 + $0x2fc8] sm:$0xff]  ;;  %v16822_v32 = vcombine.high %v1599_v26, %v1607_v27  ;;  %v16821_v40 = vcombine.low %v1599_v26, %v1607_v27 }
 0x1ae   :  { %v16824_v33 = vcombine.high %v1600_v28, %v1608_v29  ;;  %v16823_v41 = vcombine.low %v1600_v28, %v1608_v29  ;;  %v1696_v26 = vld [vmem:[#allocation2 + $0x3288] sm:$0xff]  ;;  %v16903_v29 = vcombine.low %v1680_v13, %v1688_v14 }
 0x1af   :  { %12729 = vmatpush1.bf16.msra.mxu0 %v16709_v34  ;;  %13057 = vmatpush1.bf16.msra.mxu1 %v16711_v35  ;;  %v1615_v34 = vld [vmem:[#allocation2 + $0x3000] sm:$0xff]  ;;  %v1704_v27 = vld [vmem:[#allocation2 + $0x32c8] sm:$0xff] }
 0x1b0   :  { %12730 = vmatprep.subr.bf16.mxu0 %v16726_v37  ;;  %13058 = vmatprep.subr.bf16.mxu1 %v16728_v38  ;;  %v1623_v35 = vld [vmem:[#allocation2 + $0x3040] sm:$0xff]  ;;  %v1616_v37 = vld [vmem:[#allocation2 + $0x3008] sm:$0xff] }
 0x1b1   :  { %v1624_v38 = vld [vmem:[#allocation2 + $0x3048] sm:$0xff]  ;;  %v16838_v42 = vcombine.high %v1615_v34, %v1623_v35  ;;  %v16837_v50 = vcombine.low %v1615_v34, %v1623_v35 }
 0x1b2   :  { %v16840_v43 = vcombine.high %v1616_v37, %v1624_v38  ;;  %v16839_v51 = vcombine.low %v1616_v37, %v1624_v38  ;;  %v1712_v34 = vld [vmem:[#allocation2 + $0x3308] sm:$0xff]  ;;  %v16919_v38 = vcombine.low %v1696_v26, %v1704_v27 }
 0x1b3   :  { %12731 = vmatpush1.bf16.msra.mxu0 %v16725_v44  ;;  %13059 = vmatpush1.bf16.msra.mxu1 %v16727_v45  ;;  %v1631_v44 = vld [vmem:[#allocation2 + $0x3080] sm:$0xff]  ;;  %v1720_v35 = vld [vmem:[#allocation2 + $0x3348] sm:$0xff] }
 0x1b4   :  { %12732 = vmatprep.subr.bf16.mxu0 %v16742_v46  ;;  %13060 = vmatprep.subr.bf16.mxu1 %v16744_v47  ;;  %v1639_v45 = vld [vmem:[#allocation2 + $0x30c0] sm:$0xff]  ;;  %v17986_v46 = vcombine.low %v17974_v19, %v17974_v19  ;;  %v1632_v47 = vld [vmem:[#allocation2 + $0x3088] sm:$0xff]  ;;  %v17995_v19 = vcombine.high %v17991_v49, %v17991_v49 }
 0x1b5   :  { %v16853_v62 = vcombine.low %v1631_v44, %v1639_v45  ;;  %v16855_v63 = vcombine.low %v1632_v47, %v1640_v48 }
 0x1b7   :  { %12733 = vmatpush1.bf16.msra.mxu0 %v16741_v52  ;;  %13061 = vmatpush1.bf16.msra.mxu1 %v16743_v54  ;;  %v16854_v52 = vcombine.high %v1631_v44, %v1639_v45  ;;  %v16856_v54 = vcombine.high %v1632_v47, %v1640_v48  ;;  %v1728_v44 = vld [vmem:[#allocation2 + $0x3388] sm:$0xff]  ;;  %v16935_v48 = vcombine.low %v1712_v34, %v1720_v35 }
 0x1b8   :  { %12734 = vmatprep.subr.bf16.mxu0 %v16758_v56  ;;  %13062 = vmatprep.subr.bf16.mxu1 %v16760_v58  ;;  %v1647_v56 = vld [vmem:[#allocation2 + $0x3100] sm:$0xff]  ;;  %v1736_v45 = vld [vmem:[#allocation2 + $0x33c8] sm:$0xff] }
 0x1b9   :  { %v1655_v58 = vld [vmem:[#allocation2 + $0x3140] sm:$0xff] }
 0x1ba   :  { %v16869_v6 = vcombine.low %v1647_v56, %v1655_v58 }
 0x1bb   :  { %12735 = vmatpush1.bf16.msra.mxu0 %v16757_v0  ;;  %13063 = vmatpush1.bf16.msra.mxu1 %v16759_v1  ;;  %v16870_v0 = vcombine.high %v1647_v56, %v1655_v58  ;;  %v16872_v1 = vcombine.high %v1648_v60, %v1656_v61  ;;  %v1744_v56 = vld [vmem:[#allocation2 + $0x3408] sm:$0xff]  ;;  %v16951_v61 = vcombine.low %v1728_v44, %v1736_v45 }
 0x1bc   :  { %12736 = vmatprep.subr.bf16.mxu0 %v16774_v2  ;;  %13064 = vmatprep.subr.bf16.mxu1 %v16776_v3  ;;  %v1663_v2 = vld [vmem:[#allocation2 + $0x3180] sm:$0xff]  ;;  %v1752_v58 = vld [vmem:[#allocation2 + $0x3448] sm:$0xff] }
 0x1bd   :  { %v1671_v3 = vld [vmem:[#allocation2 + $0x31c0] sm:$0xff] }
 0x1be   :  { %v16885_v17 = vcombine.low %v1663_v2, %v1671_v3 }
 0x1bf   :  { %12737 = vmatpush1.bf16.msra.mxu0 %v16773_v8  ;;  %13065 = vmatpush1.bf16.msra.mxu1 %v16775_v9  ;;  %v16886_v8 = vcombine.high %v1663_v2, %v1671_v3  ;;  %v16888_v9 = vcombine.high %v1664_v4, %v1672_v5  ;;  %v1760_v2 = vld [vmem:[#allocation2 + $0x3488] sm:$0xff]  ;;  %v16967_v5 = vcombine.low %v1744_v56, %v1752_v58 }
 0x1c0   :  { %12738 = vmatprep.subr.bf16.mxu0 %v16790_v10  ;;  %13066 = vmatprep.subr.bf16.mxu1 %v16792_v11  ;;  %v1679_v10 = vld [vmem:[#allocation2 + $0x3200] sm:$0xff]  ;;  %v1768_v3 = vld [vmem:[#allocation2 + $0x34c8] sm:$0xff] }
 0x1c1   :  { %v1687_v11 = vld [vmem:[#allocation2 + $0x3240] sm:$0xff] }
 0x1c2   :  { %v16901_v28 = vcombine.low %v1679_v10, %v1687_v11 }
 0x1c3   :  { %12739 = vmatpush1.bf16.msra.mxu0 %v16789_v20  ;;  %13067 = vmatpush1.bf16.msra.mxu1 %v16791_v21  ;;  %v16902_v20 = vcombine.high %v1679_v10, %v1687_v11  ;;  %v16904_v21 = vcombine.high %v1680_v13, %v1688_v14  ;;  %v1776_v10 = vld [vmem:[#allocation2 + $0x3508] sm:$0xff]  ;;  %v16983_v14 = vcombine.low %v1760_v2, %v1768_v3 }
 0x1c4   :  { %12740 = vmatprep.subr.bf16.mxu0 %v16806_v23  ;;  %13068 = vmatprep.subr.bf16.mxu1 %v16808_v24  ;;  %v1695_v23 = vld [vmem:[#allocation2 + $0x3280] sm:$0xff]  ;;  %v1784_v11 = vld [vmem:[#allocation2 + $0x3548] sm:$0xff] }
 0x1c5   :  { %v1703_v24 = vld [vmem:[#allocation2 + $0x32c0] sm:$0xff] }
 0x1c6   :  { %v16917_v37 = vcombine.low %v1695_v23, %v1703_v24 }
 0x1c7   :  { %12741 = vmatpush1.bf16.msra.mxu0 %v16805_v30  ;;  %13069 = vmatpush1.bf16.msra.mxu1 %v16807_v31  ;;  %v16918_v30 = vcombine.high %v1695_v23, %v1703_v24  ;;  %v16920_v31 = vcombine.high %v1696_v26, %v1704_v27  ;;  %v1792_v23 = vld [vmem:[#allocation2 + $0x3588] sm:$0xff]  ;;  %v16999_v27 = vcombine.low %v1776_v10, %v1784_v11 }
 0x1c8   :  { %12742 = vmatprep.subr.bf16.mxu0 %v16822_v32  ;;  %13070 = vmatprep.subr.bf16.mxu1 %v16824_v33  ;;  %v1711_v32 = vld [vmem:[#allocation2 + $0x3300] sm:$0xff]  ;;  %v1800_v24 = vld [vmem:[#allocation2 + $0x35c8] sm:$0xff] }
 0x1c9   :  { %v1719_v33 = vld [vmem:[#allocation2 + $0x3340] sm:$0xff] }
 0x1ca   :  { %v16933_v47 = vcombine.low %v1711_v32, %v1719_v33 }
 0x1cb   :  { %12743 = vmatpush1.bf16.msra.mxu0 %v16821_v40  ;;  %13071 = vmatpush1.bf16.msra.mxu1 %v16823_v41  ;;  %v16934_v40 = vcombine.high %v1711_v32, %v1719_v33  ;;  %v16936_v41 = vcombine.high %v1712_v34, %v1720_v35  ;;  %v1808_v32 = vld [vmem:[#allocation2 + $0x3608] sm:$0xff]  ;;  %v17015_v35 = vcombine.low %v1792_v23, %v1800_v24 }
 0x1cc   :  { %12753 = vmatprep.subr.bf16.mxu0 %v16838_v42  ;;  %13081 = vmatprep.subr.bf16.mxu1 %v16840_v43  ;;  %v1727_v42 = vld [vmem:[#allocation2 + $0x3380] sm:$0xff]  ;;  %v1816_v33 = vld [vmem:[#allocation2 + $0x3648] sm:$0xff] }
 0x1cd   :  { %v1735_v43 = vld [vmem:[#allocation2 + $0x33c0] sm:$0xff] }
 0x1ce   :  { %12745 = vmatmul.mubr.bf16.vlgmr.msra.gmra.mrb[0].mxu0 %v17986_v46  ;;  %13073 = vmatmul.mubr.bf16.vlgmr.msra.gmra.mrb[0].mxu1 %v17986_v46  ;;  %v16949_v60 = vcombine.low %v1727_v42, %v1735_v43 }
 0x1cf   :  { %12754 = vmatpush1.bf16.msra.mxu0 %v16837_v50  ;;  %13082 = vmatpush1.bf16.msra.mxu1 %v16839_v51  ;;  %v16950_v50 = vcombine.high %v1727_v42, %v1735_v43  ;;  %v16952_v51 = vcombine.high %v1728_v44, %v1736_v45  ;;  %v1824_v42 = vld [vmem:[#allocation2 + $0x3688] sm:$0xff]  ;;  %v17031_v45 = vcombine.low %v1808_v32, %v1816_v33 }
 0x1d0   :  { %12755 = vmatprep.subr.bf16.mxu0 %v16854_v52  ;;  %13083 = vmatprep.subr.bf16.mxu1 %v16856_v54  ;;  %v1743_v52 = vld [vmem:[#allocation2 + $0x3400] sm:$0xff]  ;;  %v1832_v43 = vld [vmem:[#allocation2 + $0x36c8] sm:$0xff] }
 0x1d1   :  { %12785 = vmatprep.mubr.bf16.mxu0 %v17995_v19  ;;  %13113 = vmatprep.mubr.bf16.mxu1 %v17995_v19  ;;  %v1751_v54 = vld [vmem:[#allocation2 + $0x3440] sm:$0xff] }
 0x1d2   :  { %v16965_v4 = vcombine.low %v1743_v52, %v1751_v54 }
 0x1d3   :  { %12756 = vmatpush1.bf16.msra.mxu0 %v16853_v62  ;;  %13084 = vmatpush1.bf16.msra.mxu1 %v16855_v63  ;;  %v16966_v62 = vcombine.high %v1743_v52, %v1751_v54  ;;  %v16968_v63 = vcombine.high %v1744_v56, %v1752_v58  ;;  %v1840_v52 = vld [vmem:[#allocation2 + $0x3708] sm:$0xff]  ;;  %v17047_v58 = vcombine.low %v1824_v42, %v1832_v43 }
 0x1d4   :  { %12757 = vmatprep.subr.bf16.mxu0 %v16870_v0  ;;  %13085 = vmatprep.subr.bf16.mxu1 %v16872_v1  ;;  %v1759_v0 = vld [vmem:[#allocation2 + $0x3480] sm:$0xff]  ;;  %v1848_v54 = vld [vmem:[#allocation2 + $0x3748] sm:$0xff] }
 0x1d5   :  { %v1767_v1 = vld [vmem:[#allocation2 + $0x34c0] sm:$0xff] }
 0x1d6   :  { %v16981_v13 = vcombine.low %v1759_v0, %v1767_v1 }
 0x1d7   :  { %12758 = vmatpush1.bf16.msra.mxu0 %v16869_v6  ;;  %13086 = vmatpush1.bf16.msra.mxu1 %v16871_v7  ;;  %v16982_v6 = vcombine.high %v1759_v0, %v1767_v1  ;;  %v16984_v7 = vcombine.high %v1760_v2, %v1768_v3  ;;  %v1856_v0 = vld [vmem:[#allocation2 + $0x3788] sm:$0xff]  ;;  %v17063_v3 = vcombine.low %v1840_v52, %v1848_v54 }
 0x1d8   :  { %12759 = vmatprep.subr.bf16.mxu0 %v16886_v8  ;;  %13087 = vmatprep.subr.bf16.mxu1 %v16888_v9  ;;  %v1775_v8 = vld [vmem:[#allocation2 + $0x3500] sm:$0xff]  ;;  %v1864_v1 = vld [vmem:[#allocation2 + $0x37c8] sm:$0xff] }
 0x1d9   :  { %v1783_v9 = vld [vmem:[#allocation2 + $0x3540] sm:$0xff] }
 0x1da   :  { %v16997_v26 = vcombine.low %v1775_v8, %v1783_v9 }
 0x1db   :  { %12760 = vmatpush1.bf16.msra.mxu0 %v16885_v17  ;;  %13088 = vmatpush1.bf16.msra.mxu1 %v16887_v18  ;;  %v16998_v17 = vcombine.high %v1775_v8, %v1783_v9  ;;  %v17000_v18 = vcombine.high %v1776_v10, %v1784_v11  ;;  %v1872_v8 = vld [vmem:[#allocation2 + $0x3808] sm:$0xff]  ;;  %v17079_v11 = vcombine.low %v1856_v0, %v1864_v1 }
 0x1dc   :  { %12761 = vmatprep.subr.bf16.mxu0 %v16902_v20  ;;  %13089 = vmatprep.subr.bf16.mxu1 %v16904_v21  ;;  %v1791_v20 = vld [vmem:[#allocation2 + $0x3580] sm:$0xff]  ;;  %v1880_v9 = vld [vmem:[#allocation2 + $0x3848] sm:$0xff] }
 0x1dd   :  { %v1799_v21 = vld [vmem:[#allocation2 + $0x35c0] sm:$0xff] }
 0x1de   :  { %v17013_v34 = vcombine.low %v1791_v20, %v1799_v21 }
 0x1df   :  { %12762 = vmatpush1.bf16.msra.mxu0 %v16901_v28  ;;  %13090 = vmatpush1.bf16.msra.mxu1 %v16903_v29  ;;  %v17014_v28 = vcombine.high %v1791_v20, %v1799_v21  ;;  %v17016_v29 = vcombine.high %v1792_v23, %v1800_v24  ;;  %v18003_v20 = vcombine.low %v17991_v49, %v17991_v49  ;;  %v1888_v21 = vld [vmem:[#allocation2 + $0x3888] sm:$0xff]  ;;  %v18008_v24 = vld [vmem:[%s18224_s0 + $0x38] sm:$0xff] }
 0x1e0   :  { %12763 = vmatprep.subr.bf16.mxu0 %v16918_v30  ;;  %13091 = vmatprep.subr.bf16.mxu1 %v16920_v31  ;;  %v1807_v30 = vld [vmem:[#allocation2 + $0x3600] sm:$0xff]  ;;  %v1896_v23 = vld [vmem:[#allocation2 + $0x38c8] sm:$0xff]  ;;  %v18012_v49 = vcombine.high %v18008_v24, %v18008_v24 }
 0x1e1   :  { %v1815_v31 = vld [vmem:[#allocation2 + $0x3640] sm:$0xff] }
 0x1e2   :  { %v17029_v44 = vcombine.low %v1807_v30, %v1815_v31 }
 0x1e3   :  { %12764 = vmatpush1.bf16.msra.mxu0 %v16917_v37  ;;  %13092 = vmatpush1.bf16.msra.mxu1 %v16919_v38  ;;  %v17030_v37 = vcombine.high %v1807_v30, %v1815_v31  ;;  %v17032_v38 = vcombine.high %v1808_v32, %v1816_v33  ;;  %v1903_v30 = vld [vmem:[#allocation2 + $0x3900] sm:$0xff]  ;;  %v1904_v32 = vld [vmem:[#allocation2 + $0x3908] sm:$0xff] }
 0x1e4   :  { %12765 = vmatprep.subr.bf16.mxu0 %v16934_v40  ;;  %13093 = vmatprep.subr.bf16.mxu1 %v16936_v41  ;;  %v1823_v40 = vld [vmem:[#allocation2 + $0x3680] sm:$0xff]  ;;  %v1912_v33 = vld [vmem:[#allocation2 + $0x3948] sm:$0xff] }
 0x1e5   :  { %v1831_v41 = vld [vmem:[#allocation2 + $0x36c0] sm:$0xff] }
 0x1e6   :  { %v17045_v56 = vcombine.low %v1823_v40, %v1831_v41  ;;  %v1911_v31 = vld [vmem:[#allocation2 + $0x3940] sm:$0xff] }
 0x1e7   :  { %12766 = vmatpush1.bf16.msra.mxu0 %v16933_v47  ;;  %13094 = vmatpush1.bf16.msra.mxu1 %v16935_v48  ;;  %v17046_v47 = vcombine.high %v1823_v40, %v1831_v41  ;;  %v17048_v48 = vcombine.high %v1824_v42, %v1832_v43  ;;  %v1919_v40 = vld [vmem:[#allocation2 + $0x3980] sm:$0xff]  ;;  %v1920_v42 = vld [vmem:[#allocation2 + $0x3988] sm:$0xff] }
 0x1e8   :  { %12767 = vmatprep.subr.bf16.mxu0 %v16950_v50  ;;  %13095 = vmatprep.subr.bf16.mxu1 %v16952_v51  ;;  %v1839_v50 = vld [vmem:[#allocation2 + $0x3700] sm:$0xff]  ;;  %v1928_v43 = vld [vmem:[#allocation2 + $0x39c8] sm:$0xff] }
 0x1e9   :  { %v1847_v51 = vld [vmem:[#allocation2 + $0x3740] sm:$0xff] }
 0x1ea   :  { %v17061_v2 = vcombine.low %v1839_v50, %v1847_v51  ;;  %v1927_v41 = vld [vmem:[#allocation2 + $0x39c0] sm:$0xff] }
 0x1eb   :  { %12768 = vmatpush1.bf16.msra.mxu0 %v16949_v60  ;;  %13096 = vmatpush1.bf16.msra.mxu1 %v16951_v61  ;;  %v17062_v60 = vcombine.high %v1839_v50, %v1847_v51  ;;  %v17064_v61 = vcombine.high %v1840_v52, %v1848_v54  ;;  %v1935_v50 = vld [vmem:[#allocation2 + $0x3a00] sm:$0xff]  ;;  %v1936_v52 = vld [vmem:[#allocation2 + $0x3a08] sm:$0xff] }
 0x1ec   :  { %12769 = vmatprep.subr.bf16.mxu0 %v16966_v62  ;;  %13097 = vmatprep.subr.bf16.mxu1 %v16968_v63  ;;  %v1855_v62 = vld [vmem:[#allocation2 + $0x3780] sm:$0xff]  ;;  %v1944_v54 = vld [vmem:[#allocation2 + $0x3a48] sm:$0xff] }
 0x1ed   :  { %v1863_v63 = vld [vmem:[#allocation2 + $0x37c0] sm:$0xff] }
 0x1ee   :  { %v17077_v10 = vcombine.low %v1855_v62, %v1863_v63  ;;  %v1943_v51 = vld [vmem:[#allocation2 + $0x3a40] sm:$0xff] }
 0x1ef   :  { %12770 = vmatpush1.bf16.msra.mxu0 %v16965_v4  ;;  %13098 = vmatpush1.bf16.msra.mxu1 %v16967_v5  ;;  %v17078_v4 = vcombine.high %v1855_v62, %v1863_v63  ;;  %v17080_v5 = vcombine.high %v1856_v0, %v1864_v1  ;;  %v1951_v62 = vld [vmem:[#allocation2 + $0x3a80] sm:$0xff]  ;;  %v1952_v0 = vld [vmem:[#allocation2 + $0x3a88] sm:$0xff] }
 0x1f0   :  { %12771 = vmatprep.subr.bf16.mxu0 %v16982_v6  ;;  %13099 = vmatprep.subr.bf16.mxu1 %v16984_v7  ;;  %v1871_v6 = vld [vmem:[#allocation2 + $0x3800] sm:$0xff]  ;;  %v1960_v1 = vld [vmem:[#allocation2 + $0x3ac8] sm:$0xff] }
 0x1f1   :  { %v1879_v7 = vld [vmem:[#allocation2 + $0x3840] sm:$0xff] }
 0x1f2   :  { %v1959_v63 = vld [vmem:[#allocation2 + $0x3ac0] sm:$0xff] }
 0x1f3   :  { %12772 = vmatpush1.bf16.msra.mxu0 %v16981_v13  ;;  %13100 = vmatpush1.bf16.msra.mxu1 %v16983_v14  ;;  %v17094_v13 = vcombine.high %v1871_v6, %v1879_v7  ;;  %v17096_v14 = vcombine.high %v1872_v8, %v1880_v9 }
 0x1f4   :  { %12773 = vmatprep.subr.bf16.mxu0 %v16998_v17  ;;  %13101 = vmatprep.subr.bf16.mxu1 %v17000_v18  ;;  %v1887_v17 = vld [vmem:[#allocation2 + $0x3880] sm:$0xff] }
 0x1f5   :  { %v1895_v18 = vld [vmem:[#allocation2 + $0x38c0] sm:$0xff] }
 0x1f7   :  { %12774 = vmatpush1.bf16.msra.mxu0 %v16997_v26  ;;  %13102 = vmatpush1.bf16.msra.mxu1 %v16999_v27  ;;  %v17093_v26 = vcombine.low %v1871_v6, %v1879_v7  ;;  %v17095_v27 = vcombine.low %v1872_v8, %v1880_v9  ;;  %v1967_v6 = vld [vmem:[#allocation2 + $0x3b00] sm:$0xff]  ;;  %v1968_v8 = vld [vmem:[#allocation2 + $0x3b08] sm:$0xff] }
 0x1f8   :  { %12775 = vmatprep.subr.bf16.mxu0 %v17014_v28  ;;  %13103 = vmatprep.subr.bf16.mxu1 %v17016_v29  ;;  %v17110_v28 = vcombine.high %v1887_v17, %v1895_v18  ;;  %v17112_v29 = vcombine.high %v1888_v21, %v1896_v23  ;;  %v1975_v7 = vld [vmem:[#allocation2 + $0x3b40] sm:$0xff]  ;;  %v1976_v9 = vld [vmem:[#allocation2 + $0x3b48] sm:$0xff] }
 0x1fb   :  { %12776 = vmatpush1.bf16.msra.mxu0 %v17013_v34  ;;  %13104 = vmatpush1.bf16.msra.mxu1 %v17015_v35  ;;  %v17109_v34 = vcombine.low %v1887_v17, %v1895_v18  ;;  %v17111_v35 = vcombine.low %v1888_v21, %v1896_v23  ;;  %v1983_v17 = vld [vmem:[#allocation2 + $0x3b80] sm:$0xff]  ;;  %v1984_v21 = vld [vmem:[#allocation2 + $0x3b88] sm:$0xff] }
 0x1fc   :  { %12777 = vmatprep.subr.bf16.mxu0 %v17030_v37  ;;  %13105 = vmatprep.subr.bf16.mxu1 %v17032_v38  ;;  %v17126_v37 = vcombine.high %v1903_v30, %v1911_v31  ;;  %v17128_v38 = vcombine.high %v1904_v32, %v1912_v33  ;;  %v1991_v18 = vld [vmem:[#allocation2 + $0x3bc0] sm:$0xff]  ;;  %v1992_v23 = vld [vmem:[#allocation2 + $0x3bc8] sm:$0xff] }
 0x1ff   :  { %12778 = vmatpush1.bf16.msra.mxu0 %v17029_v44  ;;  %13106 = vmatpush1.bf16.msra.mxu1 %v17031_v45  ;;  %v17125_v44 = vcombine.low %v1903_v30, %v1911_v31  ;;  %v17127_v45 = vcombine.low %v1904_v32, %v1912_v33  ;;  %v1999_v30 = vld [vmem:[#allocation2 + $0x3c00] sm:$0xff]  ;;  %v2000_v32 = vld [vmem:[#allocation2 + $0x3c08] sm:$0xff] }
 0x200   :  { %12779 = vmatprep.subr.bf16.mxu0 %v17046_v47  ;;  %13107 = vmatprep.subr.bf16.mxu1 %v17048_v48  ;;  %v17142_v47 = vcombine.high %v1919_v40, %v1927_v41  ;;  %v17144_v48 = vcombine.high %v1920_v42, %v1928_v43  ;;  %v2007_v31 = vld [vmem:[#allocation2 + $0x3c40] sm:$0xff]  ;;  %v2008_v33 = vld [vmem:[#allocation2 + $0x3c48] sm:$0xff] }
 0x203   :  { %12780 = vmatpush1.bf16.msra.mxu0 %v17045_v56  ;;  %13108 = vmatpush1.bf16.msra.mxu1 %v17047_v58  ;;  %v17141_v56 = vcombine.low %v1919_v40, %v1927_v41  ;;  %v17143_v58 = vcombine.low %v1920_v42, %v1928_v43  ;;  %v2015_v40 = vld [vmem:[#allocation2 + $0x3c80] sm:$0xff]  ;;  %v2016_v42 = vld [vmem:[#allocation2 + $0x3c88] sm:$0xff] }
 0x204   :  { %12781 = vmatprep.subr.bf16.mxu0 %v17062_v60  ;;  %13109 = vmatprep.subr.bf16.mxu1 %v17064_v61  ;;  %v17158_v60 = vcombine.high %v1935_v50, %v1943_v51  ;;  %v17160_v61 = vcombine.high %v1936_v52, %v1944_v54  ;;  %v2023_v41 = vld [vmem:[#allocation2 + $0x3cc0] sm:$0xff]  ;;  %v2024_v43 = vld [vmem:[#allocation2 + $0x3cc8] sm:$0xff] }
 0x207   :  { %12782 = vmatpush1.bf16.msra.mxu0 %v17061_v2  ;;  %13110 = vmatpush1.bf16.msra.mxu1 %v17063_v3  ;;  %v17157_v2 = vcombine.low %v1935_v50, %v1943_v51  ;;  %v17159_v3 = vcombine.low %v1936_v52, %v1944_v54  ;;  %v2031_v50 = vld [vmem:[#allocation2 + $0x3d00] sm:$0xff]  ;;  %v2032_v52 = vld [vmem:[#allocation2 + $0x3d08] sm:$0xff] }
 0x208   :  { %12783 = vmatprep.subr.bf16.mxu0 %v17078_v4  ;;  %13111 = vmatprep.subr.bf16.mxu1 %v17080_v5  ;;  %v17174_v4 = vcombine.high %v1951_v62, %v1959_v63  ;;  %v17176_v5 = vcombine.high %v1952_v0, %v1960_v1  ;;  %v2039_v51 = vld [vmem:[#allocation2 + $0x3d40] sm:$0xff]  ;;  %v2040_v54 = vld [vmem:[#allocation2 + $0x3d48] sm:$0xff] }
 0x20b   :  { %12784 = vmatpush1.bf16.msra.mxu0 %v17077_v10  ;;  %13112 = vmatpush1.bf16.msra.mxu1 %v17079_v11  ;;  %v17173_v10 = vcombine.low %v1951_v62, %v1959_v63  ;;  %v17175_v11 = vcombine.low %v1952_v0, %v1960_v1  ;;  %v2047_v62 = vld [vmem:[#allocation2 + $0x3d80] sm:$0xff]  ;;  %v2048_v0 = vld [vmem:[#allocation2 + $0x3d88] sm:$0xff] }
 0x20c   :  { %12794 = vmatprep.subr.bf16.mxu0 %v17094_v13  ;;  %13122 = vmatprep.subr.bf16.mxu1 %v17096_v14  ;;  %v17190_v13 = vcombine.high %v1967_v6, %v1975_v7  ;;  %v17192_v14 = vcombine.high %v1968_v8, %v1976_v9  ;;  %v2055_v63 = vld [vmem:[#allocation2 + $0x3dc0] sm:$0xff]  ;;  %v2056_v1 = vld [vmem:[#allocation2 + $0x3dc8] sm:$0xff] }
 0x20e   :  { %12786 = vmatmul.mubr.bf16.vlgmr.msra.gmra.mrb[0].mxu0 %v18003_v20  ;;  %13114 = vmatmul.mubr.bf16.vlgmr.msra.gmra.mrb[0].mxu1 %v18003_v20 }
 0x20f   :  { %12795 = vmatpush1.bf16.msra.mxu0 %v17093_v26  ;;  %13123 = vmatpush1.bf16.msra.mxu1 %v17095_v27  ;;  %v17189_v26 = vcombine.low %v1967_v6, %v1975_v7  ;;  %v17191_v27 = vcombine.low %v1968_v8, %v1976_v9  ;;  %v2063_v6 = vld [vmem:[#allocation2 + $0x3e00] sm:$0xff]  ;;  %v2064_v8 = vld [vmem:[#allocation2 + $0x3e08] sm:$0xff] }
 0x210   :  { %12796 = vmatprep.subr.bf16.mxu0 %v17110_v28  ;;  %13124 = vmatprep.subr.bf16.mxu1 %v17112_v29  ;;  %v17206_v28 = vcombine.high %v1983_v17, %v1991_v18  ;;  %v17208_v29 = vcombine.high %v1984_v21, %v1992_v23  ;;  %v2071_v7 = vld [vmem:[#allocation2 + $0x3e40] sm:$0xff]  ;;  %v2072_v9 = vld [vmem:[#allocation2 + $0x3e48] sm:$0xff] }
 0x211   :  { %12826 = vmatprep.mubr.bf16.mxu0 %v18012_v49  ;;  %13154 = vmatprep.mubr.bf16.mxu1 %v18012_v49 }
 0x213   :  { %12797 = vmatpush1.bf16.msra.mxu0 %v17109_v34  ;;  %13125 = vmatpush1.bf16.msra.mxu1 %v17111_v35  ;;  %v17205_v34 = vcombine.low %v1983_v17, %v1991_v18  ;;  %v17207_v35 = vcombine.low %v1984_v21, %v1992_v23  ;;  %v2079_v17 = vld [vmem:[#allocation2 + $0x3e80] sm:$0xff]  ;;  %v2080_v21 = vld [vmem:[#allocation2 + $0x3e88] sm:$0xff] }
 0x214   :  { %12798 = vmatprep.subr.bf16.mxu0 %v17126_v37  ;;  %13126 = vmatprep.subr.bf16.mxu1 %v17128_v38  ;;  %v17222_v37 = vcombine.high %v1999_v30, %v2007_v31  ;;  %v17224_v38 = vcombine.high %v2000_v32, %v2008_v33  ;;  %v2087_v18 = vld [vmem:[#allocation2 + $0x3ec0] sm:$0xff]  ;;  %v2088_v23 = vld [vmem:[#allocation2 + $0x3ec8] sm:$0xff] }
 0x217   :  { %12799 = vmatpush1.bf16.msra.mxu0 %v17125_v44  ;;  %13127 = vmatpush1.bf16.msra.mxu1 %v17127_v45  ;;  %v17221_v44 = vcombine.low %v1999_v30, %v2007_v31  ;;  %v17223_v45 = vcombine.low %v2000_v32, %v2008_v33  ;;  %v2095_v30 = vld [vmem:[#allocation2 + $0x3f00] sm:$0xff]  ;;  %v2096_v32 = vld [vmem:[#allocation2 + $0x3f08] sm:$0xff] }
 0x218   :  { %12800 = vmatprep.subr.bf16.mxu0 %v17142_v47  ;;  %13128 = vmatprep.subr.bf16.mxu1 %v17144_v48  ;;  %v17238_v47 = vcombine.high %v2015_v40, %v2023_v41  ;;  %v17240_v48 = vcombine.high %v2016_v42, %v2024_v43  ;;  %v2103_v31 = vld [vmem:[#allocation2 + $0x3f40] sm:$0xff]  ;;  %v2104_v33 = vld [vmem:[#allocation2 + $0x3f48] sm:$0xff] }
 0x21b   :  { %12801 = vmatpush1.bf16.msra.mxu0 %v17141_v56  ;;  %13129 = vmatpush1.bf16.msra.mxu1 %v17143_v58  ;;  %v17237_v56 = vcombine.low %v2015_v40, %v2023_v41  ;;  %v17239_v58 = vcombine.low %v2016_v42, %v2024_v43  ;;  %v2111_v40 = vld [vmem:[#allocation2 + $0x3f80] sm:$0xff]  ;;  %v2112_v42 = vld [vmem:[#allocation2 + $0x3f88] sm:$0xff] }
 0x21c   :  { %12802 = vmatprep.subr.bf16.mxu0 %v17158_v60  ;;  %13130 = vmatprep.subr.bf16.mxu1 %v17160_v61  ;;  %v17254_v60 = vcombine.high %v2031_v50, %v2039_v51  ;;  %v17256_v61 = vcombine.high %v2032_v52, %v2040_v54  ;;  %v2119_v41 = vld [vmem:[#allocation2 + $0x3fc0] sm:$0xff]  ;;  %v2120_v43 = vld [vmem:[#allocation2 + $0x3fc8] sm:$0xff] }
 0x21f   :  { %12803 = vmatpush1.bf16.msra.mxu0 %v17157_v2  ;;  %13131 = vmatpush1.bf16.msra.mxu1 %v17159_v3  ;;  %v17253_v2 = vcombine.low %v2031_v50, %v2039_v51  ;;  %v17255_v3 = vcombine.low %v2032_v52, %v2040_v54  ;;  %v81_v50 = vld [vmem:[#allocation2 + $0x10] sm:$0xff]  ;;  %v82_v52 = vld [vmem:[#allocation2 + $0x18] sm:$0xff] }
 0x220   :  { %12804 = vmatprep.subr.bf16.mxu0 %v17174_v4  ;;  %13132 = vmatprep.subr.bf16.mxu1 %v17176_v5  ;;  %v17270_v4 = vcombine.high %v2047_v62, %v2055_v63  ;;  %v17272_v5 = vcombine.high %v2048_v0, %v2056_v1  ;;  %v89_v51 = vld [vmem:[#allocation2 + $0x50] sm:$0xff]  ;;  %v90_v54 = vld [vmem:[#allocation2 + $0x58] sm:$0xff] }
 0x223   :  { %12805 = vmatpush1.bf16.msra.mxu0 %v17173_v10  ;;  %13133 = vmatpush1.bf16.msra.mxu1 %v17175_v11  ;;  %v17269_v10 = vcombine.low %v2047_v62, %v2055_v63  ;;  %v17271_v11 = vcombine.low %v2048_v0, %v2056_v1  ;;  %v97_v62 = vld [vmem:[#allocation2 + $0x90] sm:$0xff]  ;;  %v18020_v0 = vcombine.low %v18008_v24, %v18008_v24  ;;  %v98_v1 = vld [vmem:[#allocation2 + $0x98] sm:$0xff] }
 0x224   :  { %12806 = vmatprep.subr.bf16.mxu0 %v17190_v13  ;;  %13134 = vmatprep.subr.bf16.mxu1 %v17192_v14  ;;  %v17286_v13 = vcombine.high %v2063_v6, %v2071_v7  ;;  %v17288_v14 = vcombine.high %v2064_v8, %v2072_v9  ;;  %v105_v63 = vld [vmem:[#allocation2 + $0xd0] sm:$0xff] }
 0x225   :  { %v15321_v24 = vcombine.low %v97_v62, %v105_v63 }
 0x227   :  { %12807 = vmatpush1.bf16.msra.mxu0 %v17189_v26  ;;  %13135 = vmatpush1.bf16.msra.mxu1 %v17191_v27  ;;  %v17285_v26 = vcombine.low %v2063_v6, %v2071_v7  ;;  %v17287_v27 = vcombine.low %v2064_v8, %v2072_v9  ;;  %v113_v7 = vld [vmem:[#allocation2 + $0x110] sm:$0xff]  ;;  %v114_v9 = vld [vmem:[#allocation2 + $0x118] sm:$0xff] }
 0x228   :  { %12808 = vmatprep.subr.bf16.mxu0 %v17206_v28  ;;  %13136 = vmatprep.subr.bf16.mxu1 %v17208_v29  ;;  %v17302_v28 = vcombine.high %v2079_v17, %v2087_v18  ;;  %v17304_v29 = vcombine.high %v2080_v21, %v2088_v23  ;;  %v121_v8 = vld [vmem:[#allocation2 + $0x150] sm:$0xff] }
 0x22b   :  { %12809 = vmatpush1.bf16.msra.mxu0 %v17205_v34  ;;  %13137 = vmatpush1.bf16.msra.mxu1 %v17207_v35  ;;  %v17301_v34 = vcombine.low %v2079_v17, %v2087_v18  ;;  %v17303_v35 = vcombine.low %v2080_v21, %v2088_v23  ;;  %v129_v17 = vld [vmem:[#allocation2 + $0x190] sm:$0xff]  ;;  %v130_v21 = vld [vmem:[#allocation2 + $0x198] sm:$0xff] }
 0x22c   :  { %12810 = vmatprep.subr.bf16.mxu0 %v17222_v37  ;;  %13138 = vmatprep.subr.bf16.mxu1 %v17224_v38  ;;  %v17318_v37 = vcombine.high %v2095_v30, %v2103_v31  ;;  %v17320_v38 = vcombine.high %v2096_v32, %v2104_v33  ;;  %v137_v18 = vld [vmem:[#allocation2 + $0x1d0] sm:$0xff]  ;;  %v138_v23 = vld [vmem:[#allocation2 + $0x1d8] sm:$0xff] }
 0x22f   :  { %12811 = vmatpush1.bf16.msra.mxu0 %v17221_v44  ;;  %13139 = vmatpush1.bf16.msra.mxu1 %v17223_v45  ;;  %v17317_v44 = vcombine.low %v2095_v30, %v2103_v31  ;;  %v17319_v45 = vcombine.low %v2096_v32, %v2104_v33  ;;  %v145_v30 = vld [vmem:[#allocation2 + $0x210] sm:$0xff]  ;;  %v146_v32 = vld [vmem:[#allocation2 + $0x218] sm:$0xff] }
 0x230   :  { %12812 = vmatprep.subr.bf16.mxu0 %v17238_v47  ;;  %13140 = vmatprep.subr.bf16.mxu1 %v17240_v48  ;;  %v17334_v47 = vcombine.high %v2111_v40, %v2119_v41  ;;  %v17336_v48 = vcombine.high %v2112_v42, %v2120_v43  ;;  %v153_v31 = vld [vmem:[#allocation2 + $0x250] sm:$0xff]  ;;  %v154_v33 = vld [vmem:[#allocation2 + $0x258] sm:$0xff] }
 0x233   :  { %12813 = vmatpush1.bf16.msra.mxu0 %v17237_v56  ;;  %13141 = vmatpush1.bf16.msra.mxu1 %v17239_v58  ;;  %v17333_v56 = vcombine.low %v2111_v40, %v2119_v41  ;;  %v17335_v58 = vcombine.low %v2112_v42, %v2120_v43  ;;  %v161_v40 = vld [vmem:[#allocation2 + $0x290] sm:$0xff]  ;;  %v162_v42 = vld [vmem:[#allocation2 + $0x298] sm:$0xff] }
 0x234   :  { %12814 = vmatprep.subr.bf16.mxu0 %v17254_v60  ;;  %13142 = vmatprep.subr.bf16.mxu1 %v17256_v61  ;;  %v15306_v60 = vcombine.high %v81_v50, %v89_v51  ;;  %v15308_v61 = vcombine.high %v82_v52, %v90_v54  ;;  %v169_v41 = vld [vmem:[#allocation2 + $0x2d0] sm:$0xff]  ;;  %v170_v43 = vld [vmem:[#allocation2 + $0x2d8] sm:$0xff] }
 0x237   :  { %12815 = vmatpush1.bf16.msra.mxu0 %v17253_v2  ;;  %13143 = vmatpush1.bf16.msra.mxu1 %v17255_v3  ;;  %v106_v2 = vld [vmem:[#allocation2 + $0xd8] sm:$0xff]  ;;  %v15305_v3 = vcombine.low %v81_v50, %v89_v51  ;;  %v177_v50 = vld [vmem:[#allocation2 + $0x310] sm:$0xff] }
 0x238   :  { %12816 = vmatprep.subr.bf16.mxu0 %v17270_v4  ;;  %13144 = vmatprep.subr.bf16.mxu1 %v17272_v5  ;;  %v15307_v4 = vcombine.low %v82_v52, %v90_v54  ;;  %v15322_v5 = vcombine.high %v97_v62, %v105_v63  ;;  %v15324_v6 = vcombine.high %v98_v1, %v106_v2  ;;  %v185_v51 = vld [vmem:[#allocation2 + $0x350] sm:$0xff]  ;;  %v178_v52 = vld [vmem:[#allocation2 + $0x318] sm:$0xff] }
 0x239   :  { %v186_v54 = vld [vmem:[#allocation2 + $0x358] sm:$0xff]  ;;  %v193_v62 = vld [vmem:[#allocation2 + $0x390] sm:$0xff] }
 0x23a   :  { %v201_v63 = vld [vmem:[#allocation2 + $0x3d0] sm:$0xff] }
 0x23b   :  { %12817 = vmatpush1.bf16.msra.mxu0 %v17269_v10  ;;  %13145 = vmatpush1.bf16.msra.mxu1 %v17271_v11  ;;  %v122_v10 = vld [vmem:[#allocation2 + $0x158] sm:$0xff]  ;;  %v15323_v11 = vcombine.low %v98_v1, %v106_v2 }
 0x23c   :  { %12818 = vmatprep.subr.bf16.mxu0 %v17286_v13  ;;  %13146 = vmatprep.subr.bf16.mxu1 %v17288_v14  ;;  %v15338_v13 = vcombine.high %v113_v7, %v121_v8  ;;  %v15340_v14 = vcombine.high %v114_v9, %v122_v10  ;;  %v194_v1 = vld [vmem:[#allocation2 + $0x398] sm:$0xff] }
 0x23d   :  { %v202_v2 = vld [vmem:[#allocation2 + $0x3d8] sm:$0xff] }
 0x23f   :  { %12819 = vmatpush1.bf16.msra.mxu0 %v17285_v26  ;;  %13147 = vmatpush1.bf16.msra.mxu1 %v17287_v27  ;;  %v15337_v26 = vcombine.low %v113_v7, %v121_v8  ;;  %v15339_v27 = vcombine.low %v114_v9, %v122_v10  ;;  %v209_v7 = vld [vmem:[#allocation2 + $0x410] sm:$0xff]  ;;  %v210_v9 = vld [vmem:[#allocation2 + $0x418] sm:$0xff] }
 0x240   :  { %12820 = vmatprep.subr.bf16.mxu0 %v17302_v28  ;;  %13148 = vmatprep.subr.bf16.mxu1 %v17304_v29  ;;  %v15354_v28 = vcombine.high %v129_v17, %v137_v18  ;;  %v15356_v29 = vcombine.high %v130_v21, %v138_v23  ;;  %v217_v8 = vld [vmem:[#allocation2 + $0x450] sm:$0xff]  ;;  %v218_v10 = vld [vmem:[#allocation2 + $0x458] sm:$0xff] }
 0x243   :  { %12821 = vmatpush1.bf16.msra.mxu0 %v17301_v34  ;;  %13149 = vmatpush1.bf16.msra.mxu1 %v17303_v35  ;;  %v15353_v34 = vcombine.low %v129_v17, %v137_v18  ;;  %v15355_v35 = vcombine.low %v130_v21, %v138_v23  ;;  %v225_v17 = vld [vmem:[#allocation2 + $0x490] sm:$0xff]  ;;  %v226_v21 = vld [vmem:[#allocation2 + $0x498] sm:$0xff] }
 0x244   :  { %12822 = vmatprep.subr.bf16.mxu0 %v17318_v37  ;;  %13150 = vmatprep.subr.bf16.mxu1 %v17320_v38  ;;  %v15370_v37 = vcombine.high %v145_v30, %v153_v31  ;;  %v15372_v38 = vcombine.high %v146_v32, %v154_v33  ;;  %v233_v18 = vld [vmem:[#allocation2 + $0x4d0] sm:$0xff]  ;;  %v234_v23 = vld [vmem:[#allocation2 + $0x4d8] sm:$0xff] }
 0x247   :  { %12823 = vmatpush1.bf16.msra.mxu0 %v17317_v44  ;;  %13151 = vmatpush1.bf16.msra.mxu1 %v17319_v45  ;;  %v15369_v44 = vcombine.low %v145_v30, %v153_v31  ;;  %v15371_v45 = vcombine.low %v146_v32, %v154_v33  ;;  %v241_v30 = vld [vmem:[#allocation2 + $0x510] sm:$0xff]  ;;  %v242_v32 = vld [vmem:[#allocation2 + $0x518] sm:$0xff] }
 0x248   :  { %12824 = vmatprep.subr.bf16.mxu0 %v17334_v47  ;;  %13152 = vmatprep.subr.bf16.mxu1 %v17336_v48  ;;  %v15386_v47 = vcombine.high %v161_v40, %v169_v41  ;;  %v15388_v48 = vcombine.high %v162_v42, %v170_v43  ;;  %v249_v31 = vld [vmem:[#allocation2 + $0x550] sm:$0xff]  ;;  %v250_v33 = vld [vmem:[#allocation2 + $0x558] sm:$0xff] }
 0x24b   :  { %12825 = vmatpush1.bf16.msra.mxu0 %v17333_v56  ;;  %13153 = vmatpush1.bf16.msra.mxu1 %v17335_v58  ;;  %v15385_v56 = vcombine.low %v161_v40, %v169_v41  ;;  %v15387_v58 = vcombine.low %v162_v42, %v170_v43  ;;  %v257_v40 = vld [vmem:[#allocation2 + $0x590] sm:$0xff]  ;;  %v258_v42 = vld [vmem:[#allocation2 + $0x598] sm:$0xff] }
 0x24c   :  { %13163 = vmatprep.subr.bf16.mxu0 %v15306_v60  ;;  %13491 = vmatprep.subr.bf16.mxu1 %v15308_v61  ;;  %v15402_v60 = vcombine.high %v177_v50, %v185_v51  ;;  %v15404_v61 = vcombine.high %v178_v52, %v186_v54  ;;  %v265_v41 = vld [vmem:[#allocation2 + $0x5d0] sm:$0xff]  ;;  %v266_v43 = vld [vmem:[#allocation2 + $0x5d8] sm:$0xff] }
 0x24e   :  { %12827 = vmatmul.mubr.bf16.vlgmr.msra.gmra.mrb[0].mxu0 %v18020_v0  ;;  %13155 = vmatmul.mubr.bf16.vlgmr.msra.gmra.mrb[0].mxu1 %v18020_v0 }
 0x24f   :  { %13164 = vmatpush1.bf16.msra.mxu0 %v15305_v3  ;;  %13492 = vmatpush1.bf16.msra.mxu1 %v15307_v4  ;;  %v15401_v3 = vcombine.low %v177_v50, %v185_v51  ;;  %v15403_v4 = vcombine.low %v178_v52, %v186_v54  ;;  %v273_v50 = vld [vmem:[#allocation2 + $0x610] sm:$0xff]  ;;  %v274_v52 = vld [vmem:[#allocation2 + $0x618] sm:$0xff] }
 0x250   :  { %13165 = vmatprep.subr.bf16.mxu0 %v15322_v5  ;;  %13493 = vmatprep.subr.bf16.mxu1 %v15324_v6  ;;  %v15418_v5 = vcombine.high %v193_v62, %v201_v63  ;;  %v15420_v6 = vcombine.high %v194_v1, %v202_v2  ;;  %v281_v51 = vld [vmem:[#allocation2 + $0x650] sm:$0xff]  ;;  %v282_v54 = vld [vmem:[#allocation2 + $0x658] sm:$0xff] }
 0x251   :  { %13195 = vmatprep.mubr.bf16.mxu0 %v17895_v57  ;;  %13523 = vmatprep.mubr.bf16.mxu1 %v17895_v57 }
 0x253   :  { %13166 = vmatpush1.bf16.msra.mxu0 %v15321_v24  ;;  %13494 = vmatpush1.bf16.msra.mxu1 %v15323_v11  ;;  %v15417_v24 = vcombine.low %v193_v62, %v201_v63  ;;  %v15419_v11 = vcombine.low %v194_v1, %v202_v2  ;;  %v289_v62 = vld [vmem:[#allocation2 + $0x690] sm:$0xff]  ;;  %v290_v1 = vld [vmem:[#allocation2 + $0x698] sm:$0xff] }
 0x254   :  { %13167 = vmatprep.subr.bf16.mxu0 %v15338_v13  ;;  %13495 = vmatprep.subr.bf16.mxu1 %v15340_v14  ;;  %v15434_v13 = vcombine.high %v209_v7, %v217_v8  ;;  %v15436_v14 = vcombine.high %v210_v9, %v218_v10  ;;  %v297_v63 = vld [vmem:[#allocation2 + $0x6d0] sm:$0xff]  ;;  %v298_v2 = vld [vmem:[#allocation2 + $0x6d8] sm:$0xff] }
 0x257   :  { %13168 = vmatpush1.bf16.msra.mxu0 %v15337_v26  ;;  %13496 = vmatpush1.bf16.msra.mxu1 %v15339_v27  ;;  %v15433_v26 = vcombine.low %v209_v7, %v217_v8  ;;  %v15435_v27 = vcombine.low %v210_v9, %v218_v10  ;;  %v305_v7 = vld [vmem:[#allocation2 + $0x710] sm:$0xff]  ;;  %v306_v9 = vld [vmem:[#allocation2 + $0x718] sm:$0xff] }
 0x258   :  { %13169 = vmatprep.subr.bf16.mxu0 %v15354_v28  ;;  %13497 = vmatprep.subr.bf16.mxu1 %v15356_v29  ;;  %v15450_v28 = vcombine.high %v225_v17, %v233_v18  ;;  %v15452_v29 = vcombine.high %v226_v21, %v234_v23  ;;  %v313_v8 = vld [vmem:[#allocation2 + $0x750] sm:$0xff]  ;;  %v314_v10 = vld [vmem:[#allocation2 + $0x758] sm:$0xff] }
 0x25b   :  { %13170 = vmatpush1.bf16.msra.mxu0 %v15353_v34  ;;  %13498 = vmatpush1.bf16.msra.mxu1 %v15355_v35  ;;  %v15449_v34 = vcombine.low %v225_v17, %v233_v18  ;;  %v15451_v35 = vcombine.low %v226_v21, %v234_v23  ;;  %v321_v17 = vld [vmem:[#allocation2 + $0x790] sm:$0xff]  ;;  %v322_v21 = vld [vmem:[#allocation2 + $0x798] sm:$0xff] }
 0x25c   :  { %13171 = vmatprep.subr.bf16.mxu0 %v15370_v37  ;;  %13499 = vmatprep.subr.bf16.mxu1 %v15372_v38  ;;  %v15466_v37 = vcombine.high %v241_v30, %v249_v31  ;;  %v15468_v38 = vcombine.high %v242_v32, %v250_v33  ;;  %v329_v18 = vld [vmem:[#allocation2 + $0x7d0] sm:$0xff]  ;;  %v330_v23 = vld [vmem:[#allocation2 + $0x7d8] sm:$0xff] }
 0x25f   :  { %13172 = vmatpush1.bf16.msra.mxu0 %v15369_v44  ;;  %13500 = vmatpush1.bf16.msra.mxu1 %v15371_v45  ;;  %v15465_v44 = vcombine.low %v241_v30, %v249_v31  ;;  %v15467_v45 = vcombine.low %v242_v32, %v250_v33  ;;  %v337_v30 = vld [vmem:[#allocation2 + $0x810] sm:$0xff]  ;;  %v338_v32 = vld [vmem:[#allocation2 + $0x818] sm:$0xff] }
 0x260   :  { %13173 = vmatprep.subr.bf16.mxu0 %v15386_v47  ;;  %13501 = vmatprep.subr.bf16.mxu1 %v15388_v48  ;;  %v15482_v47 = vcombine.high %v257_v40, %v265_v41  ;;  %v15484_v48 = vcombine.high %v258_v42, %v266_v43  ;;  %v345_v31 = vld [vmem:[#allocation2 + $0x850] sm:$0xff]  ;;  %v346_v33 = vld [vmem:[#allocation2 + $0x858] sm:$0xff] }
 0x263   :  { %13174 = vmatpush1.bf16.msra.mxu0 %v15385_v56  ;;  %13502 = vmatpush1.bf16.msra.mxu1 %v15387_v58  ;;  %v15481_v56 = vcombine.low %v257_v40, %v265_v41  ;;  %v15483_v58 = vcombine.low %v258_v42, %v266_v43  ;;  %v353_v40 = vld [vmem:[#allocation2 + $0x890] sm:$0xff]  ;;  %v354_v42 = vld [vmem:[#allocation2 + $0x898] sm:$0xff] }
 0x264   :  { %13175 = vmatprep.subr.bf16.mxu0 %v15402_v60  ;;  %13503 = vmatprep.subr.bf16.mxu1 %v15404_v61  ;;  %v15498_v60 = vcombine.high %v273_v50, %v281_v51  ;;  %v15500_v61 = vcombine.high %v274_v52, %v282_v54  ;;  %v361_v41 = vld [vmem:[#allocation2 + $0x8d0] sm:$0xff]  ;;  %v362_v43 = vld [vmem:[#allocation2 + $0x8d8] sm:$0xff] }
 0x267   :  { %13176 = vmatpush1.bf16.msra.mxu0 %v15401_v3  ;;  %13504 = vmatpush1.bf16.msra.mxu1 %v15403_v4  ;;  %v15497_v3 = vcombine.low %v273_v50, %v281_v51  ;;  %v15499_v4 = vcombine.low %v274_v52, %v282_v54  ;;  %v369_v50 = vld [vmem:[#allocation2 + $0x910] sm:$0xff]  ;;  %v370_v52 = vld [vmem:[#allocation2 + $0x918] sm:$0xff] }
 0x268   :  { %13177 = vmatprep.subr.bf16.mxu0 %v15418_v5  ;;  %13505 = vmatprep.subr.bf16.mxu1 %v15420_v6  ;;  %v15514_v5 = vcombine.high %v289_v62, %v297_v63  ;;  %v15516_v6 = vcombine.high %v290_v1, %v298_v2  ;;  %v377_v51 = vld [vmem:[#allocation2 + $0x950] sm:$0xff]  ;;  %v378_v54 = vld [vmem:[#allocation2 + $0x958] sm:$0xff] }
 0x26b   :  { %13178 = vmatpush1.bf16.msra.mxu0 %v15417_v24  ;;  %13506 = vmatpush1.bf16.msra.mxu1 %v15419_v11  ;;  %v15513_v24 = vcombine.low %v289_v62, %v297_v63  ;;  %v15515_v11 = vcombine.low %v290_v1, %v298_v2  ;;  %v385_v62 = vld [vmem:[#allocation2 + $0x990] sm:$0xff]  ;;  %v386_v1 = vld [vmem:[#allocation2 + $0x998] sm:$0xff] }
 0x26c   :  { %13179 = vmatprep.subr.bf16.mxu0 %v15434_v13  ;;  %13507 = vmatprep.subr.bf16.mxu1 %v15436_v14  ;;  %v15530_v13 = vcombine.high %v305_v7, %v313_v8  ;;  %v15532_v14 = vcombine.high %v306_v9, %v314_v10  ;;  %v393_v63 = vld [vmem:[#allocation2 + $0x9d0] sm:$0xff]  ;;  %v394_v2 = vld [vmem:[#allocation2 + $0x9d8] sm:$0xff] }
 0x26f   :  { %13180 = vmatpush1.bf16.msra.mxu0 %v15433_v26  ;;  %13508 = vmatpush1.bf16.msra.mxu1 %v15435_v27  ;;  %v15529_v26 = vcombine.low %v305_v7, %v313_v8  ;;  %v15531_v27 = vcombine.low %v306_v9, %v314_v10  ;;  %v401_v7 = vld [vmem:[#allocation2 + $0xa10] sm:$0xff]  ;;  %v402_v9 = vld [vmem:[#allocation2 + $0xa18] sm:$0xff] }
 0x270   :  { %13181 = vmatprep.subr.bf16.mxu0 %v15450_v28  ;;  %13509 = vmatprep.subr.bf16.mxu1 %v15452_v29  ;;  %v15546_v28 = vcombine.high %v321_v17, %v329_v18  ;;  %v15548_v29 = vcombine.high %v322_v21, %v330_v23  ;;  %v409_v8 = vld [vmem:[#allocation2 + $0xa50] sm:$0xff]  ;;  %v410_v10 = vld [vmem:[#allocation2 + $0xa58] sm:$0xff] }
 0x273   :  { %13182 = vmatpush1.bf16.msra.mxu0 %v15449_v34  ;;  %13510 = vmatpush1.bf16.msra.mxu1 %v15451_v35  ;;  %v15545_v34 = vcombine.low %v321_v17, %v329_v18  ;;  %v15547_v35 = vcombine.low %v322_v21, %v330_v23  ;;  %v417_v17 = vld [vmem:[#allocation2 + $0xa90] sm:$0xff]  ;;  %v418_v21 = vld [vmem:[#allocation2 + $0xa98] sm:$0xff] }
 0x274   :  { %13183 = vmatprep.subr.bf16.mxu0 %v15466_v37  ;;  %13511 = vmatprep.subr.bf16.mxu1 %v15468_v38  ;;  %v15562_v37 = vcombine.high %v337_v30, %v345_v31  ;;  %v15564_v38 = vcombine.high %v338_v32, %v346_v33  ;;  %v425_v18 = vld [vmem:[#allocation2 + $0xad0] sm:$0xff]  ;;  %v426_v23 = vld [vmem:[#allocation2 + $0xad8] sm:$0xff] }
 0x277   :  { %13184 = vmatpush1.bf16.msra.mxu0 %v15465_v44  ;;  %13512 = vmatpush1.bf16.msra.mxu1 %v15467_v45  ;;  %v15561_v44 = vcombine.low %v337_v30, %v345_v31  ;;  %v15563_v45 = vcombine.low %v338_v32, %v346_v33  ;;  %v433_v30 = vld [vmem:[#allocation2 + $0xb10] sm:$0xff]  ;;  %v434_v32 = vld [vmem:[#allocation2 + $0xb18] sm:$0xff] }
 0x278   :  { %13185 = vmatprep.subr.bf16.mxu0 %v15482_v47  ;;  %13513 = vmatprep.subr.bf16.mxu1 %v15484_v48  ;;  %v15578_v47 = vcombine.high %v353_v40, %v361_v41  ;;  %v15580_v48 = vcombine.high %v354_v42, %v362_v43  ;;  %v441_v31 = vld [vmem:[#allocation2 + $0xb50] sm:$0xff]  ;;  %v442_v33 = vld [vmem:[#allocation2 + $0xb58] sm:$0xff] }
 0x27b   :  { %13186 = vmatpush1.bf16.msra.mxu0 %v15481_v56  ;;  %13514 = vmatpush1.bf16.msra.mxu1 %v15483_v58  ;;  %v15577_v56 = vcombine.low %v353_v40, %v361_v41  ;;  %v15579_v58 = vcombine.low %v354_v42, %v362_v43  ;;  %v449_v40 = vld [vmem:[#allocation2 + $0xb90] sm:$0xff]  ;;  %v450_v42 = vld [vmem:[#allocation2 + $0xb98] sm:$0xff] }
 0x27c   :  { %13187 = vmatprep.subr.bf16.mxu0 %v15498_v60  ;;  %13515 = vmatprep.subr.bf16.mxu1 %v15500_v61  ;;  %v15594_v60 = vcombine.high %v369_v50, %v377_v51  ;;  %v15596_v61 = vcombine.high %v370_v52, %v378_v54  ;;  %v457_v41 = vld [vmem:[#allocation2 + $0xbd0] sm:$0xff]  ;;  %v458_v43 = vld [vmem:[#allocation2 + $0xbd8] sm:$0xff] }
 0x27f   :  { %13188 = vmatpush1.bf16.msra.mxu0 %v15497_v3  ;;  %13516 = vmatpush1.bf16.msra.mxu1 %v15499_v4  ;;  %v15593_v3 = vcombine.low %v369_v50, %v377_v51  ;;  %v15595_v4 = vcombine.low %v370_v52, %v378_v54  ;;  %v465_v50 = vld [vmem:[#allocation2 + $0xc10] sm:$0xff]  ;;  %v466_v52 = vld [vmem:[#allocation2 + $0xc18] sm:$0xff] }
 0x280   :  { %13189 = vmatprep.subr.bf16.mxu0 %v15514_v5  ;;  %13517 = vmatprep.subr.bf16.mxu1 %v15516_v6  ;;  %v15610_v5 = vcombine.high %v385_v62, %v393_v63  ;;  %v15612_v6 = vcombine.high %v386_v1, %v394_v2  ;;  %v473_v51 = vld [vmem:[#allocation2 + $0xc50] sm:$0xff]  ;;  %v474_v54 = vld [vmem:[#allocation2 + $0xc58] sm:$0xff] }
 0x283   :  { %13190 = vmatpush1.bf16.msra.mxu0 %v15513_v24  ;;  %13518 = vmatpush1.bf16.msra.mxu1 %v15515_v11  ;;  %v15609_v24 = vcombine.low %v385_v62, %v393_v63  ;;  %v15611_v11 = vcombine.low %v386_v1, %v394_v2  ;;  %v481_v62 = vld [vmem:[#allocation2 + $0xc90] sm:$0xff]  ;;  %v482_v1 = vld [vmem:[#allocation2 + $0xc98] sm:$0xff] }
 0x284   :  { %13191 = vmatprep.subr.bf16.mxu0 %v15530_v13  ;;  %13519 = vmatprep.subr.bf16.mxu1 %v15532_v14  ;;  %v15626_v13 = vcombine.high %v401_v7, %v409_v8  ;;  %v15628_v14 = vcombine.high %v402_v9, %v410_v10  ;;  %v489_v63 = vld [vmem:[#allocation2 + $0xcd0] sm:$0xff]  ;;  %v490_v2 = vld [vmem:[#allocation2 + $0xcd8] sm:$0xff] }
 0x287   :  { %13192 = vmatpush1.bf16.msra.mxu0 %v15529_v26  ;;  %13520 = vmatpush1.bf16.msra.mxu1 %v15531_v27  ;;  %v15625_v26 = vcombine.low %v401_v7, %v409_v8  ;;  %v15627_v27 = vcombine.low %v402_v9, %v410_v10  ;;  %v497_v7 = vld [vmem:[#allocation2 + $0xd10] sm:$0xff]  ;;  %v498_v9 = vld [vmem:[#allocation2 + $0xd18] sm:$0xff] }
 0x288   :  { %13193 = vmatprep.subr.bf16.mxu0 %v15546_v28  ;;  %13521 = vmatprep.subr.bf16.mxu1 %v15548_v29  ;;  %v15642_v28 = vcombine.high %v417_v17, %v425_v18  ;;  %v15644_v29 = vcombine.high %v418_v21, %v426_v23  ;;  %v505_v8 = vld [vmem:[#allocation2 + $0xd50] sm:$0xff]  ;;  %v506_v10 = vld [vmem:[#allocation2 + $0xd58] sm:$0xff] }
 0x28b   :  { %13194 = vmatpush1.bf16.msra.mxu0 %v15545_v34  ;;  %13522 = vmatpush1.bf16.msra.mxu1 %v15547_v35  ;;  %v15641_v34 = vcombine.low %v417_v17, %v425_v18  ;;  %v15643_v35 = vcombine.low %v418_v21, %v426_v23  ;;  %v513_v17 = vld [vmem:[#allocation2 + $0xd90] sm:$0xff]  ;;  %v514_v21 = vld [vmem:[#allocation2 + $0xd98] sm:$0xff] }
 0x28c   :  { %13204 = vmatprep.subr.bf16.mxu0 %v15562_v37  ;;  %13532 = vmatprep.subr.bf16.mxu1 %v15564_v38  ;;  %v15658_v37 = vcombine.high %v433_v30, %v441_v31  ;;  %v15660_v38 = vcombine.high %v434_v32, %v442_v33  ;;  %v521_v18 = vld [vmem:[#allocation2 + $0xdd0] sm:$0xff]  ;;  %v522_v23 = vld [vmem:[#allocation2 + $0xdd8] sm:$0xff] }
 0x28e   :  { %13196 = vmatmul.mubr.bf16.vlgmr.msra.gmra.mrb[4].mxu0 %v17901_v12  ;;  %13524 = vmatmul.mubr.bf16.vlgmr.msra.gmra.mrb[4].mxu1 %v17901_v12 }
 0x28f   :  { %13205 = vmatpush1.bf16.msra.mxu0 %v15561_v44  ;;  %13533 = vmatpush1.bf16.msra.mxu1 %v15563_v45  ;;  %v15657_v44 = vcombine.low %v433_v30, %v441_v31  ;;  %v15659_v45 = vcombine.low %v434_v32, %v442_v33  ;;  %v529_v30 = vld [vmem:[#allocation2 + $0xe10] sm:$0xff]  ;;  %v530_v32 = vld [vmem:[#allocation2 + $0xe18] sm:$0xff] }
 0x290   :  { %13206 = vmatprep.subr.bf16.mxu0 %v15578_v47  ;;  %13534 = vmatprep.subr.bf16.mxu1 %v15580_v48  ;;  %v15674_v47 = vcombine.high %v449_v40, %v457_v41  ;;  %v15676_v48 = vcombine.high %v450_v42, %v458_v43  ;;  %v537_v31 = vld [vmem:[#allocation2 + $0xe50] sm:$0xff]  ;;  %v538_v33 = vld [vmem:[#allocation2 + $0xe58] sm:$0xff] }
 0x291   :  { %13236 = vmatprep.mubr.bf16.mxu0 %v17910_v53  ;;  %13564 = vmatprep.mubr.bf16.mxu1 %v17910_v53 }
 0x293   :  { %13207 = vmatpush1.bf16.msra.mxu0 %v15577_v56  ;;  %13535 = vmatpush1.bf16.msra.mxu1 %v15579_v58  ;;  %v15673_v56 = vcombine.low %v449_v40, %v457_v41  ;;  %v15675_v58 = vcombine.low %v450_v42, %v458_v43  ;;  %v545_v40 = vld [vmem:[#allocation2 + $0xe90] sm:$0xff]  ;;  %v546_v42 = vld [vmem:[#allocation2 + $0xe98] sm:$0xff] }
 0x294   :  { %13208 = vmatprep.subr.bf16.mxu0 %v15594_v60  ;;  %13536 = vmatprep.subr.bf16.mxu1 %v15596_v61  ;;  %v15690_v60 = vcombine.high %v465_v50, %v473_v51  ;;  %v15692_v61 = vcombine.high %v466_v52, %v474_v54  ;;  %v553_v41 = vld [vmem:[#allocation2 + $0xed0] sm:$0xff]  ;;  %v554_v43 = vld [vmem:[#allocation2 + $0xed8] sm:$0xff] }
 0x297   :  { %13209 = vmatpush1.bf16.msra.mxu0 %v15593_v3  ;;  %13537 = vmatpush1.bf16.msra.mxu1 %v15595_v4  ;;  %v15689_v3 = vcombine.low %v465_v50, %v473_v51  ;;  %v15691_v4 = vcombine.low %v466_v52, %v474_v54  ;;  %v561_v50 = vld [vmem:[#allocation2 + $0xf10] sm:$0xff]  ;;  %v562_v52 = vld [vmem:[#allocation2 + $0xf18] sm:$0xff] }
 0x298   :  { %13210 = vmatprep.subr.bf16.mxu0 %v15610_v5  ;;  %13538 = vmatprep.subr.bf16.mxu1 %v15612_v6  ;;  %v15706_v5 = vcombine.high %v481_v62, %v489_v63  ;;  %v15708_v6 = vcombine.high %v482_v1, %v490_v2  ;;  %v569_v51 = vld [vmem:[#allocation2 + $0xf50] sm:$0xff]  ;;  %v570_v54 = vld [vmem:[#allocation2 + $0xf58] sm:$0xff] }
 0x29b   :  { %13211 = vmatpush1.bf16.msra.mxu0 %v15609_v24  ;;  %13539 = vmatpush1.bf16.msra.mxu1 %v15611_v11  ;;  %v15705_v24 = vcombine.low %v481_v62, %v489_v63  ;;  %v15707_v11 = vcombine.low %v482_v1, %v490_v2  ;;  %v577_v62 = vld [vmem:[#allocation2 + $0xf90] sm:$0xff]  ;;  %v578_v1 = vld [vmem:[#allocation2 + $0xf98] sm:$0xff] }
 0x29c   :  { %13212 = vmatprep.subr.bf16.mxu0 %v15626_v13  ;;  %13540 = vmatprep.subr.bf16.mxu1 %v15628_v14  ;;  %v15722_v13 = vcombine.high %v497_v7, %v505_v8  ;;  %v15724_v14 = vcombine.high %v498_v9, %v506_v10  ;;  %v585_v63 = vld [vmem:[#allocation2 + $0xfd0] sm:$0xff]  ;;  %v586_v2 = vld [vmem:[#allocation2 + $0xfd8] sm:$0xff] }
 0x29f   :  { %13213 = vmatpush1.bf16.msra.mxu0 %v15625_v26  ;;  %13541 = vmatpush1.bf16.msra.mxu1 %v15627_v27  ;;  %v15721_v26 = vcombine.low %v497_v7, %v505_v8  ;;  %v15723_v27 = vcombine.low %v498_v9, %v506_v10  ;;  %v593_v7 = vld [vmem:[#allocation2 + $0x1010] sm:$0xff]  ;;  %v594_v9 = vld [vmem:[#allocation2 + $0x1018] sm:$0xff] }
 0x2a0   :  { %13214 = vmatprep.subr.bf16.mxu0 %v15642_v28  ;;  %13542 = vmatprep.subr.bf16.mxu1 %v15644_v29  ;;  %v15738_v28 = vcombine.high %v513_v17, %v521_v18  ;;  %v15740_v29 = vcombine.high %v514_v21, %v522_v23  ;;  %v601_v8 = vld [vmem:[#allocation2 + $0x1050] sm:$0xff]  ;;  %v602_v10 = vld [vmem:[#allocation2 + $0x1058] sm:$0xff] }
 0x2a3   :  { %13215 = vmatpush1.bf16.msra.mxu0 %v15641_v34  ;;  %13543 = vmatpush1.bf16.msra.mxu1 %v15643_v35  ;;  %v15737_v34 = vcombine.low %v513_v17, %v521_v18  ;;  %v15739_v35 = vcombine.low %v514_v21, %v522_v23  ;;  %v609_v17 = vld [vmem:[#allocation2 + $0x1090] sm:$0xff]  ;;  %v610_v21 = vld [vmem:[#allocation2 + $0x1098] sm:$0xff] }
 0x2a4   :  { %13216 = vmatprep.subr.bf16.mxu0 %v15658_v37  ;;  %13544 = vmatprep.subr.bf16.mxu1 %v15660_v38  ;;  %v15754_v37 = vcombine.high %v529_v30, %v537_v31  ;;  %v15756_v38 = vcombine.high %v530_v32, %v538_v33  ;;  %v617_v18 = vld [vmem:[#allocation2 + $0x10d0] sm:$0xff]  ;;  %v618_v23 = vld [vmem:[#allocation2 + $0x10d8] sm:$0xff] }
 0x2a7   :  { %13217 = vmatpush1.bf16.msra.mxu0 %v15657_v44  ;;  %13545 = vmatpush1.bf16.msra.mxu1 %v15659_v45  ;;  %v15753_v44 = vcombine.low %v529_v30, %v537_v31  ;;  %v15755_v45 = vcombine.low %v530_v32, %v538_v33  ;;  %v625_v30 = vld [vmem:[#allocation2 + $0x1110] sm:$0xff]  ;;  %v626_v32 = vld [vmem:[#allocation2 + $0x1118] sm:$0xff] }
 0x2a8   :  { %13218 = vmatprep.subr.bf16.mxu0 %v15674_v47  ;;  %13546 = vmatprep.subr.bf16.mxu1 %v15676_v48  ;;  %v15770_v47 = vcombine.high %v545_v40, %v553_v41  ;;  %v15772_v48 = vcombine.high %v546_v42, %v554_v43  ;;  %v633_v31 = vld [vmem:[#allocation2 + $0x1150] sm:$0xff]  ;;  %v634_v33 = vld [vmem:[#allocation2 + $0x1158] sm:$0xff] }
 0x2ab   :  { %13219 = vmatpush1.bf16.msra.mxu0 %v15673_v56  ;;  %13547 = vmatpush1.bf16.msra.mxu1 %v15675_v58  ;;  %v15769_v56 = vcombine.low %v545_v40, %v553_v41  ;;  %v15771_v58 = vcombine.low %v546_v42, %v554_v43  ;;  %v641_v40 = vld [vmem:[#allocation2 + $0x1190] sm:$0xff]  ;;  %v642_v42 = vld [vmem:[#allocation2 + $0x1198] sm:$0xff] }
 0x2ac   :  { %13220 = vmatprep.subr.bf16.mxu0 %v15690_v60  ;;  %13548 = vmatprep.subr.bf16.mxu1 %v15692_v61  ;;  %v15786_v60 = vcombine.high %v561_v50, %v569_v51  ;;  %v15788_v61 = vcombine.high %v562_v52, %v570_v54  ;;  %v649_v41 = vld [vmem:[#allocation2 + $0x11d0] sm:$0xff]  ;;  %v650_v43 = vld [vmem:[#allocation2 + $0x11d8] sm:$0xff] }
 0x2af   :  { %13221 = vmatpush1.bf16.msra.mxu0 %v15689_v3  ;;  %13549 = vmatpush1.bf16.msra.mxu1 %v15691_v4  ;;  %v15785_v3 = vcombine.low %v561_v50, %v569_v51  ;;  %v15787_v4 = vcombine.low %v562_v52, %v570_v54  ;;  %v657_v50 = vld [vmem:[#allocation2 + $0x1210] sm:$0xff]  ;;  %v658_v52 = vld [vmem:[#allocation2 + $0x1218] sm:$0xff] }
 0x2b0   :  { %13222 = vmatprep.subr.bf16.mxu0 %v15706_v5  ;;  %13550 = vmatprep.subr.bf16.mxu1 %v15708_v6  ;;  %v15802_v5 = vcombine.high %v577_v62, %v585_v63  ;;  %v15804_v6 = vcombine.high %v578_v1, %v586_v2  ;;  %v665_v51 = vld [vmem:[#allocation2 + $0x1250] sm:$0xff]  ;;  %v666_v54 = vld [vmem:[#allocation2 + $0x1258] sm:$0xff] }
 0x2b3   :  { %13223 = vmatpush1.bf16.msra.mxu0 %v15705_v24  ;;  %13551 = vmatpush1.bf16.msra.mxu1 %v15707_v11  ;;  %v15801_v24 = vcombine.low %v577_v62, %v585_v63  ;;  %v15803_v11 = vcombine.low %v578_v1, %v586_v2  ;;  %v673_v62 = vld [vmem:[#allocation2 + $0x1290] sm:$0xff]  ;;  %v674_v1 = vld [vmem:[#allocation2 + $0x1298] sm:$0xff] }
 0x2b4   :  { %13224 = vmatprep.subr.bf16.mxu0 %v15722_v13  ;;  %13552 = vmatprep.subr.bf16.mxu1 %v15724_v14  ;;  %v15818_v13 = vcombine.high %v593_v7, %v601_v8  ;;  %v15820_v14 = vcombine.high %v594_v9, %v602_v10  ;;  %v681_v63 = vld [vmem:[#allocation2 + $0x12d0] sm:$0xff]  ;;  %v682_v2 = vld [vmem:[#allocation2 + $0x12d8] sm:$0xff] }
 0x2b7   :  { %13225 = vmatpush1.bf16.msra.mxu0 %v15721_v26  ;;  %13553 = vmatpush1.bf16.msra.mxu1 %v15723_v27  ;;  %v15817_v26 = vcombine.low %v593_v7, %v601_v8  ;;  %v15819_v27 = vcombine.low %v594_v9, %v602_v10  ;;  %v689_v7 = vld [vmem:[#allocation2 + $0x1310] sm:$0xff]  ;;  %v690_v9 = vld [vmem:[#allocation2 + $0x1318] sm:$0xff] }
 0x2b8   :  { %13226 = vmatprep.subr.bf16.mxu0 %v15738_v28  ;;  %13554 = vmatprep.subr.bf16.mxu1 %v15740_v29  ;;  %v15834_v28 = vcombine.high %v609_v17, %v617_v18  ;;  %v15836_v29 = vcombine.high %v610_v21, %v618_v23  ;;  %v697_v8 = vld [vmem:[#allocation2 + $0x1350] sm:$0xff]  ;;  %v698_v10 = vld [vmem:[#allocation2 + $0x1358] sm:$0xff] }
 0x2bb   :  { %13227 = vmatpush1.bf16.msra.mxu0 %v15737_v34  ;;  %13555 = vmatpush1.bf16.msra.mxu1 %v15739_v35  ;;  %v15833_v34 = vcombine.low %v609_v17, %v617_v18  ;;  %v15835_v35 = vcombine.low %v610_v21, %v618_v23  ;;  %v705_v17 = vld [vmem:[#allocation2 + $0x1390] sm:$0xff]  ;;  %v706_v21 = vld [vmem:[#allocation2 + $0x1398] sm:$0xff] }
 0x2bc   :  { %13228 = vmatprep.subr.bf16.mxu0 %v15754_v37  ;;  %13556 = vmatprep.subr.bf16.mxu1 %v15756_v38  ;;  %v15850_v37 = vcombine.high %v625_v30, %v633_v31  ;;  %v15852_v38 = vcombine.high %v626_v32, %v634_v33  ;;  %v713_v18 = vld [vmem:[#allocation2 + $0x13d0] sm:$0xff]  ;;  %v714_v23 = vld [vmem:[#allocation2 + $0x13d8] sm:$0xff] }
 0x2bf   :  { %13229 = vmatpush1.bf16.msra.mxu0 %v15753_v44  ;;  %13557 = vmatpush1.bf16.msra.mxu1 %v15755_v45  ;;  %v15849_v44 = vcombine.low %v625_v30, %v633_v31  ;;  %v15851_v45 = vcombine.low %v626_v32, %v634_v33  ;;  %v721_v30 = vld [vmem:[#allocation2 + $0x1410] sm:$0xff]  ;;  %v722_v32 = vld [vmem:[#allocation2 + $0x1418] sm:$0xff] }
 0x2c0   :  { %13230 = vmatprep.subr.bf16.mxu0 %v15770_v47  ;;  %13558 = vmatprep.subr.bf16.mxu1 %v15772_v48  ;;  %v15866_v47 = vcombine.high %v641_v40, %v649_v41  ;;  %v15868_v48 = vcombine.high %v642_v42, %v650_v43  ;;  %v729_v31 = vld [vmem:[#allocation2 + $0x1450] sm:$0xff]  ;;  %v730_v33 = vld [vmem:[#allocation2 + $0x1458] sm:$0xff] }
 0x2c3   :  { %13231 = vmatpush1.bf16.msra.mxu0 %v15769_v56  ;;  %13559 = vmatpush1.bf16.msra.mxu1 %v15771_v58  ;;  %v15865_v56 = vcombine.low %v641_v40, %v649_v41  ;;  %v15867_v58 = vcombine.low %v642_v42, %v650_v43  ;;  %v737_v40 = vld [vmem:[#allocation2 + $0x1490] sm:$0xff]  ;;  %v738_v42 = vld [vmem:[#allocation2 + $0x1498] sm:$0xff] }
 0x2c4   :  { %13232 = vmatprep.subr.bf16.mxu0 %v15786_v60  ;;  %13560 = vmatprep.subr.bf16.mxu1 %v15788_v61  ;;  %v15882_v60 = vcombine.high %v657_v50, %v665_v51  ;;  %v15884_v61 = vcombine.high %v658_v52, %v666_v54  ;;  %v745_v41 = vld [vmem:[#allocation2 + $0x14d0] sm:$0xff]  ;;  %v746_v43 = vld [vmem:[#allocation2 + $0x14d8] sm:$0xff] }
 0x2c7   :  { %13233 = vmatpush1.bf16.msra.mxu0 %v15785_v3  ;;  %13561 = vmatpush1.bf16.msra.mxu1 %v15787_v4  ;;  %v15881_v3 = vcombine.low %v657_v50, %v665_v51  ;;  %v15883_v4 = vcombine.low %v658_v52, %v666_v54  ;;  %v753_v50 = vld [vmem:[#allocation2 + $0x1510] sm:$0xff]  ;;  %v754_v52 = vld [vmem:[#allocation2 + $0x1518] sm:$0xff] }
 0x2c8   :  { %13234 = vmatprep.subr.bf16.mxu0 %v15802_v5  ;;  %13562 = vmatprep.subr.bf16.mxu1 %v15804_v6  ;;  %v15898_v5 = vcombine.high %v673_v62, %v681_v63  ;;  %v15900_v6 = vcombine.high %v674_v1, %v682_v2  ;;  %v761_v51 = vld [vmem:[#allocation2 + $0x1550] sm:$0xff]  ;;  %v762_v54 = vld [vmem:[#allocation2 + $0x1558] sm:$0xff] }
 0x2cb   :  { %13235 = vmatpush1.bf16.msra.mxu0 %v15801_v24  ;;  %13563 = vmatpush1.bf16.msra.mxu1 %v15803_v11  ;;  %v15897_v24 = vcombine.low %v673_v62, %v681_v63  ;;  %v15899_v11 = vcombine.low %v674_v1, %v682_v2  ;;  %v769_v62 = vld [vmem:[#allocation2 + $0x1590] sm:$0xff]  ;;  %v770_v1 = vld [vmem:[#allocation2 + $0x1598] sm:$0xff] }
 0x2cc   :  { %13245 = vmatprep.subr.bf16.mxu0 %v15818_v13  ;;  %13573 = vmatprep.subr.bf16.mxu1 %v15820_v14  ;;  %v15914_v13 = vcombine.high %v689_v7, %v697_v8  ;;  %v15916_v14 = vcombine.high %v690_v9, %v698_v10  ;;  %v777_v63 = vld [vmem:[#allocation2 + $0x15d0] sm:$0xff]  ;;  %v778_v2 = vld [vmem:[#allocation2 + $0x15d8] sm:$0xff] }
 0x2ce   :  { %13237 = vmatmul.mubr.bf16.vlgmr.msra.gmra.mrb[4].mxu0 %v17918_v22  ;;  %13565 = vmatmul.mubr.bf16.vlgmr.msra.gmra.mrb[4].mxu1 %v17918_v22 }
 0x2cf   :  { %13246 = vmatpush1.bf16.msra.mxu0 %v15817_v26  ;;  %13574 = vmatpush1.bf16.msra.mxu1 %v15819_v27  ;;  %v15913_v26 = vcombine.low %v689_v7, %v697_v8  ;;  %v15915_v27 = vcombine.low %v690_v9, %v698_v10  ;;  %v785_v7 = vld [vmem:[#allocation2 + $0x1610] sm:$0xff]  ;;  %v786_v9 = vld [vmem:[#allocation2 + $0x1618] sm:$0xff] }
 0x2d0   :  { %13247 = vmatprep.subr.bf16.mxu0 %v15834_v28  ;;  %13575 = vmatprep.subr.bf16.mxu1 %v15836_v29  ;;  %v15930_v28 = vcombine.high %v705_v17, %v713_v18  ;;  %v15932_v29 = vcombine.high %v706_v21, %v714_v23  ;;  %v793_v8 = vld [vmem:[#allocation2 + $0x1650] sm:$0xff]  ;;  %v794_v10 = vld [vmem:[#allocation2 + $0x1658] sm:$0xff] }
 0x2d1   :  { %13277 = vmatprep.mubr.bf16.mxu0 %v17927_v15  ;;  %13605 = vmatprep.mubr.bf16.mxu1 %v17927_v15 }
 0x2d3   :  { %13248 = vmatpush1.bf16.msra.mxu0 %v15833_v34  ;;  %13576 = vmatpush1.bf16.msra.mxu1 %v15835_v35  ;;  %v15929_v34 = vcombine.low %v705_v17, %v713_v18  ;;  %v15931_v35 = vcombine.low %v706_v21, %v714_v23  ;;  %v801_v17 = vld [vmem:[#allocation2 + $0x1690] sm:$0xff]  ;;  %v802_v21 = vld [vmem:[#allocation2 + $0x1698] sm:$0xff] }
 0x2d4   :  { %13249 = vmatprep.subr.bf16.mxu0 %v15850_v37  ;;  %13577 = vmatprep.subr.bf16.mxu1 %v15852_v38  ;;  %v15946_v37 = vcombine.high %v721_v30, %v729_v31  ;;  %v15948_v38 = vcombine.high %v722_v32, %v730_v33  ;;  %v809_v18 = vld [vmem:[#allocation2 + $0x16d0] sm:$0xff]  ;;  %v810_v23 = vld [vmem:[#allocation2 + $0x16d8] sm:$0xff] }
 0x2d7   :  { %13250 = vmatpush1.bf16.msra.mxu0 %v15849_v44  ;;  %13578 = vmatpush1.bf16.msra.mxu1 %v15851_v45  ;;  %v15945_v44 = vcombine.low %v721_v30, %v729_v31  ;;  %v15947_v45 = vcombine.low %v722_v32, %v730_v33  ;;  %v817_v30 = vld [vmem:[#allocation2 + $0x1710] sm:$0xff]  ;;  %v818_v32 = vld [vmem:[#allocation2 + $0x1718] sm:$0xff] }
 0x2d8   :  { %13251 = vmatprep.subr.bf16.mxu0 %v15866_v47  ;;  %13579 = vmatprep.subr.bf16.mxu1 %v15868_v48  ;;  %v15962_v47 = vcombine.high %v737_v40, %v745_v41  ;;  %v15964_v48 = vcombine.high %v738_v42, %v746_v43  ;;  %v825_v31 = vld [vmem:[#allocation2 + $0x1750] sm:$0xff]  ;;  %v826_v33 = vld [vmem:[#allocation2 + $0x1758] sm:$0xff] }
 0x2db   :  { %13252 = vmatpush1.bf16.msra.mxu0 %v15865_v56  ;;  %13580 = vmatpush1.bf16.msra.mxu1 %v15867_v58  ;;  %v15961_v56 = vcombine.low %v737_v40, %v745_v41  ;;  %v15963_v58 = vcombine.low %v738_v42, %v746_v43  ;;  %v833_v40 = vld [vmem:[#allocation2 + $0x1790] sm:$0xff]  ;;  %v834_v42 = vld [vmem:[#allocation2 + $0x1798] sm:$0xff] }
 0x2dc   :  { %13253 = vmatprep.subr.bf16.mxu0 %v15882_v60  ;;  %13581 = vmatprep.subr.bf16.mxu1 %v15884_v61  ;;  %v15978_v60 = vcombine.high %v753_v50, %v761_v51  ;;  %v15980_v61 = vcombine.high %v754_v52, %v762_v54  ;;  %v841_v41 = vld [vmem:[#allocation2 + $0x17d0] sm:$0xff]  ;;  %v842_v43 = vld [vmem:[#allocation2 + $0x17d8] sm:$0xff] }
 0x2df   :  { %13254 = vmatpush1.bf16.msra.mxu0 %v15881_v3  ;;  %13582 = vmatpush1.bf16.msra.mxu1 %v15883_v4  ;;  %v15977_v3 = vcombine.low %v753_v50, %v761_v51  ;;  %v15979_v4 = vcombine.low %v754_v52, %v762_v54  ;;  %v849_v50 = vld [vmem:[#allocation2 + $0x1810] sm:$0xff]  ;;  %v850_v52 = vld [vmem:[#allocation2 + $0x1818] sm:$0xff] }
 0x2e0   :  { %13255 = vmatprep.subr.bf16.mxu0 %v15898_v5  ;;  %13583 = vmatprep.subr.bf16.mxu1 %v15900_v6  ;;  %v15994_v5 = vcombine.high %v769_v62, %v777_v63  ;;  %v15996_v6 = vcombine.high %v770_v1, %v778_v2  ;;  %v857_v51 = vld [vmem:[#allocation2 + $0x1850] sm:$0xff]  ;;  %v858_v54 = vld [vmem:[#allocation2 + $0x1858] sm:$0xff] }
 0x2e3   :  { %13256 = vmatpush1.bf16.msra.mxu0 %v15897_v24  ;;  %13584 = vmatpush1.bf16.msra.mxu1 %v15899_v11  ;;  %v15993_v24 = vcombine.low %v769_v62, %v777_v63  ;;  %v15995_v11 = vcombine.low %v770_v1, %v778_v2  ;;  %v865_v62 = vld [vmem:[#allocation2 + $0x1890] sm:$0xff]  ;;  %v866_v1 = vld [vmem:[#allocation2 + $0x1898] sm:$0xff] }
 0x2e4   :  { %13257 = vmatprep.subr.bf16.mxu0 %v15914_v13  ;;  %13585 = vmatprep.subr.bf16.mxu1 %v15916_v14  ;;  %v16010_v13 = vcombine.high %v785_v7, %v793_v8  ;;  %v16012_v14 = vcombine.high %v786_v9, %v794_v10  ;;  %v873_v63 = vld [vmem:[#allocation2 + $0x18d0] sm:$0xff]  ;;  %v874_v2 = vld [vmem:[#allocation2 + $0x18d8] sm:$0xff] }
 0x2e7   :  { %13258 = vmatpush1.bf16.msra.mxu0 %v15913_v26  ;;  %13586 = vmatpush1.bf16.msra.mxu1 %v15915_v27  ;;  %v16009_v26 = vcombine.low %v785_v7, %v793_v8  ;;  %v16011_v27 = vcombine.low %v786_v9, %v794_v10  ;;  %v881_v7 = vld [vmem:[#allocation2 + $0x1910] sm:$0xff]  ;;  %v882_v9 = vld [vmem:[#allocation2 + $0x1918] sm:$0xff] }
 0x2e8   :  { %13259 = vmatprep.subr.bf16.mxu0 %v15930_v28  ;;  %13587 = vmatprep.subr.bf16.mxu1 %v15932_v29  ;;  %v16026_v28 = vcombine.high %v801_v17, %v809_v18  ;;  %v16028_v29 = vcombine.high %v802_v21, %v810_v23  ;;  %v889_v8 = vld [vmem:[#allocation2 + $0x1950] sm:$0xff]  ;;  %v890_v10 = vld [vmem:[#allocation2 + $0x1958] sm:$0xff] }
 0x2eb   :  { %13260 = vmatpush1.bf16.msra.mxu0 %v15929_v34  ;;  %13588 = vmatpush1.bf16.msra.mxu1 %v15931_v35  ;;  %v16025_v34 = vcombine.low %v801_v17, %v809_v18  ;;  %v16027_v35 = vcombine.low %v802_v21, %v810_v23  ;;  %v897_v17 = vld [vmem:[#allocation2 + $0x1990] sm:$0xff]  ;;  %v898_v21 = vld [vmem:[#allocation2 + $0x1998] sm:$0xff] }
 0x2ec   :  { %13261 = vmatprep.subr.bf16.mxu0 %v15946_v37  ;;  %13589 = vmatprep.subr.bf16.mxu1 %v15948_v38  ;;  %v16042_v37 = vcombine.high %v817_v30, %v825_v31  ;;  %v16044_v38 = vcombine.high %v818_v32, %v826_v33  ;;  %v905_v18 = vld [vmem:[#allocation2 + $0x19d0] sm:$0xff]  ;;  %v906_v23 = vld [vmem:[#allocation2 + $0x19d8] sm:$0xff] }
 0x2ef   :  { %13262 = vmatpush1.bf16.msra.mxu0 %v15945_v44  ;;  %13590 = vmatpush1.bf16.msra.mxu1 %v15947_v45  ;;  %v16041_v44 = vcombine.low %v817_v30, %v825_v31  ;;  %v16043_v45 = vcombine.low %v818_v32, %v826_v33  ;;  %v913_v30 = vld [vmem:[#allocation2 + $0x1a10] sm:$0xff]  ;;  %v914_v32 = vld [vmem:[#allocation2 + $0x1a18] sm:$0xff] }
 0x2f0   :  { %13263 = vmatprep.subr.bf16.mxu0 %v15962_v47  ;;  %13591 = vmatprep.subr.bf16.mxu1 %v15964_v48  ;;  %v16058_v47 = vcombine.high %v833_v40, %v841_v41  ;;  %v16060_v48 = vcombine.high %v834_v42, %v842_v43  ;;  %v921_v31 = vld [vmem:[#allocation2 + $0x1a50] sm:$0xff]  ;;  %v922_v33 = vld [vmem:[#allocation2 + $0x1a58] sm:$0xff] }
 0x2f3   :  { %13264 = vmatpush1.bf16.msra.mxu0 %v15961_v56  ;;  %13592 = vmatpush1.bf16.msra.mxu1 %v15963_v58  ;;  %v16057_v56 = vcombine.low %v833_v40, %v841_v41  ;;  %v16059_v58 = vcombine.low %v834_v42, %v842_v43  ;;  %v929_v40 = vld [vmem:[#allocation2 + $0x1a90] sm:$0xff]  ;;  %v930_v42 = vld [vmem:[#allocation2 + $0x1a98] sm:$0xff] }
 0x2f4   :  { %13265 = vmatprep.subr.bf16.mxu0 %v15978_v60  ;;  %13593 = vmatprep.subr.bf16.mxu1 %v15980_v61  ;;  %v16074_v60 = vcombine.high %v849_v50, %v857_v51  ;;  %v16076_v61 = vcombine.high %v850_v52, %v858_v54  ;;  %v937_v41 = vld [vmem:[#allocation2 + $0x1ad0] sm:$0xff]  ;;  %v938_v43 = vld [vmem:[#allocation2 + $0x1ad8] sm:$0xff] }
 0x2f7   :  { %13266 = vmatpush1.bf16.msra.mxu0 %v15977_v3  ;;  %13594 = vmatpush1.bf16.msra.mxu1 %v15979_v4  ;;  %v16073_v3 = vcombine.low %v849_v50, %v857_v51  ;;  %v16075_v4 = vcombine.low %v850_v52, %v858_v54  ;;  %v945_v50 = vld [vmem:[#allocation2 + $0x1b10] sm:$0xff]  ;;  %v946_v52 = vld [vmem:[#allocation2 + $0x1b18] sm:$0xff] }
 0x2f8   :  { %13267 = vmatprep.subr.bf16.mxu0 %v15994_v5  ;;  %13595 = vmatprep.subr.bf16.mxu1 %v15996_v6  ;;  %v16090_v5 = vcombine.high %v865_v62, %v873_v63  ;;  %v16092_v6 = vcombine.high %v866_v1, %v874_v2  ;;  %v953_v51 = vld [vmem:[#allocation2 + $0x1b50] sm:$0xff]  ;;  %v954_v54 = vld [vmem:[#allocation2 + $0x1b58] sm:$0xff] }
 0x2fb   :  { %13268 = vmatpush1.bf16.msra.mxu0 %v15993_v24  ;;  %13596 = vmatpush1.bf16.msra.mxu1 %v15995_v11  ;;  %v16089_v24 = vcombine.low %v865_v62, %v873_v63  ;;  %v16091_v11 = vcombine.low %v866_v1, %v874_v2  ;;  %v16172_v62 = vcombine.high %v946_v52, %v954_v54  ;;  %v961_v63 = vld [vmem:[#allocation2 + $0x1b90] sm:$0xff] }
 0x2fc   :  { %13269 = vmatprep.subr.bf16.mxu0 %v16010_v13  ;;  %13597 = vmatprep.subr.bf16.mxu1 %v16012_v14  ;;  %v16106_v13 = vcombine.high %v881_v7, %v889_v8  ;;  %v16108_v14 = vcombine.high %v882_v9, %v890_v10  ;;  %v969_v1 = vld [vmem:[#allocation2 + $0x1bd0] sm:$0xff] }
 0x2ff   :  { %13270 = vmatpush1.bf16.msra.mxu0 %v16009_v26  ;;  %13598 = vmatpush1.bf16.msra.mxu1 %v16011_v27  ;;  %v16105_v26 = vcombine.low %v881_v7, %v889_v8  ;;  %v16107_v27 = vcombine.low %v882_v9, %v890_v10  ;;  %v16169_v8 = vcombine.low %v945_v50, %v953_v51 }
 0x300   :  { %13271 = vmatprep.subr.bf16.mxu0 %v16026_v28  ;;  %13599 = vmatprep.subr.bf16.mxu1 %v16028_v29  ;;  %v16122_v28 = vcombine.high %v897_v17, %v905_v18  ;;  %v16124_v29 = vcombine.high %v898_v21, %v906_v23 }
 0x303   :  { %13272 = vmatpush1.bf16.msra.mxu0 %v16025_v34  ;;  %13600 = vmatpush1.bf16.msra.mxu1 %v16027_v35  ;;  %v16121_v34 = vcombine.low %v897_v17, %v905_v18  ;;  %v16123_v35 = vcombine.low %v898_v21, %v906_v23  ;;  %v977_v17 = vld [vmem:[#allocation2 + $0x1c10] sm:$0xff]  ;;  %v978_v21 = vld [vmem:[#allocation2 + $0x1c18] sm:$0xff] }
 0x304   :  { %13273 = vmatprep.subr.bf16.mxu0 %v16042_v37  ;;  %13601 = vmatprep.subr.bf16.mxu1 %v16044_v38  ;;  %v16138_v37 = vcombine.high %v913_v30, %v921_v31  ;;  %v16140_v38 = vcombine.high %v914_v32, %v922_v33  ;;  %v985_v18 = vld [vmem:[#allocation2 + $0x1c50] sm:$0xff]  ;;  %v986_v23 = vld [vmem:[#allocation2 + $0x1c58] sm:$0xff] }
 0x307   :  { %13274 = vmatpush1.bf16.msra.mxu0 %v16041_v44  ;;  %13602 = vmatpush1.bf16.msra.mxu1 %v16043_v45  ;;  %v16137_v44 = vcombine.low %v913_v30, %v921_v31  ;;  %v16139_v45 = vcombine.low %v914_v32, %v922_v33  ;;  %v993_v30 = vld [vmem:[#allocation2 + $0x1c90] sm:$0xff]  ;;  %v994_v32 = vld [vmem:[#allocation2 + $0x1c98] sm:$0xff] }
 0x308   :  { %13275 = vmatprep.subr.bf16.mxu0 %v16058_v47  ;;  %13603 = vmatprep.subr.bf16.mxu1 %v16060_v48  ;;  %v16154_v47 = vcombine.high %v929_v40, %v937_v41  ;;  %v16156_v48 = vcombine.high %v930_v42, %v938_v43  ;;  %v1001_v31 = vld [vmem:[#allocation2 + $0x1cd0] sm:$0xff]  ;;  %v1002_v33 = vld [vmem:[#allocation2 + $0x1cd8] sm:$0xff] }
 0x30b   :  { %13276 = vmatpush1.bf16.msra.mxu0 %v16057_v56  ;;  %13604 = vmatpush1.bf16.msra.mxu1 %v16059_v58  ;;  %v16153_v56 = vcombine.low %v929_v40, %v937_v41  ;;  %v16155_v58 = vcombine.low %v930_v42, %v938_v43  ;;  %v1009_v40 = vld [vmem:[#allocation2 + $0x1d10] sm:$0xff]  ;;  %v1010_v42 = vld [vmem:[#allocation2 + $0x1d18] sm:$0xff] }
 0x30c   :  { %13286 = vmatprep.subr.bf16.mxu0 %v16074_v60  ;;  %13614 = vmatprep.subr.bf16.mxu1 %v16076_v61  ;;  %v16170_v60 = vcombine.high %v945_v50, %v953_v51  ;;  %v1017_v41 = vld [vmem:[#allocation2 + $0x1d50] sm:$0xff]  ;;  %v1018_v43 = vld [vmem:[#allocation2 + $0x1d58] sm:$0xff] }
 0x30d   :  { %v1025_v50 = vld [vmem:[#allocation2 + $0x1d90] sm:$0xff] }
 0x30e   :  { %13278 = vmatmul.mubr.bf16.vlgmr.msra.gmra.mrb[4].mxu0 %v17935_v36  ;;  %13606 = vmatmul.mubr.bf16.vlgmr.msra.gmra.mrb[4].mxu1 %v17935_v36  ;;  %v1033_v51 = vld [vmem:[#allocation2 + $0x1dd0] sm:$0xff] }
 0x30f   :  { %13287 = vmatpush1.bf16.msra.mxu0 %v16073_v3  ;;  %13615 = vmatpush1.bf16.msra.mxu1 %v16075_v4  ;;  %v962_v4 = vld [vmem:[#allocation2 + $0x1b98] sm:$0xff] }
 0x310   :  { %13288 = vmatprep.subr.bf16.mxu0 %v16090_v5  ;;  %13616 = vmatprep.subr.bf16.mxu1 %v16092_v6  ;;  %v970_v5 = vld [vmem:[#allocation2 + $0x1bd8] sm:$0xff] }
 0x311   :  { %13318 = vmatprep.mubr.bf16.mxu0 %v17944_v25  ;;  %13646 = vmatprep.mubr.bf16.mxu1 %v17944_v25 }
 0x313   :  { %13289 = vmatpush1.bf16.msra.mxu0 %v16089_v24  ;;  %13617 = vmatpush1.bf16.msra.mxu1 %v16091_v11  ;;  %v16171_v24 = vcombine.low %v946_v52, %v954_v54  ;;  %v16186_v11 = vcombine.high %v961_v63, %v969_v1  ;;  %v1026_v52 = vld [vmem:[#allocation2 + $0x1d98] sm:$0xff] }
 0x314   :  { %13290 = vmatprep.subr.bf16.mxu0 %v16106_v13  ;;  %13618 = vmatprep.subr.bf16.mxu1 %v16108_v14  ;;  %v16188_v14 = vcombine.high %v962_v4, %v970_v5  ;;  %v1034_v54 = vld [vmem:[#allocation2 + $0x1dd8] sm:$0xff] }
 0x317   :  { %13291 = vmatpush1.bf16.msra.mxu0 %v16105_v26  ;;  %13619 = vmatpush1.bf16.msra.mxu1 %v16107_v27  ;;  %v16185_v26 = vcombine.low %v961_v63, %v969_v1  ;;  %v16187_v27 = vcombine.low %v962_v4, %v970_v5  ;;  %v1041_v63 = vld [vmem:[#allocation2 + $0x1e10] sm:$0xff]  ;;  %v1042_v4 = vld [vmem:[#allocation2 + $0x1e18] sm:$0xff] }
 0x318   :  { %13292 = vmatprep.subr.bf16.mxu0 %v16122_v28  ;;  %13620 = vmatprep.subr.bf16.mxu1 %v16124_v29  ;;  %v16202_v28 = vcombine.high %v977_v17, %v985_v18  ;;  %v16204_v29 = vcombine.high %v978_v21, %v986_v23  ;;  %v1049_v1 = vld [vmem:[#allocation2 + $0x1e50] sm:$0xff]  ;;  %v1050_v5 = vld [vmem:[#allocation2 + $0x1e58] sm:$0xff] }
 0x31b   :  { %13293 = vmatpush1.bf16.msra.mxu0 %v16121_v34  ;;  %13621 = vmatpush1.bf16.msra.mxu1 %v16123_v35  ;;  %v16201_v34 = vcombine.low %v977_v17, %v985_v18  ;;  %v16203_v35 = vcombine.low %v978_v21, %v986_v23  ;;  %v16265_v17 = vcombine.low %v1041_v63, %v1049_v1 }
 0x31c   :  { %13294 = vmatprep.subr.bf16.mxu0 %v16138_v37  ;;  %13622 = vmatprep.subr.bf16.mxu1 %v16140_v38  ;;  %v16218_v37 = vcombine.high %v993_v30, %v1001_v31  ;;  %v16220_v38 = vcombine.high %v994_v32, %v1002_v33  ;;  %v16267_v18 = vcombine.low %v1042_v4, %v1050_v5 }
 0x31f   :  { %13295 = vmatpush1.bf16.msra.mxu0 %v16137_v44  ;;  %13623 = vmatpush1.bf16.msra.mxu1 %v16139_v45  ;;  %v16217_v44 = vcombine.low %v993_v30, %v1001_v31  ;;  %v16219_v45 = vcombine.low %v994_v32, %v1002_v33 }
 0x320   :  { %13296 = vmatprep.subr.bf16.mxu0 %v16154_v47  ;;  %13624 = vmatprep.subr.bf16.mxu1 %v16156_v48  ;;  %v16234_v47 = vcombine.high %v1009_v40, %v1017_v41  ;;  %v16236_v48 = vcombine.high %v1010_v42, %v1018_v43 }
 0x321   :  { %v18038_v61 = vpop.f32.mrb[0].mxu0  ;;  %v18040_v2 = vpop.f32.mrb[0].mxu1 }
 0x322   :  { %v18042_v3 = vpop.f32.mrb[1].mxu0  ;;  %v18044_v6 = vpop.f32.mrb[1].mxu1 }
 0x323   :  { %v12832_v7 = vpop.f32.mrb[2].mxu0  ;;  %13297 = vmatpush1.bf16.msra.mxu0 %v16153_v56  ;;  %v13160_v9 = vpop.f32.mrb[2].mxu1  ;;  %13625 = vmatpush1.bf16.msra.mxu1 %v16155_v58  ;;  %v16233_v56 = vcombine.low %v1009_v40, %v1017_v41  ;;  %v16235_v58 = vcombine.low %v1010_v42, %v1018_v43 }
 0x324   :  { %v12833_v10 = vpop.f32.mrb[3].mxu0  ;;  %13298 = vmatprep.subr.bf16.mxu0 %v16170_v60  ;;  %v13161_v13 = vpop.f32.mrb[3].mxu1  ;;  %13626 = vmatprep.subr.bf16.mxu1 %v16172_v62  ;;  %v16250_v60 = vcombine.high %v1025_v50, %v1033_v51  ;;  %v16252_v62 = vcombine.high %v1026_v52, %v1034_v54  ;;  %v16249_v7 = vcombine.low %v1025_v50, %v1033_v51 }
 0x325   :  { %v16266_v9 = vcombine.high %v1041_v63, %v1049_v1  ;;  %v16268_v10 = vcombine.high %v1042_v4, %v1050_v5  ;;  %v1058_v13 = vld [vmem:[#allocation2 + $0x1e98] sm:$0xff] }
 0x327   :  { %13299 = vmatpush1.bf16.msra.mxu0 %v16169_v8  ;;  %13627 = vmatpush1.bf16.msra.mxu1 %v16171_v24  ;;  %v16251_v8 = vcombine.low %v1026_v52, %v1034_v54  ;;  %v1057_v24 = vld [vmem:[#allocation2 + $0x1e90] sm:$0xff] }
 0x328   :  { %13300 = vmatprep.subr.bf16.mxu0 %v16186_v11  ;;  %13628 = vmatprep.subr.bf16.mxu1 %v16188_v14  ;;  %v1065_v11 = vld [vmem:[#allocation2 + $0x1ed0] sm:$0xff]  ;;  %v1066_v14 = vld [vmem:[#allocation2 + $0x1ed8] sm:$0xff] }
 0x329   :  { %v16282_v21 = vcombine.high %v1057_v24, %v1065_v11  ;;  %v16284_v23 = vcombine.high %v1058_v13, %v1066_v14  ;;  %v16281_v30 = vcombine.low %v1057_v24, %v1065_v11  ;;  %v16283_v31 = vcombine.low %v1058_v13, %v1066_v14 }
 0x32b   :  { %13301 = vmatpush1.bf16.msra.mxu0 %v16185_v26  ;;  %13629 = vmatpush1.bf16.msra.mxu1 %v16187_v27  ;;  %v1073_v26 = vld [vmem:[#allocation2 + $0x1f10] sm:$0xff] }
 0x32c   :  { %13302 = vmatprep.subr.bf16.mxu0 %v16202_v28  ;;  %13630 = vmatprep.subr.bf16.mxu1 %v16204_v29  ;;  %v1081_v27 = vld [vmem:[#allocation2 + $0x1f50] sm:$0xff]  ;;  %v1074_v28 = vld [vmem:[#allocation2 + $0x1f18] sm:$0xff] }
 0x32d   :  { %v1082_v29 = vld [vmem:[#allocation2 + $0x1f58] sm:$0xff]  ;;  %v16298_v32 = vcombine.high %v1073_v26, %v1081_v27  ;;  %v16297_v40 = vcombine.low %v1073_v26, %v1081_v27 }
 0x32e   :  { %v16300_v33 = vcombine.high %v1074_v28, %v1082_v29  ;;  %v16299_v41 = vcombine.low %v1074_v28, %v1082_v29 }
 0x32f   :  { %13303 = vmatpush1.bf16.msra.mxu0 %v16201_v34  ;;  %13631 = vmatpush1.bf16.msra.mxu1 %v16203_v35  ;;  %v1089_v34 = vld [vmem:[#allocation2 + $0x1f90] sm:$0xff] }
 0x330   :  { %13304 = vmatprep.subr.bf16.mxu0 %v16218_v37  ;;  %13632 = vmatprep.subr.bf16.mxu1 %v16220_v38  ;;  %v1097_v35 = vld [vmem:[#allocation2 + $0x1fd0] sm:$0xff]  ;;  %v1090_v37 = vld [vmem:[#allocation2 + $0x1f98] sm:$0xff] }
 0x331   :  { %v1098_v38 = vld [vmem:[#allocation2 + $0x1fd8] sm:$0xff]  ;;  %v16314_v42 = vcombine.high %v1089_v34, %v1097_v35  ;;  %v16313_v50 = vcombine.low %v1089_v34, %v1097_v35 }
 0x332   :  { %v16316_v43 = vcombine.high %v1090_v37, %v1098_v38  ;;  %v16315_v51 = vcombine.low %v1090_v37, %v1098_v38 }
 0x333   :  { %13305 = vmatpush1.bf16.msra.mxu0 %v16217_v44  ;;  %13633 = vmatpush1.bf16.msra.mxu1 %v16219_v45  ;;  %v1105_v44 = vld [vmem:[#allocation2 + $0x2010] sm:$0xff] }
 0x334   :  { %13306 = vmatprep.subr.bf16.mxu0 %v16234_v47  ;;  %13634 = vmatprep.subr.bf16.mxu1 %v16236_v48  ;;  %v1113_v45 = vld [vmem:[#allocation2 + $0x2050] sm:$0xff]  ;;  %v1106_v47 = vld [vmem:[#allocation2 + $0x2018] sm:$0xff] }
 0x335   :  { %v1114_v48 = vld [vmem:[#allocation2 + $0x2058] sm:$0xff]  ;;  %v16330_v52 = vcombine.high %v1105_v44, %v1113_v45  ;;  %v16329_v63 = vcombine.low %v1105_v44, %v1113_v45 }
 0x336   :  { %v16332_v54 = vcombine.high %v1106_v47, %v1114_v48  ;;  %v16331_v1 = vcombine.low %v1106_v47, %v1114_v48 }
 0x337   :  { %13307 = vmatpush1.bf16.msra.mxu0 %v16233_v56  ;;  %13635 = vmatpush1.bf16.msra.mxu1 %v16235_v58  ;;  %v1121_v56 = vld [vmem:[#allocation2 + $0x2090] sm:$0xff] }
 0x338   :  { %13308 = vmatprep.subr.bf16.mxu0 %v16250_v60  ;;  %13636 = vmatprep.subr.bf16.mxu1 %v16252_v62  ;;  %v1129_v58 = vld [vmem:[#allocation2 + $0x20d0] sm:$0xff]  ;;  %v1122_v60 = vld [vmem:[#allocation2 + $0x2098] sm:$0xff] }
 0x339   :  { %v1130_v62 = vld [vmem:[#allocation2 + $0x20d8] sm:$0xff]  ;;  %v16346_v4 = vcombine.high %v1121_v56, %v1129_v58  ;;  %v16345_v24 = vcombine.low %v1121_v56, %v1129_v58 }
 0x33a   :  { %v16348_v5 = vcombine.high %v1122_v60, %v1130_v62  ;;  %v16347_v11 = vcombine.low %v1122_v60, %v1130_v62 }
 0x33b   :  { %13309 = vmatpush1.bf16.msra.mxu0 %v16249_v7  ;;  %13637 = vmatpush1.bf16.msra.mxu1 %v16251_v8  ;;  %v1137_v7 = vld [vmem:[#allocation2 + $0x2110] sm:$0xff] }
 0x33c   :  { %13310 = vmatprep.subr.bf16.mxu0 %v16266_v9  ;;  %13638 = vmatprep.subr.bf16.mxu1 %v16268_v10  ;;  %v1145_v8 = vld [vmem:[#allocation2 + $0x2150] sm:$0xff]  ;;  %v1138_v9 = vld [vmem:[#allocation2 + $0x2118] sm:$0xff] }
 0x33d   :  { %v1146_v10 = vld [vmem:[#allocation2 + $0x2158] sm:$0xff]  ;;  %v16362_v13 = vcombine.high %v1137_v7, %v1145_v8  ;;  %v16361_v26 = vcombine.low %v1137_v7, %v1145_v8 }
 0x33e   :  { %v16364_v14 = vcombine.high %v1138_v9, %v1146_v10  ;;  %v16363_v27 = vcombine.low %v1138_v9, %v1146_v10 }
 0x33f   :  { %13311 = vmatpush1.bf16.msra.mxu0 %v16265_v17  ;;  %13639 = vmatpush1.bf16.msra.mxu1 %v16267_v18  ;;  %v1153_v17 = vld [vmem:[#allocation2 + $0x2190] sm:$0xff] }
 0x340   :  { %13312 = vmatprep.subr.bf16.mxu0 %v16282_v21  ;;  %13640 = vmatprep.subr.bf16.mxu1 %v16284_v23  ;;  %v1161_v18 = vld [vmem:[#allocation2 + $0x21d0] sm:$0xff]  ;;  %v1154_v21 = vld [vmem:[#allocation2 + $0x2198] sm:$0xff] }
 0x341   :  { %v1162_v23 = vld [vmem:[#allocation2 + $0x21d8] sm:$0xff]  ;;  %v16378_v28 = vcombine.high %v1153_v17, %v1161_v18  ;;  %v16377_v34 = vcombine.low %v1153_v17, %v1161_v18 }
 0x342   :  { %v16380_v29 = vcombine.high %v1154_v21, %v1162_v23  ;;  %v16379_v35 = vcombine.low %v1154_v21, %v1162_v23 }
 0x343   :  { %13313 = vmatpush1.bf16.msra.mxu0 %v16281_v30  ;;  %13641 = vmatpush1.bf16.msra.mxu1 %v16283_v31  ;;  %v1169_v30 = vld [vmem:[#allocation2 + $0x2210] sm:$0xff] }
 0x344   :  { %13314 = vmatprep.subr.bf16.mxu0 %v16298_v32  ;;  %13642 = vmatprep.subr.bf16.mxu1 %v16300_v33  ;;  %v1177_v31 = vld [vmem:[#allocation2 + $0x2250] sm:$0xff]  ;;  %v1170_v32 = vld [vmem:[#allocation2 + $0x2218] sm:$0xff] }
 0x345   :  { %v1178_v33 = vld [vmem:[#allocation2 + $0x2258] sm:$0xff]  ;;  %v16394_v37 = vcombine.high %v1169_v30, %v1177_v31  ;;  %v16393_v44 = vcombine.low %v1169_v30, %v1177_v31 }
 0x346   :  { %v16396_v38 = vcombine.high %v1170_v32, %v1178_v33  ;;  %v16395_v45 = vcombine.low %v1170_v32, %v1178_v33 }
 0x347   :  { %13315 = vmatpush1.bf16.msra.mxu0 %v16297_v40  ;;  %13643 = vmatpush1.bf16.msra.mxu1 %v16299_v41  ;;  %v1185_v40 = vld [vmem:[#allocation2 + $0x2290] sm:$0xff] }
 0x348   :  { %13316 = vmatprep.subr.bf16.mxu0 %v16314_v42  ;;  %13644 = vmatprep.subr.bf16.mxu1 %v16316_v43  ;;  %v1193_v41 = vld [vmem:[#allocation2 + $0x22d0] sm:$0xff]  ;;  %v1186_v42 = vld [vmem:[#allocation2 + $0x2298] sm:$0xff] }
 0x349   :  { %v1194_v43 = vld [vmem:[#allocation2 + $0x22d8] sm:$0xff]  ;;  %v16410_v47 = vcombine.high %v1185_v40, %v1193_v41  ;;  %v16409_v56 = vcombine.low %v1185_v40, %v1193_v41 }
 0x34a   :  { %v16412_v48 = vcombine.high %v1186_v42, %v1194_v43  ;;  %v16411_v58 = vcombine.low %v1186_v42, %v1194_v43 }
 0x34b   :  { %13317 = vmatpush1.bf16.msra.mxu0 %v16313_v50  ;;  %13645 = vmatpush1.bf16.msra.mxu1 %v16315_v51  ;;  %v1201_v50 = vld [vmem:[#allocation2 + $0x2310] sm:$0xff] }
 0x34c   :  { %13327 = vmatprep.subr.bf16.mxu0 %v16330_v52  ;;  %13655 = vmatprep.subr.bf16.mxu1 %v16332_v54  ;;  %v1209_v51 = vld [vmem:[#allocation2 + $0x2350] sm:$0xff]  ;;  %v1202_v52 = vld [vmem:[#allocation2 + $0x2318] sm:$0xff] }
 0x34d   :  { %v1210_v54 = vld [vmem:[#allocation2 + $0x2358] sm:$0xff]  ;;  %v16426_v60 = vcombine.high %v1201_v50, %v1209_v51  ;;  %v16425_v7 = vcombine.low %v1201_v50, %v1209_v51 }
 0x34e   :  { %13319 = vmatmul.mubr.bf16.vlgmr.msra.gmra.mrb[4].mxu0 %v17952_v55  ;;  %13647 = vmatmul.mubr.bf16.vlgmr.msra.gmra.mrb[4].mxu1 %v17952_v55  ;;  %v16428_v62 = vcombine.high %v1202_v52, %v1210_v54  ;;  %v16427_v8 = vcombine.low %v1202_v52, %v1210_v54 }
 0x34f   :  { %13328 = vmatpush1.bf16.msra.mxu0 %v16329_v63  ;;  %13656 = vmatpush1.bf16.msra.mxu1 %v16331_v1  ;;  %v1217_v63 = vld [vmem:[#allocation2 + $0x2390] sm:$0xff] }
 0x350   :  { %13329 = vmatprep.subr.bf16.mxu0 %v16346_v4  ;;  %13657 = vmatprep.subr.bf16.mxu1 %v16348_v5  ;;  %v1225_v1 = vld [vmem:[#allocation2 + $0x23d0] sm:$0xff]  ;;  %v1218_v4 = vld [vmem:[#allocation2 + $0x2398] sm:$0xff] }
 0x351   :  { %13359 = vmatprep.mubr.bf16.mxu0 %v17961_v39  ;;  %13687 = vmatprep.mubr.bf16.mxu1 %v17961_v39  ;;  %v1226_v5 = vld [vmem:[#allocation2 + $0x23d8] sm:$0xff]  ;;  %v16442_v9 = vcombine.high %v1217_v63, %v1225_v1  ;;  %v16441_v17 = vcombine.low %v1217_v63, %v1225_v1 }
 0x352   :  { %v16444_v10 = vcombine.high %v1218_v4, %v1226_v5  ;;  %v16443_v18 = vcombine.low %v1218_v4, %v1226_v5 }
 0x353   :  { %13330 = vmatpush1.bf16.msra.mxu0 %v16345_v24  ;;  %13658 = vmatpush1.bf16.msra.mxu1 %v16347_v11  ;;  %v1233_v24 = vld [vmem:[#allocation2 + $0x2410] sm:$0xff] }
 0x354   :  { %13331 = vmatprep.subr.bf16.mxu0 %v16362_v13  ;;  %13659 = vmatprep.subr.bf16.mxu1 %v16364_v14  ;;  %v1241_v11 = vld [vmem:[#allocation2 + $0x2450] sm:$0xff]  ;;  %v1234_v13 = vld [vmem:[#allocation2 + $0x2418] sm:$0xff] }
 0x355   :  { %v1242_v14 = vld [vmem:[#allocation2 + $0x2458] sm:$0xff]  ;;  %v16458_v21 = vcombine.high %v1233_v24, %v1241_v11  ;;  %v16457_v30 = vcombine.low %v1233_v24, %v1241_v11 }
 0x356   :  { %v16460_v23 = vcombine.high %v1234_v13, %v1242_v14  ;;  %v16459_v31 = vcombine.low %v1234_v13, %v1242_v14 }
 0x357   :  { %13332 = vmatpush1.bf16.msra.mxu0 %v16361_v26  ;;  %13660 = vmatpush1.bf16.msra.mxu1 %v16363_v27  ;;  %v1249_v26 = vld [vmem:[#allocation2 + $0x2490] sm:$0xff] }
 0x358   :  { %13333 = vmatprep.subr.bf16.mxu0 %v16378_v28  ;;  %13661 = vmatprep.subr.bf16.mxu1 %v16380_v29  ;;  %v1257_v27 = vld [vmem:[#allocation2 + $0x24d0] sm:$0xff]  ;;  %v1250_v28 = vld [vmem:[#allocation2 + $0x2498] sm:$0xff] }
 0x359   :  { %v1258_v29 = vld [vmem:[#allocation2 + $0x24d8] sm:$0xff]  ;;  %v16474_v32 = vcombine.high %v1249_v26, %v1257_v27  ;;  %v16473_v40 = vcombine.low %v1249_v26, %v1257_v27 }
 0x35a   :  { %v16476_v33 = vcombine.high %v1250_v28, %v1258_v29  ;;  %v16475_v41 = vcombine.low %v1250_v28, %v1258_v29 }
 0x35b   :  { %13334 = vmatpush1.bf16.msra.mxu0 %v16377_v34  ;;  %13662 = vmatpush1.bf16.msra.mxu1 %v16379_v35  ;;  %v1265_v34 = vld [vmem:[#allocation2 + $0x2510] sm:$0xff] }
 0x35c   :  { %13335 = vmatprep.subr.bf16.mxu0 %v16394_v37  ;;  %13663 = vmatprep.subr.bf16.mxu1 %v16396_v38  ;;  %v1273_v35 = vld [vmem:[#allocation2 + $0x2550] sm:$0xff]  ;;  %v1266_v37 = vld [vmem:[#allocation2 + $0x2518] sm:$0xff] }
 0x35d   :  { %v1274_v38 = vld [vmem:[#allocation2 + $0x2558] sm:$0xff]  ;;  %v16490_v42 = vcombine.high %v1265_v34, %v1273_v35  ;;  %v16489_v50 = vcombine.low %v1265_v34, %v1273_v35 }
 0x35e   :  { %v16492_v43 = vcombine.high %v1266_v37, %v1274_v38  ;;  %v16491_v51 = vcombine.low %v1266_v37, %v1274_v38 }
 0x35f   :  { %13336 = vmatpush1.bf16.msra.mxu0 %v16393_v44  ;;  %13664 = vmatpush1.bf16.msra.mxu1 %v16395_v45  ;;  %v1281_v44 = vld [vmem:[#allocation2 + $0x2590] sm:$0xff] }
 0x360   :  { %13337 = vmatprep.subr.bf16.mxu0 %v16410_v47  ;;  %13665 = vmatprep.subr.bf16.mxu1 %v16412_v48  ;;  %v1289_v45 = vld [vmem:[#allocation2 + $0x25d0] sm:$0xff]  ;;  %v1282_v47 = vld [vmem:[#allocation2 + $0x2598] sm:$0xff] }
 0x361   :  { %v1290_v48 = vld [vmem:[#allocation2 + $0x25d8] sm:$0xff]  ;;  %v16506_v52 = vcombine.high %v1281_v44, %v1289_v45  ;;  %v16505_v63 = vcombine.low %v1281_v44, %v1289_v45 }
 0x362   :  { %v16508_v54 = vcombine.high %v1282_v47, %v1290_v48  ;;  %v16507_v1 = vcombine.low %v1282_v47, %v1290_v48 }
 0x363   :  { %13338 = vmatpush1.bf16.msra.mxu0 %v16409_v56  ;;  %13666 = vmatpush1.bf16.msra.mxu1 %v16411_v58  ;;  %v1297_v56 = vld [vmem:[#allocation2 + $0x2610] sm:$0xff] }
 0x364   :  { %13339 = vmatprep.subr.bf16.mxu0 %v16426_v60  ;;  %13667 = vmatprep.subr.bf16.mxu1 %v16428_v62  ;;  %v1305_v58 = vld [vmem:[#allocation2 + $0x2650] sm:$0xff]  ;;  %v1298_v60 = vld [vmem:[#allocation2 + $0x2618] sm:$0xff] }
 0x365   :  { %v1306_v62 = vld [vmem:[#allocation2 + $0x2658] sm:$0xff]  ;;  %v16522_v4 = vcombine.high %v1297_v56, %v1305_v58  ;;  %v16521_v24 = vcombine.low %v1297_v56, %v1305_v58 }
 0x366   :  { %v16524_v5 = vcombine.high %v1298_v60, %v1306_v62  ;;  %v16523_v11 = vcombine.low %v1298_v60, %v1306_v62 }
 0x367   :  { %13340 = vmatpush1.bf16.msra.mxu0 %v16425_v7  ;;  %13668 = vmatpush1.bf16.msra.mxu1 %v16427_v8  ;;  %v1313_v7 = vld [vmem:[#allocation2 + $0x2690] sm:$0xff] }
 0x368   :  { %13341 = vmatprep.subr.bf16.mxu0 %v16442_v9  ;;  %13669 = vmatprep.subr.bf16.mxu1 %v16444_v10  ;;  %v1321_v8 = vld [vmem:[#allocation2 + $0x26d0] sm:$0xff]  ;;  %v1314_v9 = vld [vmem:[#allocation2 + $0x2698] sm:$0xff] }
 0x369   :  { %v1322_v10 = vld [vmem:[#allocation2 + $0x26d8] sm:$0xff]  ;;  %v16538_v13 = vcombine.high %v1313_v7, %v1321_v8  ;;  %v16537_v26 = vcombine.low %v1313_v7, %v1321_v8 }
 0x36a   :  { %v16540_v14 = vcombine.high %v1314_v9, %v1322_v10  ;;  %v16539_v27 = vcombine.low %v1314_v9, %v1322_v10 }
 0x36b   :  { %13342 = vmatpush1.bf16.msra.mxu0 %v16441_v17  ;;  %13670 = vmatpush1.bf16.msra.mxu1 %v16443_v18  ;;  %v1329_v17 = vld [vmem:[#allocation2 + $0x2710] sm:$0xff] }
 0x36c   :  { %13343 = vmatprep.subr.bf16.mxu0 %v16458_v21  ;;  %13671 = vmatprep.subr.bf16.mxu1 %v16460_v23  ;;  %v1337_v18 = vld [vmem:[#allocation2 + $0x2750] sm:$0xff]  ;;  %v1330_v21 = vld [vmem:[#allocation2 + $0x2718] sm:$0xff] }
 0x36d   :  { %v1338_v23 = vld [vmem:[#allocation2 + $0x2758] sm:$0xff]  ;;  %v16554_v28 = vcombine.high %v1329_v17, %v1337_v18  ;;  %v16553_v34 = vcombine.low %v1329_v17, %v1337_v18 }
 0x36e   :  { %v16556_v29 = vcombine.high %v1330_v21, %v1338_v23  ;;  %v16555_v35 = vcombine.low %v1330_v21, %v1338_v23 }
 0x36f   :  { %13344 = vmatpush1.bf16.msra.mxu0 %v16457_v30  ;;  %13672 = vmatpush1.bf16.msra.mxu1 %v16459_v31  ;;  %v1345_v30 = vld [vmem:[#allocation2 + $0x2790] sm:$0xff] }
 0x370   :  { %13345 = vmatprep.subr.bf16.mxu0 %v16474_v32  ;;  %13673 = vmatprep.subr.bf16.mxu1 %v16476_v33  ;;  %v1353_v31 = vld [vmem:[#allocation2 + $0x27d0] sm:$0xff]  ;;  %v1346_v32 = vld [vmem:[#allocation2 + $0x2798] sm:$0xff] }
 0x371   :  { %v1354_v33 = vld [vmem:[#allocation2 + $0x27d8] sm:$0xff]  ;;  %v16570_v37 = vcombine.high %v1345_v30, %v1353_v31  ;;  %v16569_v44 = vcombine.low %v1345_v30, %v1353_v31 }
 0x372   :  { %v16572_v38 = vcombine.high %v1346_v32, %v1354_v33  ;;  %v16571_v45 = vcombine.low %v1346_v32, %v1354_v33 }
 0x373   :  { %13346 = vmatpush1.bf16.msra.mxu0 %v16473_v40  ;;  %13674 = vmatpush1.bf16.msra.mxu1 %v16475_v41  ;;  %v1361_v40 = vld [vmem:[#allocation2 + $0x2810] sm:$0xff] }
 0x374   :  { %13347 = vmatprep.subr.bf16.mxu0 %v16490_v42  ;;  %13675 = vmatprep.subr.bf16.mxu1 %v16492_v43  ;;  %v1369_v41 = vld [vmem:[#allocation2 + $0x2850] sm:$0xff]  ;;  %v1362_v42 = vld [vmem:[#allocation2 + $0x2818] sm:$0xff] }
 0x375   :  { %v1370_v43 = vld [vmem:[#allocation2 + $0x2858] sm:$0xff]  ;;  %v16586_v47 = vcombine.high %v1361_v40, %v1369_v41  ;;  %v16585_v56 = vcombine.low %v1361_v40, %v1369_v41 }
 0x376   :  { %v16588_v48 = vcombine.high %v1362_v42, %v1370_v43  ;;  %v16587_v58 = vcombine.low %v1362_v42, %v1370_v43 }
 0x377   :  { %13348 = vmatpush1.bf16.msra.mxu0 %v16489_v50  ;;  %13676 = vmatpush1.bf16.msra.mxu1 %v16491_v51  ;;  %v1377_v50 = vld [vmem:[#allocation2 + $0x2890] sm:$0xff] }
 0x378   :  { %13349 = vmatprep.subr.bf16.mxu0 %v16506_v52  ;;  %13677 = vmatprep.subr.bf16.mxu1 %v16508_v54  ;;  %v1385_v51 = vld [vmem:[#allocation2 + $0x28d0] sm:$0xff]  ;;  %v1378_v52 = vld [vmem:[#allocation2 + $0x2898] sm:$0xff] }
 0x379   :  { %v1386_v54 = vld [vmem:[#allocation2 + $0x28d8] sm:$0xff]  ;;  %v16602_v60 = vcombine.high %v1377_v50, %v1385_v51  ;;  %v16601_v7 = vcombine.low %v1377_v50, %v1385_v51 }
 0x37a   :  { %v16604_v62 = vcombine.high %v1378_v52, %v1386_v54  ;;  %v16603_v8 = vcombine.low %v1378_v52, %v1386_v54 }
 0x37b   :  { %13350 = vmatpush1.bf16.msra.mxu0 %v16505_v63  ;;  %13678 = vmatpush1.bf16.msra.mxu1 %v16507_v1  ;;  %v1393_v63 = vld [vmem:[#allocation2 + $0x2910] sm:$0xff] }
 0x37c   :  { %13351 = vmatprep.subr.bf16.mxu0 %v16522_v4  ;;  %13679 = vmatprep.subr.bf16.mxu1 %v16524_v5  ;;  %v1401_v1 = vld [vmem:[#allocation2 + $0x2950] sm:$0xff]  ;;  %v1394_v4 = vld [vmem:[#allocation2 + $0x2918] sm:$0xff] }
 0x37d   :  { %v1402_v5 = vld [vmem:[#allocation2 + $0x2958] sm:$0xff]  ;;  %v16618_v9 = vcombine.high %v1393_v63, %v1401_v1  ;;  %v16617_v17 = vcombine.low %v1393_v63, %v1401_v1 }
 0x37e   :  { %v16620_v10 = vcombine.high %v1394_v4, %v1402_v5  ;;  %v16619_v18 = vcombine.low %v1394_v4, %v1402_v5 }
 0x37f   :  { %13352 = vmatpush1.bf16.msra.mxu0 %v16521_v24  ;;  %13680 = vmatpush1.bf16.msra.mxu1 %v16523_v11  ;;  %v1409_v24 = vld [vmem:[#allocation2 + $0x2990] sm:$0xff] }
 0x380   :  { %13353 = vmatprep.subr.bf16.mxu0 %v16538_v13  ;;  %13681 = vmatprep.subr.bf16.mxu1 %v16540_v14  ;;  %v1417_v11 = vld [vmem:[#allocation2 + $0x29d0] sm:$0xff]  ;;  %v1410_v13 = vld [vmem:[#allocation2 + $0x2998] sm:$0xff] }
 0x381   :  { %v1418_v14 = vld [vmem:[#allocation2 + $0x29d8] sm:$0xff]  ;;  %v16634_v21 = vcombine.high %v1409_v24, %v1417_v11  ;;  %v16633_v30 = vcombine.low %v1409_v24, %v1417_v11 }
 0x382   :  { %v16636_v23 = vcombine.high %v1410_v13, %v1418_v14  ;;  %v16635_v31 = vcombine.low %v1410_v13, %v1418_v14 }
 0x383   :  { %13354 = vmatpush1.bf16.msra.mxu0 %v16537_v26  ;;  %13682 = vmatpush1.bf16.msra.mxu1 %v16539_v27  ;;  %v1425_v26 = vld [vmem:[#allocation2 + $0x2a10] sm:$0xff] }
 0x384   :  { %13355 = vmatprep.subr.bf16.mxu0 %v16554_v28  ;;  %13683 = vmatprep.subr.bf16.mxu1 %v16556_v29  ;;  %v1433_v27 = vld [vmem:[#allocation2 + $0x2a50] sm:$0xff]  ;;  %v1426_v28 = vld [vmem:[#allocation2 + $0x2a18] sm:$0xff] }
 0x385   :  { %v1434_v29 = vld [vmem:[#allocation2 + $0x2a58] sm:$0xff]  ;;  %v16650_v32 = vcombine.high %v1425_v26, %v1433_v27  ;;  %v16649_v40 = vcombine.low %v1425_v26, %v1433_v27 }
 0x386   :  { %v16652_v33 = vcombine.high %v1426_v28, %v1434_v29  ;;  %v16651_v41 = vcombine.low %v1426_v28, %v1434_v29 }
 0x387   :  { %13356 = vmatpush1.bf16.msra.mxu0 %v16553_v34  ;;  %13684 = vmatpush1.bf16.msra.mxu1 %v16555_v35  ;;  %v1441_v34 = vld [vmem:[#allocation2 + $0x2a90] sm:$0xff] }
 0x388   :  { %13357 = vmatprep.subr.bf16.mxu0 %v16570_v37  ;;  %13685 = vmatprep.subr.bf16.mxu1 %v16572_v38  ;;  %v1449_v35 = vld [vmem:[#allocation2 + $0x2ad0] sm:$0xff]  ;;  %v1442_v37 = vld [vmem:[#allocation2 + $0x2a98] sm:$0xff] }
 0x389   :  { %v1450_v38 = vld [vmem:[#allocation2 + $0x2ad8] sm:$0xff]  ;;  %v16666_v42 = vcombine.high %v1441_v34, %v1449_v35  ;;  %v16665_v50 = vcombine.low %v1441_v34, %v1449_v35 }
 0x38a   :  { %v16668_v43 = vcombine.high %v1442_v37, %v1450_v38  ;;  %v16667_v51 = vcombine.low %v1442_v37, %v1450_v38 }
 0x38b   :  { %13358 = vmatpush1.bf16.msra.mxu0 %v16569_v44  ;;  %13686 = vmatpush1.bf16.msra.mxu1 %v16571_v45  ;;  %v1457_v44 = vld [vmem:[#allocation2 + $0x2b10] sm:$0xff] }
 0x38c   :  { %13368 = vmatprep.subr.bf16.mxu0 %v16586_v47  ;;  %13696 = vmatprep.subr.bf16.mxu1 %v16588_v48  ;;  %v1465_v45 = vld [vmem:[#allocation2 + $0x2b50] sm:$0xff]  ;;  %v1458_v47 = vld [vmem:[#allocation2 + $0x2b18] sm:$0xff] }
 0x38d   :  { %v1466_v48 = vld [vmem:[#allocation2 + $0x2b58] sm:$0xff]  ;;  %v16682_v52 = vcombine.high %v1457_v44, %v1465_v45  ;;  %v16681_v63 = vcombine.low %v1457_v44, %v1465_v45 }
 0x38e   :  { %13360 = vmatmul.mubr.bf16.vlgmr.msra.gmra.mrb[4].mxu0 %v17969_v16  ;;  %13688 = vmatmul.mubr.bf16.vlgmr.msra.gmra.mrb[4].mxu1 %v17969_v16  ;;  %v16684_v54 = vcombine.high %v1458_v47, %v1466_v48  ;;  %v16683_v1 = vcombine.low %v1458_v47, %v1466_v48 }
 0x38f   :  { %13369 = vmatpush1.bf16.msra.mxu0 %v16585_v56  ;;  %13697 = vmatpush1.bf16.msra.mxu1 %v16587_v58  ;;  %v1473_v56 = vld [vmem:[#allocation2 + $0x2b90] sm:$0xff] }
 0x390   :  { %13370 = vmatprep.subr.bf16.mxu0 %v16602_v60  ;;  %13698 = vmatprep.subr.bf16.mxu1 %v16604_v62  ;;  %v1481_v58 = vld [vmem:[#allocation2 + $0x2bd0] sm:$0xff]  ;;  %v1474_v60 = vld [vmem:[#allocation2 + $0x2b98] sm:$0xff] }
 0x391   :  { %13400 = vmatprep.mubr.bf16.mxu0 %v17978_v59  ;;  %13728 = vmatprep.mubr.bf16.mxu1 %v17978_v59  ;;  %v1482_v62 = vld [vmem:[#allocation2 + $0x2bd8] sm:$0xff]  ;;  %v16698_v4 = vcombine.high %v1473_v56, %v1481_v58  ;;  %v16697_v24 = vcombine.low %v1473_v56, %v1481_v58 }
 0x392   :  { %v16700_v5 = vcombine.high %v1474_v60, %v1482_v62  ;;  %v16699_v11 = vcombine.low %v1474_v60, %v1482_v62 }
 0x393   :  { %13371 = vmatpush1.bf16.msra.mxu0 %v16601_v7  ;;  %13699 = vmatpush1.bf16.msra.mxu1 %v16603_v8  ;;  %v1489_v7 = vld [vmem:[#allocation2 + $0x2c10] sm:$0xff] }
 0x394   :  { %13372 = vmatprep.subr.bf16.mxu0 %v16618_v9  ;;  %13700 = vmatprep.subr.bf16.mxu1 %v16620_v10  ;;  %v1497_v8 = vld [vmem:[#allocation2 + $0x2c50] sm:$0xff]  ;;  %v1490_v9 = vld [vmem:[#allocation2 + $0x2c18] sm:$0xff] }
 0x395   :  { %v1498_v10 = vld [vmem:[#allocation2 + $0x2c58] sm:$0xff]  ;;  %v16714_v13 = vcombine.high %v1489_v7, %v1497_v8  ;;  %v16713_v26 = vcombine.low %v1489_v7, %v1497_v8 }
 0x396   :  { %v16716_v14 = vcombine.high %v1490_v9, %v1498_v10  ;;  %v16715_v27 = vcombine.low %v1490_v9, %v1498_v10 }
 0x397   :  { %13373 = vmatpush1.bf16.msra.mxu0 %v16617_v17  ;;  %13701 = vmatpush1.bf16.msra.mxu1 %v16619_v18  ;;  %v1505_v17 = vld [vmem:[#allocation2 + $0x2c90] sm:$0xff] }
 0x398   :  { %13374 = vmatprep.subr.bf16.mxu0 %v16634_v21  ;;  %13702 = vmatprep.subr.bf16.mxu1 %v16636_v23  ;;  %v1513_v18 = vld [vmem:[#allocation2 + $0x2cd0] sm:$0xff]  ;;  %v1506_v21 = vld [vmem:[#allocation2 + $0x2c98] sm:$0xff] }
 0x399   :  { %v1514_v23 = vld [vmem:[#allocation2 + $0x2cd8] sm:$0xff]  ;;  %v16730_v28 = vcombine.high %v1505_v17, %v1513_v18  ;;  %v16729_v34 = vcombine.low %v1505_v17, %v1513_v18 }
 0x39a   :  { %v16732_v29 = vcombine.high %v1506_v21, %v1514_v23  ;;  %v16731_v35 = vcombine.low %v1506_v21, %v1514_v23 }
 0x39b   :  { %13375 = vmatpush1.bf16.msra.mxu0 %v16633_v30  ;;  %13703 = vmatpush1.bf16.msra.mxu1 %v16635_v31  ;;  %v1521_v30 = vld [vmem:[#allocation2 + $0x2d10] sm:$0xff] }
 0x39c   :  { %13376 = vmatprep.subr.bf16.mxu0 %v16650_v32  ;;  %13704 = vmatprep.subr.bf16.mxu1 %v16652_v33  ;;  %v1529_v31 = vld [vmem:[#allocation2 + $0x2d50] sm:$0xff]  ;;  %v1522_v32 = vld [vmem:[#allocation2 + $0x2d18] sm:$0xff] }
 0x39d   :  { %v1530_v33 = vld [vmem:[#allocation2 + $0x2d58] sm:$0xff]  ;;  %v16746_v37 = vcombine.high %v1521_v30, %v1529_v31  ;;  %v16745_v44 = vcombine.low %v1521_v30, %v1529_v31 }
 0x39e   :  { %v16748_v38 = vcombine.high %v1522_v32, %v1530_v33  ;;  %v16747_v45 = vcombine.low %v1522_v32, %v1530_v33 }
 0x39f   :  { %13377 = vmatpush1.bf16.msra.mxu0 %v16649_v40  ;;  %13705 = vmatpush1.bf16.msra.mxu1 %v16651_v41  ;;  %v1537_v40 = vld [vmem:[#allocation2 + $0x2d90] sm:$0xff] }
 0x3a0   :  { %13378 = vmatprep.subr.bf16.mxu0 %v16666_v42  ;;  %13706 = vmatprep.subr.bf16.mxu1 %v16668_v43  ;;  %v1545_v41 = vld [vmem:[#allocation2 + $0x2dd0] sm:$0xff]  ;;  %v1538_v42 = vld [vmem:[#allocation2 + $0x2d98] sm:$0xff] }
 0x3a1   :  { %v1546_v43 = vld [vmem:[#allocation2 + $0x2dd8] sm:$0xff]  ;;  %v16762_v47 = vcombine.high %v1537_v40, %v1545_v41  ;;  %v16761_v56 = vcombine.low %v1537_v40, %v1545_v41 }
 0x3a2   :  { %v16764_v48 = vcombine.high %v1538_v42, %v1546_v43  ;;  %v16763_v58 = vcombine.low %v1538_v42, %v1546_v43 }
 0x3a3   :  { %13379 = vmatpush1.bf16.msra.mxu0 %v16665_v50  ;;  %13707 = vmatpush1.bf16.msra.mxu1 %v16667_v51  ;;  %v1553_v50 = vld [vmem:[#allocation2 + $0x2e10] sm:$0xff] }
 0x3a4   :  { %13380 = vmatprep.subr.bf16.mxu0 %v16682_v52  ;;  %13708 = vmatprep.subr.bf16.mxu1 %v16684_v54  ;;  %v1561_v51 = vld [vmem:[#allocation2 + $0x2e50] sm:$0xff]  ;;  %v1554_v52 = vld [vmem:[#allocation2 + $0x2e18] sm:$0xff] }
 0x3a5   :  { %v1562_v54 = vld [vmem:[#allocation2 + $0x2e58] sm:$0xff]  ;;  %v16778_v60 = vcombine.high %v1553_v50, %v1561_v51  ;;  %v16777_v7 = vcombine.low %v1553_v50, %v1561_v51 }
 0x3a6   :  { %v16780_v62 = vcombine.high %v1554_v52, %v1562_v54  ;;  %v16779_v8 = vcombine.low %v1554_v52, %v1562_v54 }
 0x3a7   :  { %13381 = vmatpush1.bf16.msra.mxu0 %v16681_v63  ;;  %13709 = vmatpush1.bf16.msra.mxu1 %v16683_v1  ;;  %v1569_v63 = vld [vmem:[#allocation2 + $0x2e90] sm:$0xff] }
 0x3a8   :  { %13382 = vmatprep.subr.bf16.mxu0 %v16698_v4  ;;  %13710 = vmatprep.subr.bf16.mxu1 %v16700_v5  ;;  %v1577_v1 = vld [vmem:[#allocation2 + $0x2ed0] sm:$0xff]  ;;  %v1570_v4 = vld [vmem:[#allocation2 + $0x2e98] sm:$0xff] }
 0x3a9   :  { %v1578_v5 = vld [vmem:[#allocation2 + $0x2ed8] sm:$0xff]  ;;  %v16794_v9 = vcombine.high %v1569_v63, %v1577_v1  ;;  %v16793_v17 = vcombine.low %v1569_v63, %v1577_v1 }
 0x3aa   :  { %v16796_v10 = vcombine.high %v1570_v4, %v1578_v5  ;;  %v16795_v18 = vcombine.low %v1570_v4, %v1578_v5 }
 0x3ab   :  { %13383 = vmatpush1.bf16.msra.mxu0 %v16697_v24  ;;  %13711 = vmatpush1.bf16.msra.mxu1 %v16699_v11  ;;  %v1585_v24 = vld [vmem:[#allocation2 + $0x2f10] sm:$0xff] }
 0x3ac   :  { %13384 = vmatprep.subr.bf16.mxu0 %v16714_v13  ;;  %13712 = vmatprep.subr.bf16.mxu1 %v16716_v14  ;;  %v1593_v11 = vld [vmem:[#allocation2 + $0x2f50] sm:$0xff]  ;;  %v1586_v13 = vld [vmem:[#allocation2 + $0x2f18] sm:$0xff] }
 0x3ad   :  { %v1594_v14 = vld [vmem:[#allocation2 + $0x2f58] sm:$0xff]  ;;  %v16810_v21 = vcombine.high %v1585_v24, %v1593_v11  ;;  %v16809_v30 = vcombine.low %v1585_v24, %v1593_v11 }
 0x3ae   :  { %v16812_v23 = vcombine.high %v1586_v13, %v1594_v14  ;;  %v16811_v31 = vcombine.low %v1586_v13, %v1594_v14 }
 0x3af   :  { %13385 = vmatpush1.bf16.msra.mxu0 %v16713_v26  ;;  %13713 = vmatpush1.bf16.msra.mxu1 %v16715_v27  ;;  %v1601_v26 = vld [vmem:[#allocation2 + $0x2f90] sm:$0xff] }
 0x3b0   :  { %13386 = vmatprep.subr.bf16.mxu0 %v16730_v28  ;;  %13714 = vmatprep.subr.bf16.mxu1 %v16732_v29  ;;  %v1609_v27 = vld [vmem:[#allocation2 + $0x2fd0] sm:$0xff]  ;;  %v1602_v28 = vld [vmem:[#allocation2 + $0x2f98] sm:$0xff] }
 0x3b1   :  { %v1610_v29 = vld [vmem:[#allocation2 + $0x2fd8] sm:$0xff]  ;;  %v16826_v32 = vcombine.high %v1601_v26, %v1609_v27  ;;  %v16825_v40 = vcombine.low %v1601_v26, %v1609_v27 }
 0x3b2   :  { %v16828_v33 = vcombine.high %v1602_v28, %v1610_v29  ;;  %v16827_v41 = vcombine.low %v1602_v28, %v1610_v29 }
 0x3b3   :  { %13387 = vmatpush1.bf16.msra.mxu0 %v16729_v34  ;;  %13715 = vmatpush1.bf16.msra.mxu1 %v16731_v35  ;;  %v1617_v34 = vld [vmem:[#allocation2 + $0x3010] sm:$0xff] }
 0x3b4   :  { %13388 = vmatprep.subr.bf16.mxu0 %v16746_v37  ;;  %13716 = vmatprep.subr.bf16.mxu1 %v16748_v38  ;;  %v1625_v35 = vld [vmem:[#allocation2 + $0x3050] sm:$0xff]  ;;  %v1618_v37 = vld [vmem:[#allocation2 + $0x3018] sm:$0xff] }
 0x3b5   :  { %v1626_v38 = vld [vmem:[#allocation2 + $0x3058] sm:$0xff]  ;;  %v16842_v42 = vcombine.high %v1617_v34, %v1625_v35  ;;  %v16841_v50 = vcombine.low %v1617_v34, %v1625_v35 }
 0x3b6   :  { %v16844_v43 = vcombine.high %v1618_v37, %v1626_v38  ;;  %v16843_v51 = vcombine.low %v1618_v37, %v1626_v38 }
 0x3b7   :  { %13389 = vmatpush1.bf16.msra.mxu0 %v16745_v44  ;;  %13717 = vmatpush1.bf16.msra.mxu1 %v16747_v45  ;;  %v1633_v44 = vld [vmem:[#allocation2 + $0x3090] sm:$0xff] }
 0x3b8   :  { %13390 = vmatprep.subr.bf16.mxu0 %v16762_v47  ;;  %13718 = vmatprep.subr.bf16.mxu1 %v16764_v48  ;;  %v1641_v45 = vld [vmem:[#allocation2 + $0x30d0] sm:$0xff]  ;;  %v1634_v47 = vld [vmem:[#allocation2 + $0x3098] sm:$0xff] }
 0x3b9   :  { %v1642_v48 = vld [vmem:[#allocation2 + $0x30d8] sm:$0xff]  ;;  %v16858_v52 = vcombine.high %v1633_v44, %v1641_v45  ;;  %v16857_v63 = vcombine.low %v1633_v44, %v1641_v45 }
 0x3ba   :  { %v16860_v54 = vcombine.high %v1634_v47, %v1642_v48  ;;  %v16859_v1 = vcombine.low %v1634_v47, %v1642_v48 }
 0x3bb   :  { %13391 = vmatpush1.bf16.msra.mxu0 %v16761_v56  ;;  %13719 = vmatpush1.bf16.msra.mxu1 %v16763_v58  ;;  %v1649_v56 = vld [vmem:[#allocation2 + $0x3110] sm:$0xff] }
 0x3bc   :  { %13392 = vmatprep.subr.bf16.mxu0 %v16778_v60  ;;  %13720 = vmatprep.subr.bf16.mxu1 %v16780_v62  ;;  %v1657_v58 = vld [vmem:[#allocation2 + $0x3150] sm:$0xff]  ;;  %v1650_v60 = vld [vmem:[#allocation2 + $0x3118] sm:$0xff] }
 0x3bd   :  { %v1658_v62 = vld [vmem:[#allocation2 + $0x3158] sm:$0xff]  ;;  %v16874_v4 = vcombine.high %v1649_v56, %v1657_v58  ;;  %v16873_v24 = vcombine.low %v1649_v56, %v1657_v58 }
 0x3be   :  { %v16876_v5 = vcombine.high %v1650_v60, %v1658_v62  ;;  %v16875_v11 = vcombine.low %v1650_v60, %v1658_v62 }
 0x3bf   :  { %13393 = vmatpush1.bf16.msra.mxu0 %v16777_v7  ;;  %13721 = vmatpush1.bf16.msra.mxu1 %v16779_v8  ;;  %v1665_v7 = vld [vmem:[#allocation2 + $0x3190] sm:$0xff] }
 0x3c0   :  { %13394 = vmatprep.subr.bf16.mxu0 %v16794_v9  ;;  %13722 = vmatprep.subr.bf16.mxu1 %v16796_v10  ;;  %v1673_v8 = vld [vmem:[#allocation2 + $0x31d0] sm:$0xff]  ;;  %v1666_v9 = vld [vmem:[#allocation2 + $0x3198] sm:$0xff] }
 0x3c1   :  { %v1674_v10 = vld [vmem:[#allocation2 + $0x31d8] sm:$0xff]  ;;  %v16890_v13 = vcombine.high %v1665_v7, %v1673_v8  ;;  %v16889_v26 = vcombine.low %v1665_v7, %v1673_v8 }
 0x3c2   :  { %v16892_v14 = vcombine.high %v1666_v9, %v1674_v10  ;;  %v16891_v27 = vcombine.low %v1666_v9, %v1674_v10 }
 0x3c3   :  { %13395 = vmatpush1.bf16.msra.mxu0 %v16793_v17  ;;  %13723 = vmatpush1.bf16.msra.mxu1 %v16795_v18  ;;  %v1681_v17 = vld [vmem:[#allocation2 + $0x3210] sm:$0xff] }
 0x3c4   :  { %13396 = vmatprep.subr.bf16.mxu0 %v16810_v21  ;;  %13724 = vmatprep.subr.bf16.mxu1 %v16812_v23  ;;  %v1689_v18 = vld [vmem:[#allocation2 + $0x3250] sm:$0xff]  ;;  %v1682_v21 = vld [vmem:[#allocation2 + $0x3218] sm:$0xff] }
 0x3c5   :  { %v1690_v23 = vld [vmem:[#allocation2 + $0x3258] sm:$0xff]  ;;  %v16906_v28 = vcombine.high %v1681_v17, %v1689_v18  ;;  %v16905_v34 = vcombine.low %v1681_v17, %v1689_v18 }
 0x3c6   :  { %v16908_v29 = vcombine.high %v1682_v21, %v1690_v23  ;;  %v16907_v35 = vcombine.low %v1682_v21, %v1690_v23 }
 0x3c7   :  { %13397 = vmatpush1.bf16.msra.mxu0 %v16809_v30  ;;  %13725 = vmatpush1.bf16.msra.mxu1 %v16811_v31  ;;  %v1697_v30 = vld [vmem:[#allocation2 + $0x3290] sm:$0xff] }
 0x3c8   :  { %13398 = vmatprep.subr.bf16.mxu0 %v16826_v32  ;;  %13726 = vmatprep.subr.bf16.mxu1 %v16828_v33  ;;  %v1705_v31 = vld [vmem:[#allocation2 + $0x32d0] sm:$0xff]  ;;  %v1698_v32 = vld [vmem:[#allocation2 + $0x3298] sm:$0xff] }
 0x3c9   :  { %v1706_v33 = vld [vmem:[#allocation2 + $0x32d8] sm:$0xff]  ;;  %v16922_v37 = vcombine.high %v1697_v30, %v1705_v31  ;;  %v16921_v44 = vcombine.low %v1697_v30, %v1705_v31 }
 0x3ca   :  { %v16924_v38 = vcombine.high %v1698_v32, %v1706_v33  ;;  %v16923_v45 = vcombine.low %v1698_v32, %v1706_v33 }
 0x3cb   :  { %13399 = vmatpush1.bf16.msra.mxu0 %v16825_v40  ;;  %13727 = vmatpush1.bf16.msra.mxu1 %v16827_v41  ;;  %v1713_v40 = vld [vmem:[#allocation2 + $0x3310] sm:$0xff] }
 0x3cc   :  { %13409 = vmatprep.subr.bf16.mxu0 %v16842_v42  ;;  %13737 = vmatprep.subr.bf16.mxu1 %v16844_v43  ;;  %v1721_v41 = vld [vmem:[#allocation2 + $0x3350] sm:$0xff]  ;;  %v1714_v42 = vld [vmem:[#allocation2 + $0x3318] sm:$0xff] }
 0x3cd   :  { %v1722_v43 = vld [vmem:[#allocation2 + $0x3358] sm:$0xff]  ;;  %v16938_v47 = vcombine.high %v1713_v40, %v1721_v41  ;;  %v16937_v56 = vcombine.low %v1713_v40, %v1721_v41 }
 0x3ce   :  { %13401 = vmatmul.mubr.bf16.vlgmr.msra.gmra.mrb[4].mxu0 %v17986_v46  ;;  %13729 = vmatmul.mubr.bf16.vlgmr.msra.gmra.mrb[4].mxu1 %v17986_v46  ;;  %v16940_v48 = vcombine.high %v1714_v42, %v1722_v43  ;;  %v16939_v58 = vcombine.low %v1714_v42, %v1722_v43 }
 0x3cf   :  { %13410 = vmatpush1.bf16.msra.mxu0 %v16841_v50  ;;  %13738 = vmatpush1.bf16.msra.mxu1 %v16843_v51  ;;  %v1729_v50 = vld [vmem:[#allocation2 + $0x3390] sm:$0xff] }
 0x3d0   :  { %13411 = vmatprep.subr.bf16.mxu0 %v16858_v52  ;;  %13739 = vmatprep.subr.bf16.mxu1 %v16860_v54  ;;  %v1737_v51 = vld [vmem:[#allocation2 + $0x33d0] sm:$0xff]  ;;  %v1730_v52 = vld [vmem:[#allocation2 + $0x3398] sm:$0xff] }
 0x3d1   :  { %13441 = vmatprep.mubr.bf16.mxu0 %v17995_v19  ;;  %13769 = vmatprep.mubr.bf16.mxu1 %v17995_v19  ;;  %v1738_v54 = vld [vmem:[#allocation2 + $0x33d8] sm:$0xff]  ;;  %v16954_v60 = vcombine.high %v1729_v50, %v1737_v51  ;;  %v16953_v7 = vcombine.low %v1729_v50, %v1737_v51 }
 0x3d2   :  { %v16956_v62 = vcombine.high %v1730_v52, %v1738_v54  ;;  %v16955_v8 = vcombine.low %v1730_v52, %v1738_v54 }
 0x3d3   :  { %13412 = vmatpush1.bf16.msra.mxu0 %v16857_v63  ;;  %13740 = vmatpush1.bf16.msra.mxu1 %v16859_v1  ;;  %v1745_v63 = vld [vmem:[#allocation2 + $0x3410] sm:$0xff] }
 0x3d4   :  { %13413 = vmatprep.subr.bf16.mxu0 %v16874_v4  ;;  %13741 = vmatprep.subr.bf16.mxu1 %v16876_v5  ;;  %v1753_v1 = vld [vmem:[#allocation2 + $0x3450] sm:$0xff]  ;;  %v1746_v4 = vld [vmem:[#allocation2 + $0x3418] sm:$0xff] }
 0x3d5   :  { %v1754_v5 = vld [vmem:[#allocation2 + $0x3458] sm:$0xff]  ;;  %v16970_v9 = vcombine.high %v1745_v63, %v1753_v1  ;;  %v16969_v17 = vcombine.low %v1745_v63, %v1753_v1 }
 0x3d6   :  { %v16972_v10 = vcombine.high %v1746_v4, %v1754_v5  ;;  %v16971_v18 = vcombine.low %v1746_v4, %v1754_v5 }
 0x3d7   :  { %13414 = vmatpush1.bf16.msra.mxu0 %v16873_v24  ;;  %13742 = vmatpush1.bf16.msra.mxu1 %v16875_v11  ;;  %v1761_v24 = vld [vmem:[#allocation2 + $0x3490] sm:$0xff] }
 0x3d8   :  { %13415 = vmatprep.subr.bf16.mxu0 %v16890_v13  ;;  %13743 = vmatprep.subr.bf16.mxu1 %v16892_v14  ;;  %v1769_v11 = vld [vmem:[#allocation2 + $0x34d0] sm:$0xff]  ;;  %v1762_v13 = vld [vmem:[#allocation2 + $0x3498] sm:$0xff] }
 0x3d9   :  { %v1770_v14 = vld [vmem:[#allocation2 + $0x34d8] sm:$0xff]  ;;  %v16986_v21 = vcombine.high %v1761_v24, %v1769_v11  ;;  %v16985_v30 = vcombine.low %v1761_v24, %v1769_v11 }
 0x3da   :  { %v16988_v23 = vcombine.high %v1762_v13, %v1770_v14  ;;  %v16987_v31 = vcombine.low %v1762_v13, %v1770_v14 }
 0x3db   :  { %13416 = vmatpush1.bf16.msra.mxu0 %v16889_v26  ;;  %13744 = vmatpush1.bf16.msra.mxu1 %v16891_v27  ;;  %v1777_v26 = vld [vmem:[#allocation2 + $0x3510] sm:$0xff] }
 0x3dc   :  { %13417 = vmatprep.subr.bf16.mxu0 %v16906_v28  ;;  %13745 = vmatprep.subr.bf16.mxu1 %v16908_v29  ;;  %v1785_v27 = vld [vmem:[#allocation2 + $0x3550] sm:$0xff]  ;;  %v1778_v28 = vld [vmem:[#allocation2 + $0x3518] sm:$0xff] }
 0x3dd   :  { %v1786_v29 = vld [vmem:[#allocation2 + $0x3558] sm:$0xff]  ;;  %v17002_v32 = vcombine.high %v1777_v26, %v1785_v27  ;;  %v17001_v40 = vcombine.low %v1777_v26, %v1785_v27 }
 0x3de   :  { %v17004_v33 = vcombine.high %v1778_v28, %v1786_v29  ;;  %v17003_v41 = vcombine.low %v1778_v28, %v1786_v29 }
 0x3df   :  { %13418 = vmatpush1.bf16.msra.mxu0 %v16905_v34  ;;  %13746 = vmatpush1.bf16.msra.mxu1 %v16907_v35  ;;  %v1793_v34 = vld [vmem:[#allocation2 + $0x3590] sm:$0xff] }
 0x3e0   :  { %13419 = vmatprep.subr.bf16.mxu0 %v16922_v37  ;;  %13747 = vmatprep.subr.bf16.mxu1 %v16924_v38  ;;  %v1801_v35 = vld [vmem:[#allocation2 + $0x35d0] sm:$0xff]  ;;  %v1794_v37 = vld [vmem:[#allocation2 + $0x3598] sm:$0xff] }
 0x3e1   :  { %v1802_v38 = vld [vmem:[#allocation2 + $0x35d8] sm:$0xff]  ;;  %v17018_v42 = vcombine.high %v1793_v34, %v1801_v35  ;;  %v17017_v50 = vcombine.low %v1793_v34, %v1801_v35 }
 0x3e2   :  { %v17020_v43 = vcombine.high %v1794_v37, %v1802_v38  ;;  %v17019_v51 = vcombine.low %v1794_v37, %v1802_v38 }
 0x3e3   :  { %13420 = vmatpush1.bf16.msra.mxu0 %v16921_v44  ;;  %13748 = vmatpush1.bf16.msra.mxu1 %v16923_v45  ;;  %v1809_v44 = vld [vmem:[#allocation2 + $0x3610] sm:$0xff] }
 0x3e4   :  { %13421 = vmatprep.subr.bf16.mxu0 %v16938_v47  ;;  %13749 = vmatprep.subr.bf16.mxu1 %v16940_v48  ;;  %v1817_v45 = vld [vmem:[#allocation2 + $0x3650] sm:$0xff]  ;;  %v1810_v47 = vld [vmem:[#allocation2 + $0x3618] sm:$0xff] }
 0x3e5   :  { %v1818_v48 = vld [vmem:[#allocation2 + $0x3658] sm:$0xff]  ;;  %v17034_v52 = vcombine.high %v1809_v44, %v1817_v45  ;;  %v17033_v63 = vcombine.low %v1809_v44, %v1817_v45 }
 0x3e6   :  { %v17036_v54 = vcombine.high %v1810_v47, %v1818_v48  ;;  %v17035_v1 = vcombine.low %v1810_v47, %v1818_v48 }
 0x3e7   :  { %13422 = vmatpush1.bf16.msra.mxu0 %v16937_v56  ;;  %13750 = vmatpush1.bf16.msra.mxu1 %v16939_v58  ;;  %v1825_v56 = vld [vmem:[#allocation2 + $0x3690] sm:$0xff] }
 0x3e8   :  { %13423 = vmatprep.subr.bf16.mxu0 %v16954_v60  ;;  %13751 = vmatprep.subr.bf16.mxu1 %v16956_v62  ;;  %v1833_v58 = vld [vmem:[#allocation2 + $0x36d0] sm:$0xff]  ;;  %v1826_v60 = vld [vmem:[#allocation2 + $0x3698] sm:$0xff] }
 0x3e9   :  { %v1834_v62 = vld [vmem:[#allocation2 + $0x36d8] sm:$0xff]  ;;  %v17050_v4 = vcombine.high %v1825_v56, %v1833_v58  ;;  %v17049_v24 = vcombine.low %v1825_v56, %v1833_v58 }
 0x3ea   :  { %v17052_v5 = vcombine.high %v1826_v60, %v1834_v62  ;;  %v17051_v11 = vcombine.low %v1826_v60, %v1834_v62 }
 0x3eb   :  { %13424 = vmatpush1.bf16.msra.mxu0 %v16953_v7  ;;  %13752 = vmatpush1.bf16.msra.mxu1 %v16955_v8  ;;  %v1841_v7 = vld [vmem:[#allocation2 + $0x3710] sm:$0xff] }
 0x3ec   :  { %13425 = vmatprep.subr.bf16.mxu0 %v16970_v9  ;;  %13753 = vmatprep.subr.bf16.mxu1 %v16972_v10  ;;  %v1849_v8 = vld [vmem:[#allocation2 + $0x3750] sm:$0xff]  ;;  %v1842_v9 = vld [vmem:[#allocation2 + $0x3718] sm:$0xff] }
 0x3ed   :  { %v1850_v10 = vld [vmem:[#allocation2 + $0x3758] sm:$0xff]  ;;  %v17066_v13 = vcombine.high %v1841_v7, %v1849_v8  ;;  %v17065_v26 = vcombine.low %v1841_v7, %v1849_v8 }
 0x3ee   :  { %v17068_v14 = vcombine.high %v1842_v9, %v1850_v10  ;;  %v17067_v27 = vcombine.low %v1842_v9, %v1850_v10 }
 0x3ef   :  { %13426 = vmatpush1.bf16.msra.mxu0 %v16969_v17  ;;  %13754 = vmatpush1.bf16.msra.mxu1 %v16971_v18  ;;  %v1857_v17 = vld [vmem:[#allocation2 + $0x3790] sm:$0xff] }
 0x3f0   :  { %13427 = vmatprep.subr.bf16.mxu0 %v16986_v21  ;;  %13755 = vmatprep.subr.bf16.mxu1 %v16988_v23  ;;  %v1865_v18 = vld [vmem:[#allocation2 + $0x37d0] sm:$0xff]  ;;  %v1858_v21 = vld [vmem:[#allocation2 + $0x3798] sm:$0xff] }
 0x3f1   :  { %v1866_v23 = vld [vmem:[#allocation2 + $0x37d8] sm:$0xff]  ;;  %v17082_v28 = vcombine.high %v1857_v17, %v1865_v18  ;;  %v17081_v34 = vcombine.low %v1857_v17, %v1865_v18 }
 0x3f2   :  { %v17084_v29 = vcombine.high %v1858_v21, %v1866_v23  ;;  %v17083_v35 = vcombine.low %v1858_v21, %v1866_v23 }
 0x3f3   :  { %13428 = vmatpush1.bf16.msra.mxu0 %v16985_v30  ;;  %13756 = vmatpush1.bf16.msra.mxu1 %v16987_v31  ;;  %v1873_v30 = vld [vmem:[#allocation2 + $0x3810] sm:$0xff] }
 0x3f4   :  { %13429 = vmatprep.subr.bf16.mxu0 %v17002_v32  ;;  %13757 = vmatprep.subr.bf16.mxu1 %v17004_v33  ;;  %v1881_v31 = vld [vmem:[#allocation2 + $0x3850] sm:$0xff]  ;;  %v1874_v32 = vld [vmem:[#allocation2 + $0x3818] sm:$0xff] }
 0x3f5   :  { %v1882_v33 = vld [vmem:[#allocation2 + $0x3858] sm:$0xff]  ;;  %v17098_v37 = vcombine.high %v1873_v30, %v1881_v31  ;;  %v17097_v44 = vcombine.low %v1873_v30, %v1881_v31 }
 0x3f6   :  { %v17100_v38 = vcombine.high %v1874_v32, %v1882_v33  ;;  %v17099_v45 = vcombine.low %v1874_v32, %v1882_v33 }
 0x3f7   :  { %13430 = vmatpush1.bf16.msra.mxu0 %v17001_v40  ;;  %13758 = vmatpush1.bf16.msra.mxu1 %v17003_v41  ;;  %v1889_v40 = vld [vmem:[#allocation2 + $0x3890] sm:$0xff] }
 0x3f8   :  { %13431 = vmatprep.subr.bf16.mxu0 %v17018_v42  ;;  %13759 = vmatprep.subr.bf16.mxu1 %v17020_v43  ;;  %v1897_v41 = vld [vmem:[#allocation2 + $0x38d0] sm:$0xff]  ;;  %v1890_v42 = vld [vmem:[#allocation2 + $0x3898] sm:$0xff] }
 0x3f9   :  { %v1898_v43 = vld [vmem:[#allocation2 + $0x38d8] sm:$0xff]  ;;  %v17114_v47 = vcombine.high %v1889_v40, %v1897_v41  ;;  %v17113_v56 = vcombine.low %v1889_v40, %v1897_v41 }
 0x3fa   :  { %v17116_v48 = vcombine.high %v1890_v42, %v1898_v43  ;;  %v17115_v58 = vcombine.low %v1890_v42, %v1898_v43 }
 0x3fb   :  { %13432 = vmatpush1.bf16.msra.mxu0 %v17017_v50  ;;  %13760 = vmatpush1.bf16.msra.mxu1 %v17019_v51  ;;  %v1905_v50 = vld [vmem:[#allocation2 + $0x3910] sm:$0xff] }
 0x3fc   :  { %13433 = vmatprep.subr.bf16.mxu0 %v17034_v52  ;;  %13761 = vmatprep.subr.bf16.mxu1 %v17036_v54  ;;  %v1913_v51 = vld [vmem:[#allocation2 + $0x3950] sm:$0xff]  ;;  %v1906_v52 = vld [vmem:[#allocation2 + $0x3918] sm:$0xff] }
 0x3fd   :  { %v1914_v54 = vld [vmem:[#allocation2 + $0x3958] sm:$0xff]  ;;  %v17130_v60 = vcombine.high %v1905_v50, %v1913_v51  ;;  %v17129_v7 = vcombine.low %v1905_v50, %v1913_v51 }
 0x3fe   :  { %v17132_v62 = vcombine.high %v1906_v52, %v1914_v54  ;;  %v17131_v8 = vcombine.low %v1906_v52, %v1914_v54 }
 0x3ff   :  { %13434 = vmatpush1.bf16.msra.mxu0 %v17033_v63  ;;  %13762 = vmatpush1.bf16.msra.mxu1 %v17035_v1  ;;  %v1921_v63 = vld [vmem:[#allocation2 + $0x3990] sm:$0xff] }
 0x400   :  { %13435 = vmatprep.subr.bf16.mxu0 %v17050_v4  ;;  %13763 = vmatprep.subr.bf16.mxu1 %v17052_v5  ;;  %v1929_v1 = vld [vmem:[#allocation2 + $0x39d0] sm:$0xff]  ;;  %v1922_v4 = vld [vmem:[#allocation2 + $0x3998] sm:$0xff] }
 0x401   :  { %v1930_v5 = vld [vmem:[#allocation2 + $0x39d8] sm:$0xff]  ;;  %v17146_v9 = vcombine.high %v1921_v63, %v1929_v1  ;;  %v17145_v17 = vcombine.low %v1921_v63, %v1929_v1 }
 0x402   :  { %v17148_v10 = vcombine.high %v1922_v4, %v1930_v5  ;;  %v17147_v18 = vcombine.low %v1922_v4, %v1930_v5 }
 0x403   :  { %13436 = vmatpush1.bf16.msra.mxu0 %v17049_v24  ;;  %13764 = vmatpush1.bf16.msra.mxu1 %v17051_v11  ;;  %v1937_v24 = vld [vmem:[#allocation2 + $0x3a10] sm:$0xff] }
 0x404   :  { %13437 = vmatprep.subr.bf16.mxu0 %v17066_v13  ;;  %13765 = vmatprep.subr.bf16.mxu1 %v17068_v14  ;;  %v1945_v11 = vld [vmem:[#allocation2 + $0x3a50] sm:$0xff]  ;;  %v1938_v13 = vld [vmem:[#allocation2 + $0x3a18] sm:$0xff] }
 0x405   :  { %v1946_v14 = vld [vmem:[#allocation2 + $0x3a58] sm:$0xff]  ;;  %v17162_v21 = vcombine.high %v1937_v24, %v1945_v11  ;;  %v17161_v30 = vcombine.low %v1937_v24, %v1945_v11 }
 0x406   :  { %v17164_v23 = vcombine.high %v1938_v13, %v1946_v14  ;;  %v17163_v31 = vcombine.low %v1938_v13, %v1946_v14 }
 0x407   :  { %13438 = vmatpush1.bf16.msra.mxu0 %v17065_v26  ;;  %13766 = vmatpush1.bf16.msra.mxu1 %v17067_v27  ;;  %v1953_v26 = vld [vmem:[#allocation2 + $0x3a90] sm:$0xff] }
 0x408   :  { %13439 = vmatprep.subr.bf16.mxu0 %v17082_v28  ;;  %13767 = vmatprep.subr.bf16.mxu1 %v17084_v29  ;;  %v1961_v27 = vld [vmem:[#allocation2 + $0x3ad0] sm:$0xff]  ;;  %v1954_v28 = vld [vmem:[#allocation2 + $0x3a98] sm:$0xff] }
 0x409   :  { %v1962_v29 = vld [vmem:[#allocation2 + $0x3ad8] sm:$0xff]  ;;  %v17178_v32 = vcombine.high %v1953_v26, %v1961_v27  ;;  %v17177_v40 = vcombine.low %v1953_v26, %v1961_v27 }
 0x40a   :  { %v17180_v33 = vcombine.high %v1954_v28, %v1962_v29  ;;  %v17179_v41 = vcombine.low %v1954_v28, %v1962_v29 }
 0x40b   :  { %13440 = vmatpush1.bf16.msra.mxu0 %v17081_v34  ;;  %13768 = vmatpush1.bf16.msra.mxu1 %v17083_v35  ;;  %v1969_v34 = vld [vmem:[#allocation2 + $0x3b10] sm:$0xff] }
 0x40c   :  { %13450 = vmatprep.subr.bf16.mxu0 %v17098_v37  ;;  %13778 = vmatprep.subr.bf16.mxu1 %v17100_v38  ;;  %v1977_v35 = vld [vmem:[#allocation2 + $0x3b50] sm:$0xff]  ;;  %v1970_v37 = vld [vmem:[#allocation2 + $0x3b18] sm:$0xff] }
 0x40d   :  { %v1978_v38 = vld [vmem:[#allocation2 + $0x3b58] sm:$0xff]  ;;  %v17194_v42 = vcombine.high %v1969_v34, %v1977_v35  ;;  %v17193_v50 = vcombine.low %v1969_v34, %v1977_v35 }
 0x40e   :  { %13442 = vmatmul.mubr.bf16.vlgmr.msra.gmra.mrb[4].mxu0 %v18003_v20  ;;  %13770 = vmatmul.mubr.bf16.vlgmr.msra.gmra.mrb[4].mxu1 %v18003_v20  ;;  %v17196_v43 = vcombine.high %v1970_v37, %v1978_v38  ;;  %v17195_v51 = vcombine.low %v1970_v37, %v1978_v38 }
 0x40f   :  { %13451 = vmatpush1.bf16.msra.mxu0 %v17097_v44  ;;  %13779 = vmatpush1.bf16.msra.mxu1 %v17099_v45  ;;  %v1985_v44 = vld [vmem:[#allocation2 + $0x3b90] sm:$0xff] }
 0x410   :  { %13452 = vmatprep.subr.bf16.mxu0 %v17114_v47  ;;  %13780 = vmatprep.subr.bf16.mxu1 %v17116_v48  ;;  %v1993_v45 = vld [vmem:[#allocation2 + $0x3bd0] sm:$0xff]  ;;  %v1986_v47 = vld [vmem:[#allocation2 + $0x3b98] sm:$0xff] }
 0x411   :  { %13482 = vmatprep.mubr.bf16.mxu0 %v18012_v49  ;;  %13810 = vmatprep.mubr.bf16.mxu1 %v18012_v49  ;;  %v1994_v48 = vld [vmem:[#allocation2 + $0x3bd8] sm:$0xff]  ;;  %v17210_v52 = vcombine.high %v1985_v44, %v1993_v45  ;;  %v17209_v63 = vcombine.low %v1985_v44, %v1993_v45 }
 0x412   :  { %v17212_v54 = vcombine.high %v1986_v47, %v1994_v48  ;;  %v17211_v1 = vcombine.low %v1986_v47, %v1994_v48 }
 0x413   :  { %13453 = vmatpush1.bf16.msra.mxu0 %v17113_v56  ;;  %13781 = vmatpush1.bf16.msra.mxu1 %v17115_v58  ;;  %v2001_v56 = vld [vmem:[#allocation2 + $0x3c10] sm:$0xff] }
 0x414   :  { %13454 = vmatprep.subr.bf16.mxu0 %v17130_v60  ;;  %13782 = vmatprep.subr.bf16.mxu1 %v17132_v62  ;;  %v2009_v58 = vld [vmem:[#allocation2 + $0x3c50] sm:$0xff]  ;;  %v2002_v60 = vld [vmem:[#allocation2 + $0x3c18] sm:$0xff] }
 0x415   :  { %v2010_v62 = vld [vmem:[#allocation2 + $0x3c58] sm:$0xff]  ;;  %v17226_v4 = vcombine.high %v2001_v56, %v2009_v58  ;;  %v17225_v24 = vcombine.low %v2001_v56, %v2009_v58 }
 0x416   :  { %v17228_v5 = vcombine.high %v2002_v60, %v2010_v62  ;;  %v17227_v11 = vcombine.low %v2002_v60, %v2010_v62 }
 0x417   :  { %13455 = vmatpush1.bf16.msra.mxu0 %v17129_v7  ;;  %13783 = vmatpush1.bf16.msra.mxu1 %v17131_v8  ;;  %v2017_v7 = vld [vmem:[#allocation2 + $0x3c90] sm:$0xff] }
 0x418   :  { %13456 = vmatprep.subr.bf16.mxu0 %v17146_v9  ;;  %13784 = vmatprep.subr.bf16.mxu1 %v17148_v10  ;;  %v2025_v8 = vld [vmem:[#allocation2 + $0x3cd0] sm:$0xff]  ;;  %v2018_v9 = vld [vmem:[#allocation2 + $0x3c98] sm:$0xff] }
 0x419   :  { %v2026_v10 = vld [vmem:[#allocation2 + $0x3cd8] sm:$0xff]  ;;  %v17242_v13 = vcombine.high %v2017_v7, %v2025_v8  ;;  %v17241_v26 = vcombine.low %v2017_v7, %v2025_v8 }
 0x41a   :  { %v17244_v14 = vcombine.high %v2018_v9, %v2026_v10  ;;  %v17243_v27 = vcombine.low %v2018_v9, %v2026_v10 }
 0x41b   :  { %13457 = vmatpush1.bf16.msra.mxu0 %v17145_v17  ;;  %13785 = vmatpush1.bf16.msra.mxu1 %v17147_v18  ;;  %v2033_v17 = vld [vmem:[#allocation2 + $0x3d10] sm:$0xff] }
 0x41c   :  { %13458 = vmatprep.subr.bf16.mxu0 %v17162_v21  ;;  %13786 = vmatprep.subr.bf16.mxu1 %v17164_v23  ;;  %v2041_v18 = vld [vmem:[#allocation2 + $0x3d50] sm:$0xff]  ;;  %v2034_v21 = vld [vmem:[#allocation2 + $0x3d18] sm:$0xff] }
 0x41d   :  { %v2042_v23 = vld [vmem:[#allocation2 + $0x3d58] sm:$0xff]  ;;  %v17258_v28 = vcombine.high %v2033_v17, %v2041_v18  ;;  %v17257_v34 = vcombine.low %v2033_v17, %v2041_v18 }
 0x41e   :  { %v17260_v29 = vcombine.high %v2034_v21, %v2042_v23  ;;  %v17259_v35 = vcombine.low %v2034_v21, %v2042_v23 }
 0x41f   :  { %13459 = vmatpush1.bf16.msra.mxu0 %v17161_v30  ;;  %13787 = vmatpush1.bf16.msra.mxu1 %v17163_v31  ;;  %v2049_v30 = vld [vmem:[#allocation2 + $0x3d90] sm:$0xff] }
 0x420   :  { %13460 = vmatprep.subr.bf16.mxu0 %v17178_v32  ;;  %13788 = vmatprep.subr.bf16.mxu1 %v17180_v33  ;;  %v2057_v31 = vld [vmem:[#allocation2 + $0x3dd0] sm:$0xff]  ;;  %v2050_v32 = vld [vmem:[#allocation2 + $0x3d98] sm:$0xff] }
 0x421   :  { %v2058_v33 = vld [vmem:[#allocation2 + $0x3dd8] sm:$0xff]  ;;  %v17274_v37 = vcombine.high %v2049_v30, %v2057_v31  ;;  %v17273_v44 = vcombine.low %v2049_v30, %v2057_v31 }
 0x422   :  { %v17276_v38 = vcombine.high %v2050_v32, %v2058_v33  ;;  %v17275_v45 = vcombine.low %v2050_v32, %v2058_v33 }
 0x423   :  { %13461 = vmatpush1.bf16.msra.mxu0 %v17177_v40  ;;  %13789 = vmatpush1.bf16.msra.mxu1 %v17179_v41  ;;  %v2065_v40 = vld [vmem:[#allocation2 + $0x3e10] sm:$0xff] }
 0x424   :  { %13462 = vmatprep.subr.bf16.mxu0 %v17194_v42  ;;  %13790 = vmatprep.subr.bf16.mxu1 %v17196_v43  ;;  %v2073_v41 = vld [vmem:[#allocation2 + $0x3e50] sm:$0xff]  ;;  %v2066_v42 = vld [vmem:[#allocation2 + $0x3e18] sm:$0xff] }
 0x425   :  { %v2074_v43 = vld [vmem:[#allocation2 + $0x3e58] sm:$0xff]  ;;  %v17290_v47 = vcombine.high %v2065_v40, %v2073_v41  ;;  %v17289_v56 = vcombine.low %v2065_v40, %v2073_v41 }
 0x426   :  { %v17292_v48 = vcombine.high %v2066_v42, %v2074_v43  ;;  %v17291_v58 = vcombine.low %v2066_v42, %v2074_v43 }
 0x427   :  { %13463 = vmatpush1.bf16.msra.mxu0 %v17193_v50  ;;  %13791 = vmatpush1.bf16.msra.mxu1 %v17195_v51  ;;  %v2081_v50 = vld [vmem:[#allocation2 + $0x3e90] sm:$0xff] }
 0x428   :  { %13464 = vmatprep.subr.bf16.mxu0 %v17210_v52  ;;  %13792 = vmatprep.subr.bf16.mxu1 %v17212_v54  ;;  %v2089_v51 = vld [vmem:[#allocation2 + $0x3ed0] sm:$0xff]  ;;  %v2082_v52 = vld [vmem:[#allocation2 + $0x3e98] sm:$0xff] }
 0x429   :  { %v2090_v54 = vld [vmem:[#allocation2 + $0x3ed8] sm:$0xff]  ;;  %v17306_v60 = vcombine.high %v2081_v50, %v2089_v51  ;;  %v17305_v7 = vcombine.low %v2081_v50, %v2089_v51 }
 0x42a   :  { %v17308_v62 = vcombine.high %v2082_v52, %v2090_v54  ;;  %v17307_v8 = vcombine.low %v2082_v52, %v2090_v54 }
 0x42b   :  { %13465 = vmatpush1.bf16.msra.mxu0 %v17209_v63  ;;  %13793 = vmatpush1.bf16.msra.mxu1 %v17211_v1  ;;  %v2097_v63 = vld [vmem:[#allocation2 + $0x3f10] sm:$0xff] }
 0x42c   :  { %13466 = vmatprep.subr.bf16.mxu0 %v17226_v4  ;;  %13794 = vmatprep.subr.bf16.mxu1 %v17228_v5  ;;  %v2105_v1 = vld [vmem:[#allocation2 + $0x3f50] sm:$0xff]  ;;  %v2098_v4 = vld [vmem:[#allocation2 + $0x3f18] sm:$0xff] }
 0x42d   :  { %v2106_v5 = vld [vmem:[#allocation2 + $0x3f58] sm:$0xff]  ;;  %v17322_v9 = vcombine.high %v2097_v63, %v2105_v1  ;;  %v17321_v17 = vcombine.low %v2097_v63, %v2105_v1 }
 0x42e   :  { %v17324_v10 = vcombine.high %v2098_v4, %v2106_v5  ;;  %v17323_v18 = vcombine.low %v2098_v4, %v2106_v5 }
 0x42f   :  { %13467 = vmatpush1.bf16.msra.mxu0 %v17225_v24  ;;  %13795 = vmatpush1.bf16.msra.mxu1 %v17227_v11  ;;  %v2113_v24 = vld [vmem:[#allocation2 + $0x3f90] sm:$0xff] }
 0x430   :  { %13468 = vmatprep.subr.bf16.mxu0 %v17242_v13  ;;  %13796 = vmatprep.subr.bf16.mxu1 %v17244_v14  ;;  %v2121_v11 = vld [vmem:[#allocation2 + $0x3fd0] sm:$0xff]  ;;  %v2114_v13 = vld [vmem:[#allocation2 + $0x3f98] sm:$0xff] }
 0x431   :  { %v2122_v14 = vld [vmem:[#allocation2 + $0x3fd8] sm:$0xff]  ;;  %v17338_v21 = vcombine.high %v2113_v24, %v2121_v11  ;;  %v17337_v30 = vcombine.low %v2113_v24, %v2121_v11 }
 0x432   :  { %v17340_v23 = vcombine.high %v2114_v13, %v2122_v14  ;;  %v17339_v31 = vcombine.low %v2114_v13, %v2122_v14 }
 0x433   :  { %13469 = vmatpush1.bf16.msra.mxu0 %v17241_v26  ;;  %13797 = vmatpush1.bf16.msra.mxu1 %v17243_v27  ;;  %v83_v26 = vld [vmem:[#allocation2 + $0x20] sm:$0xff] }
 0x434   :  { %13470 = vmatprep.subr.bf16.mxu0 %v17258_v28  ;;  %13798 = vmatprep.subr.bf16.mxu1 %v17260_v29  ;;  %v91_v27 = vld [vmem:[#allocation2 + $0x60] sm:$0xff]  ;;  %v84_v28 = vld [vmem:[#allocation2 + $0x28] sm:$0xff] }
 0x435   :  { %v92_v29 = vld [vmem:[#allocation2 + $0x68] sm:$0xff]  ;;  %v15310_v32 = vcombine.high %v83_v26, %v91_v27  ;;  %v15309_v40 = vcombine.low %v83_v26, %v91_v27 }
 0x436   :  { %v15312_v33 = vcombine.high %v84_v28, %v92_v29  ;;  %v15311_v41 = vcombine.low %v84_v28, %v92_v29 }
 0x437   :  { %13471 = vmatpush1.bf16.msra.mxu0 %v17257_v34  ;;  %13799 = vmatpush1.bf16.msra.mxu1 %v17259_v35  ;;  %v99_v34 = vld [vmem:[#allocation2 + $0xa0] sm:$0xff] }
 0x438   :  { %13472 = vmatprep.subr.bf16.mxu0 %v17274_v37  ;;  %13800 = vmatprep.subr.bf16.mxu1 %v17276_v38  ;;  %v107_v35 = vld [vmem:[#allocation2 + $0xe0] sm:$0xff]  ;;  %v100_v37 = vld [vmem:[#allocation2 + $0xa8] sm:$0xff] }
 0x439   :  { %v108_v38 = vld [vmem:[#allocation2 + $0xe8] sm:$0xff]  ;;  %v15326_v42 = vcombine.high %v99_v34, %v107_v35  ;;  %v15325_v50 = vcombine.low %v99_v34, %v107_v35 }
 0x43a   :  { %v15328_v43 = vcombine.high %v100_v37, %v108_v38  ;;  %v15327_v51 = vcombine.low %v100_v37, %v108_v38 }
 0x43b   :  { %13473 = vmatpush1.bf16.msra.mxu0 %v17273_v44  ;;  %13801 = vmatpush1.bf16.msra.mxu1 %v17275_v45  ;;  %v115_v44 = vld [vmem:[#allocation2 + $0x120] sm:$0xff] }
 0x43c   :  { %13474 = vmatprep.subr.bf16.mxu0 %v17290_v47  ;;  %13802 = vmatprep.subr.bf16.mxu1 %v17292_v48  ;;  %v123_v45 = vld [vmem:[#allocation2 + $0x160] sm:$0xff]  ;;  %v116_v47 = vld [vmem:[#allocation2 + $0x128] sm:$0xff] }
 0x43d   :  { %v124_v48 = vld [vmem:[#allocation2 + $0x168] sm:$0xff]  ;;  %v15342_v52 = vcombine.high %v115_v44, %v123_v45  ;;  %v15341_v63 = vcombine.low %v115_v44, %v123_v45 }
 0x43e   :  { %v15344_v54 = vcombine.high %v116_v47, %v124_v48  ;;  %v15343_v1 = vcombine.low %v116_v47, %v124_v48 }
 0x43f   :  { %13475 = vmatpush1.bf16.msra.mxu0 %v17289_v56  ;;  %13803 = vmatpush1.bf16.msra.mxu1 %v17291_v58  ;;  %v131_v56 = vld [vmem:[#allocation2 + $0x1a0] sm:$0xff] }
 0x440   :  { %13476 = vmatprep.subr.bf16.mxu0 %v17306_v60  ;;  %13804 = vmatprep.subr.bf16.mxu1 %v17308_v62  ;;  %v139_v58 = vld [vmem:[#allocation2 + $0x1e0] sm:$0xff]  ;;  %v132_v60 = vld [vmem:[#allocation2 + $0x1a8] sm:$0xff] }
 0x441   :  { %v140_v62 = vld [vmem:[#allocation2 + $0x1e8] sm:$0xff]  ;;  %v15358_v4 = vcombine.high %v131_v56, %v139_v58  ;;  %v15357_v24 = vcombine.low %v131_v56, %v139_v58 }
 0x442   :  { %v15360_v5 = vcombine.high %v132_v60, %v140_v62  ;;  %v15359_v11 = vcombine.low %v132_v60, %v140_v62 }
 0x443   :  { %13477 = vmatpush1.bf16.msra.mxu0 %v17305_v7  ;;  %13805 = vmatpush1.bf16.msra.mxu1 %v17307_v8  ;;  %v147_v7 = vld [vmem:[#allocation2 + $0x220] sm:$0xff] }
 0x444   :  { %13478 = vmatprep.subr.bf16.mxu0 %v17322_v9  ;;  %13806 = vmatprep.subr.bf16.mxu1 %v17324_v10  ;;  %v155_v8 = vld [vmem:[#allocation2 + $0x260] sm:$0xff]  ;;  %v148_v9 = vld [vmem:[#allocation2 + $0x228] sm:$0xff] }
 0x445   :  { %v156_v10 = vld [vmem:[#allocation2 + $0x268] sm:$0xff]  ;;  %v15374_v13 = vcombine.high %v147_v7, %v155_v8  ;;  %v15373_v26 = vcombine.low %v147_v7, %v155_v8 }
 0x446   :  { %v15376_v14 = vcombine.high %v148_v9, %v156_v10  ;;  %v15375_v27 = vcombine.low %v148_v9, %v156_v10 }
 0x447   :  { %13479 = vmatpush1.bf16.msra.mxu0 %v17321_v17  ;;  %13807 = vmatpush1.bf16.msra.mxu1 %v17323_v18  ;;  %v163_v17 = vld [vmem:[#allocation2 + $0x2a0] sm:$0xff] }
 0x448   :  { %13480 = vmatprep.subr.bf16.mxu0 %v17338_v21  ;;  %13808 = vmatprep.subr.bf16.mxu1 %v17340_v23  ;;  %v171_v18 = vld [vmem:[#allocation2 + $0x2e0] sm:$0xff]  ;;  %v164_v21 = vld [vmem:[#allocation2 + $0x2a8] sm:$0xff] }
 0x449   :  { %v172_v23 = vld [vmem:[#allocation2 + $0x2e8] sm:$0xff]  ;;  %v15390_v28 = vcombine.high %v163_v17, %v171_v18  ;;  %v15389_v34 = vcombine.low %v163_v17, %v171_v18 }
 0x44a   :  { %v15392_v29 = vcombine.high %v164_v21, %v172_v23  ;;  %v15391_v35 = vcombine.low %v164_v21, %v172_v23 }
 0x44b   :  { %13481 = vmatpush1.bf16.msra.mxu0 %v17337_v30  ;;  %13809 = vmatpush1.bf16.msra.mxu1 %v17339_v31  ;;  %v179_v30 = vld [vmem:[#allocation2 + $0x320] sm:$0xff] }
 0x44c   :  { %13819 = vmatprep.subr.bf16.mxu0 %v15310_v32  ;;  %14147 = vmatprep.subr.bf16.mxu1 %v15312_v33  ;;  %v187_v31 = vld [vmem:[#allocation2 + $0x360] sm:$0xff]  ;;  %v180_v32 = vld [vmem:[#allocation2 + $0x328] sm:$0xff] }
 0x44d   :  { %v188_v33 = vld [vmem:[#allocation2 + $0x368] sm:$0xff]  ;;  %v15406_v37 = vcombine.high %v179_v30, %v187_v31  ;;  %v15405_v44 = vcombine.low %v179_v30, %v187_v31 }
 0x44e   :  { %13483 = vmatmul.mubr.bf16.vlgmr.msra.gmra.mrb[4].mxu0 %v18020_v0  ;;  %13811 = vmatmul.mubr.bf16.vlgmr.msra.gmra.mrb[4].mxu1 %v18020_v0  ;;  %v15408_v38 = vcombine.high %v180_v32, %v188_v33  ;;  %v15407_v45 = vcombine.low %v180_v32, %v188_v33 }
 0x44f   :  { %13820 = vmatpush1.bf16.msra.mxu0 %v15309_v40  ;;  %14148 = vmatpush1.bf16.msra.mxu1 %v15311_v41  ;;  %v195_v40 = vld [vmem:[#allocation2 + $0x3a0] sm:$0xff] }
 0x450   :  { %13821 = vmatprep.subr.bf16.mxu0 %v15326_v42  ;;  %14149 = vmatprep.subr.bf16.mxu1 %v15328_v43  ;;  %v203_v41 = vld [vmem:[#allocation2 + $0x3e0] sm:$0xff]  ;;  %v196_v42 = vld [vmem:[#allocation2 + $0x3a8] sm:$0xff] }
 0x451   :  { %13851 = vmatprep.mubr.bf16.mxu0 %v17895_v57  ;;  %14179 = vmatprep.mubr.bf16.mxu1 %v17895_v57  ;;  %v204_v43 = vld [vmem:[#allocation2 + $0x3e8] sm:$0xff]  ;;  %v15422_v47 = vcombine.high %v195_v40, %v203_v41  ;;  %v15421_v56 = vcombine.low %v195_v40, %v203_v41 }
 0x452   :  { %v15424_v48 = vcombine.high %v196_v42, %v204_v43  ;;  %v15423_v58 = vcombine.low %v196_v42, %v204_v43 }
 0x453   :  { %13822 = vmatpush1.bf16.msra.mxu0 %v15325_v50  ;;  %14150 = vmatpush1.bf16.msra.mxu1 %v15327_v51  ;;  %v211_v50 = vld [vmem:[#allocation2 + $0x420] sm:$0xff] }
 0x454   :  { %13823 = vmatprep.subr.bf16.mxu0 %v15342_v52  ;;  %14151 = vmatprep.subr.bf16.mxu1 %v15344_v54  ;;  %v219_v51 = vld [vmem:[#allocation2 + $0x460] sm:$0xff]  ;;  %v212_v52 = vld [vmem:[#allocation2 + $0x428] sm:$0xff] }
 0x455   :  { %v220_v54 = vld [vmem:[#allocation2 + $0x468] sm:$0xff]  ;;  %v15438_v60 = vcombine.high %v211_v50, %v219_v51  ;;  %v15437_v7 = vcombine.low %v211_v50, %v219_v51 }
 0x456   :  { %v15440_v62 = vcombine.high %v212_v52, %v220_v54  ;;  %v15439_v8 = vcombine.low %v212_v52, %v220_v54 }
 0x457   :  { %13824 = vmatpush1.bf16.msra.mxu0 %v15341_v63  ;;  %14152 = vmatpush1.bf16.msra.mxu1 %v15343_v1  ;;  %v227_v63 = vld [vmem:[#allocation2 + $0x4a0] sm:$0xff] }
 0x458   :  { %13825 = vmatprep.subr.bf16.mxu0 %v15358_v4  ;;  %14153 = vmatprep.subr.bf16.mxu1 %v15360_v5  ;;  %v235_v1 = vld [vmem:[#allocation2 + $0x4e0] sm:$0xff]  ;;  %v228_v4 = vld [vmem:[#allocation2 + $0x4a8] sm:$0xff] }
 0x459   :  { %v236_v5 = vld [vmem:[#allocation2 + $0x4e8] sm:$0xff]  ;;  %v15454_v9 = vcombine.high %v227_v63, %v235_v1  ;;  %v15453_v17 = vcombine.low %v227_v63, %v235_v1 }
 0x45a   :  { %v15456_v10 = vcombine.high %v228_v4, %v236_v5  ;;  %v15455_v18 = vcombine.low %v228_v4, %v236_v5 }
 0x45b   :  { %13826 = vmatpush1.bf16.msra.mxu0 %v15357_v24  ;;  %14154 = vmatpush1.bf16.msra.mxu1 %v15359_v11  ;;  %v243_v24 = vld [vmem:[#allocation2 + $0x520] sm:$0xff] }
 0x45c   :  { %13827 = vmatprep.subr.bf16.mxu0 %v15374_v13  ;;  %14155 = vmatprep.subr.bf16.mxu1 %v15376_v14  ;;  %v251_v11 = vld [vmem:[#allocation2 + $0x560] sm:$0xff]  ;;  %v244_v13 = vld [vmem:[#allocation2 + $0x528] sm:$0xff] }
 0x45d   :  { %v252_v14 = vld [vmem:[#allocation2 + $0x568] sm:$0xff]  ;;  %v15470_v21 = vcombine.high %v243_v24, %v251_v11  ;;  %v15469_v30 = vcombine.low %v243_v24, %v251_v11 }
 0x45e   :  { %v15472_v23 = vcombine.high %v244_v13, %v252_v14  ;;  %v15471_v31 = vcombine.low %v244_v13, %v252_v14 }
 0x45f   :  { %13828 = vmatpush1.bf16.msra.mxu0 %v15373_v26  ;;  %14156 = vmatpush1.bf16.msra.mxu1 %v15375_v27  ;;  %v259_v26 = vld [vmem:[#allocation2 + $0x5a0] sm:$0xff] }
 0x460   :  { %13829 = vmatprep.subr.bf16.mxu0 %v15390_v28  ;;  %14157 = vmatprep.subr.bf16.mxu1 %v15392_v29  ;;  %v267_v27 = vld [vmem:[#allocation2 + $0x5e0] sm:$0xff]  ;;  %v260_v28 = vld [vmem:[#allocation2 + $0x5a8] sm:$0xff] }
 0x461   :  { %v268_v29 = vld [vmem:[#allocation2 + $0x5e8] sm:$0xff]  ;;  %v15486_v32 = vcombine.high %v259_v26, %v267_v27  ;;  %v15485_v40 = vcombine.low %v259_v26, %v267_v27 }
 0x462   :  { %v15488_v33 = vcombine.high %v260_v28, %v268_v29  ;;  %v15487_v41 = vcombine.low %v260_v28, %v268_v29 }
 0x463   :  { %13830 = vmatpush1.bf16.msra.mxu0 %v15389_v34  ;;  %14158 = vmatpush1.bf16.msra.mxu1 %v15391_v35  ;;  %v275_v34 = vld [vmem:[#allocation2 + $0x620] sm:$0xff] }
 0x464   :  { %13831 = vmatprep.subr.bf16.mxu0 %v15406_v37  ;;  %14159 = vmatprep.subr.bf16.mxu1 %v15408_v38  ;;  %v283_v35 = vld [vmem:[#allocation2 + $0x660] sm:$0xff]  ;;  %v276_v37 = vld [vmem:[#allocation2 + $0x628] sm:$0xff] }
 0x465   :  { %v284_v38 = vld [vmem:[#allocation2 + $0x668] sm:$0xff]  ;;  %v15502_v42 = vcombine.high %v275_v34, %v283_v35  ;;  %v15501_v50 = vcombine.low %v275_v34, %v283_v35 }
 0x466   :  { %v15504_v43 = vcombine.high %v276_v37, %v284_v38  ;;  %v15503_v51 = vcombine.low %v276_v37, %v284_v38 }
 0x467   :  { %13832 = vmatpush1.bf16.msra.mxu0 %v15405_v44  ;;  %14160 = vmatpush1.bf16.msra.mxu1 %v15407_v45  ;;  %v291_v44 = vld [vmem:[#allocation2 + $0x6a0] sm:$0xff] }
 0x468   :  { %13833 = vmatprep.subr.bf16.mxu0 %v15422_v47  ;;  %14161 = vmatprep.subr.bf16.mxu1 %v15424_v48  ;;  %v299_v45 = vld [vmem:[#allocation2 + $0x6e0] sm:$0xff]  ;;  %v292_v47 = vld [vmem:[#allocation2 + $0x6a8] sm:$0xff] }
 0x469   :  { %v300_v48 = vld [vmem:[#allocation2 + $0x6e8] sm:$0xff]  ;;  %v15518_v52 = vcombine.high %v291_v44, %v299_v45  ;;  %v15517_v63 = vcombine.low %v291_v44, %v299_v45 }
 0x46a   :  { %v15520_v54 = vcombine.high %v292_v47, %v300_v48  ;;  %v15519_v1 = vcombine.low %v292_v47, %v300_v48 }
 0x46b   :  { %13834 = vmatpush1.bf16.msra.mxu0 %v15421_v56  ;;  %14162 = vmatpush1.bf16.msra.mxu1 %v15423_v58  ;;  %v307_v56 = vld [vmem:[#allocation2 + $0x720] sm:$0xff] }
 0x46c   :  { %13835 = vmatprep.subr.bf16.mxu0 %v15438_v60  ;;  %14163 = vmatprep.subr.bf16.mxu1 %v15440_v62  ;;  %v315_v58 = vld [vmem:[#allocation2 + $0x760] sm:$0xff]  ;;  %v308_v60 = vld [vmem:[#allocation2 + $0x728] sm:$0xff] }
 0x46d   :  { %v316_v62 = vld [vmem:[#allocation2 + $0x768] sm:$0xff]  ;;  %v15534_v4 = vcombine.high %v307_v56, %v315_v58  ;;  %v15533_v24 = vcombine.low %v307_v56, %v315_v58 }
 0x46e   :  { %v15536_v5 = vcombine.high %v308_v60, %v316_v62  ;;  %v15535_v11 = vcombine.low %v308_v60, %v316_v62 }
 0x46f   :  { %13836 = vmatpush1.bf16.msra.mxu0 %v15437_v7  ;;  %14164 = vmatpush1.bf16.msra.mxu1 %v15439_v8  ;;  %v323_v7 = vld [vmem:[#allocation2 + $0x7a0] sm:$0xff] }
 0x470   :  { %13837 = vmatprep.subr.bf16.mxu0 %v15454_v9  ;;  %14165 = vmatprep.subr.bf16.mxu1 %v15456_v10  ;;  %v331_v8 = vld [vmem:[#allocation2 + $0x7e0] sm:$0xff]  ;;  %v324_v9 = vld [vmem:[#allocation2 + $0x7a8] sm:$0xff] }
 0x471   :  { %v332_v10 = vld [vmem:[#allocation2 + $0x7e8] sm:$0xff]  ;;  %v15550_v13 = vcombine.high %v323_v7, %v331_v8  ;;  %v15549_v26 = vcombine.low %v323_v7, %v331_v8 }
 0x472   :  { %v15552_v14 = vcombine.high %v324_v9, %v332_v10  ;;  %v15551_v27 = vcombine.low %v324_v9, %v332_v10 }
 0x473   :  { %13838 = vmatpush1.bf16.msra.mxu0 %v15453_v17  ;;  %14166 = vmatpush1.bf16.msra.mxu1 %v15455_v18  ;;  %v339_v17 = vld [vmem:[#allocation2 + $0x820] sm:$0xff] }
 0x474   :  { %13839 = vmatprep.subr.bf16.mxu0 %v15470_v21  ;;  %14167 = vmatprep.subr.bf16.mxu1 %v15472_v23  ;;  %v347_v18 = vld [vmem:[#allocation2 + $0x860] sm:$0xff]  ;;  %v340_v21 = vld [vmem:[#allocation2 + $0x828] sm:$0xff] }
 0x475   :  { %v348_v23 = vld [vmem:[#allocation2 + $0x868] sm:$0xff]  ;;  %v15566_v28 = vcombine.high %v339_v17, %v347_v18  ;;  %v15565_v34 = vcombine.low %v339_v17, %v347_v18 }
 0x476   :  { %v15568_v29 = vcombine.high %v340_v21, %v348_v23  ;;  %v15567_v35 = vcombine.low %v340_v21, %v348_v23 }
 0x477   :  { %13840 = vmatpush1.bf16.msra.mxu0 %v15469_v30  ;;  %14168 = vmatpush1.bf16.msra.mxu1 %v15471_v31  ;;  %v355_v30 = vld [vmem:[#allocation2 + $0x8a0] sm:$0xff] }
 0x478   :  { %13841 = vmatprep.subr.bf16.mxu0 %v15486_v32  ;;  %14169 = vmatprep.subr.bf16.mxu1 %v15488_v33  ;;  %v363_v31 = vld [vmem:[#allocation2 + $0x8e0] sm:$0xff]  ;;  %v356_v32 = vld [vmem:[#allocation2 + $0x8a8] sm:$0xff] }
 0x479   :  { %v364_v33 = vld [vmem:[#allocation2 + $0x8e8] sm:$0xff]  ;;  %v15582_v37 = vcombine.high %v355_v30, %v363_v31  ;;  %v15581_v44 = vcombine.low %v355_v30, %v363_v31 }
 0x47a   :  { %v15584_v38 = vcombine.high %v356_v32, %v364_v33  ;;  %v15583_v45 = vcombine.low %v356_v32, %v364_v33 }
 0x47b   :  { %13842 = vmatpush1.bf16.msra.mxu0 %v15485_v40  ;;  %14170 = vmatpush1.bf16.msra.mxu1 %v15487_v41  ;;  %v371_v40 = vld [vmem:[#allocation2 + $0x920] sm:$0xff] }
 0x47c   :  { %13843 = vmatprep.subr.bf16.mxu0 %v15502_v42  ;;  %14171 = vmatprep.subr.bf16.mxu1 %v15504_v43  ;;  %v379_v41 = vld [vmem:[#allocation2 + $0x960] sm:$0xff]  ;;  %v372_v42 = vld [vmem:[#allocation2 + $0x928] sm:$0xff] }
 0x47d   :  { %v380_v43 = vld [vmem:[#allocation2 + $0x968] sm:$0xff]  ;;  %v15598_v47 = vcombine.high %v371_v40, %v379_v41  ;;  %v15597_v56 = vcombine.low %v371_v40, %v379_v41 }
 0x47e   :  { %v15600_v48 = vcombine.high %v372_v42, %v380_v43  ;;  %v15599_v58 = vcombine.low %v372_v42, %v380_v43 }
 0x47f   :  { %13844 = vmatpush1.bf16.msra.mxu0 %v15501_v50  ;;  %14172 = vmatpush1.bf16.msra.mxu1 %v15503_v51  ;;  %v387_v50 = vld [vmem:[#allocation2 + $0x9a0] sm:$0xff] }
 0x480   :  { %13845 = vmatprep.subr.bf16.mxu0 %v15518_v52  ;;  %14173 = vmatprep.subr.bf16.mxu1 %v15520_v54  ;;  %v395_v51 = vld [vmem:[#allocation2 + $0x9e0] sm:$0xff]  ;;  %v388_v52 = vld [vmem:[#allocation2 + $0x9a8] sm:$0xff] }
 0x481   :  { %v396_v54 = vld [vmem:[#allocation2 + $0x9e8] sm:$0xff]  ;;  %v15614_v60 = vcombine.high %v387_v50, %v395_v51  ;;  %v15613_v7 = vcombine.low %v387_v50, %v395_v51 }
 0x482   :  { %v15616_v62 = vcombine.high %v388_v52, %v396_v54  ;;  %v15615_v8 = vcombine.low %v388_v52, %v396_v54 }
 0x483   :  { %13846 = vmatpush1.bf16.msra.mxu0 %v15517_v63  ;;  %14174 = vmatpush1.bf16.msra.mxu1 %v15519_v1  ;;  %v403_v63 = vld [vmem:[#allocation2 + $0xa20] sm:$0xff] }
 0x484   :  { %13847 = vmatprep.subr.bf16.mxu0 %v15534_v4  ;;  %14175 = vmatprep.subr.bf16.mxu1 %v15536_v5  ;;  %v411_v1 = vld [vmem:[#allocation2 + $0xa60] sm:$0xff]  ;;  %v404_v4 = vld [vmem:[#allocation2 + $0xa28] sm:$0xff] }
 0x485   :  { %v412_v5 = vld [vmem:[#allocation2 + $0xa68] sm:$0xff]  ;;  %v15630_v9 = vcombine.high %v403_v63, %v411_v1  ;;  %v15629_v17 = vcombine.low %v403_v63, %v411_v1 }
 0x486   :  { %v15632_v10 = vcombine.high %v404_v4, %v412_v5  ;;  %v15631_v18 = vcombine.low %v404_v4, %v412_v5 }
 0x487   :  { %13848 = vmatpush1.bf16.msra.mxu0 %v15533_v24  ;;  %14176 = vmatpush1.bf16.msra.mxu1 %v15535_v11  ;;  %v419_v24 = vld [vmem:[#allocation2 + $0xaa0] sm:$0xff] }
 0x488   :  { %13849 = vmatprep.subr.bf16.mxu0 %v15550_v13  ;;  %14177 = vmatprep.subr.bf16.mxu1 %v15552_v14  ;;  %v427_v11 = vld [vmem:[#allocation2 + $0xae0] sm:$0xff]  ;;  %v420_v13 = vld [vmem:[#allocation2 + $0xaa8] sm:$0xff] }
 0x489   :  { %v428_v14 = vld [vmem:[#allocation2 + $0xae8] sm:$0xff]  ;;  %v15646_v21 = vcombine.high %v419_v24, %v427_v11  ;;  %v15645_v30 = vcombine.low %v419_v24, %v427_v11 }
 0x48a   :  { %v15648_v23 = vcombine.high %v420_v13, %v428_v14  ;;  %v15647_v31 = vcombine.low %v420_v13, %v428_v14 }
 0x48b   :  { %13850 = vmatpush1.bf16.msra.mxu0 %v15549_v26  ;;  %14178 = vmatpush1.bf16.msra.mxu1 %v15551_v27  ;;  %v435_v26 = vld [vmem:[#allocation2 + $0xb20] sm:$0xff] }
 0x48c   :  { %13860 = vmatprep.subr.bf16.mxu0 %v15566_v28  ;;  %14188 = vmatprep.subr.bf16.mxu1 %v15568_v29  ;;  %v443_v27 = vld [vmem:[#allocation2 + $0xb60] sm:$0xff]  ;;  %v436_v28 = vld [vmem:[#allocation2 + $0xb28] sm:$0xff] }
 0x48d   :  { %v444_v29 = vld [vmem:[#allocation2 + $0xb68] sm:$0xff]  ;;  %v15662_v32 = vcombine.high %v435_v26, %v443_v27  ;;  %v15661_v40 = vcombine.low %v435_v26, %v443_v27 }
 0x48e   :  { %13852 = vmatmul.mubr.bf16.vlgmr.msra.gmra.mrb[8].mxu0 %v17901_v12  ;;  %14180 = vmatmul.mubr.bf16.vlgmr.msra.gmra.mrb[8].mxu1 %v17901_v12  ;;  %v15664_v33 = vcombine.high %v436_v28, %v444_v29  ;;  %v15663_v41 = vcombine.low %v436_v28, %v444_v29 }
 0x48f   :  { %13861 = vmatpush1.bf16.msra.mxu0 %v15565_v34  ;;  %14189 = vmatpush1.bf16.msra.mxu1 %v15567_v35  ;;  %v451_v34 = vld [vmem:[#allocation2 + $0xba0] sm:$0xff] }
 0x490   :  { %13862 = vmatprep.subr.bf16.mxu0 %v15582_v37  ;;  %14190 = vmatprep.subr.bf16.mxu1 %v15584_v38  ;;  %v459_v35 = vld [vmem:[#allocation2 + $0xbe0] sm:$0xff]  ;;  %v452_v37 = vld [vmem:[#allocation2 + $0xba8] sm:$0xff] }
 0x491   :  { %13892 = vmatprep.mubr.bf16.mxu0 %v17910_v53  ;;  %14220 = vmatprep.mubr.bf16.mxu1 %v17910_v53  ;;  %v460_v38 = vld [vmem:[#allocation2 + $0xbe8] sm:$0xff]  ;;  %v15678_v42 = vcombine.high %v451_v34, %v459_v35  ;;  %v15677_v50 = vcombine.low %v451_v34, %v459_v35 }
 0x492   :  { %v15680_v43 = vcombine.high %v452_v37, %v460_v38  ;;  %v15679_v51 = vcombine.low %v452_v37, %v460_v38 }
 0x493   :  { %13863 = vmatpush1.bf16.msra.mxu0 %v15581_v44  ;;  %14191 = vmatpush1.bf16.msra.mxu1 %v15583_v45  ;;  %v467_v44 = vld [vmem:[#allocation2 + $0xc20] sm:$0xff] }
 0x494   :  { %13864 = vmatprep.subr.bf16.mxu0 %v15598_v47  ;;  %14192 = vmatprep.subr.bf16.mxu1 %v15600_v48  ;;  %v475_v45 = vld [vmem:[#allocation2 + $0xc60] sm:$0xff]  ;;  %v468_v47 = vld [vmem:[#allocation2 + $0xc28] sm:$0xff] }
 0x495   :  { %v476_v48 = vld [vmem:[#allocation2 + $0xc68] sm:$0xff]  ;;  %v15694_v52 = vcombine.high %v467_v44, %v475_v45  ;;  %v15693_v63 = vcombine.low %v467_v44, %v475_v45 }
 0x496   :  { %v15696_v54 = vcombine.high %v468_v47, %v476_v48  ;;  %v15695_v1 = vcombine.low %v468_v47, %v476_v48 }
 0x497   :  { %13865 = vmatpush1.bf16.msra.mxu0 %v15597_v56  ;;  %14193 = vmatpush1.bf16.msra.mxu1 %v15599_v58  ;;  %v483_v56 = vld [vmem:[#allocation2 + $0xca0] sm:$0xff] }
 0x498   :  { %13866 = vmatprep.subr.bf16.mxu0 %v15614_v60  ;;  %14194 = vmatprep.subr.bf16.mxu1 %v15616_v62  ;;  %v491_v58 = vld [vmem:[#allocation2 + $0xce0] sm:$0xff]  ;;  %v484_v60 = vld [vmem:[#allocation2 + $0xca8] sm:$0xff] }
 0x499   :  { %v492_v62 = vld [vmem:[#allocation2 + $0xce8] sm:$0xff]  ;;  %v15710_v4 = vcombine.high %v483_v56, %v491_v58  ;;  %v15709_v24 = vcombine.low %v483_v56, %v491_v58 }
 0x49a   :  { %v15712_v5 = vcombine.high %v484_v60, %v492_v62  ;;  %v15711_v11 = vcombine.low %v484_v60, %v492_v62 }
 0x49b   :  { %13867 = vmatpush1.bf16.msra.mxu0 %v15613_v7  ;;  %14195 = vmatpush1.bf16.msra.mxu1 %v15615_v8  ;;  %v499_v7 = vld [vmem:[#allocation2 + $0xd20] sm:$0xff] }
 0x49c   :  { %13868 = vmatprep.subr.bf16.mxu0 %v15630_v9  ;;  %14196 = vmatprep.subr.bf16.mxu1 %v15632_v10  ;;  %v507_v8 = vld [vmem:[#allocation2 + $0xd60] sm:$0xff]  ;;  %v500_v9 = vld [vmem:[#allocation2 + $0xd28] sm:$0xff] }
 0x49d   :  { %v508_v10 = vld [vmem:[#allocation2 + $0xd68] sm:$0xff]  ;;  %v15726_v13 = vcombine.high %v499_v7, %v507_v8  ;;  %v15725_v26 = vcombine.low %v499_v7, %v507_v8 }
 0x49e   :  { %v15728_v14 = vcombine.high %v500_v9, %v508_v10  ;;  %v15727_v27 = vcombine.low %v500_v9, %v508_v10 }
 0x49f   :  { %13869 = vmatpush1.bf16.msra.mxu0 %v15629_v17  ;;  %14197 = vmatpush1.bf16.msra.mxu1 %v15631_v18  ;;  %v515_v17 = vld [vmem:[#allocation2 + $0xda0] sm:$0xff] }
 0x4a0   :  { %13870 = vmatprep.subr.bf16.mxu0 %v15646_v21  ;;  %14198 = vmatprep.subr.bf16.mxu1 %v15648_v23  ;;  %v523_v18 = vld [vmem:[#allocation2 + $0xde0] sm:$0xff]  ;;  %v516_v21 = vld [vmem:[#allocation2 + $0xda8] sm:$0xff] }
 0x4a1   :  { %v524_v23 = vld [vmem:[#allocation2 + $0xde8] sm:$0xff]  ;;  %v15742_v28 = vcombine.high %v515_v17, %v523_v18  ;;  %v15741_v34 = vcombine.low %v515_v17, %v523_v18 }
 0x4a2   :  { %v15744_v29 = vcombine.high %v516_v21, %v524_v23  ;;  %v15743_v35 = vcombine.low %v516_v21, %v524_v23 }
 0x4a3   :  { %13871 = vmatpush1.bf16.msra.mxu0 %v15645_v30  ;;  %14199 = vmatpush1.bf16.msra.mxu1 %v15647_v31  ;;  %v531_v30 = vld [vmem:[#allocation2 + $0xe20] sm:$0xff] }
 0x4a4   :  { %13872 = vmatprep.subr.bf16.mxu0 %v15662_v32  ;;  %14200 = vmatprep.subr.bf16.mxu1 %v15664_v33  ;;  %v539_v31 = vld [vmem:[#allocation2 + $0xe60] sm:$0xff]  ;;  %v532_v32 = vld [vmem:[#allocation2 + $0xe28] sm:$0xff] }
 0x4a5   :  { %v540_v33 = vld [vmem:[#allocation2 + $0xe68] sm:$0xff]  ;;  %v15758_v37 = vcombine.high %v531_v30, %v539_v31  ;;  %v15757_v44 = vcombine.low %v531_v30, %v539_v31 }
 0x4a6   :  { %v15760_v38 = vcombine.high %v532_v32, %v540_v33  ;;  %v15759_v45 = vcombine.low %v532_v32, %v540_v33 }
 0x4a7   :  { %13873 = vmatpush1.bf16.msra.mxu0 %v15661_v40  ;;  %14201 = vmatpush1.bf16.msra.mxu1 %v15663_v41  ;;  %v547_v40 = vld [vmem:[#allocation2 + $0xea0] sm:$0xff] }
 0x4a8   :  { %13874 = vmatprep.subr.bf16.mxu0 %v15678_v42  ;;  %14202 = vmatprep.subr.bf16.mxu1 %v15680_v43  ;;  %v555_v41 = vld [vmem:[#allocation2 + $0xee0] sm:$0xff]  ;;  %v548_v42 = vld [vmem:[#allocation2 + $0xea8] sm:$0xff] }
 0x4a9   :  { %v556_v43 = vld [vmem:[#allocation2 + $0xee8] sm:$0xff]  ;;  %v15774_v47 = vcombine.high %v547_v40, %v555_v41  ;;  %v15773_v56 = vcombine.low %v547_v40, %v555_v41 }
 0x4aa   :  { %v15776_v48 = vcombine.high %v548_v42, %v556_v43  ;;  %v15775_v58 = vcombine.low %v548_v42, %v556_v43 }
 0x4ab   :  { %13875 = vmatpush1.bf16.msra.mxu0 %v15677_v50  ;;  %14203 = vmatpush1.bf16.msra.mxu1 %v15679_v51  ;;  %v563_v50 = vld [vmem:[#allocation2 + $0xf20] sm:$0xff] }
 0x4ac   :  { %13876 = vmatprep.subr.bf16.mxu0 %v15694_v52  ;;  %14204 = vmatprep.subr.bf16.mxu1 %v15696_v54  ;;  %v571_v51 = vld [vmem:[#allocation2 + $0xf60] sm:$0xff]  ;;  %v564_v52 = vld [vmem:[#allocation2 + $0xf28] sm:$0xff] }
 0x4ad   :  { %v572_v54 = vld [vmem:[#allocation2 + $0xf68] sm:$0xff]  ;;  %v15790_v60 = vcombine.high %v563_v50, %v571_v51  ;;  %v15789_v7 = vcombine.low %v563_v50, %v571_v51 }
 0x4ae   :  { %v15792_v62 = vcombine.high %v564_v52, %v572_v54  ;;  %v15791_v8 = vcombine.low %v564_v52, %v572_v54 }
 0x4af   :  { %13877 = vmatpush1.bf16.msra.mxu0 %v15693_v63  ;;  %14205 = vmatpush1.bf16.msra.mxu1 %v15695_v1  ;;  %v579_v63 = vld [vmem:[#allocation2 + $0xfa0] sm:$0xff] }
 0x4b0   :  { %13878 = vmatprep.subr.bf16.mxu0 %v15710_v4  ;;  %14206 = vmatprep.subr.bf16.mxu1 %v15712_v5  ;;  %v587_v1 = vld [vmem:[#allocation2 + $0xfe0] sm:$0xff]  ;;  %v580_v4 = vld [vmem:[#allocation2 + $0xfa8] sm:$0xff] }
 0x4b1   :  { %v588_v5 = vld [vmem:[#allocation2 + $0xfe8] sm:$0xff]  ;;  %v15806_v9 = vcombine.high %v579_v63, %v587_v1  ;;  %v15805_v17 = vcombine.low %v579_v63, %v587_v1 }
 0x4b2   :  { %v15808_v10 = vcombine.high %v580_v4, %v588_v5  ;;  %v15807_v18 = vcombine.low %v580_v4, %v588_v5 }
 0x4b3   :  { %13879 = vmatpush1.bf16.msra.mxu0 %v15709_v24  ;;  %14207 = vmatpush1.bf16.msra.mxu1 %v15711_v11  ;;  %v595_v24 = vld [vmem:[#allocation2 + $0x1020] sm:$0xff] }
 0x4b4   :  { %13880 = vmatprep.subr.bf16.mxu0 %v15726_v13  ;;  %14208 = vmatprep.subr.bf16.mxu1 %v15728_v14  ;;  %v603_v11 = vld [vmem:[#allocation2 + $0x1060] sm:$0xff]  ;;  %v596_v13 = vld [vmem:[#allocation2 + $0x1028] sm:$0xff] }
 0x4b5   :  { %v604_v14 = vld [vmem:[#allocation2 + $0x1068] sm:$0xff]  ;;  %v15822_v21 = vcombine.high %v595_v24, %v603_v11  ;;  %v15821_v30 = vcombine.low %v595_v24, %v603_v11 }
 0x4b6   :  { %v15824_v23 = vcombine.high %v596_v13, %v604_v14  ;;  %v15823_v31 = vcombine.low %v596_v13, %v604_v14 }
 0x4b7   :  { %13881 = vmatpush1.bf16.msra.mxu0 %v15725_v26  ;;  %14209 = vmatpush1.bf16.msra.mxu1 %v15727_v27  ;;  %v611_v26 = vld [vmem:[#allocation2 + $0x10a0] sm:$0xff] }
 0x4b8   :  { %13882 = vmatprep.subr.bf16.mxu0 %v15742_v28  ;;  %14210 = vmatprep.subr.bf16.mxu1 %v15744_v29  ;;  %v619_v27 = vld [vmem:[#allocation2 + $0x10e0] sm:$0xff]  ;;  %v612_v28 = vld [vmem:[#allocation2 + $0x10a8] sm:$0xff] }
 0x4b9   :  { %v620_v29 = vld [vmem:[#allocation2 + $0x10e8] sm:$0xff]  ;;  %v15838_v32 = vcombine.high %v611_v26, %v619_v27  ;;  %v15837_v40 = vcombine.low %v611_v26, %v619_v27 }
 0x4ba   :  { %v15840_v33 = vcombine.high %v612_v28, %v620_v29  ;;  %v15839_v41 = vcombine.low %v612_v28, %v620_v29 }
 0x4bb   :  { %13883 = vmatpush1.bf16.msra.mxu0 %v15741_v34  ;;  %14211 = vmatpush1.bf16.msra.mxu1 %v15743_v35  ;;  %v627_v34 = vld [vmem:[#allocation2 + $0x1120] sm:$0xff] }
 0x4bc   :  { %13884 = vmatprep.subr.bf16.mxu0 %v15758_v37  ;;  %14212 = vmatprep.subr.bf16.mxu1 %v15760_v38  ;;  %v635_v35 = vld [vmem:[#allocation2 + $0x1160] sm:$0xff]  ;;  %v628_v37 = vld [vmem:[#allocation2 + $0x1128] sm:$0xff] }
 0x4bd   :  { %v636_v38 = vld [vmem:[#allocation2 + $0x1168] sm:$0xff]  ;;  %v15854_v42 = vcombine.high %v627_v34, %v635_v35  ;;  %v15853_v50 = vcombine.low %v627_v34, %v635_v35 }
 0x4be   :  { %v15856_v43 = vcombine.high %v628_v37, %v636_v38  ;;  %v15855_v51 = vcombine.low %v628_v37, %v636_v38 }
 0x4bf   :  { %13885 = vmatpush1.bf16.msra.mxu0 %v15757_v44  ;;  %14213 = vmatpush1.bf16.msra.mxu1 %v15759_v45  ;;  %v643_v44 = vld [vmem:[#allocation2 + $0x11a0] sm:$0xff] }
 0x4c0   :  { %13886 = vmatprep.subr.bf16.mxu0 %v15774_v47  ;;  %14214 = vmatprep.subr.bf16.mxu1 %v15776_v48  ;;  %v651_v45 = vld [vmem:[#allocation2 + $0x11e0] sm:$0xff]  ;;  %v644_v47 = vld [vmem:[#allocation2 + $0x11a8] sm:$0xff] }
 0x4c1   :  { %v652_v48 = vld [vmem:[#allocation2 + $0x11e8] sm:$0xff]  ;;  %v15870_v52 = vcombine.high %v643_v44, %v651_v45  ;;  %v15869_v63 = vcombine.low %v643_v44, %v651_v45 }
 0x4c2   :  { %v15872_v54 = vcombine.high %v644_v47, %v652_v48  ;;  %v15871_v1 = vcombine.low %v644_v47, %v652_v48 }
 0x4c3   :  { %13887 = vmatpush1.bf16.msra.mxu0 %v15773_v56  ;;  %14215 = vmatpush1.bf16.msra.mxu1 %v15775_v58  ;;  %v659_v56 = vld [vmem:[#allocation2 + $0x1220] sm:$0xff] }
 0x4c4   :  { %13888 = vmatprep.subr.bf16.mxu0 %v15790_v60  ;;  %14216 = vmatprep.subr.bf16.mxu1 %v15792_v62  ;;  %v667_v58 = vld [vmem:[#allocation2 + $0x1260] sm:$0xff]  ;;  %v660_v60 = vld [vmem:[#allocation2 + $0x1228] sm:$0xff] }
 0x4c5   :  { %v668_v62 = vld [vmem:[#allocation2 + $0x1268] sm:$0xff]  ;;  %v15886_v4 = vcombine.high %v659_v56, %v667_v58  ;;  %v15885_v24 = vcombine.low %v659_v56, %v667_v58 }
 0x4c6   :  { %v15888_v5 = vcombine.high %v660_v60, %v668_v62  ;;  %v15887_v11 = vcombine.low %v660_v60, %v668_v62 }
 0x4c7   :  { %13889 = vmatpush1.bf16.msra.mxu0 %v15789_v7  ;;  %14217 = vmatpush1.bf16.msra.mxu1 %v15791_v8  ;;  %v675_v7 = vld [vmem:[#allocation2 + $0x12a0] sm:$0xff] }
 0x4c8   :  { %13890 = vmatprep.subr.bf16.mxu0 %v15806_v9  ;;  %14218 = vmatprep.subr.bf16.mxu1 %v15808_v10  ;;  %v683_v8 = vld [vmem:[#allocation2 + $0x12e0] sm:$0xff]  ;;  %v676_v9 = vld [vmem:[#allocation2 + $0x12a8] sm:$0xff] }
 0x4c9   :  { %v684_v10 = vld [vmem:[#allocation2 + $0x12e8] sm:$0xff]  ;;  %v15902_v13 = vcombine.high %v675_v7, %v683_v8  ;;  %v15901_v26 = vcombine.low %v675_v7, %v683_v8 }
 0x4ca   :  { %v15904_v14 = vcombine.high %v676_v9, %v684_v10  ;;  %v15903_v27 = vcombine.low %v676_v9, %v684_v10 }
 0x4cb   :  { %13891 = vmatpush1.bf16.msra.mxu0 %v15805_v17  ;;  %14219 = vmatpush1.bf16.msra.mxu1 %v15807_v18  ;;  %v691_v17 = vld [vmem:[#allocation2 + $0x1320] sm:$0xff] }
 0x4cc   :  { %13901 = vmatprep.subr.bf16.mxu0 %v15822_v21  ;;  %14229 = vmatprep.subr.bf16.mxu1 %v15824_v23  ;;  %v699_v18 = vld [vmem:[#allocation2 + $0x1360] sm:$0xff]  ;;  %v692_v21 = vld [vmem:[#allocation2 + $0x1328] sm:$0xff] }
 0x4cd   :  { %v700_v23 = vld [vmem:[#allocation2 + $0x1368] sm:$0xff]  ;;  %v15918_v28 = vcombine.high %v691_v17, %v699_v18  ;;  %v15917_v34 = vcombine.low %v691_v17, %v699_v18 }
 0x4ce   :  { %13893 = vmatmul.mubr.bf16.vlgmr.msra.gmra.mrb[8].mxu0 %v17918_v22  ;;  %14221 = vmatmul.mubr.bf16.vlgmr.msra.gmra.mrb[8].mxu1 %v17918_v22  ;;  %v15920_v29 = vcombine.high %v692_v21, %v700_v23  ;;  %v15919_v35 = vcombine.low %v692_v21, %v700_v23 }
 0x4cf   :  { %13902 = vmatpush1.bf16.msra.mxu0 %v15821_v30  ;;  %14230 = vmatpush1.bf16.msra.mxu1 %v15823_v31  ;;  %v707_v30 = vld [vmem:[#allocation2 + $0x13a0] sm:$0xff] }
 0x4d0   :  { %13903 = vmatprep.subr.bf16.mxu0 %v15838_v32  ;;  %14231 = vmatprep.subr.bf16.mxu1 %v15840_v33  ;;  %v715_v31 = vld [vmem:[#allocation2 + $0x13e0] sm:$0xff]  ;;  %v708_v32 = vld [vmem:[#allocation2 + $0x13a8] sm:$0xff] }
 0x4d1   :  { %13933 = vmatprep.mubr.bf16.mxu0 %v17927_v15  ;;  %14261 = vmatprep.mubr.bf16.mxu1 %v17927_v15  ;;  %v716_v33 = vld [vmem:[#allocation2 + $0x13e8] sm:$0xff]  ;;  %v15934_v37 = vcombine.high %v707_v30, %v715_v31  ;;  %v15933_v44 = vcombine.low %v707_v30, %v715_v31 }
 0x4d2   :  { %v15936_v38 = vcombine.high %v708_v32, %v716_v33  ;;  %v15935_v45 = vcombine.low %v708_v32, %v716_v33 }
 0x4d3   :  { %13904 = vmatpush1.bf16.msra.mxu0 %v15837_v40  ;;  %14232 = vmatpush1.bf16.msra.mxu1 %v15839_v41  ;;  %v723_v40 = vld [vmem:[#allocation2 + $0x1420] sm:$0xff] }
 0x4d4   :  { %13905 = vmatprep.subr.bf16.mxu0 %v15854_v42  ;;  %14233 = vmatprep.subr.bf16.mxu1 %v15856_v43  ;;  %v731_v41 = vld [vmem:[#allocation2 + $0x1460] sm:$0xff]  ;;  %v724_v42 = vld [vmem:[#allocation2 + $0x1428] sm:$0xff] }
 0x4d5   :  { %v732_v43 = vld [vmem:[#allocation2 + $0x1468] sm:$0xff]  ;;  %v15950_v47 = vcombine.high %v723_v40, %v731_v41  ;;  %v15949_v56 = vcombine.low %v723_v40, %v731_v41 }
 0x4d6   :  { %v15952_v48 = vcombine.high %v724_v42, %v732_v43  ;;  %v15951_v58 = vcombine.low %v724_v42, %v732_v43 }
 0x4d7   :  { %13906 = vmatpush1.bf16.msra.mxu0 %v15853_v50  ;;  %14234 = vmatpush1.bf16.msra.mxu1 %v15855_v51  ;;  %v739_v50 = vld [vmem:[#allocation2 + $0x14a0] sm:$0xff] }
 0x4d8   :  { %13907 = vmatprep.subr.bf16.mxu0 %v15870_v52  ;;  %14235 = vmatprep.subr.bf16.mxu1 %v15872_v54  ;;  %v747_v51 = vld [vmem:[#allocation2 + $0x14e0] sm:$0xff]  ;;  %v740_v52 = vld [vmem:[#allocation2 + $0x14a8] sm:$0xff] }
 0x4d9   :  { %v748_v54 = vld [vmem:[#allocation2 + $0x14e8] sm:$0xff]  ;;  %v15966_v60 = vcombine.high %v739_v50, %v747_v51  ;;  %v15965_v7 = vcombine.low %v739_v50, %v747_v51 }
 0x4da   :  { %v15968_v62 = vcombine.high %v740_v52, %v748_v54  ;;  %v15967_v8 = vcombine.low %v740_v52, %v748_v54 }
 0x4db   :  { %13908 = vmatpush1.bf16.msra.mxu0 %v15869_v63  ;;  %14236 = vmatpush1.bf16.msra.mxu1 %v15871_v1  ;;  %v755_v63 = vld [vmem:[#allocation2 + $0x1520] sm:$0xff] }
 0x4dc   :  { %13909 = vmatprep.subr.bf16.mxu0 %v15886_v4  ;;  %14237 = vmatprep.subr.bf16.mxu1 %v15888_v5  ;;  %v763_v1 = vld [vmem:[#allocation2 + $0x1560] sm:$0xff]  ;;  %v756_v4 = vld [vmem:[#allocation2 + $0x1528] sm:$0xff] }
 0x4dd   :  { %v764_v5 = vld [vmem:[#allocation2 + $0x1568] sm:$0xff]  ;;  %v15982_v9 = vcombine.high %v755_v63, %v763_v1  ;;  %v15981_v17 = vcombine.low %v755_v63, %v763_v1 }
 0x4de   :  { %v15984_v10 = vcombine.high %v756_v4, %v764_v5  ;;  %v15983_v18 = vcombine.low %v756_v4, %v764_v5 }
 0x4df   :  { %13910 = vmatpush1.bf16.msra.mxu0 %v15885_v24  ;;  %14238 = vmatpush1.bf16.msra.mxu1 %v15887_v11  ;;  %v771_v24 = vld [vmem:[#allocation2 + $0x15a0] sm:$0xff] }
 0x4e0   :  { %13911 = vmatprep.subr.bf16.mxu0 %v15902_v13  ;;  %14239 = vmatprep.subr.bf16.mxu1 %v15904_v14  ;;  %v779_v11 = vld [vmem:[#allocation2 + $0x15e0] sm:$0xff]  ;;  %v772_v13 = vld [vmem:[#allocation2 + $0x15a8] sm:$0xff] }
 0x4e1   :  { %v780_v14 = vld [vmem:[#allocation2 + $0x15e8] sm:$0xff]  ;;  %v15998_v21 = vcombine.high %v771_v24, %v779_v11  ;;  %v15997_v30 = vcombine.low %v771_v24, %v779_v11 }
 0x4e2   :  { %v16000_v23 = vcombine.high %v772_v13, %v780_v14  ;;  %v15999_v31 = vcombine.low %v772_v13, %v780_v14 }
 0x4e3   :  { %13912 = vmatpush1.bf16.msra.mxu0 %v15901_v26  ;;  %14240 = vmatpush1.bf16.msra.mxu1 %v15903_v27  ;;  %v787_v26 = vld [vmem:[#allocation2 + $0x1620] sm:$0xff] }
 0x4e4   :  { %13913 = vmatprep.subr.bf16.mxu0 %v15918_v28  ;;  %14241 = vmatprep.subr.bf16.mxu1 %v15920_v29  ;;  %v795_v27 = vld [vmem:[#allocation2 + $0x1660] sm:$0xff]  ;;  %v788_v28 = vld [vmem:[#allocation2 + $0x1628] sm:$0xff] }
 0x4e5   :  { %v796_v29 = vld [vmem:[#allocation2 + $0x1668] sm:$0xff]  ;;  %v16014_v32 = vcombine.high %v787_v26, %v795_v27  ;;  %v16013_v40 = vcombine.low %v787_v26, %v795_v27 }
 0x4e6   :  { %v16016_v33 = vcombine.high %v788_v28, %v796_v29  ;;  %v16015_v41 = vcombine.low %v788_v28, %v796_v29 }
 0x4e7   :  { %13914 = vmatpush1.bf16.msra.mxu0 %v15917_v34  ;;  %14242 = vmatpush1.bf16.msra.mxu1 %v15919_v35  ;;  %v803_v34 = vld [vmem:[#allocation2 + $0x16a0] sm:$0xff] }
 0x4e8   :  { %13915 = vmatprep.subr.bf16.mxu0 %v15934_v37  ;;  %14243 = vmatprep.subr.bf16.mxu1 %v15936_v38  ;;  %v811_v35 = vld [vmem:[#allocation2 + $0x16e0] sm:$0xff]  ;;  %v804_v37 = vld [vmem:[#allocation2 + $0x16a8] sm:$0xff] }
 0x4e9   :  { %v812_v38 = vld [vmem:[#allocation2 + $0x16e8] sm:$0xff]  ;;  %v16030_v42 = vcombine.high %v803_v34, %v811_v35  ;;  %v16029_v50 = vcombine.low %v803_v34, %v811_v35 }
 0x4ea   :  { %v16032_v43 = vcombine.high %v804_v37, %v812_v38  ;;  %v16031_v51 = vcombine.low %v804_v37, %v812_v38 }
 0x4eb   :  { %13916 = vmatpush1.bf16.msra.mxu0 %v15933_v44  ;;  %14244 = vmatpush1.bf16.msra.mxu1 %v15935_v45  ;;  %v819_v44 = vld [vmem:[#allocation2 + $0x1720] sm:$0xff] }
 0x4ec   :  { %13917 = vmatprep.subr.bf16.mxu0 %v15950_v47  ;;  %14245 = vmatprep.subr.bf16.mxu1 %v15952_v48  ;;  %v827_v45 = vld [vmem:[#allocation2 + $0x1760] sm:$0xff]  ;;  %v820_v47 = vld [vmem:[#allocation2 + $0x1728] sm:$0xff] }
 0x4ed   :  { %v828_v48 = vld [vmem:[#allocation2 + $0x1768] sm:$0xff]  ;;  %v16046_v52 = vcombine.high %v819_v44, %v827_v45  ;;  %v16045_v63 = vcombine.low %v819_v44, %v827_v45 }
 0x4ee   :  { %v16048_v54 = vcombine.high %v820_v47, %v828_v48  ;;  %v16047_v1 = vcombine.low %v820_v47, %v828_v48 }
 0x4ef   :  { %13918 = vmatpush1.bf16.msra.mxu0 %v15949_v56  ;;  %14246 = vmatpush1.bf16.msra.mxu1 %v15951_v58  ;;  %v835_v56 = vld [vmem:[#allocation2 + $0x17a0] sm:$0xff] }
 0x4f0   :  { %13919 = vmatprep.subr.bf16.mxu0 %v15966_v60  ;;  %14247 = vmatprep.subr.bf16.mxu1 %v15968_v62  ;;  %v843_v58 = vld [vmem:[#allocation2 + $0x17e0] sm:$0xff]  ;;  %v836_v60 = vld [vmem:[#allocation2 + $0x17a8] sm:$0xff] }
 0x4f1   :  { %v844_v62 = vld [vmem:[#allocation2 + $0x17e8] sm:$0xff]  ;;  %v16062_v4 = vcombine.high %v835_v56, %v843_v58  ;;  %v16061_v24 = vcombine.low %v835_v56, %v843_v58 }
 0x4f2   :  { %v16064_v5 = vcombine.high %v836_v60, %v844_v62  ;;  %v16063_v11 = vcombine.low %v836_v60, %v844_v62 }
 0x4f3   :  { %13920 = vmatpush1.bf16.msra.mxu0 %v15965_v7  ;;  %14248 = vmatpush1.bf16.msra.mxu1 %v15967_v8  ;;  %v851_v7 = vld [vmem:[#allocation2 + $0x1820] sm:$0xff] }
 0x4f4   :  { %13921 = vmatprep.subr.bf16.mxu0 %v15982_v9  ;;  %14249 = vmatprep.subr.bf16.mxu1 %v15984_v10  ;;  %v859_v8 = vld [vmem:[#allocation2 + $0x1860] sm:$0xff]  ;;  %v852_v9 = vld [vmem:[#allocation2 + $0x1828] sm:$0xff] }
 0x4f5   :  { %v860_v10 = vld [vmem:[#allocation2 + $0x1868] sm:$0xff]  ;;  %v16078_v13 = vcombine.high %v851_v7, %v859_v8  ;;  %v16077_v26 = vcombine.low %v851_v7, %v859_v8 }
 0x4f6   :  { %v16080_v14 = vcombine.high %v852_v9, %v860_v10  ;;  %v16079_v27 = vcombine.low %v852_v9, %v860_v10 }
 0x4f7   :  { %13922 = vmatpush1.bf16.msra.mxu0 %v15981_v17  ;;  %14250 = vmatpush1.bf16.msra.mxu1 %v15983_v18  ;;  %v867_v17 = vld [vmem:[#allocation2 + $0x18a0] sm:$0xff] }
 0x4f8   :  { %13923 = vmatprep.subr.bf16.mxu0 %v15998_v21  ;;  %14251 = vmatprep.subr.bf16.mxu1 %v16000_v23  ;;  %v875_v18 = vld [vmem:[#allocation2 + $0x18e0] sm:$0xff]  ;;  %v868_v21 = vld [vmem:[#allocation2 + $0x18a8] sm:$0xff] }
 0x4f9   :  { %v876_v23 = vld [vmem:[#allocation2 + $0x18e8] sm:$0xff]  ;;  %v16094_v28 = vcombine.high %v867_v17, %v875_v18  ;;  %v16093_v34 = vcombine.low %v867_v17, %v875_v18 }
 0x4fa   :  { %v16096_v29 = vcombine.high %v868_v21, %v876_v23  ;;  %v16095_v35 = vcombine.low %v868_v21, %v876_v23 }
 0x4fb   :  { %13924 = vmatpush1.bf16.msra.mxu0 %v15997_v30  ;;  %14252 = vmatpush1.bf16.msra.mxu1 %v15999_v31  ;;  %v883_v30 = vld [vmem:[#allocation2 + $0x1920] sm:$0xff] }
 0x4fc   :  { %13925 = vmatprep.subr.bf16.mxu0 %v16014_v32  ;;  %14253 = vmatprep.subr.bf16.mxu1 %v16016_v33  ;;  %v891_v31 = vld [vmem:[#allocation2 + $0x1960] sm:$0xff]  ;;  %v884_v32 = vld [vmem:[#allocation2 + $0x1928] sm:$0xff] }
 0x4fd   :  { %v892_v33 = vld [vmem:[#allocation2 + $0x1968] sm:$0xff]  ;;  %v16110_v37 = vcombine.high %v883_v30, %v891_v31  ;;  %v16109_v44 = vcombine.low %v883_v30, %v891_v31 }
 0x4fe   :  { %v16112_v38 = vcombine.high %v884_v32, %v892_v33  ;;  %v16111_v45 = vcombine.low %v884_v32, %v892_v33  ;;  %v964_v31 = vld [vmem:[#allocation2 + $0x1ba8] sm:$0xff] }
 0x4ff   :  { %13926 = vmatpush1.bf16.msra.mxu0 %v16013_v40  ;;  %14254 = vmatpush1.bf16.msra.mxu1 %v16015_v41  ;;  %v899_v40 = vld [vmem:[#allocation2 + $0x19a0] sm:$0xff]  ;;  %v972_v32 = vld [vmem:[#allocation2 + $0x1be8] sm:$0xff] }
 0x500   :  { %13927 = vmatprep.subr.bf16.mxu0 %v16030_v42  ;;  %14255 = vmatprep.subr.bf16.mxu1 %v16032_v43  ;;  %v907_v41 = vld [vmem:[#allocation2 + $0x19e0] sm:$0xff]  ;;  %v900_v42 = vld [vmem:[#allocation2 + $0x19a8] sm:$0xff] }
 0x501   :  { %v908_v43 = vld [vmem:[#allocation2 + $0x19e8] sm:$0xff]  ;;  %v16126_v47 = vcombine.high %v899_v40, %v907_v41  ;;  %v16125_v56 = vcombine.low %v899_v40, %v907_v41 }
 0x502   :  { %v16128_v48 = vcombine.high %v900_v42, %v908_v43  ;;  %v16127_v58 = vcombine.low %v900_v42, %v908_v43  ;;  %v16192_v43 = vcombine.high %v964_v31, %v972_v32 }
 0x503   :  { %13928 = vmatpush1.bf16.msra.mxu0 %v16029_v50  ;;  %14256 = vmatpush1.bf16.msra.mxu1 %v16031_v51  ;;  %v915_v50 = vld [vmem:[#allocation2 + $0x1a20] sm:$0xff] }
 0x504   :  { %13929 = vmatprep.subr.bf16.mxu0 %v16046_v52  ;;  %14257 = vmatprep.subr.bf16.mxu1 %v16048_v54  ;;  %v923_v51 = vld [vmem:[#allocation2 + $0x1a60] sm:$0xff]  ;;  %v916_v52 = vld [vmem:[#allocation2 + $0x1a28] sm:$0xff] }
 0x505   :  { %v924_v54 = vld [vmem:[#allocation2 + $0x1a68] sm:$0xff]  ;;  %v16142_v60 = vcombine.high %v915_v50, %v923_v51  ;;  %v16141_v7 = vcombine.low %v915_v50, %v923_v51  ;;  %v16191_v51 = vcombine.low %v964_v31, %v972_v32 }
 0x506   :  { %v16144_v62 = vcombine.high %v916_v52, %v924_v54  ;;  %v16143_v8 = vcombine.low %v916_v52, %v924_v54 }
 0x507   :  { %13930 = vmatpush1.bf16.msra.mxu0 %v16045_v63  ;;  %14258 = vmatpush1.bf16.msra.mxu1 %v16047_v1  ;;  %v931_v63 = vld [vmem:[#allocation2 + $0x1aa0] sm:$0xff] }
 0x508   :  { %13931 = vmatprep.subr.bf16.mxu0 %v16062_v4  ;;  %14259 = vmatprep.subr.bf16.mxu1 %v16064_v5  ;;  %v939_v1 = vld [vmem:[#allocation2 + $0x1ae0] sm:$0xff]  ;;  %v932_v4 = vld [vmem:[#allocation2 + $0x1aa8] sm:$0xff] }
 0x509   :  { %v940_v5 = vld [vmem:[#allocation2 + $0x1ae8] sm:$0xff]  ;;  %v16158_v9 = vcombine.high %v931_v63, %v939_v1  ;;  %v16157_v17 = vcombine.low %v931_v63, %v939_v1 }
 0x50a   :  { %v16160_v10 = vcombine.high %v932_v4, %v940_v5  ;;  %v16159_v18 = vcombine.low %v932_v4, %v940_v5 }
 0x50b   :  { %13932 = vmatpush1.bf16.msra.mxu0 %v16061_v24  ;;  %14260 = vmatpush1.bf16.msra.mxu1 %v16063_v11  ;;  %v947_v24 = vld [vmem:[#allocation2 + $0x1b20] sm:$0xff] }
 0x50c   :  { %13942 = vmatprep.subr.bf16.mxu0 %v16078_v13  ;;  %14270 = vmatprep.subr.bf16.mxu1 %v16080_v14  ;;  %v955_v11 = vld [vmem:[#allocation2 + $0x1b60] sm:$0xff]  ;;  %v948_v13 = vld [vmem:[#allocation2 + $0x1b28] sm:$0xff] }
 0x50d   :  { %v956_v14 = vld [vmem:[#allocation2 + $0x1b68] sm:$0xff]  ;;  %v16174_v21 = vcombine.high %v947_v24, %v955_v11 }
 0x50e   :  { %13934 = vmatmul.mubr.bf16.vlgmr.msra.gmra.mrb[8].mxu0 %v17935_v36  ;;  %14262 = vmatmul.mubr.bf16.vlgmr.msra.gmra.mrb[8].mxu1 %v17935_v36  ;;  %v16175_v40 = vcombine.low %v948_v13, %v956_v14 }
 0x50f   :  { %13943 = vmatpush1.bf16.msra.mxu0 %v16077_v26  ;;  %14271 = vmatpush1.bf16.msra.mxu1 %v16079_v27  ;;  %v16176_v26 = vcombine.high %v948_v13, %v956_v14  ;;  %v963_v27 = vld [vmem:[#allocation2 + $0x1ba0] sm:$0xff] }
 0x510   :  { %13944 = vmatprep.subr.bf16.mxu0 %v16094_v28  ;;  %14272 = vmatprep.subr.bf16.mxu1 %v16096_v29  ;;  %v971_v28 = vld [vmem:[#allocation2 + $0x1be0] sm:$0xff] }
 0x511   :  { %13974 = vmatprep.mubr.bf16.mxu0 %v17944_v25  ;;  %14302 = vmatprep.mubr.bf16.mxu1 %v17944_v25  ;;  %v16190_v41 = vcombine.high %v963_v27, %v971_v28  ;;  %v16189_v50 = vcombine.low %v963_v27, %v971_v28 }
 0x513   :  { %13945 = vmatpush1.bf16.msra.mxu0 %v16093_v34  ;;  %14273 = vmatpush1.bf16.msra.mxu1 %v16095_v35  ;;  %v16173_v35 = vcombine.low %v947_v24, %v955_v11 }
 0x514   :  { %13946 = vmatprep.subr.bf16.mxu0 %v16110_v37  ;;  %14274 = vmatprep.subr.bf16.mxu1 %v16112_v38 }
 0x517   :  { %13947 = vmatpush1.bf16.msra.mxu0 %v16109_v44  ;;  %14275 = vmatpush1.bf16.msra.mxu1 %v16111_v45  ;;  %v979_v44 = vld [vmem:[#allocation2 + $0x1c20] sm:$0xff] }
 0x518   :  { %13948 = vmatprep.subr.bf16.mxu0 %v16126_v47  ;;  %14276 = vmatprep.subr.bf16.mxu1 %v16128_v48  ;;  %v987_v45 = vld [vmem:[#allocation2 + $0x1c60] sm:$0xff]  ;;  %v980_v47 = vld [vmem:[#allocation2 + $0x1c28] sm:$0xff] }
 0x519   :  { %v988_v48 = vld [vmem:[#allocation2 + $0x1c68] sm:$0xff]  ;;  %v16206_v52 = vcombine.high %v979_v44, %v987_v45  ;;  %v16205_v63 = vcombine.low %v979_v44, %v987_v45  ;;  %v1059_v44 = vld [vmem:[#allocation2 + $0x1ea0] sm:$0xff] }
 0x51a   :  { %v16208_v54 = vcombine.high %v980_v47, %v988_v48  ;;  %v16207_v1 = vcombine.low %v980_v47, %v988_v48  ;;  %v1067_v45 = vld [vmem:[#allocation2 + $0x1ee0] sm:$0xff]  ;;  %v1060_v47 = vld [vmem:[#allocation2 + $0x1ea8] sm:$0xff] }
 0x51b   :  { %13949 = vmatpush1.bf16.msra.mxu0 %v16125_v56  ;;  %14277 = vmatpush1.bf16.msra.mxu1 %v16127_v58  ;;  %v995_v56 = vld [vmem:[#allocation2 + $0x1ca0] sm:$0xff]  ;;  %v1068_v48 = vld [vmem:[#allocation2 + $0x1ee8] sm:$0xff] }
 0x51c   :  { %13950 = vmatprep.subr.bf16.mxu0 %v16142_v60  ;;  %14278 = vmatprep.subr.bf16.mxu1 %v16144_v62  ;;  %v1003_v58 = vld [vmem:[#allocation2 + $0x1ce0] sm:$0xff]  ;;  %v996_v60 = vld [vmem:[#allocation2 + $0x1ca8] sm:$0xff] }
 0x51d   :  { %v1004_v62 = vld [vmem:[#allocation2 + $0x1ce8] sm:$0xff]  ;;  %v16222_v4 = vcombine.high %v995_v56, %v1003_v58  ;;  %v16221_v24 = vcombine.low %v995_v56, %v1003_v58  ;;  %v1075_v56 = vld [vmem:[#allocation2 + $0x1f20] sm:$0xff] }
 0x51e   :  { %v16224_v5 = vcombine.high %v996_v60, %v1004_v62  ;;  %v16223_v11 = vcombine.low %v996_v60, %v1004_v62  ;;  %v1083_v58 = vld [vmem:[#allocation2 + $0x1f60] sm:$0xff]  ;;  %v1076_v60 = vld [vmem:[#allocation2 + $0x1f28] sm:$0xff] }
 0x51f   :  { %13951 = vmatpush1.bf16.msra.mxu0 %v16141_v7  ;;  %14279 = vmatpush1.bf16.msra.mxu1 %v16143_v8  ;;  %v1011_v7 = vld [vmem:[#allocation2 + $0x1d20] sm:$0xff]  ;;  %v1084_v62 = vld [vmem:[#allocation2 + $0x1f68] sm:$0xff] }
 0x520   :  { %13952 = vmatprep.subr.bf16.mxu0 %v16158_v9  ;;  %14280 = vmatprep.subr.bf16.mxu1 %v16160_v10  ;;  %v1019_v8 = vld [vmem:[#allocation2 + $0x1d60] sm:$0xff]  ;;  %v1012_v9 = vld [vmem:[#allocation2 + $0x1d28] sm:$0xff] }
 0x521   :  { %v18078_v23 = vpop.f32.mrb[4].mxu0  ;;  %v18080_v29 = vpop.f32.mrb[4].mxu1  ;;  %v1020_v10 = vld [vmem:[#allocation2 + $0x1d68] sm:$0xff]  ;;  %v16238_v13 = vcombine.high %v1011_v7, %v1019_v8  ;;  %v16237_v27 = vcombine.low %v1011_v7, %v1019_v8  ;;  %v1091_v7 = vld [vmem:[#allocation2 + $0x1fa0] sm:$0xff] }
 0x522   :  { %v18082_v30 = vpop.f32.mrb[5].mxu0  ;;  %v18084_v33 = vpop.f32.mrb[5].mxu1  ;;  %v16240_v14 = vcombine.high %v1012_v9, %v1020_v10  ;;  %v16239_v28 = vcombine.low %v1012_v9, %v1020_v10  ;;  %v1099_v8 = vld [vmem:[#allocation2 + $0x1fe0] sm:$0xff]  ;;  %v1092_v9 = vld [vmem:[#allocation2 + $0x1fa8] sm:$0xff] }
 0x523   :  { %v13488_v34 = vpop.f32.mrb[6].mxu0  ;;  %13953 = vmatpush1.bf16.msra.mxu0 %v16157_v17  ;;  %v13816_v37 = vpop.f32.mrb[6].mxu1  ;;  %14281 = vmatpush1.bf16.msra.mxu1 %v16159_v18  ;;  %v1027_v17 = vld [vmem:[#allocation2 + $0x1da0] sm:$0xff]  ;;  %v1100_v10 = vld [vmem:[#allocation2 + $0x1fe8] sm:$0xff] }
 0x524   :  { %v13489_v38 = vpop.f32.mrb[7].mxu0  ;;  %13954 = vmatprep.subr.bf16.mxu0 %v16174_v21  ;;  %v13817_v42 = vpop.f32.mrb[7].mxu1  ;;  %14282 = vmatprep.subr.bf16.mxu1 %v16176_v26  ;;  %v1035_v18 = vld [vmem:[#allocation2 + $0x1de0] sm:$0xff]  ;;  %v1028_v21 = vld [vmem:[#allocation2 + $0x1da8] sm:$0xff] }
 0x525   :  { %v1036_v26 = vld [vmem:[#allocation2 + $0x1de8] sm:$0xff]  ;;  %v16254_v31 = vcombine.high %v1027_v17, %v1035_v18  ;;  %v1043_v34 = vld [vmem:[#allocation2 + $0x1e20] sm:$0xff] }
 0x526   :  { %v16256_v32 = vcombine.high %v1028_v21, %v1036_v26  ;;  %v1044_v37 = vld [vmem:[#allocation2 + $0x1e28] sm:$0xff] }
 0x527   :  { %13955 = vmatpush1.bf16.msra.mxu0 %v16173_v35  ;;  %14283 = vmatpush1.bf16.msra.mxu1 %v16175_v40  ;;  %v1051_v35 = vld [vmem:[#allocation2 + $0x1e60] sm:$0xff]  ;;  %v1052_v38 = vld [vmem:[#allocation2 + $0x1e68] sm:$0xff]  ;;  %v16253_v40 = vcombine.low %v1027_v17, %v1035_v18 }
 0x528   :  { %13956 = vmatprep.subr.bf16.mxu0 %v16190_v41  ;;  %14284 = vmatprep.subr.bf16.mxu1 %v16192_v43  ;;  %v16255_v41 = vcombine.low %v1028_v21, %v1036_v26  ;;  %v16270_v42 = vcombine.high %v1043_v34, %v1051_v35  ;;  %v16272_v43 = vcombine.high %v1044_v37, %v1052_v38  ;;  %v1107_v17 = vld [vmem:[#allocation2 + $0x2020] sm:$0xff]  ;;  %v1108_v21 = vld [vmem:[#allocation2 + $0x2028] sm:$0xff] }
 0x529   :  { %v1115_v18 = vld [vmem:[#allocation2 + $0x2060] sm:$0xff]  ;;  %v1116_v26 = vld [vmem:[#allocation2 + $0x2068] sm:$0xff] }
 0x52b   :  { %13957 = vmatpush1.bf16.msra.mxu0 %v16189_v50  ;;  %14285 = vmatpush1.bf16.msra.mxu1 %v16191_v51  ;;  %v16269_v50 = vcombine.low %v1043_v34, %v1051_v35  ;;  %v16271_v51 = vcombine.low %v1044_v37, %v1052_v38  ;;  %v1123_v34 = vld [vmem:[#allocation2 + $0x20a0] sm:$0xff]  ;;  %v1124_v37 = vld [vmem:[#allocation2 + $0x20a8] sm:$0xff] }
 0x52c   :  { %13958 = vmatprep.subr.bf16.mxu0 %v16206_v52  ;;  %14286 = vmatprep.subr.bf16.mxu1 %v16208_v54  ;;  %v16286_v52 = vcombine.high %v1059_v44, %v1067_v45  ;;  %v16288_v54 = vcombine.high %v1060_v47, %v1068_v48  ;;  %v1131_v35 = vld [vmem:[#allocation2 + $0x20e0] sm:$0xff]  ;;  %v1132_v38 = vld [vmem:[#allocation2 + $0x20e8] sm:$0xff] }
 0x52f   :  { %13959 = vmatpush1.bf16.msra.mxu0 %v16205_v63  ;;  %14287 = vmatpush1.bf16.msra.mxu1 %v16207_v1  ;;  %v16285_v63 = vcombine.low %v1059_v44, %v1067_v45  ;;  %v16287_v1 = vcombine.low %v1060_v47, %v1068_v48  ;;  %v1139_v44 = vld [vmem:[#allocation2 + $0x2120] sm:$0xff]  ;;  %v1140_v47 = vld [vmem:[#allocation2 + $0x2128] sm:$0xff] }
 0x530   :  { %13960 = vmatprep.subr.bf16.mxu0 %v16222_v4  ;;  %14288 = vmatprep.subr.bf16.mxu1 %v16224_v5  ;;  %v16302_v4 = vcombine.high %v1075_v56, %v1083_v58  ;;  %v16304_v5 = vcombine.high %v1076_v60, %v1084_v62  ;;  %v1147_v45 = vld [vmem:[#allocation2 + $0x2160] sm:$0xff]  ;;  %v1148_v48 = vld [vmem:[#allocation2 + $0x2168] sm:$0xff] }
 0x533   :  { %13961 = vmatpush1.bf16.msra.mxu0 %v16221_v24  ;;  %14289 = vmatpush1.bf16.msra.mxu1 %v16223_v11  ;;  %v16301_v24 = vcombine.low %v1075_v56, %v1083_v58  ;;  %v16303_v11 = vcombine.low %v1076_v60, %v1084_v62  ;;  %v1155_v56 = vld [vmem:[#allocation2 + $0x21a0] sm:$0xff]  ;;  %v1156_v60 = vld [vmem:[#allocation2 + $0x21a8] sm:$0xff] }
 0x534   :  { %13962 = vmatprep.subr.bf16.mxu0 %v16238_v13  ;;  %14290 = vmatprep.subr.bf16.mxu1 %v16240_v14  ;;  %v16318_v13 = vcombine.high %v1091_v7, %v1099_v8  ;;  %v16320_v14 = vcombine.high %v1092_v9, %v1100_v10  ;;  %v1163_v58 = vld [vmem:[#allocation2 + $0x21e0] sm:$0xff]  ;;  %v1164_v62 = vld [vmem:[#allocation2 + $0x21e8] sm:$0xff] }
 0x537   :  { %13963 = vmatpush1.bf16.msra.mxu0 %v16237_v27  ;;  %14291 = vmatpush1.bf16.msra.mxu1 %v16239_v28  ;;  %v16317_v27 = vcombine.low %v1091_v7, %v1099_v8  ;;  %v16319_v28 = vcombine.low %v1092_v9, %v1100_v10  ;;  %v1171_v7 = vld [vmem:[#allocation2 + $0x2220] sm:$0xff]  ;;  %v1172_v9 = vld [vmem:[#allocation2 + $0x2228] sm:$0xff] }
 0x538   :  { %13964 = vmatprep.subr.bf16.mxu0 %v16254_v31  ;;  %14292 = vmatprep.subr.bf16.mxu1 %v16256_v32  ;;  %v16334_v31 = vcombine.high %v1107_v17, %v1115_v18  ;;  %v16336_v32 = vcombine.high %v1108_v21, %v1116_v26  ;;  %v1179_v8 = vld [vmem:[#allocation2 + $0x2260] sm:$0xff]  ;;  %v1180_v10 = vld [vmem:[#allocation2 + $0x2268] sm:$0xff] }
 0x53b   :  { %13965 = vmatpush1.bf16.msra.mxu0 %v16253_v40  ;;  %14293 = vmatpush1.bf16.msra.mxu1 %v16255_v41  ;;  %v16333_v40 = vcombine.low %v1107_v17, %v1115_v18  ;;  %v16335_v41 = vcombine.low %v1108_v21, %v1116_v26  ;;  %v1187_v17 = vld [vmem:[#allocation2 + $0x22a0] sm:$0xff]  ;;  %v1188_v21 = vld [vmem:[#allocation2 + $0x22a8] sm:$0xff] }
 0x53c   :  { %13966 = vmatprep.subr.bf16.mxu0 %v16270_v42  ;;  %14294 = vmatprep.subr.bf16.mxu1 %v16272_v43  ;;  %v16350_v42 = vcombine.high %v1123_v34, %v1131_v35  ;;  %v16352_v43 = vcombine.high %v1124_v37, %v1132_v38  ;;  %v1195_v18 = vld [vmem:[#allocation2 + $0x22e0] sm:$0xff]  ;;  %v1196_v26 = vld [vmem:[#allocation2 + $0x22e8] sm:$0xff] }
 0x53f   :  { %13967 = vmatpush1.bf16.msra.mxu0 %v16269_v50  ;;  %14295 = vmatpush1.bf16.msra.mxu1 %v16271_v51  ;;  %v16349_v50 = vcombine.low %v1123_v34, %v1131_v35  ;;  %v16351_v51 = vcombine.low %v1124_v37, %v1132_v38  ;;  %v1203_v34 = vld [vmem:[#allocation2 + $0x2320] sm:$0xff]  ;;  %v1204_v37 = vld [vmem:[#allocation2 + $0x2328] sm:$0xff] }
 0x540   :  { %13968 = vmatprep.subr.bf16.mxu0 %v16286_v52  ;;  %14296 = vmatprep.subr.bf16.mxu1 %v16288_v54  ;;  %v16366_v52 = vcombine.high %v1139_v44, %v1147_v45  ;;  %v16368_v54 = vcombine.high %v1140_v47, %v1148_v48  ;;  %v1211_v35 = vld [vmem:[#allocation2 + $0x2360] sm:$0xff]  ;;  %v1212_v38 = vld [vmem:[#allocation2 + $0x2368] sm:$0xff] }
 0x543   :  { %13969 = vmatpush1.bf16.msra.mxu0 %v16285_v63  ;;  %14297 = vmatpush1.bf16.msra.mxu1 %v16287_v1  ;;  %v16365_v63 = vcombine.low %v1139_v44, %v1147_v45  ;;  %v16367_v1 = vcombine.low %v1140_v47, %v1148_v48  ;;  %v1219_v44 = vld [vmem:[#allocation2 + $0x23a0] sm:$0xff]  ;;  %v1220_v47 = vld [vmem:[#allocation2 + $0x23a8] sm:$0xff] }
 0x544   :  { %13970 = vmatprep.subr.bf16.mxu0 %v16302_v4  ;;  %14298 = vmatprep.subr.bf16.mxu1 %v16304_v5  ;;  %v16382_v4 = vcombine.high %v1155_v56, %v1163_v58  ;;  %v16384_v5 = vcombine.high %v1156_v60, %v1164_v62  ;;  %v1227_v45 = vld [vmem:[#allocation2 + $0x23e0] sm:$0xff]  ;;  %v1228_v48 = vld [vmem:[#allocation2 + $0x23e8] sm:$0xff] }
 0x547   :  { %13971 = vmatpush1.bf16.msra.mxu0 %v16301_v24  ;;  %14299 = vmatpush1.bf16.msra.mxu1 %v16303_v11  ;;  %v16381_v24 = vcombine.low %v1155_v56, %v1163_v58  ;;  %v16383_v11 = vcombine.low %v1156_v60, %v1164_v62  ;;  %v1235_v56 = vld [vmem:[#allocation2 + $0x2420] sm:$0xff]  ;;  %v1236_v60 = vld [vmem:[#allocation2 + $0x2428] sm:$0xff] }
 0x548   :  { %13972 = vmatprep.subr.bf16.mxu0 %v16318_v13  ;;  %14300 = vmatprep.subr.bf16.mxu1 %v16320_v14  ;;  %v16398_v13 = vcombine.high %v1171_v7, %v1179_v8  ;;  %v16400_v14 = vcombine.high %v1172_v9, %v1180_v10  ;;  %v1243_v58 = vld [vmem:[#allocation2 + $0x2460] sm:$0xff]  ;;  %v1244_v62 = vld [vmem:[#allocation2 + $0x2468] sm:$0xff] }
 0x54b   :  { %13973 = vmatpush1.bf16.msra.mxu0 %v16317_v27  ;;  %14301 = vmatpush1.bf16.msra.mxu1 %v16319_v28  ;;  %v16397_v27 = vcombine.low %v1171_v7, %v1179_v8  ;;  %v16399_v28 = vcombine.low %v1172_v9, %v1180_v10  ;;  %v1251_v7 = vld [vmem:[#allocation2 + $0x24a0] sm:$0xff]  ;;  %v1252_v9 = vld [vmem:[#allocation2 + $0x24a8] sm:$0xff] }
 0x54c   :  { %13983 = vmatprep.subr.bf16.mxu0 %v16334_v31  ;;  %14311 = vmatprep.subr.bf16.mxu1 %v16336_v32  ;;  %v16414_v31 = vcombine.high %v1187_v17, %v1195_v18  ;;  %v16416_v32 = vcombine.high %v1188_v21, %v1196_v26  ;;  %v1259_v8 = vld [vmem:[#allocation2 + $0x24e0] sm:$0xff]  ;;  %v1260_v10 = vld [vmem:[#allocation2 + $0x24e8] sm:$0xff] }
 0x54e   :  { %13975 = vmatmul.mubr.bf16.vlgmr.msra.gmra.mrb[8].mxu0 %v17952_v55  ;;  %14303 = vmatmul.mubr.bf16.vlgmr.msra.gmra.mrb[8].mxu1 %v17952_v55 }
 0x54f   :  { %13984 = vmatpush1.bf16.msra.mxu0 %v16333_v40  ;;  %14312 = vmatpush1.bf16.msra.mxu1 %v16335_v41  ;;  %v16413_v40 = vcombine.low %v1187_v17, %v1195_v18  ;;  %v16415_v41 = vcombine.low %v1188_v21, %v1196_v26  ;;  %v1267_v17 = vld [vmem:[#allocation2 + $0x2520] sm:$0xff]  ;;  %v1268_v21 = vld [vmem:[#allocation2 + $0x2528] sm:$0xff] }
 0x550   :  { %13985 = vmatprep.subr.bf16.mxu0 %v16350_v42  ;;  %14313 = vmatprep.subr.bf16.mxu1 %v16352_v43  ;;  %v16430_v42 = vcombine.high %v1203_v34, %v1211_v35  ;;  %v16432_v43 = vcombine.high %v1204_v37, %v1212_v38  ;;  %v1275_v18 = vld [vmem:[#allocation2 + $0x2560] sm:$0xff]  ;;  %v1276_v26 = vld [vmem:[#allocation2 + $0x2568] sm:$0xff] }
 0x551   :  { %14015 = vmatprep.mubr.bf16.mxu0 %v17961_v39  ;;  %14343 = vmatprep.mubr.bf16.mxu1 %v17961_v39 }
 0x553   :  { %13986 = vmatpush1.bf16.msra.mxu0 %v16349_v50  ;;  %14314 = vmatpush1.bf16.msra.mxu1 %v16351_v51  ;;  %v16429_v50 = vcombine.low %v1203_v34, %v1211_v35  ;;  %v16431_v51 = vcombine.low %v1204_v37, %v1212_v38  ;;  %v1283_v34 = vld [vmem:[#allocation2 + $0x25a0] sm:$0xff]  ;;  %v1284_v37 = vld [vmem:[#allocation2 + $0x25a8] sm:$0xff] }
 0x554   :  { %13987 = vmatprep.subr.bf16.mxu0 %v16366_v52  ;;  %14315 = vmatprep.subr.bf16.mxu1 %v16368_v54  ;;  %v16446_v52 = vcombine.high %v1219_v44, %v1227_v45  ;;  %v16448_v54 = vcombine.high %v1220_v47, %v1228_v48  ;;  %v1291_v35 = vld [vmem:[#allocation2 + $0x25e0] sm:$0xff]  ;;  %v1292_v38 = vld [vmem:[#allocation2 + $0x25e8] sm:$0xff] }
 0x557   :  { %13988 = vmatpush1.bf16.msra.mxu0 %v16365_v63  ;;  %14316 = vmatpush1.bf16.msra.mxu1 %v16367_v1  ;;  %v16445_v63 = vcombine.low %v1219_v44, %v1227_v45  ;;  %v16447_v1 = vcombine.low %v1220_v47, %v1228_v48  ;;  %v1299_v44 = vld [vmem:[#allocation2 + $0x2620] sm:$0xff]  ;;  %v1300_v47 = vld [vmem:[#allocation2 + $0x2628] sm:$0xff] }
 0x558   :  { %13989 = vmatprep.subr.bf16.mxu0 %v16382_v4  ;;  %14317 = vmatprep.subr.bf16.mxu1 %v16384_v5  ;;  %v16462_v4 = vcombine.high %v1235_v56, %v1243_v58  ;;  %v16464_v5 = vcombine.high %v1236_v60, %v1244_v62  ;;  %v1307_v45 = vld [vmem:[#allocation2 + $0x2660] sm:$0xff]  ;;  %v1308_v48 = vld [vmem:[#allocation2 + $0x2668] sm:$0xff] }
 0x55b   :  { %13990 = vmatpush1.bf16.msra.mxu0 %v16381_v24  ;;  %14318 = vmatpush1.bf16.msra.mxu1 %v16383_v11  ;;  %v16461_v24 = vcombine.low %v1235_v56, %v1243_v58  ;;  %v16463_v11 = vcombine.low %v1236_v60, %v1244_v62  ;;  %v1315_v56 = vld [vmem:[#allocation2 + $0x26a0] sm:$0xff]  ;;  %v1316_v60 = vld [vmem:[#allocation2 + $0x26a8] sm:$0xff] }
 0x55c   :  { %13991 = vmatprep.subr.bf16.mxu0 %v16398_v13  ;;  %14319 = vmatprep.subr.bf16.mxu1 %v16400_v14  ;;  %v16478_v13 = vcombine.high %v1251_v7, %v1259_v8  ;;  %v16480_v14 = vcombine.high %v1252_v9, %v1260_v10  ;;  %v1323_v58 = vld [vmem:[#allocation2 + $0x26e0] sm:$0xff]  ;;  %v1324_v62 = vld [vmem:[#allocation2 + $0x26e8] sm:$0xff] }
 0x55f   :  { %13992 = vmatpush1.bf16.msra.mxu0 %v16397_v27  ;;  %14320 = vmatpush1.bf16.msra.mxu1 %v16399_v28  ;;  %v16477_v27 = vcombine.low %v1251_v7, %v1259_v8  ;;  %v16479_v28 = vcombine.low %v1252_v9, %v1260_v10  ;;  %v1331_v7 = vld [vmem:[#allocation2 + $0x2720] sm:$0xff]  ;;  %v1332_v9 = vld [vmem:[#allocation2 + $0x2728] sm:$0xff] }
 0x560   :  { %13993 = vmatprep.subr.bf16.mxu0 %v16414_v31  ;;  %14321 = vmatprep.subr.bf16.mxu1 %v16416_v32  ;;  %v16494_v31 = vcombine.high %v1267_v17, %v1275_v18  ;;  %v16496_v32 = vcombine.high %v1268_v21, %v1276_v26  ;;  %v1339_v8 = vld [vmem:[#allocation2 + $0x2760] sm:$0xff]  ;;  %v1340_v10 = vld [vmem:[#allocation2 + $0x2768] sm:$0xff] }
 0x563   :  { %13994 = vmatpush1.bf16.msra.mxu0 %v16413_v40  ;;  %14322 = vmatpush1.bf16.msra.mxu1 %v16415_v41  ;;  %v16493_v40 = vcombine.low %v1267_v17, %v1275_v18  ;;  %v16495_v41 = vcombine.low %v1268_v21, %v1276_v26  ;;  %v1347_v17 = vld [vmem:[#allocation2 + $0x27a0] sm:$0xff]  ;;  %v1348_v21 = vld [vmem:[#allocation2 + $0x27a8] sm:$0xff] }
 0x564   :  { %13995 = vmatprep.subr.bf16.mxu0 %v16430_v42  ;;  %14323 = vmatprep.subr.bf16.mxu1 %v16432_v43  ;;  %v16510_v42 = vcombine.high %v1283_v34, %v1291_v35  ;;  %v16512_v43 = vcombine.high %v1284_v37, %v1292_v38  ;;  %v1355_v18 = vld [vmem:[#allocation2 + $0x27e0] sm:$0xff]  ;;  %v1356_v26 = vld [vmem:[#allocation2 + $0x27e8] sm:$0xff] }
 0x567   :  { %13996 = vmatpush1.bf16.msra.mxu0 %v16429_v50  ;;  %14324 = vmatpush1.bf16.msra.mxu1 %v16431_v51  ;;  %v16509_v50 = vcombine.low %v1283_v34, %v1291_v35  ;;  %v16511_v51 = vcombine.low %v1284_v37, %v1292_v38  ;;  %v1363_v34 = vld [vmem:[#allocation2 + $0x2820] sm:$0xff]  ;;  %v1364_v37 = vld [vmem:[#allocation2 + $0x2828] sm:$0xff] }
 0x568   :  { %13997 = vmatprep.subr.bf16.mxu0 %v16446_v52  ;;  %14325 = vmatprep.subr.bf16.mxu1 %v16448_v54  ;;  %v16526_v52 = vcombine.high %v1299_v44, %v1307_v45  ;;  %v16528_v54 = vcombine.high %v1300_v47, %v1308_v48  ;;  %v1371_v35 = vld [vmem:[#allocation2 + $0x2860] sm:$0xff]  ;;  %v1372_v38 = vld [vmem:[#allocation2 + $0x2868] sm:$0xff] }
 0x56b   :  { %13998 = vmatpush1.bf16.msra.mxu0 %v16445_v63  ;;  %14326 = vmatpush1.bf16.msra.mxu1 %v16447_v1  ;;  %v16525_v63 = vcombine.low %v1299_v44, %v1307_v45  ;;  %v16527_v1 = vcombine.low %v1300_v47, %v1308_v48  ;;  %v1379_v44 = vld [vmem:[#allocation2 + $0x28a0] sm:$0xff]  ;;  %v1380_v47 = vld [vmem:[#allocation2 + $0x28a8] sm:$0xff] }
 0x56c   :  { %13999 = vmatprep.subr.bf16.mxu0 %v16462_v4  ;;  %14327 = vmatprep.subr.bf16.mxu1 %v16464_v5  ;;  %v16542_v4 = vcombine.high %v1315_v56, %v1323_v58  ;;  %v16544_v5 = vcombine.high %v1316_v60, %v1324_v62  ;;  %v1387_v45 = vld [vmem:[#allocation2 + $0x28e0] sm:$0xff]  ;;  %v1388_v48 = vld [vmem:[#allocation2 + $0x28e8] sm:$0xff] }
 0x56f   :  { %14000 = vmatpush1.bf16.msra.mxu0 %v16461_v24  ;;  %14328 = vmatpush1.bf16.msra.mxu1 %v16463_v11  ;;  %v16541_v24 = vcombine.low %v1315_v56, %v1323_v58  ;;  %v16543_v11 = vcombine.low %v1316_v60, %v1324_v62  ;;  %v1395_v56 = vld [vmem:[#allocation2 + $0x2920] sm:$0xff]  ;;  %v1396_v60 = vld [vmem:[#allocation2 + $0x2928] sm:$0xff] }
 0x570   :  { %14001 = vmatprep.subr.bf16.mxu0 %v16478_v13  ;;  %14329 = vmatprep.subr.bf16.mxu1 %v16480_v14  ;;  %v16558_v13 = vcombine.high %v1331_v7, %v1339_v8  ;;  %v16560_v14 = vcombine.high %v1332_v9, %v1340_v10  ;;  %v1403_v58 = vld [vmem:[#allocation2 + $0x2960] sm:$0xff]  ;;  %v1404_v62 = vld [vmem:[#allocation2 + $0x2968] sm:$0xff] }
 0x573   :  { %14002 = vmatpush1.bf16.msra.mxu0 %v16477_v27  ;;  %14330 = vmatpush1.bf16.msra.mxu1 %v16479_v28  ;;  %v16557_v27 = vcombine.low %v1331_v7, %v1339_v8  ;;  %v16559_v28 = vcombine.low %v1332_v9, %v1340_v10  ;;  %v1411_v7 = vld [vmem:[#allocation2 + $0x29a0] sm:$0xff]  ;;  %v1412_v9 = vld [vmem:[#allocation2 + $0x29a8] sm:$0xff] }
 0x574   :  { %14003 = vmatprep.subr.bf16.mxu0 %v16494_v31  ;;  %14331 = vmatprep.subr.bf16.mxu1 %v16496_v32  ;;  %v16574_v31 = vcombine.high %v1347_v17, %v1355_v18  ;;  %v16576_v32 = vcombine.high %v1348_v21, %v1356_v26  ;;  %v1419_v8 = vld [vmem:[#allocation2 + $0x29e0] sm:$0xff]  ;;  %v1420_v10 = vld [vmem:[#allocation2 + $0x29e8] sm:$0xff] }
 0x577   :  { %14004 = vmatpush1.bf16.msra.mxu0 %v16493_v40  ;;  %14332 = vmatpush1.bf16.msra.mxu1 %v16495_v41  ;;  %v16573_v40 = vcombine.low %v1347_v17, %v1355_v18  ;;  %v16575_v41 = vcombine.low %v1348_v21, %v1356_v26  ;;  %v1427_v17 = vld [vmem:[#allocation2 + $0x2a20] sm:$0xff]  ;;  %v1428_v21 = vld [vmem:[#allocation2 + $0x2a28] sm:$0xff] }
 0x578   :  { %14005 = vmatprep.subr.bf16.mxu0 %v16510_v42  ;;  %14333 = vmatprep.subr.bf16.mxu1 %v16512_v43  ;;  %v16590_v42 = vcombine.high %v1363_v34, %v1371_v35  ;;  %v16592_v43 = vcombine.high %v1364_v37, %v1372_v38  ;;  %v1435_v18 = vld [vmem:[#allocation2 + $0x2a60] sm:$0xff]  ;;  %v1436_v26 = vld [vmem:[#allocation2 + $0x2a68] sm:$0xff] }
 0x57b   :  { %14006 = vmatpush1.bf16.msra.mxu0 %v16509_v50  ;;  %14334 = vmatpush1.bf16.msra.mxu1 %v16511_v51  ;;  %v16589_v50 = vcombine.low %v1363_v34, %v1371_v35  ;;  %v16591_v51 = vcombine.low %v1364_v37, %v1372_v38  ;;  %v1443_v34 = vld [vmem:[#allocation2 + $0x2aa0] sm:$0xff]  ;;  %v1444_v37 = vld [vmem:[#allocation2 + $0x2aa8] sm:$0xff] }
 0x57c   :  { %14007 = vmatprep.subr.bf16.mxu0 %v16526_v52  ;;  %14335 = vmatprep.subr.bf16.mxu1 %v16528_v54  ;;  %v16606_v52 = vcombine.high %v1379_v44, %v1387_v45  ;;  %v16608_v54 = vcombine.high %v1380_v47, %v1388_v48  ;;  %v1451_v35 = vld [vmem:[#allocation2 + $0x2ae0] sm:$0xff]  ;;  %v1452_v38 = vld [vmem:[#allocation2 + $0x2ae8] sm:$0xff] }
 0x57f   :  { %14008 = vmatpush1.bf16.msra.mxu0 %v16525_v63  ;;  %14336 = vmatpush1.bf16.msra.mxu1 %v16527_v1  ;;  %v16605_v63 = vcombine.low %v1379_v44, %v1387_v45  ;;  %v16607_v1 = vcombine.low %v1380_v47, %v1388_v48  ;;  %v1459_v44 = vld [vmem:[#allocation2 + $0x2b20] sm:$0xff]  ;;  %v1460_v47 = vld [vmem:[#allocation2 + $0x2b28] sm:$0xff] }
 0x580   :  { %14009 = vmatprep.subr.bf16.mxu0 %v16542_v4  ;;  %14337 = vmatprep.subr.bf16.mxu1 %v16544_v5  ;;  %v16622_v4 = vcombine.high %v1395_v56, %v1403_v58  ;;  %v16624_v5 = vcombine.high %v1396_v60, %v1404_v62  ;;  %v1467_v45 = vld [vmem:[#allocation2 + $0x2b60] sm:$0xff]  ;;  %v1468_v48 = vld [vmem:[#allocation2 + $0x2b68] sm:$0xff] }
 0x583   :  { %14010 = vmatpush1.bf16.msra.mxu0 %v16541_v24  ;;  %14338 = vmatpush1.bf16.msra.mxu1 %v16543_v11  ;;  %v16621_v24 = vcombine.low %v1395_v56, %v1403_v58  ;;  %v16623_v11 = vcombine.low %v1396_v60, %v1404_v62  ;;  %v1475_v56 = vld [vmem:[#allocation2 + $0x2ba0] sm:$0xff]  ;;  %v1476_v60 = vld [vmem:[#allocation2 + $0x2ba8] sm:$0xff] }
 0x584   :  { %14011 = vmatprep.subr.bf16.mxu0 %v16558_v13  ;;  %14339 = vmatprep.subr.bf16.mxu1 %v16560_v14  ;;  %v16638_v13 = vcombine.high %v1411_v7, %v1419_v8  ;;  %v16640_v14 = vcombine.high %v1412_v9, %v1420_v10  ;;  %v1483_v58 = vld [vmem:[#allocation2 + $0x2be0] sm:$0xff]  ;;  %v1484_v62 = vld [vmem:[#allocation2 + $0x2be8] sm:$0xff] }
 0x587   :  { %14012 = vmatpush1.bf16.msra.mxu0 %v16557_v27  ;;  %14340 = vmatpush1.bf16.msra.mxu1 %v16559_v28  ;;  %v16637_v27 = vcombine.low %v1411_v7, %v1419_v8  ;;  %v16639_v28 = vcombine.low %v1412_v9, %v1420_v10  ;;  %v1491_v7 = vld [vmem:[#allocation2 + $0x2c20] sm:$0xff]  ;;  %v1492_v9 = vld [vmem:[#allocation2 + $0x2c28] sm:$0xff] }
 0x588   :  { %14013 = vmatprep.subr.bf16.mxu0 %v16574_v31  ;;  %14341 = vmatprep.subr.bf16.mxu1 %v16576_v32  ;;  %v16654_v31 = vcombine.high %v1427_v17, %v1435_v18  ;;  %v16656_v32 = vcombine.high %v1428_v21, %v1436_v26  ;;  %v1499_v8 = vld [vmem:[#allocation2 + $0x2c60] sm:$0xff]  ;;  %v1500_v10 = vld [vmem:[#allocation2 + $0x2c68] sm:$0xff] }
 0x58b   :  { %14014 = vmatpush1.bf16.msra.mxu0 %v16573_v40  ;;  %14342 = vmatpush1.bf16.msra.mxu1 %v16575_v41  ;;  %v16653_v40 = vcombine.low %v1427_v17, %v1435_v18  ;;  %v16655_v41 = vcombine.low %v1428_v21, %v1436_v26  ;;  %v1507_v17 = vld [vmem:[#allocation2 + $0x2ca0] sm:$0xff]  ;;  %v1508_v21 = vld [vmem:[#allocation2 + $0x2ca8] sm:$0xff] }
 0x58c   :  { %14024 = vmatprep.subr.bf16.mxu0 %v16590_v42  ;;  %14352 = vmatprep.subr.bf16.mxu1 %v16592_v43  ;;  %v16670_v42 = vcombine.high %v1443_v34, %v1451_v35  ;;  %v16672_v43 = vcombine.high %v1444_v37, %v1452_v38  ;;  %v1515_v18 = vld [vmem:[#allocation2 + $0x2ce0] sm:$0xff]  ;;  %v1516_v26 = vld [vmem:[#allocation2 + $0x2ce8] sm:$0xff] }
 0x58e   :  { %14016 = vmatmul.mubr.bf16.vlgmr.msra.gmra.mrb[8].mxu0 %v17969_v16  ;;  %14344 = vmatmul.mubr.bf16.vlgmr.msra.gmra.mrb[8].mxu1 %v17969_v16 }
 0x58f   :  { %14025 = vmatpush1.bf16.msra.mxu0 %v16589_v50  ;;  %14353 = vmatpush1.bf16.msra.mxu1 %v16591_v51  ;;  %v16669_v50 = vcombine.low %v1443_v34, %v1451_v35  ;;  %v16671_v51 = vcombine.low %v1444_v37, %v1452_v38  ;;  %v1523_v34 = vld [vmem:[#allocation2 + $0x2d20] sm:$0xff]  ;;  %v1524_v37 = vld [vmem:[#allocation2 + $0x2d28] sm:$0xff] }
 0x590   :  { %14026 = vmatprep.subr.bf16.mxu0 %v16606_v52  ;;  %14354 = vmatprep.subr.bf16.mxu1 %v16608_v54  ;;  %v16686_v52 = vcombine.high %v1459_v44, %v1467_v45  ;;  %v16688_v54 = vcombine.high %v1460_v47, %v1468_v48  ;;  %v1531_v35 = vld [vmem:[#allocation2 + $0x2d60] sm:$0xff]  ;;  %v1532_v38 = vld [vmem:[#allocation2 + $0x2d68] sm:$0xff] }
 0x591   :  { %14056 = vmatprep.mubr.bf16.mxu0 %v17978_v59  ;;  %14384 = vmatprep.mubr.bf16.mxu1 %v17978_v59 }
 0x593   :  { %14027 = vmatpush1.bf16.msra.mxu0 %v16605_v63  ;;  %14355 = vmatpush1.bf16.msra.mxu1 %v16607_v1  ;;  %v16685_v63 = vcombine.low %v1459_v44, %v1467_v45  ;;  %v16687_v1 = vcombine.low %v1460_v47, %v1468_v48  ;;  %v1539_v44 = vld [vmem:[#allocation2 + $0x2da0] sm:$0xff]  ;;  %v1540_v47 = vld [vmem:[#allocation2 + $0x2da8] sm:$0xff] }
 0x594   :  { %14028 = vmatprep.subr.bf16.mxu0 %v16622_v4  ;;  %14356 = vmatprep.subr.bf16.mxu1 %v16624_v5  ;;  %v16702_v4 = vcombine.high %v1475_v56, %v1483_v58  ;;  %v16704_v5 = vcombine.high %v1476_v60, %v1484_v62  ;;  %v1547_v45 = vld [vmem:[#allocation2 + $0x2de0] sm:$0xff]  ;;  %v1548_v48 = vld [vmem:[#allocation2 + $0x2de8] sm:$0xff] }
 0x597   :  { %14029 = vmatpush1.bf16.msra.mxu0 %v16621_v24  ;;  %14357 = vmatpush1.bf16.msra.mxu1 %v16623_v11  ;;  %v16701_v24 = vcombine.low %v1475_v56, %v1483_v58  ;;  %v16703_v11 = vcombine.low %v1476_v60, %v1484_v62  ;;  %v1555_v56 = vld [vmem:[#allocation2 + $0x2e20] sm:$0xff]  ;;  %v1556_v60 = vld [vmem:[#allocation2 + $0x2e28] sm:$0xff] }
 0x598   :  { %14030 = vmatprep.subr.bf16.mxu0 %v16638_v13  ;;  %14358 = vmatprep.subr.bf16.mxu1 %v16640_v14  ;;  %v16718_v13 = vcombine.high %v1491_v7, %v1499_v8  ;;  %v16720_v14 = vcombine.high %v1492_v9, %v1500_v10  ;;  %v1563_v58 = vld [vmem:[#allocation2 + $0x2e60] sm:$0xff]  ;;  %v1564_v62 = vld [vmem:[#allocation2 + $0x2e68] sm:$0xff] }
 0x59b   :  { %14031 = vmatpush1.bf16.msra.mxu0 %v16637_v27  ;;  %14359 = vmatpush1.bf16.msra.mxu1 %v16639_v28  ;;  %v16717_v27 = vcombine.low %v1491_v7, %v1499_v8  ;;  %v16719_v28 = vcombine.low %v1492_v9, %v1500_v10  ;;  %v1571_v7 = vld [vmem:[#allocation2 + $0x2ea0] sm:$0xff]  ;;  %v1572_v9 = vld [vmem:[#allocation2 + $0x2ea8] sm:$0xff] }
 0x59c   :  { %14032 = vmatprep.subr.bf16.mxu0 %v16654_v31  ;;  %14360 = vmatprep.subr.bf16.mxu1 %v16656_v32  ;;  %v16734_v31 = vcombine.high %v1507_v17, %v1515_v18  ;;  %v16736_v32 = vcombine.high %v1508_v21, %v1516_v26  ;;  %v1579_v8 = vld [vmem:[#allocation2 + $0x2ee0] sm:$0xff]  ;;  %v1580_v10 = vld [vmem:[#allocation2 + $0x2ee8] sm:$0xff] }
 0x59f   :  { %14033 = vmatpush1.bf16.msra.mxu0 %v16653_v40  ;;  %14361 = vmatpush1.bf16.msra.mxu1 %v16655_v41  ;;  %v16733_v40 = vcombine.low %v1507_v17, %v1515_v18  ;;  %v16735_v41 = vcombine.low %v1508_v21, %v1516_v26  ;;  %v1587_v17 = vld [vmem:[#allocation2 + $0x2f20] sm:$0xff]  ;;  %v1588_v21 = vld [vmem:[#allocation2 + $0x2f28] sm:$0xff] }
 0x5a0   :  { %14034 = vmatprep.subr.bf16.mxu0 %v16670_v42  ;;  %14362 = vmatprep.subr.bf16.mxu1 %v16672_v43  ;;  %v16750_v42 = vcombine.high %v1523_v34, %v1531_v35  ;;  %v16752_v43 = vcombine.high %v1524_v37, %v1532_v38  ;;  %v1595_v18 = vld [vmem:[#allocation2 + $0x2f60] sm:$0xff]  ;;  %v1596_v26 = vld [vmem:[#allocation2 + $0x2f68] sm:$0xff] }
 0x5a3   :  { %14035 = vmatpush1.bf16.msra.mxu0 %v16669_v50  ;;  %14363 = vmatpush1.bf16.msra.mxu1 %v16671_v51  ;;  %v16749_v50 = vcombine.low %v1523_v34, %v1531_v35  ;;  %v16751_v51 = vcombine.low %v1524_v37, %v1532_v38  ;;  %v1603_v34 = vld [vmem:[#allocation2 + $0x2fa0] sm:$0xff]  ;;  %v1604_v37 = vld [vmem:[#allocation2 + $0x2fa8] sm:$0xff] }
 0x5a4   :  { %14036 = vmatprep.subr.bf16.mxu0 %v16686_v52  ;;  %14364 = vmatprep.subr.bf16.mxu1 %v16688_v54  ;;  %v16766_v52 = vcombine.high %v1539_v44, %v1547_v45  ;;  %v16768_v54 = vcombine.high %v1540_v47, %v1548_v48  ;;  %v1611_v35 = vld [vmem:[#allocation2 + $0x2fe0] sm:$0xff]  ;;  %v1612_v38 = vld [vmem:[#allocation2 + $0x2fe8] sm:$0xff] }
 0x5a7   :  { %14037 = vmatpush1.bf16.msra.mxu0 %v16685_v63  ;;  %14365 = vmatpush1.bf16.msra.mxu1 %v16687_v1  ;;  %v16765_v63 = vcombine.low %v1539_v44, %v1547_v45  ;;  %v16767_v1 = vcombine.low %v1540_v47, %v1548_v48  ;;  %v1619_v44 = vld [vmem:[#allocation2 + $0x3020] sm:$0xff]  ;;  %v1620_v47 = vld [vmem:[#allocation2 + $0x3028] sm:$0xff] }
 0x5a8   :  { %14038 = vmatprep.subr.bf16.mxu0 %v16702_v4  ;;  %14366 = vmatprep.subr.bf16.mxu1 %v16704_v5  ;;  %v16782_v4 = vcombine.high %v1555_v56, %v1563_v58  ;;  %v16784_v5 = vcombine.high %v1556_v60, %v1564_v62  ;;  %v1627_v45 = vld [vmem:[#allocation2 + $0x3060] sm:$0xff]  ;;  %v1628_v48 = vld [vmem:[#allocation2 + $0x3068] sm:$0xff] }
 0x5ab   :  { %14039 = vmatpush1.bf16.msra.mxu0 %v16701_v24  ;;  %14367 = vmatpush1.bf16.msra.mxu1 %v16703_v11  ;;  %v16781_v24 = vcombine.low %v1555_v56, %v1563_v58  ;;  %v16783_v11 = vcombine.low %v1556_v60, %v1564_v62  ;;  %v1635_v56 = vld [vmem:[#allocation2 + $0x30a0] sm:$0xff]  ;;  %v1636_v60 = vld [vmem:[#allocation2 + $0x30a8] sm:$0xff] }
 0x5ac   :  { %14040 = vmatprep.subr.bf16.mxu0 %v16718_v13  ;;  %14368 = vmatprep.subr.bf16.mxu1 %v16720_v14  ;;  %v16798_v13 = vcombine.high %v1571_v7, %v1579_v8  ;;  %v16800_v14 = vcombine.high %v1572_v9, %v1580_v10  ;;  %v1643_v58 = vld [vmem:[#allocation2 + $0x30e0] sm:$0xff]  ;;  %v1644_v62 = vld [vmem:[#allocation2 + $0x30e8] sm:$0xff] }
 0x5af   :  { %14041 = vmatpush1.bf16.msra.mxu0 %v16717_v27  ;;  %14369 = vmatpush1.bf16.msra.mxu1 %v16719_v28  ;;  %v16797_v27 = vcombine.low %v1571_v7, %v1579_v8  ;;  %v16799_v28 = vcombine.low %v1572_v9, %v1580_v10  ;;  %v1651_v7 = vld [vmem:[#allocation2 + $0x3120] sm:$0xff]  ;;  %v1652_v9 = vld [vmem:[#allocation2 + $0x3128] sm:$0xff] }
 0x5b0   :  { %14042 = vmatprep.subr.bf16.mxu0 %v16734_v31  ;;  %14370 = vmatprep.subr.bf16.mxu1 %v16736_v32  ;;  %v16814_v31 = vcombine.high %v1587_v17, %v1595_v18  ;;  %v16816_v32 = vcombine.high %v1588_v21, %v1596_v26  ;;  %v1659_v8 = vld [vmem:[#allocation2 + $0x3160] sm:$0xff]  ;;  %v1660_v10 = vld [vmem:[#allocation2 + $0x3168] sm:$0xff] }
 0x5b3   :  { %14043 = vmatpush1.bf16.msra.mxu0 %v16733_v40  ;;  %14371 = vmatpush1.bf16.msra.mxu1 %v16735_v41  ;;  %v16813_v40 = vcombine.low %v1587_v17, %v1595_v18  ;;  %v16815_v41 = vcombine.low %v1588_v21, %v1596_v26  ;;  %v1667_v17 = vld [vmem:[#allocation2 + $0x31a0] sm:$0xff]  ;;  %v1668_v21 = vld [vmem:[#allocation2 + $0x31a8] sm:$0xff] }
 0x5b4   :  { %14044 = vmatprep.subr.bf16.mxu0 %v16750_v42  ;;  %14372 = vmatprep.subr.bf16.mxu1 %v16752_v43  ;;  %v16830_v42 = vcombine.high %v1603_v34, %v1611_v35  ;;  %v16832_v43 = vcombine.high %v1604_v37, %v1612_v38  ;;  %v1675_v18 = vld [vmem:[#allocation2 + $0x31e0] sm:$0xff]  ;;  %v1676_v26 = vld [vmem:[#allocation2 + $0x31e8] sm:$0xff] }
 0x5b7   :  { %14045 = vmatpush1.bf16.msra.mxu0 %v16749_v50  ;;  %14373 = vmatpush1.bf16.msra.mxu1 %v16751_v51  ;;  %v16829_v50 = vcombine.low %v1603_v34, %v1611_v35  ;;  %v16831_v51 = vcombine.low %v1604_v37, %v1612_v38  ;;  %v1683_v34 = vld [vmem:[#allocation2 + $0x3220] sm:$0xff]  ;;  %v1684_v37 = vld [vmem:[#allocation2 + $0x3228] sm:$0xff] }
 0x5b8   :  { %14046 = vmatprep.subr.bf16.mxu0 %v16766_v52  ;;  %14374 = vmatprep.subr.bf16.mxu1 %v16768_v54  ;;  %v16846_v52 = vcombine.high %v1619_v44, %v1627_v45  ;;  %v16848_v54 = vcombine.high %v1620_v47, %v1628_v48  ;;  %v1691_v35 = vld [vmem:[#allocation2 + $0x3260] sm:$0xff]  ;;  %v1692_v38 = vld [vmem:[#allocation2 + $0x3268] sm:$0xff] }
 0x5bb   :  { %14047 = vmatpush1.bf16.msra.mxu0 %v16765_v63  ;;  %14375 = vmatpush1.bf16.msra.mxu1 %v16767_v1  ;;  %v16845_v63 = vcombine.low %v1619_v44, %v1627_v45  ;;  %v16847_v1 = vcombine.low %v1620_v47, %v1628_v48  ;;  %v1699_v44 = vld [vmem:[#allocation2 + $0x32a0] sm:$0xff]  ;;  %v1700_v47 = vld [vmem:[#allocation2 + $0x32a8] sm:$0xff] }
 0x5bc   :  { %14048 = vmatprep.subr.bf16.mxu0 %v16782_v4  ;;  %14376 = vmatprep.subr.bf16.mxu1 %v16784_v5  ;;  %v16862_v4 = vcombine.high %v1635_v56, %v1643_v58  ;;  %v16864_v5 = vcombine.high %v1636_v60, %v1644_v62  ;;  %v1707_v45 = vld [vmem:[#allocation2 + $0x32e0] sm:$0xff]  ;;  %v1708_v48 = vld [vmem:[#allocation2 + $0x32e8] sm:$0xff] }
 0x5bf   :  { %14049 = vmatpush1.bf16.msra.mxu0 %v16781_v24  ;;  %14377 = vmatpush1.bf16.msra.mxu1 %v16783_v11  ;;  %v16861_v24 = vcombine.low %v1635_v56, %v1643_v58  ;;  %v16863_v11 = vcombine.low %v1636_v60, %v1644_v62  ;;  %v1715_v56 = vld [vmem:[#allocation2 + $0x3320] sm:$0xff]  ;;  %v1716_v60 = vld [vmem:[#allocation2 + $0x3328] sm:$0xff] }
 0x5c0   :  { %14050 = vmatprep.subr.bf16.mxu0 %v16798_v13  ;;  %14378 = vmatprep.subr.bf16.mxu1 %v16800_v14  ;;  %v16878_v13 = vcombine.high %v1651_v7, %v1659_v8  ;;  %v16880_v14 = vcombine.high %v1652_v9, %v1660_v10  ;;  %v1723_v58 = vld [vmem:[#allocation2 + $0x3360] sm:$0xff]  ;;  %v1724_v62 = vld [vmem:[#allocation2 + $0x3368] sm:$0xff] }
 0x5c3   :  { %14051 = vmatpush1.bf16.msra.mxu0 %v16797_v27  ;;  %14379 = vmatpush1.bf16.msra.mxu1 %v16799_v28  ;;  %v16877_v27 = vcombine.low %v1651_v7, %v1659_v8  ;;  %v16879_v28 = vcombine.low %v1652_v9, %v1660_v10  ;;  %v1731_v7 = vld [vmem:[#allocation2 + $0x33a0] sm:$0xff]  ;;  %v1732_v9 = vld [vmem:[#allocation2 + $0x33a8] sm:$0xff] }
 0x5c4   :  { %14052 = vmatprep.subr.bf16.mxu0 %v16814_v31  ;;  %14380 = vmatprep.subr.bf16.mxu1 %v16816_v32  ;;  %v16894_v31 = vcombine.high %v1667_v17, %v1675_v18  ;;  %v16896_v32 = vcombine.high %v1668_v21, %v1676_v26  ;;  %v1739_v8 = vld [vmem:[#allocation2 + $0x33e0] sm:$0xff]  ;;  %v1740_v10 = vld [vmem:[#allocation2 + $0x33e8] sm:$0xff] }
 0x5c7   :  { %14053 = vmatpush1.bf16.msra.mxu0 %v16813_v40  ;;  %14381 = vmatpush1.bf16.msra.mxu1 %v16815_v41  ;;  %v16893_v40 = vcombine.low %v1667_v17, %v1675_v18  ;;  %v16895_v41 = vcombine.low %v1668_v21, %v1676_v26  ;;  %v1747_v17 = vld [vmem:[#allocation2 + $0x3420] sm:$0xff]  ;;  %v1748_v21 = vld [vmem:[#allocation2 + $0x3428] sm:$0xff] }
 0x5c8   :  { %14054 = vmatprep.subr.bf16.mxu0 %v16830_v42  ;;  %14382 = vmatprep.subr.bf16.mxu1 %v16832_v43  ;;  %v16910_v42 = vcombine.high %v1683_v34, %v1691_v35  ;;  %v16912_v43 = vcombine.high %v1684_v37, %v1692_v38  ;;  %v1755_v18 = vld [vmem:[#allocation2 + $0x3460] sm:$0xff]  ;;  %v1756_v26 = vld [vmem:[#allocation2 + $0x3468] sm:$0xff] }
 0x5cb   :  { %14055 = vmatpush1.bf16.msra.mxu0 %v16829_v50  ;;  %14383 = vmatpush1.bf16.msra.mxu1 %v16831_v51  ;;  %v16909_v50 = vcombine.low %v1683_v34, %v1691_v35  ;;  %v16911_v51 = vcombine.low %v1684_v37, %v1692_v38  ;;  %v1763_v34 = vld [vmem:[#allocation2 + $0x34a0] sm:$0xff]  ;;  %v1764_v37 = vld [vmem:[#allocation2 + $0x34a8] sm:$0xff] }
 0x5cc   :  { %14065 = vmatprep.subr.bf16.mxu0 %v16846_v52  ;;  %14393 = vmatprep.subr.bf16.mxu1 %v16848_v54  ;;  %v16926_v52 = vcombine.high %v1699_v44, %v1707_v45  ;;  %v16928_v54 = vcombine.high %v1700_v47, %v1708_v48  ;;  %v1771_v35 = vld [vmem:[#allocation2 + $0x34e0] sm:$0xff]  ;;  %v1772_v38 = vld [vmem:[#allocation2 + $0x34e8] sm:$0xff] }
 0x5ce   :  { %14057 = vmatmul.mubr.bf16.vlgmr.msra.gmra.mrb[8].mxu0 %v17986_v46  ;;  %14385 = vmatmul.mubr.bf16.vlgmr.msra.gmra.mrb[8].mxu1 %v17986_v46 }
 0x5cf   :  { %14066 = vmatpush1.bf16.msra.mxu0 %v16845_v63  ;;  %14394 = vmatpush1.bf16.msra.mxu1 %v16847_v1  ;;  %v16925_v63 = vcombine.low %v1699_v44, %v1707_v45  ;;  %v16927_v1 = vcombine.low %v1700_v47, %v1708_v48  ;;  %v1779_v44 = vld [vmem:[#allocation2 + $0x3520] sm:$0xff]  ;;  %v1780_v47 = vld [vmem:[#allocation2 + $0x3528] sm:$0xff] }
 0x5d0   :  { %14067 = vmatprep.subr.bf16.mxu0 %v16862_v4  ;;  %14395 = vmatprep.subr.bf16.mxu1 %v16864_v5  ;;  %v16942_v4 = vcombine.high %v1715_v56, %v1723_v58  ;;  %v16944_v5 = vcombine.high %v1716_v60, %v1724_v62  ;;  %v1787_v45 = vld [vmem:[#allocation2 + $0x3560] sm:$0xff]  ;;  %v1788_v48 = vld [vmem:[#allocation2 + $0x3568] sm:$0xff] }
 0x5d1   :  { %14097 = vmatprep.mubr.bf16.mxu0 %v17995_v19  ;;  %14425 = vmatprep.mubr.bf16.mxu1 %v17995_v19 }
 0x5d3   :  { %14068 = vmatpush1.bf16.msra.mxu0 %v16861_v24  ;;  %14396 = vmatpush1.bf16.msra.mxu1 %v16863_v11  ;;  %v16941_v24 = vcombine.low %v1715_v56, %v1723_v58  ;;  %v16943_v11 = vcombine.low %v1716_v60, %v1724_v62  ;;  %v1795_v56 = vld [vmem:[#allocation2 + $0x35a0] sm:$0xff]  ;;  %v1796_v60 = vld [vmem:[#allocation2 + $0x35a8] sm:$0xff] }
 0x5d4   :  { %14069 = vmatprep.subr.bf16.mxu0 %v16878_v13  ;;  %14397 = vmatprep.subr.bf16.mxu1 %v16880_v14  ;;  %v16958_v13 = vcombine.high %v1731_v7, %v1739_v8  ;;  %v16960_v14 = vcombine.high %v1732_v9, %v1740_v10  ;;  %v1803_v58 = vld [vmem:[#allocation2 + $0x35e0] sm:$0xff]  ;;  %v1804_v62 = vld [vmem:[#allocation2 + $0x35e8] sm:$0xff] }
 0x5d7   :  { %14070 = vmatpush1.bf16.msra.mxu0 %v16877_v27  ;;  %14398 = vmatpush1.bf16.msra.mxu1 %v16879_v28  ;;  %v16957_v27 = vcombine.low %v1731_v7, %v1739_v8  ;;  %v16959_v28 = vcombine.low %v1732_v9, %v1740_v10  ;;  %v1811_v7 = vld [vmem:[#allocation2 + $0x3620] sm:$0xff]  ;;  %v1812_v9 = vld [vmem:[#allocation2 + $0x3628] sm:$0xff] }
 0x5d8   :  { %14071 = vmatprep.subr.bf16.mxu0 %v16894_v31  ;;  %14399 = vmatprep.subr.bf16.mxu1 %v16896_v32  ;;  %v16974_v31 = vcombine.high %v1747_v17, %v1755_v18  ;;  %v16976_v32 = vcombine.high %v1748_v21, %v1756_v26  ;;  %v1819_v8 = vld [vmem:[#allocation2 + $0x3660] sm:$0xff]  ;;  %v1820_v10 = vld [vmem:[#allocation2 + $0x3668] sm:$0xff] }
 0x5db   :  { %14072 = vmatpush1.bf16.msra.mxu0 %v16893_v40  ;;  %14400 = vmatpush1.bf16.msra.mxu1 %v16895_v41  ;;  %v16973_v40 = vcombine.low %v1747_v17, %v1755_v18  ;;  %v16975_v41 = vcombine.low %v1748_v21, %v1756_v26  ;;  %v1827_v17 = vld [vmem:[#allocation2 + $0x36a0] sm:$0xff]  ;;  %v1828_v21 = vld [vmem:[#allocation2 + $0x36a8] sm:$0xff] }
 0x5dc   :  { %14073 = vmatprep.subr.bf16.mxu0 %v16910_v42  ;;  %14401 = vmatprep.subr.bf16.mxu1 %v16912_v43  ;;  %v16990_v42 = vcombine.high %v1763_v34, %v1771_v35  ;;  %v16992_v43 = vcombine.high %v1764_v37, %v1772_v38  ;;  %v1835_v18 = vld [vmem:[#allocation2 + $0x36e0] sm:$0xff]  ;;  %v1836_v26 = vld [vmem:[#allocation2 + $0x36e8] sm:$0xff] }
 0x5df   :  { %14074 = vmatpush1.bf16.msra.mxu0 %v16909_v50  ;;  %14402 = vmatpush1.bf16.msra.mxu1 %v16911_v51  ;;  %v16989_v50 = vcombine.low %v1763_v34, %v1771_v35  ;;  %v16991_v51 = vcombine.low %v1764_v37, %v1772_v38  ;;  %v1843_v34 = vld [vmem:[#allocation2 + $0x3720] sm:$0xff]  ;;  %v1844_v37 = vld [vmem:[#allocation2 + $0x3728] sm:$0xff] }
 0x5e0   :  { %14075 = vmatprep.subr.bf16.mxu0 %v16926_v52  ;;  %14403 = vmatprep.subr.bf16.mxu1 %v16928_v54  ;;  %v17006_v52 = vcombine.high %v1779_v44, %v1787_v45  ;;  %v17008_v54 = vcombine.high %v1780_v47, %v1788_v48  ;;  %v1851_v35 = vld [vmem:[#allocation2 + $0x3760] sm:$0xff]  ;;  %v1852_v38 = vld [vmem:[#allocation2 + $0x3768] sm:$0xff] }
 0x5e3   :  { %14076 = vmatpush1.bf16.msra.mxu0 %v16925_v63  ;;  %14404 = vmatpush1.bf16.msra.mxu1 %v16927_v1  ;;  %v17005_v63 = vcombine.low %v1779_v44, %v1787_v45  ;;  %v17007_v1 = vcombine.low %v1780_v47, %v1788_v48  ;;  %v1859_v44 = vld [vmem:[#allocation2 + $0x37a0] sm:$0xff]  ;;  %v1860_v47 = vld [vmem:[#allocation2 + $0x37a8] sm:$0xff] }
 0x5e4   :  { %14077 = vmatprep.subr.bf16.mxu0 %v16942_v4  ;;  %14405 = vmatprep.subr.bf16.mxu1 %v16944_v5  ;;  %v17022_v4 = vcombine.high %v1795_v56, %v1803_v58  ;;  %v17024_v5 = vcombine.high %v1796_v60, %v1804_v62  ;;  %v1867_v45 = vld [vmem:[#allocation2 + $0x37e0] sm:$0xff]  ;;  %v1868_v48 = vld [vmem:[#allocation2 + $0x37e8] sm:$0xff] }
 0x5e7   :  { %14078 = vmatpush1.bf16.msra.mxu0 %v16941_v24  ;;  %14406 = vmatpush1.bf16.msra.mxu1 %v16943_v11  ;;  %v17021_v24 = vcombine.low %v1795_v56, %v1803_v58  ;;  %v17023_v11 = vcombine.low %v1796_v60, %v1804_v62  ;;  %v1875_v56 = vld [vmem:[#allocation2 + $0x3820] sm:$0xff]  ;;  %v1876_v60 = vld [vmem:[#allocation2 + $0x3828] sm:$0xff] }
 0x5e8   :  { %14079 = vmatprep.subr.bf16.mxu0 %v16958_v13  ;;  %14407 = vmatprep.subr.bf16.mxu1 %v16960_v14  ;;  %v17038_v13 = vcombine.high %v1811_v7, %v1819_v8  ;;  %v17040_v14 = vcombine.high %v1812_v9, %v1820_v10  ;;  %v1883_v58 = vld [vmem:[#allocation2 + $0x3860] sm:$0xff]  ;;  %v1884_v62 = vld [vmem:[#allocation2 + $0x3868] sm:$0xff] }
 0x5eb   :  { %14080 = vmatpush1.bf16.msra.mxu0 %v16957_v27  ;;  %14408 = vmatpush1.bf16.msra.mxu1 %v16959_v28  ;;  %v17037_v27 = vcombine.low %v1811_v7, %v1819_v8  ;;  %v17039_v28 = vcombine.low %v1812_v9, %v1820_v10  ;;  %v1891_v7 = vld [vmem:[#allocation2 + $0x38a0] sm:$0xff]  ;;  %v1892_v9 = vld [vmem:[#allocation2 + $0x38a8] sm:$0xff] }
 0x5ec   :  { %14081 = vmatprep.subr.bf16.mxu0 %v16974_v31  ;;  %14409 = vmatprep.subr.bf16.mxu1 %v16976_v32  ;;  %v17054_v31 = vcombine.high %v1827_v17, %v1835_v18  ;;  %v17056_v32 = vcombine.high %v1828_v21, %v1836_v26  ;;  %v1899_v8 = vld [vmem:[#allocation2 + $0x38e0] sm:$0xff]  ;;  %v1900_v10 = vld [vmem:[#allocation2 + $0x38e8] sm:$0xff] }
 0x5ef   :  { %14082 = vmatpush1.bf16.msra.mxu0 %v16973_v40  ;;  %14410 = vmatpush1.bf16.msra.mxu1 %v16975_v41  ;;  %v17053_v40 = vcombine.low %v1827_v17, %v1835_v18  ;;  %v17055_v41 = vcombine.low %v1828_v21, %v1836_v26  ;;  %v1907_v17 = vld [vmem:[#allocation2 + $0x3920] sm:$0xff]  ;;  %v1908_v21 = vld [vmem:[#allocation2 + $0x3928] sm:$0xff] }
 0x5f0   :  { %14083 = vmatprep.subr.bf16.mxu0 %v16990_v42  ;;  %14411 = vmatprep.subr.bf16.mxu1 %v16992_v43  ;;  %v17070_v42 = vcombine.high %v1843_v34, %v1851_v35  ;;  %v17072_v43 = vcombine.high %v1844_v37, %v1852_v38  ;;  %v1915_v18 = vld [vmem:[#allocation2 + $0x3960] sm:$0xff]  ;;  %v1916_v26 = vld [vmem:[#allocation2 + $0x3968] sm:$0xff] }
 0x5f3   :  { %14084 = vmatpush1.bf16.msra.mxu0 %v16989_v50  ;;  %14412 = vmatpush1.bf16.msra.mxu1 %v16991_v51  ;;  %v17069_v50 = vcombine.low %v1843_v34, %v1851_v35  ;;  %v17071_v51 = vcombine.low %v1844_v37, %v1852_v38  ;;  %v1923_v34 = vld [vmem:[#allocation2 + $0x39a0] sm:$0xff]  ;;  %v1924_v37 = vld [vmem:[#allocation2 + $0x39a8] sm:$0xff] }
 0x5f4   :  { %14085 = vmatprep.subr.bf16.mxu0 %v17006_v52  ;;  %14413 = vmatprep.subr.bf16.mxu1 %v17008_v54  ;;  %v17086_v52 = vcombine.high %v1859_v44, %v1867_v45  ;;  %v17088_v54 = vcombine.high %v1860_v47, %v1868_v48  ;;  %v1931_v35 = vld [vmem:[#allocation2 + $0x39e0] sm:$0xff]  ;;  %v1932_v38 = vld [vmem:[#allocation2 + $0x39e8] sm:$0xff] }
 0x5f7   :  { %14086 = vmatpush1.bf16.msra.mxu0 %v17005_v63  ;;  %14414 = vmatpush1.bf16.msra.mxu1 %v17007_v1  ;;  %v17085_v63 = vcombine.low %v1859_v44, %v1867_v45  ;;  %v17087_v1 = vcombine.low %v1860_v47, %v1868_v48  ;;  %v1939_v44 = vld [vmem:[#allocation2 + $0x3a20] sm:$0xff]  ;;  %v1940_v47 = vld [vmem:[#allocation2 + $0x3a28] sm:$0xff] }
 0x5f8   :  { %14087 = vmatprep.subr.bf16.mxu0 %v17022_v4  ;;  %14415 = vmatprep.subr.bf16.mxu1 %v17024_v5  ;;  %v17102_v4 = vcombine.high %v1875_v56, %v1883_v58  ;;  %v17104_v5 = vcombine.high %v1876_v60, %v1884_v62  ;;  %v1947_v45 = vld [vmem:[#allocation2 + $0x3a60] sm:$0xff]  ;;  %v1948_v48 = vld [vmem:[#allocation2 + $0x3a68] sm:$0xff] }
 0x5fb   :  { %14088 = vmatpush1.bf16.msra.mxu0 %v17021_v24  ;;  %14416 = vmatpush1.bf16.msra.mxu1 %v17023_v11  ;;  %v17101_v24 = vcombine.low %v1875_v56, %v1883_v58  ;;  %v17103_v11 = vcombine.low %v1876_v60, %v1884_v62  ;;  %v1955_v56 = vld [vmem:[#allocation2 + $0x3aa0] sm:$0xff]  ;;  %v1956_v60 = vld [vmem:[#allocation2 + $0x3aa8] sm:$0xff] }
 0x5fc   :  { %14089 = vmatprep.subr.bf16.mxu0 %v17038_v13  ;;  %14417 = vmatprep.subr.bf16.mxu1 %v17040_v14  ;;  %v17118_v13 = vcombine.high %v1891_v7, %v1899_v8  ;;  %v17120_v14 = vcombine.high %v1892_v9, %v1900_v10  ;;  %v1963_v58 = vld [vmem:[#allocation2 + $0x3ae0] sm:$0xff]  ;;  %v1964_v62 = vld [vmem:[#allocation2 + $0x3ae8] sm:$0xff] }
 0x5ff   :  { %14090 = vmatpush1.bf16.msra.mxu0 %v17037_v27  ;;  %14418 = vmatpush1.bf16.msra.mxu1 %v17039_v28  ;;  %v17117_v27 = vcombine.low %v1891_v7, %v1899_v8  ;;  %v17119_v28 = vcombine.low %v1892_v9, %v1900_v10  ;;  %v1971_v7 = vld [vmem:[#allocation2 + $0x3b20] sm:$0xff]  ;;  %v1972_v9 = vld [vmem:[#allocation2 + $0x3b28] sm:$0xff] }
 0x600   :  { %14091 = vmatprep.subr.bf16.mxu0 %v17054_v31  ;;  %14419 = vmatprep.subr.bf16.mxu1 %v17056_v32  ;;  %v17134_v31 = vcombine.high %v1907_v17, %v1915_v18  ;;  %v17136_v32 = vcombine.high %v1908_v21, %v1916_v26  ;;  %v1979_v8 = vld [vmem:[#allocation2 + $0x3b60] sm:$0xff]  ;;  %v1980_v10 = vld [vmem:[#allocation2 + $0x3b68] sm:$0xff] }
 0x603   :  { %14092 = vmatpush1.bf16.msra.mxu0 %v17053_v40  ;;  %14420 = vmatpush1.bf16.msra.mxu1 %v17055_v41  ;;  %v17133_v40 = vcombine.low %v1907_v17, %v1915_v18  ;;  %v17135_v41 = vcombine.low %v1908_v21, %v1916_v26  ;;  %v1987_v17 = vld [vmem:[#allocation2 + $0x3ba0] sm:$0xff]  ;;  %v1988_v21 = vld [vmem:[#allocation2 + $0x3ba8] sm:$0xff] }
 0x604   :  { %14093 = vmatprep.subr.bf16.mxu0 %v17070_v42  ;;  %14421 = vmatprep.subr.bf16.mxu1 %v17072_v43  ;;  %v17150_v42 = vcombine.high %v1923_v34, %v1931_v35  ;;  %v17152_v43 = vcombine.high %v1924_v37, %v1932_v38  ;;  %v1995_v18 = vld [vmem:[#allocation2 + $0x3be0] sm:$0xff]  ;;  %v1996_v26 = vld [vmem:[#allocation2 + $0x3be8] sm:$0xff] }
 0x607   :  { %14094 = vmatpush1.bf16.msra.mxu0 %v17069_v50  ;;  %14422 = vmatpush1.bf16.msra.mxu1 %v17071_v51  ;;  %v17149_v50 = vcombine.low %v1923_v34, %v1931_v35  ;;  %v17151_v51 = vcombine.low %v1924_v37, %v1932_v38  ;;  %v2003_v34 = vld [vmem:[#allocation2 + $0x3c20] sm:$0xff]  ;;  %v2004_v37 = vld [vmem:[#allocation2 + $0x3c28] sm:$0xff] }
 0x608   :  { %14095 = vmatprep.subr.bf16.mxu0 %v17086_v52  ;;  %14423 = vmatprep.subr.bf16.mxu1 %v17088_v54  ;;  %v17166_v52 = vcombine.high %v1939_v44, %v1947_v45  ;;  %v17168_v54 = vcombine.high %v1940_v47, %v1948_v48  ;;  %v2011_v35 = vld [vmem:[#allocation2 + $0x3c60] sm:$0xff]  ;;  %v2012_v38 = vld [vmem:[#allocation2 + $0x3c68] sm:$0xff] }
 0x60b   :  { %14096 = vmatpush1.bf16.msra.mxu0 %v17085_v63  ;;  %14424 = vmatpush1.bf16.msra.mxu1 %v17087_v1  ;;  %v17165_v63 = vcombine.low %v1939_v44, %v1947_v45  ;;  %v17167_v1 = vcombine.low %v1940_v47, %v1948_v48  ;;  %v2019_v44 = vld [vmem:[#allocation2 + $0x3ca0] sm:$0xff]  ;;  %v2020_v47 = vld [vmem:[#allocation2 + $0x3ca8] sm:$0xff] }
 0x60c   :  { %14106 = vmatprep.subr.bf16.mxu0 %v17102_v4  ;;  %14434 = vmatprep.subr.bf16.mxu1 %v17104_v5  ;;  %v17182_v4 = vcombine.high %v1955_v56, %v1963_v58  ;;  %v17184_v5 = vcombine.high %v1956_v60, %v1964_v62  ;;  %v2027_v45 = vld [vmem:[#allocation2 + $0x3ce0] sm:$0xff]  ;;  %v2028_v48 = vld [vmem:[#allocation2 + $0x3ce8] sm:$0xff] }
 0x60e   :  { %14098 = vmatmul.mubr.bf16.vlgmr.msra.gmra.mrb[8].mxu0 %v18003_v20  ;;  %14426 = vmatmul.mubr.bf16.vlgmr.msra.gmra.mrb[8].mxu1 %v18003_v20 }
 0x60f   :  { %14107 = vmatpush1.bf16.msra.mxu0 %v17101_v24  ;;  %14435 = vmatpush1.bf16.msra.mxu1 %v17103_v11  ;;  %v17181_v24 = vcombine.low %v1955_v56, %v1963_v58  ;;  %v17183_v11 = vcombine.low %v1956_v60, %v1964_v62  ;;  %v2035_v56 = vld [vmem:[#allocation2 + $0x3d20] sm:$0xff]  ;;  %v2036_v60 = vld [vmem:[#allocation2 + $0x3d28] sm:$0xff] }
 0x610   :  { %14108 = vmatprep.subr.bf16.mxu0 %v17118_v13  ;;  %14436 = vmatprep.subr.bf16.mxu1 %v17120_v14  ;;  %v17198_v13 = vcombine.high %v1971_v7, %v1979_v8  ;;  %v17200_v14 = vcombine.high %v1972_v9, %v1980_v10  ;;  %v2043_v58 = vld [vmem:[#allocation2 + $0x3d60] sm:$0xff]  ;;  %v2044_v62 = vld [vmem:[#allocation2 + $0x3d68] sm:$0xff] }
 0x611   :  { %14138 = vmatprep.mubr.bf16.mxu0 %v18012_v49  ;;  %14466 = vmatprep.mubr.bf16.mxu1 %v18012_v49 }
 0x613   :  { %14109 = vmatpush1.bf16.msra.mxu0 %v17117_v27  ;;  %14437 = vmatpush1.bf16.msra.mxu1 %v17119_v28  ;;  %v17197_v27 = vcombine.low %v1971_v7, %v1979_v8  ;;  %v17199_v28 = vcombine.low %v1972_v9, %v1980_v10  ;;  %v2051_v7 = vld [vmem:[#allocation2 + $0x3da0] sm:$0xff]  ;;  %v2052_v9 = vld [vmem:[#allocation2 + $0x3da8] sm:$0xff] }
 0x614   :  { %14110 = vmatprep.subr.bf16.mxu0 %v17134_v31  ;;  %14438 = vmatprep.subr.bf16.mxu1 %v17136_v32  ;;  %v17214_v31 = vcombine.high %v1987_v17, %v1995_v18  ;;  %v17216_v32 = vcombine.high %v1988_v21, %v1996_v26  ;;  %v2059_v8 = vld [vmem:[#allocation2 + $0x3de0] sm:$0xff]  ;;  %v2060_v10 = vld [vmem:[#allocation2 + $0x3de8] sm:$0xff] }
 0x617   :  { %14111 = vmatpush1.bf16.msra.mxu0 %v17133_v40  ;;  %14439 = vmatpush1.bf16.msra.mxu1 %v17135_v41  ;;  %v17213_v40 = vcombine.low %v1987_v17, %v1995_v18  ;;  %v17215_v41 = vcombine.low %v1988_v21, %v1996_v26  ;;  %v2067_v17 = vld [vmem:[#allocation2 + $0x3e20] sm:$0xff]  ;;  %v2068_v21 = vld [vmem:[#allocation2 + $0x3e28] sm:$0xff] }
 0x618   :  { %14112 = vmatprep.subr.bf16.mxu0 %v17150_v42  ;;  %14440 = vmatprep.subr.bf16.mxu1 %v17152_v43  ;;  %v17230_v42 = vcombine.high %v2003_v34, %v2011_v35  ;;  %v17232_v43 = vcombine.high %v2004_v37, %v2012_v38  ;;  %v2075_v18 = vld [vmem:[#allocation2 + $0x3e60] sm:$0xff]  ;;  %v2076_v26 = vld [vmem:[#allocation2 + $0x3e68] sm:$0xff] }
 0x61b   :  { %14113 = vmatpush1.bf16.msra.mxu0 %v17149_v50  ;;  %14441 = vmatpush1.bf16.msra.mxu1 %v17151_v51  ;;  %v17229_v50 = vcombine.low %v2003_v34, %v2011_v35  ;;  %v17231_v51 = vcombine.low %v2004_v37, %v2012_v38  ;;  %v2083_v34 = vld [vmem:[#allocation2 + $0x3ea0] sm:$0xff]  ;;  %v2084_v37 = vld [vmem:[#allocation2 + $0x3ea8] sm:$0xff] }
 0x61c   :  { %14114 = vmatprep.subr.bf16.mxu0 %v17166_v52  ;;  %14442 = vmatprep.subr.bf16.mxu1 %v17168_v54  ;;  %v17246_v52 = vcombine.high %v2019_v44, %v2027_v45  ;;  %v17248_v54 = vcombine.high %v2020_v47, %v2028_v48  ;;  %v2091_v35 = vld [vmem:[#allocation2 + $0x3ee0] sm:$0xff]  ;;  %v2092_v38 = vld [vmem:[#allocation2 + $0x3ee8] sm:$0xff] }
 0x61f   :  { %14115 = vmatpush1.bf16.msra.mxu0 %v17165_v63  ;;  %14443 = vmatpush1.bf16.msra.mxu1 %v17167_v1  ;;  %v17245_v63 = vcombine.low %v2019_v44, %v2027_v45  ;;  %v17247_v1 = vcombine.low %v2020_v47, %v2028_v48  ;;  %v2099_v44 = vld [vmem:[#allocation2 + $0x3f20] sm:$0xff]  ;;  %v2100_v47 = vld [vmem:[#allocation2 + $0x3f28] sm:$0xff] }
 0x620   :  { %14116 = vmatprep.subr.bf16.mxu0 %v17182_v4  ;;  %14444 = vmatprep.subr.bf16.mxu1 %v17184_v5  ;;  %v17262_v4 = vcombine.high %v2035_v56, %v2043_v58  ;;  %v17264_v5 = vcombine.high %v2036_v60, %v2044_v62  ;;  %v2107_v45 = vld [vmem:[#allocation2 + $0x3f60] sm:$0xff]  ;;  %v2108_v48 = vld [vmem:[#allocation2 + $0x3f68] sm:$0xff] }
 0x623   :  { %14117 = vmatpush1.bf16.msra.mxu0 %v17181_v24  ;;  %14445 = vmatpush1.bf16.msra.mxu1 %v17183_v11  ;;  %v17261_v24 = vcombine.low %v2035_v56, %v2043_v58  ;;  %v17263_v11 = vcombine.low %v2036_v60, %v2044_v62  ;;  %v2115_v56 = vld [vmem:[#allocation2 + $0x3fa0] sm:$0xff]  ;;  %v2116_v60 = vld [vmem:[#allocation2 + $0x3fa8] sm:$0xff] }
 0x624   :  { %14118 = vmatprep.subr.bf16.mxu0 %v17198_v13  ;;  %14446 = vmatprep.subr.bf16.mxu1 %v17200_v14  ;;  %v17278_v13 = vcombine.high %v2051_v7, %v2059_v8  ;;  %v17280_v14 = vcombine.high %v2052_v9, %v2060_v10  ;;  %v2123_v58 = vld [vmem:[#allocation2 + $0x3fe0] sm:$0xff]  ;;  %v2124_v62 = vld [vmem:[#allocation2 + $0x3fe8] sm:$0xff] }
 0x627   :  { %14119 = vmatpush1.bf16.msra.mxu0 %v17197_v27  ;;  %14447 = vmatpush1.bf16.msra.mxu1 %v17199_v28  ;;  %v17277_v27 = vcombine.low %v2051_v7, %v2059_v8  ;;  %v17279_v28 = vcombine.low %v2052_v9, %v2060_v10  ;;  %v85_v7 = vld [vmem:[#allocation2 + $0x30] sm:$0xff]  ;;  %v86_v9 = vld [vmem:[#allocation2 + $0x38] sm:$0xff] }
 0x628   :  { %14120 = vmatprep.subr.bf16.mxu0 %v17214_v31  ;;  %14448 = vmatprep.subr.bf16.mxu1 %v17216_v32  ;;  %v17294_v31 = vcombine.high %v2067_v17, %v2075_v18  ;;  %v17296_v32 = vcombine.high %v2068_v21, %v2076_v26  ;;  %v93_v8 = vld [vmem:[#allocation2 + $0x70] sm:$0xff]  ;;  %v94_v10 = vld [vmem:[#allocation2 + $0x78] sm:$0xff] }
 0x62b   :  { %14121 = vmatpush1.bf16.msra.mxu0 %v17213_v40  ;;  %14449 = vmatpush1.bf16.msra.mxu1 %v17215_v41  ;;  %v17293_v40 = vcombine.low %v2067_v17, %v2075_v18  ;;  %v17295_v41 = vcombine.low %v2068_v21, %v2076_v26  ;;  %v101_v17 = vld [vmem:[#allocation2 + $0xb0] sm:$0xff]  ;;  %v102_v21 = vld [vmem:[#allocation2 + $0xb8] sm:$0xff] }
 0x62c   :  { %14122 = vmatprep.subr.bf16.mxu0 %v17230_v42  ;;  %14450 = vmatprep.subr.bf16.mxu1 %v17232_v43  ;;  %v17310_v42 = vcombine.high %v2083_v34, %v2091_v35  ;;  %v17312_v43 = vcombine.high %v2084_v37, %v2092_v38  ;;  %v109_v18 = vld [vmem:[#allocation2 + $0xf0] sm:$0xff]  ;;  %v110_v26 = vld [vmem:[#allocation2 + $0xf8] sm:$0xff] }
 0x62f   :  { %14123 = vmatpush1.bf16.msra.mxu0 %v17229_v50  ;;  %14451 = vmatpush1.bf16.msra.mxu1 %v17231_v51  ;;  %v17309_v50 = vcombine.low %v2083_v34, %v2091_v35  ;;  %v17311_v51 = vcombine.low %v2084_v37, %v2092_v38  ;;  %v117_v34 = vld [vmem:[#allocation2 + $0x130] sm:$0xff]  ;;  %v118_v37 = vld [vmem:[#allocation2 + $0x138] sm:$0xff] }
 0x630   :  { %14124 = vmatprep.subr.bf16.mxu0 %v17246_v52  ;;  %14452 = vmatprep.subr.bf16.mxu1 %v17248_v54  ;;  %v17326_v52 = vcombine.high %v2099_v44, %v2107_v45  ;;  %v17328_v54 = vcombine.high %v2100_v47, %v2108_v48  ;;  %v125_v35 = vld [vmem:[#allocation2 + $0x170] sm:$0xff]  ;;  %v126_v38 = vld [vmem:[#allocation2 + $0x178] sm:$0xff] }
 0x633   :  { %14125 = vmatpush1.bf16.msra.mxu0 %v17245_v63  ;;  %14453 = vmatpush1.bf16.msra.mxu1 %v17247_v1  ;;  %v17325_v63 = vcombine.low %v2099_v44, %v2107_v45  ;;  %v17327_v1 = vcombine.low %v2100_v47, %v2108_v48  ;;  %v133_v44 = vld [vmem:[#allocation2 + $0x1b0] sm:$0xff]  ;;  %v134_v47 = vld [vmem:[#allocation2 + $0x1b8] sm:$0xff] }
 0x634   :  { %14126 = vmatprep.subr.bf16.mxu0 %v17262_v4  ;;  %14454 = vmatprep.subr.bf16.mxu1 %v17264_v5  ;;  %v17342_v4 = vcombine.high %v2115_v56, %v2123_v58  ;;  %v17344_v5 = vcombine.high %v2116_v60, %v2124_v62  ;;  %v141_v45 = vld [vmem:[#allocation2 + $0x1f0] sm:$0xff]  ;;  %v142_v48 = vld [vmem:[#allocation2 + $0x1f8] sm:$0xff] }
 0x637   :  { %14127 = vmatpush1.bf16.msra.mxu0 %v17261_v24  ;;  %14455 = vmatpush1.bf16.msra.mxu1 %v17263_v11  ;;  %v17341_v24 = vcombine.low %v2115_v56, %v2123_v58  ;;  %v17343_v11 = vcombine.low %v2116_v60, %v2124_v62  ;;  %v149_v56 = vld [vmem:[#allocation2 + $0x230] sm:$0xff]  ;;  %v150_v60 = vld [vmem:[#allocation2 + $0x238] sm:$0xff] }
 0x638   :  { %14128 = vmatprep.subr.bf16.mxu0 %v17278_v13  ;;  %14456 = vmatprep.subr.bf16.mxu1 %v17280_v14  ;;  %v15314_v13 = vcombine.high %v85_v7, %v93_v8  ;;  %v15316_v14 = vcombine.high %v86_v9, %v94_v10  ;;  %v157_v58 = vld [vmem:[#allocation2 + $0x270] sm:$0xff]  ;;  %v158_v62 = vld [vmem:[#allocation2 + $0x278] sm:$0xff] }
 0x63b   :  { %14129 = vmatpush1.bf16.msra.mxu0 %v17277_v27  ;;  %14457 = vmatpush1.bf16.msra.mxu1 %v17279_v28  ;;  %v15313_v27 = vcombine.low %v85_v7, %v93_v8  ;;  %v15315_v28 = vcombine.low %v86_v9, %v94_v10  ;;  %v173_v7 = vld [vmem:[#allocation2 + $0x2f0] sm:$0xff]  ;;  %v166_v8 = vld [vmem:[#allocation2 + $0x2b8] sm:$0xff]  ;;  %v15377_v10 = vcombine.low %v149_v56, %v157_v58 }
 0x63c   :  { %14130 = vmatprep.subr.bf16.mxu0 %v17294_v31  ;;  %14458 = vmatprep.subr.bf16.mxu1 %v17296_v32  ;;  %v15330_v31 = vcombine.high %v101_v17, %v109_v18  ;;  %v15332_v32 = vcombine.high %v102_v21, %v110_v26  ;;  %v174_v9 = vld [vmem:[#allocation2 + $0x2f8] sm:$0xff] }
 0x63f   :  { %14131 = vmatpush1.bf16.msra.mxu0 %v17293_v40  ;;  %14459 = vmatpush1.bf16.msra.mxu1 %v17295_v41  ;;  %v15329_v40 = vcombine.low %v101_v17, %v109_v18  ;;  %v15331_v41 = vcombine.low %v102_v21, %v110_v26  ;;  %v189_v17 = vld [vmem:[#allocation2 + $0x370] sm:$0xff]  ;;  %v182_v18 = vld [vmem:[#allocation2 + $0x338] sm:$0xff] }
 0x640   :  { %14132 = vmatprep.subr.bf16.mxu0 %v17310_v42  ;;  %14460 = vmatprep.subr.bf16.mxu1 %v17312_v43  ;;  %v15346_v42 = vcombine.high %v117_v34, %v125_v35  ;;  %v15348_v43 = vcombine.high %v118_v37, %v126_v38  ;;  %v190_v21 = vld [vmem:[#allocation2 + $0x378] sm:$0xff] }
 0x643   :  { %14133 = vmatpush1.bf16.msra.mxu0 %v17309_v50  ;;  %14461 = vmatpush1.bf16.msra.mxu1 %v17311_v51  ;;  %v15345_v50 = vcombine.low %v117_v34, %v125_v35  ;;  %v15347_v51 = vcombine.low %v118_v37, %v126_v38  ;;  %v205_v34 = vld [vmem:[#allocation2 + $0x3f0] sm:$0xff]  ;;  %v198_v35 = vld [vmem:[#allocation2 + $0x3b8] sm:$0xff] }
 0x644   :  { %14134 = vmatprep.subr.bf16.mxu0 %v17326_v52  ;;  %14462 = vmatprep.subr.bf16.mxu1 %v17328_v54  ;;  %v15362_v52 = vcombine.high %v133_v44, %v141_v45  ;;  %v15364_v54 = vcombine.high %v134_v47, %v142_v48  ;;  %v206_v37 = vld [vmem:[#allocation2 + $0x3f8] sm:$0xff] }
 0x647   :  { %14135 = vmatpush1.bf16.msra.mxu0 %v17325_v63  ;;  %14463 = vmatpush1.bf16.msra.mxu1 %v17327_v1  ;;  %v15361_v63 = vcombine.low %v133_v44, %v141_v45  ;;  %v15363_v1 = vcombine.low %v134_v47, %v142_v48  ;;  %v221_v44 = vld [vmem:[#allocation2 + $0x470] sm:$0xff]  ;;  %v214_v45 = vld [vmem:[#allocation2 + $0x438] sm:$0xff] }
 0x648   :  { %14136 = vmatprep.subr.bf16.mxu0 %v17342_v4  ;;  %14464 = vmatprep.subr.bf16.mxu1 %v17344_v5  ;;  %v15378_v4 = vcombine.high %v149_v56, %v157_v58  ;;  %v165_v5 = vld [vmem:[#allocation2 + $0x2b0] sm:$0xff]  ;;  %v222_v47 = vld [vmem:[#allocation2 + $0x478] sm:$0xff] }
 0x649   :  { %v15393_v26 = vcombine.low %v165_v5, %v173_v7  ;;  %v237_v56 = vld [vmem:[#allocation2 + $0x4f0] sm:$0xff]  ;;  %v230_v58 = vld [vmem:[#allocation2 + $0x4b8] sm:$0xff] }
 0x64b   :  { %14137 = vmatpush1.bf16.msra.mxu0 %v17341_v24  ;;  %14465 = vmatpush1.bf16.msra.mxu1 %v17343_v11  ;;  %v15379_v24 = vcombine.low %v150_v60, %v158_v62  ;;  %v15394_v11 = vcombine.high %v165_v5, %v173_v7  ;;  %v253_v5 = vld [vmem:[#allocation2 + $0x570] sm:$0xff]  ;;  %v246_v7 = vld [vmem:[#allocation2 + $0x538] sm:$0xff] }
 0x64c   :  { %14475 = vmatprep.subr.bf16.mxu0 %v15314_v13  ;;  %14803 = vmatprep.subr.bf16.mxu1 %v15316_v14  ;;  %v15396_v13 = vcombine.high %v166_v8, %v174_v9  ;;  %v181_v14 = vld [vmem:[#allocation2 + $0x330] sm:$0xff] }
 0x64d   :  { %v15409_v38 = vcombine.low %v181_v14, %v189_v17 }
 0x64e   :  { %14139 = vmatmul.mubr.bf16.vlgmr.msra.gmra.mrb[8].mxu0 %v18020_v0  ;;  %14467 = vmatmul.mubr.bf16.vlgmr.msra.gmra.mrb[8].mxu1 %v18020_v0 }
 0x64f   :  { %14476 = vmatpush1.bf16.msra.mxu0 %v15313_v27  ;;  %14804 = vmatpush1.bf16.msra.mxu1 %v15315_v28  ;;  %v15395_v27 = vcombine.low %v166_v8, %v174_v9  ;;  %v15410_v28 = vcombine.high %v181_v14, %v189_v17  ;;  %v254_v8 = vld [vmem:[#allocation2 + $0x578] sm:$0xff]  ;;  %v269_v14 = vld [vmem:[#allocation2 + $0x5f0] sm:$0xff] }
 0x650   :  { %14477 = vmatprep.subr.bf16.mxu0 %v15330_v31  ;;  %14805 = vmatprep.subr.bf16.mxu1 %v15332_v32  ;;  %v15412_v31 = vcombine.high %v182_v18, %v190_v21  ;;  %v197_v32 = vld [vmem:[#allocation2 + $0x3b0] sm:$0xff]  ;;  %v262_v17 = vld [vmem:[#allocation2 + $0x5b8] sm:$0xff] }
 0x651   :  { %14507 = vmatprep.mubr.bf16.mxu0 %v17895_v57  ;;  %14835 = vmatprep.mubr.bf16.mxu1 %v17895_v57  ;;  %v15380_v57 = vcombine.high %v150_v60, %v158_v62  ;;  %v15425_v48 = vcombine.low %v197_v32, %v205_v34  ;;  %v238_v60 = vld [vmem:[#allocation2 + $0x4f8] sm:$0xff] }
 0x653   :  { %14478 = vmatpush1.bf16.msra.mxu0 %v15329_v40  ;;  %14806 = vmatpush1.bf16.msra.mxu1 %v15331_v41  ;;  %v15411_v40 = vcombine.low %v182_v18, %v190_v21  ;;  %v15426_v41 = vcombine.high %v197_v32, %v205_v34  ;;  %v270_v18 = vld [vmem:[#allocation2 + $0x5f8] sm:$0xff]  ;;  %v285_v32 = vld [vmem:[#allocation2 + $0x670] sm:$0xff] }
 0x654   :  { %14479 = vmatprep.subr.bf16.mxu0 %v15346_v42  ;;  %14807 = vmatprep.subr.bf16.mxu1 %v15348_v43  ;;  %v15428_v42 = vcombine.high %v198_v35, %v206_v37  ;;  %v213_v43 = vld [vmem:[#allocation2 + $0x430] sm:$0xff]  ;;  %v278_v34 = vld [vmem:[#allocation2 + $0x638] sm:$0xff] }
 0x655   :  { %v15441_v62 = vcombine.low %v213_v43, %v221_v44 }
 0x657   :  { %14480 = vmatpush1.bf16.msra.mxu0 %v15345_v50  ;;  %14808 = vmatpush1.bf16.msra.mxu1 %v15347_v51  ;;  %v15427_v50 = vcombine.low %v198_v35, %v206_v37  ;;  %v15442_v51 = vcombine.high %v213_v43, %v221_v44  ;;  %v286_v35 = vld [vmem:[#allocation2 + $0x678] sm:$0xff]  ;;  %v301_v43 = vld [vmem:[#allocation2 + $0x6f0] sm:$0xff] }
 0x658   :  { %14481 = vmatprep.subr.bf16.mxu0 %v15362_v52  ;;  %14809 = vmatprep.subr.bf16.mxu1 %v15364_v54  ;;  %v15444_v52 = vcombine.high %v214_v45, %v222_v47  ;;  %v229_v54 = vld [vmem:[#allocation2 + $0x4b0] sm:$0xff]  ;;  %v294_v44 = vld [vmem:[#allocation2 + $0x6b8] sm:$0xff] }
 0x659   :  { %v15457_v9 = vcombine.low %v229_v54, %v237_v56 }
 0x65b   :  { %14482 = vmatpush1.bf16.msra.mxu0 %v15361_v63  ;;  %14810 = vmatpush1.bf16.msra.mxu1 %v15363_v1  ;;  %v15443_v63 = vcombine.low %v214_v45, %v222_v47  ;;  %v15458_v1 = vcombine.high %v229_v54, %v237_v56  ;;  %v302_v45 = vld [vmem:[#allocation2 + $0x6f8] sm:$0xff]  ;;  %v317_v54 = vld [vmem:[#allocation2 + $0x770] sm:$0xff] }
 0x65c   :  { %14483 = vmatprep.subr.bf16.mxu0 %v15378_v4  ;;  %14811 = vmatprep.subr.bf16.mxu1 %v15380_v57  ;;  %v15460_v4 = vcombine.high %v230_v58, %v238_v60  ;;  %v245_v57 = vld [vmem:[#allocation2 + $0x530] sm:$0xff]  ;;  %v310_v56 = vld [vmem:[#allocation2 + $0x738] sm:$0xff] }
 0x65d   :  { %v15473_v21 = vcombine.low %v245_v57, %v253_v5 }
 0x65f   :  { %14484 = vmatpush1.bf16.msra.mxu0 %v15377_v10  ;;  %14812 = vmatpush1.bf16.msra.mxu1 %v15379_v24  ;;  %v15459_v10 = vcombine.low %v230_v58, %v238_v60  ;;  %v15474_v24 = vcombine.high %v245_v57, %v253_v5  ;;  %v318_v58 = vld [vmem:[#allocation2 + $0x778] sm:$0xff]  ;;  %v333_v57 = vld [vmem:[#allocation2 + $0x7f0] sm:$0xff] }
 0x660   :  { %14485 = vmatprep.subr.bf16.mxu0 %v15394_v11  ;;  %14813 = vmatprep.subr.bf16.mxu1 %v15396_v13  ;;  %v15476_v11 = vcombine.high %v246_v7, %v254_v8  ;;  %v261_v13 = vld [vmem:[#allocation2 + $0x5b0] sm:$0xff]  ;;  %v326_v5 = vld [vmem:[#allocation2 + $0x7b8] sm:$0xff] }
 0x661   :  { %v15489_v37 = vcombine.low %v261_v13, %v269_v14 }
 0x663   :  { %14486 = vmatpush1.bf16.msra.mxu0 %v15393_v26  ;;  %14814 = vmatpush1.bf16.msra.mxu1 %v15395_v27  ;;  %v15475_v26 = vcombine.low %v246_v7, %v254_v8  ;;  %v15490_v27 = vcombine.high %v261_v13, %v269_v14  ;;  %v334_v7 = vld [vmem:[#allocation2 + $0x7f8] sm:$0xff]  ;;  %v349_v13 = vld [vmem:[#allocation2 + $0x870] sm:$0xff] }
 0x664   :  { %14487 = vmatprep.subr.bf16.mxu0 %v15410_v28  ;;  %14815 = vmatprep.subr.bf16.mxu1 %v15412_v31  ;;  %v15492_v28 = vcombine.high %v262_v17, %v270_v18  ;;  %v277_v31 = vld [vmem:[#allocation2 + $0x630] sm:$0xff]  ;;  %v342_v14 = vld [vmem:[#allocation2 + $0x838] sm:$0xff] }
 0x665   :  { %v15505_v47 = vcombine.low %v277_v31, %v285_v32 }
 0x667   :  { %14488 = vmatpush1.bf16.msra.mxu0 %v15409_v38  ;;  %14816 = vmatpush1.bf16.msra.mxu1 %v15411_v40  ;;  %v15491_v38 = vcombine.low %v262_v17, %v270_v18  ;;  %v15506_v40 = vcombine.high %v277_v31, %v285_v32  ;;  %v350_v17 = vld [vmem:[#allocation2 + $0x878] sm:$0xff]  ;;  %v365_v31 = vld [vmem:[#allocation2 + $0x8f0] sm:$0xff] }
 0x668   :  { %14489 = vmatprep.subr.bf16.mxu0 %v15426_v41  ;;  %14817 = vmatprep.subr.bf16.mxu1 %v15428_v42  ;;  %v15508_v41 = vcombine.high %v278_v34, %v286_v35  ;;  %v293_v42 = vld [vmem:[#allocation2 + $0x6b0] sm:$0xff]  ;;  %v358_v32 = vld [vmem:[#allocation2 + $0x8b8] sm:$0xff] }
 0x669   :  { %v15521_v60 = vcombine.low %v293_v42, %v301_v43 }
 0x66b   :  { %14490 = vmatpush1.bf16.msra.mxu0 %v15425_v48  ;;  %14818 = vmatpush1.bf16.msra.mxu1 %v15427_v50  ;;  %v15507_v48 = vcombine.low %v278_v34, %v286_v35  ;;  %v15522_v50 = vcombine.high %v293_v42, %v301_v43  ;;  %v366_v34 = vld [vmem:[#allocation2 + $0x8f8] sm:$0xff]  ;;  %v381_v42 = vld [vmem:[#allocation2 + $0x970] sm:$0xff] }
 0x66c   :  { %14491 = vmatprep.subr.bf16.mxu0 %v15442_v51  ;;  %14819 = vmatprep.subr.bf16.mxu1 %v15444_v52  ;;  %v15524_v51 = vcombine.high %v294_v44, %v302_v45  ;;  %v309_v52 = vld [vmem:[#allocation2 + $0x730] sm:$0xff]  ;;  %v374_v43 = vld [vmem:[#allocation2 + $0x938] sm:$0xff] }
 0x66d   :  { %v15537_v8 = vcombine.low %v309_v52, %v317_v54 }
 0x66f   :  { %14492 = vmatpush1.bf16.msra.mxu0 %v15441_v62  ;;  %14820 = vmatpush1.bf16.msra.mxu1 %v15443_v63  ;;  %v15523_v62 = vcombine.low %v294_v44, %v302_v45  ;;  %v15538_v63 = vcombine.high %v309_v52, %v317_v54  ;;  %v382_v44 = vld [vmem:[#allocation2 + $0x978] sm:$0xff]  ;;  %v397_v52 = vld [vmem:[#allocation2 + $0x9f0] sm:$0xff] }
 0x670   :  { %14493 = vmatprep.subr.bf16.mxu0 %v15458_v1  ;;  %14821 = vmatprep.subr.bf16.mxu1 %v15460_v4  ;;  %v15540_v1 = vcombine.high %v310_v56, %v318_v58  ;;  %v325_v4 = vld [vmem:[#allocation2 + $0x7b0] sm:$0xff]  ;;  %v390_v54 = vld [vmem:[#allocation2 + $0x9b8] sm:$0xff] }
 0x671   :  { %v15553_v18 = vcombine.low %v325_v4, %v333_v57 }
 0x673   :  { %14494 = vmatpush1.bf16.msra.mxu0 %v15457_v9  ;;  %14822 = vmatpush1.bf16.msra.mxu1 %v15459_v10  ;;  %v15539_v9 = vcombine.low %v310_v56, %v318_v58  ;;  %v15554_v10 = vcombine.high %v325_v4, %v333_v57  ;;  %v398_v56 = vld [vmem:[#allocation2 + $0x9f8] sm:$0xff] }
 0x674   :  { %14495 = vmatprep.subr.bf16.mxu0 %v15474_v24  ;;  %14823 = vmatprep.subr.bf16.mxu1 %v15476_v11  ;;  %v15556_v24 = vcombine.high %v326_v5, %v334_v7  ;;  %v341_v11 = vld [vmem:[#allocation2 + $0x830] sm:$0xff]  ;;  %v406_v4 = vld [vmem:[#allocation2 + $0xa38] sm:$0xff] }
 0x675   :  { %v15569_v35 = vcombine.low %v341_v11, %v349_v13  ;;  %v414_v57 = vld [vmem:[#allocation2 + $0xa78] sm:$0xff] }
 0x677   :  { %14496 = vmatpush1.bf16.msra.mxu0 %v15473_v21  ;;  %14824 = vmatpush1.bf16.msra.mxu1 %v15475_v26  ;;  %v15555_v21 = vcombine.low %v326_v5, %v334_v7  ;;  %v15570_v26 = vcombine.high %v341_v11, %v349_v13  ;;  %v15619_v7 = vcombine.low %v390_v54, %v398_v56  ;;  %v430_v11 = vld [vmem:[#allocation2 + $0xaf8] sm:$0xff] }
 0x678   :  { %14497 = vmatprep.subr.bf16.mxu0 %v15490_v27  ;;  %14825 = vmatprep.subr.bf16.mxu1 %v15492_v28  ;;  %v15572_v27 = vcombine.high %v342_v14, %v350_v17  ;;  %v357_v28 = vld [vmem:[#allocation2 + $0x8b0] sm:$0xff] }
 0x679   :  { %v15585_v45 = vcombine.low %v357_v28, %v365_v31 }
 0x67b   :  { %14498 = vmatpush1.bf16.msra.mxu0 %v15489_v37  ;;  %14826 = vmatpush1.bf16.msra.mxu1 %v15491_v38  ;;  %v15571_v37 = vcombine.low %v342_v14, %v350_v17  ;;  %v15586_v38 = vcombine.high %v357_v28, %v365_v31  ;;  %v15635_v14 = vcombine.low %v406_v4, %v414_v57  ;;  %v446_v28 = vld [vmem:[#allocation2 + $0xb78] sm:$0xff] }
 0x67c   :  { %14499 = vmatprep.subr.bf16.mxu0 %v15506_v40  ;;  %14827 = vmatprep.subr.bf16.mxu1 %v15508_v41  ;;  %v15588_v40 = vcombine.high %v358_v32, %v366_v34  ;;  %v373_v41 = vld [vmem:[#allocation2 + $0x930] sm:$0xff] }
 0x67d   :  { %v15601_v58 = vcombine.low %v373_v41, %v381_v42 }
 0x67f   :  { %14500 = vmatpush1.bf16.msra.mxu0 %v15505_v47  ;;  %14828 = vmatpush1.bf16.msra.mxu1 %v15507_v48  ;;  %v15587_v47 = vcombine.low %v358_v32, %v366_v34  ;;  %v15602_v48 = vcombine.high %v373_v41, %v381_v42  ;;  %v462_v41 = vld [vmem:[#allocation2 + $0xbf8] sm:$0xff] }
 0x680   :  { %14501 = vmatprep.subr.bf16.mxu0 %v15522_v50  ;;  %14829 = vmatprep.subr.bf16.mxu1 %v15524_v51  ;;  %v15604_v50 = vcombine.high %v374_v43, %v382_v44  ;;  %v389_v51 = vld [vmem:[#allocation2 + $0x9b0] sm:$0xff] }
 0x681   :  { %v15617_v5 = vcombine.low %v389_v51, %v397_v52 }
 0x683   :  { %14502 = vmatpush1.bf16.msra.mxu0 %v15521_v60  ;;  %14830 = vmatpush1.bf16.msra.mxu1 %v15523_v62  ;;  %v15618_v60 = vcombine.high %v389_v51, %v397_v52  ;;  %v15620_v62 = vcombine.high %v390_v54, %v398_v56  ;;  %v478_v51 = vld [vmem:[#allocation2 + $0xc78] sm:$0xff] }
 0x684   :  { %14503 = vmatprep.subr.bf16.mxu0 %v15538_v63  ;;  %14831 = vmatprep.subr.bf16.mxu1 %v15540_v1  ;;  %v405_v63 = vld [vmem:[#allocation2 + $0xa30] sm:$0xff] }
 0x685   :  { %v413_v1 = vld [vmem:[#allocation2 + $0xa70] sm:$0xff] }
 0x686   :  { %v15633_v13 = vcombine.low %v405_v63, %v413_v1 }
 0x687   :  { %14504 = vmatpush1.bf16.msra.mxu0 %v15537_v8  ;;  %14832 = vmatpush1.bf16.msra.mxu1 %v15539_v9  ;;  %v15634_v8 = vcombine.high %v405_v63, %v413_v1  ;;  %v421_v9 = vld [vmem:[#allocation2 + $0xab0] sm:$0xff]  ;;  %v494_v63 = vld [vmem:[#allocation2 + $0xcf8] sm:$0xff] }
 0x688   :  { %14505 = vmatprep.subr.bf16.mxu0 %v15554_v10  ;;  %14833 = vmatprep.subr.bf16.mxu1 %v15556_v24  ;;  %v429_v10 = vld [vmem:[#allocation2 + $0xaf0] sm:$0xff]  ;;  %v422_v24 = vld [vmem:[#allocation2 + $0xab8] sm:$0xff] }
 0x689   :  { %v15650_v17 = vcombine.high %v421_v9, %v429_v10  ;;  %v15649_v31 = vcombine.low %v421_v9, %v429_v10  ;;  %v15651_v32 = vcombine.low %v422_v24, %v430_v11  ;;  %v510_v9 = vld [vmem:[#allocation2 + $0xd78] sm:$0xff] }
 0x68b   :  { %14506 = vmatpush1.bf16.msra.mxu0 %v15553_v18  ;;  %14834 = vmatpush1.bf16.msra.mxu1 %v15555_v21  ;;  %v15652_v18 = vcombine.high %v422_v24, %v430_v11  ;;  %v437_v21 = vld [vmem:[#allocation2 + $0xb30] sm:$0xff] }
 0x68c   :  { %14516 = vmatprep.subr.bf16.mxu0 %v15570_v26  ;;  %14844 = vmatprep.subr.bf16.mxu1 %v15572_v27  ;;  %v445_v26 = vld [vmem:[#allocation2 + $0xb70] sm:$0xff]  ;;  %v438_v27 = vld [vmem:[#allocation2 + $0xb38] sm:$0xff] }
 0x68d   :  { %v15666_v34 = vcombine.high %v437_v21, %v445_v26  ;;  %v15665_v42 = vcombine.low %v437_v21, %v445_v26  ;;  %v526_v21 = vld [vmem:[#allocation2 + $0xdf8] sm:$0xff] }
 0x68e   :  { %14508 = vmatmul.mubr.bf16.vlgmr.msra.gmra.mrb[12].mxu0 %v17901_v12  ;;  %14836 = vmatmul.mubr.bf16.vlgmr.msra.gmra.mrb[12].mxu1 %v17901_v12  ;;  %v15603_v12 = vcombine.low %v374_v43, %v382_v44  ;;  %v15667_v43 = vcombine.low %v438_v27, %v446_v28 }
 0x68f   :  { %14517 = vmatpush1.bf16.msra.mxu0 %v15569_v35  ;;  %14845 = vmatpush1.bf16.msra.mxu1 %v15571_v37  ;;  %v15668_v35 = vcombine.high %v438_v27, %v446_v28  ;;  %v453_v37 = vld [vmem:[#allocation2 + $0xbb0] sm:$0xff] }
 0x690   :  { %14518 = vmatprep.subr.bf16.mxu0 %v15586_v38  ;;  %14846 = vmatprep.subr.bf16.mxu1 %v15588_v40  ;;  %v461_v38 = vld [vmem:[#allocation2 + $0xbf0] sm:$0xff]  ;;  %v454_v40 = vld [vmem:[#allocation2 + $0xbb8] sm:$0xff] }
 0x691   :  { %14548 = vmatprep.mubr.bf16.mxu0 %v17910_v53  ;;  %14876 = vmatprep.mubr.bf16.mxu1 %v17910_v53  ;;  %v15636_v53 = vcombine.high %v406_v4, %v414_v57  ;;  %v15682_v44 = vcombine.high %v453_v37, %v461_v38  ;;  %v15681_v52 = vcombine.low %v453_v37, %v461_v38  ;;  %v542_v37 = vld [vmem:[#allocation2 + $0xe78] sm:$0xff] }
 0x692   :  { %v15683_v54 = vcombine.low %v454_v40, %v462_v41 }
 0x693   :  { %14519 = vmatpush1.bf16.msra.mxu0 %v15585_v45  ;;  %14847 = vmatpush1.bf16.msra.mxu1 %v15587_v47  ;;  %v15684_v45 = vcombine.high %v454_v40, %v462_v41  ;;  %v469_v47 = vld [vmem:[#allocation2 + $0xc30] sm:$0xff] }
 0x694   :  { %14520 = vmatprep.subr.bf16.mxu0 %v15602_v48  ;;  %14848 = vmatprep.subr.bf16.mxu1 %v15604_v50  ;;  %v477_v48 = vld [vmem:[#allocation2 + $0xc70] sm:$0xff]  ;;  %v470_v50 = vld [vmem:[#allocation2 + $0xc38] sm:$0xff] }
 0x695   :  { %v15698_v56 = vcombine.high %v469_v47, %v477_v48  ;;  %v15697_v1 = vcombine.low %v469_v47, %v477_v48  ;;  %v15699_v4 = vcombine.low %v470_v50, %v478_v51  ;;  %v558_v47 = vld [vmem:[#allocation2 + $0xef8] sm:$0xff] }
 0x697   :  { %14521 = vmatpush1.bf16.msra.mxu0 %v15601_v58  ;;  %14849 = vmatpush1.bf16.msra.mxu1 %v15603_v12  ;;  %v15700_v58 = vcombine.high %v470_v50, %v478_v51  ;;  %v485_v12 = vld [vmem:[#allocation2 + $0xcb0] sm:$0xff] }
 0x698   :  { %14522 = vmatprep.subr.bf16.mxu0 %v15618_v60  ;;  %14850 = vmatprep.subr.bf16.mxu1 %v15620_v62  ;;  %v493_v60 = vld [vmem:[#allocation2 + $0xcf0] sm:$0xff]  ;;  %v486_v62 = vld [vmem:[#allocation2 + $0xcb8] sm:$0xff] }
 0x699   :  { %v15714_v57 = vcombine.high %v485_v12, %v493_v60  ;;  %v15713_v10 = vcombine.low %v485_v12, %v493_v60  ;;  %v15715_v24 = vcombine.low %v486_v62, %v494_v63  ;;  %v574_v12 = vld [vmem:[#allocation2 + $0xf78] sm:$0xff] }
 0x69b   :  { %14523 = vmatpush1.bf16.msra.mxu0 %v15617_v5  ;;  %14851 = vmatpush1.bf16.msra.mxu1 %v15619_v7  ;;  %v15716_v5 = vcombine.high %v486_v62, %v494_v63  ;;  %v501_v7 = vld [vmem:[#allocation2 + $0xd30] sm:$0xff] }
 0x69c   :  { %14524 = vmatprep.subr.bf16.mxu0 %v15634_v8  ;;  %14852 = vmatprep.subr.bf16.mxu1 %v15636_v53  ;;  %v509_v8 = vld [vmem:[#allocation2 + $0xd70] sm:$0xff]  ;;  %v502_v53 = vld [vmem:[#allocation2 + $0xd38] sm:$0xff] }
 0x69d   :  { %v15730_v11 = vcombine.high %v501_v7, %v509_v8  ;;  %v15729_v26 = vcombine.low %v501_v7, %v509_v8  ;;  %v15731_v27 = vcombine.low %v502_v53, %v510_v9  ;;  %v590_v7 = vld [vmem:[#allocation2 + $0xff8] sm:$0xff] }
 0x69f   :  { %14525 = vmatpush1.bf16.msra.mxu0 %v15633_v13  ;;  %14853 = vmatpush1.bf16.msra.mxu1 %v15635_v14  ;;  %v15732_v13 = vcombine.high %v502_v53, %v510_v9  ;;  %v517_v14 = vld [vmem:[#allocation2 + $0xdb0] sm:$0xff] }
 0x6a0   :  { %14526 = vmatprep.subr.bf16.mxu0 %v15650_v17  ;;  %14854 = vmatprep.subr.bf16.mxu1 %v15652_v18  ;;  %v525_v17 = vld [vmem:[#allocation2 + $0xdf0] sm:$0xff]  ;;  %v518_v18 = vld [vmem:[#allocation2 + $0xdb8] sm:$0xff] }
 0x6a1   :  { %v15746_v28 = vcombine.high %v517_v14, %v525_v17  ;;  %v15745_v38 = vcombine.low %v517_v14, %v525_v17  ;;  %v15747_v40 = vcombine.low %v518_v18, %v526_v21  ;;  %v606_v14 = vld [vmem:[#allocation2 + $0x1078] sm:$0xff] }
 0x6a3   :  { %14527 = vmatpush1.bf16.msra.mxu0 %v15649_v31  ;;  %14855 = vmatpush1.bf16.msra.mxu1 %v15651_v32  ;;  %v15748_v31 = vcombine.high %v518_v18, %v526_v21  ;;  %v533_v32 = vld [vmem:[#allocation2 + $0xe30] sm:$0xff] }
 0x6a4   :  { %14528 = vmatprep.subr.bf16.mxu0 %v15666_v34  ;;  %14856 = vmatprep.subr.bf16.mxu1 %v15668_v35  ;;  %v541_v34 = vld [vmem:[#allocation2 + $0xe70] sm:$0xff]  ;;  %v534_v35 = vld [vmem:[#allocation2 + $0xe38] sm:$0xff] }
 0x6a5   :  { %v15762_v41 = vcombine.high %v533_v32, %v541_v34  ;;  %v15761_v48 = vcombine.low %v533_v32, %v541_v34  ;;  %v15763_v50 = vcombine.low %v534_v35, %v542_v37  ;;  %v622_v32 = vld [vmem:[#allocation2 + $0x10f8] sm:$0xff] }
 0x6a7   :  { %14529 = vmatpush1.bf16.msra.mxu0 %v15665_v42  ;;  %14857 = vmatpush1.bf16.msra.mxu1 %v15667_v43  ;;  %v15764_v42 = vcombine.high %v534_v35, %v542_v37  ;;  %v549_v43 = vld [vmem:[#allocation2 + $0xeb0] sm:$0xff] }
 0x6a8   :  { %14530 = vmatprep.subr.bf16.mxu0 %v15682_v44  ;;  %14858 = vmatprep.subr.bf16.mxu1 %v15684_v45  ;;  %v557_v44 = vld [vmem:[#allocation2 + $0xef0] sm:$0xff]  ;;  %v550_v45 = vld [vmem:[#allocation2 + $0xeb8] sm:$0xff] }
 0x6a9   :  { %v15778_v51 = vcombine.high %v549_v43, %v557_v44  ;;  %v15777_v60 = vcombine.low %v549_v43, %v557_v44  ;;  %v15779_v62 = vcombine.low %v550_v45, %v558_v47  ;;  %v638_v43 = vld [vmem:[#allocation2 + $0x1178] sm:$0xff] }
 0x6ab   :  { %14531 = vmatpush1.bf16.msra.mxu0 %v15681_v52  ;;  %14859 = vmatpush1.bf16.msra.mxu1 %v15683_v54  ;;  %v15780_v52 = vcombine.high %v550_v45, %v558_v47  ;;  %v565_v54 = vld [vmem:[#allocation2 + $0xf30] sm:$0xff] }
 0x6ac   :  { %14532 = vmatprep.subr.bf16.mxu0 %v15698_v56  ;;  %14860 = vmatprep.subr.bf16.mxu1 %v15700_v58  ;;  %v573_v56 = vld [vmem:[#allocation2 + $0xf70] sm:$0xff]  ;;  %v566_v58 = vld [vmem:[#allocation2 + $0xf38] sm:$0xff] }
 0x6ad   :  { %v15794_v63 = vcombine.high %v565_v54, %v573_v56  ;;  %v15793_v8 = vcombine.low %v565_v54, %v573_v56  ;;  %v15795_v53 = vcombine.low %v566_v58, %v574_v12  ;;  %v654_v54 = vld [vmem:[#allocation2 + $0x11f8] sm:$0xff] }
 0x6af   :  { %14533 = vmatpush1.bf16.msra.mxu0 %v15697_v1  ;;  %14861 = vmatpush1.bf16.msra.mxu1 %v15699_v4  ;;  %v15796_v1 = vcombine.high %v566_v58, %v574_v12  ;;  %v581_v4 = vld [vmem:[#allocation2 + $0xfb0] sm:$0xff] }
 0x6b0   :  { %14534 = vmatprep.subr.bf16.mxu0 %v15714_v57  ;;  %14862 = vmatprep.subr.bf16.mxu1 %v15716_v5  ;;  %v589_v57 = vld [vmem:[#allocation2 + $0xff0] sm:$0xff]  ;;  %v582_v5 = vld [vmem:[#allocation2 + $0xfb8] sm:$0xff] }
 0x6b1   :  { %v15810_v9 = vcombine.high %v581_v4, %v589_v57  ;;  %v15809_v17 = vcombine.low %v581_v4, %v589_v57  ;;  %v15811_v18 = vcombine.low %v582_v5, %v590_v7 }
 0x6b3   :  { %14535 = vmatpush1.bf16.msra.mxu0 %v15713_v10  ;;  %14863 = vmatpush1.bf16.msra.mxu1 %v15715_v24  ;;  %v15812_v10 = vcombine.high %v582_v5, %v590_v7  ;;  %v597_v24 = vld [vmem:[#allocation2 + $0x1030] sm:$0xff] }
 0x6b4   :  { %14536 = vmatprep.subr.bf16.mxu0 %v15730_v11  ;;  %14864 = vmatprep.subr.bf16.mxu1 %v15732_v13  ;;  %v605_v11 = vld [vmem:[#allocation2 + $0x1070] sm:$0xff]  ;;  %v598_v13 = vld [vmem:[#allocation2 + $0x1038] sm:$0xff] }
 0x6b5   :  { %v15826_v21 = vcombine.high %v597_v24, %v605_v11  ;;  %v15825_v34 = vcombine.low %v597_v24, %v605_v11  ;;  %v15827_v35 = vcombine.low %v598_v13, %v606_v14  ;;  %v677_v7 = vld [vmem:[#allocation2 + $0x12b0] sm:$0xff] }
 0x6b7   :  { %14537 = vmatpush1.bf16.msra.mxu0 %v15729_v26  ;;  %14865 = vmatpush1.bf16.msra.mxu1 %v15731_v27  ;;  %v15828_v26 = vcombine.high %v598_v13, %v606_v14  ;;  %v613_v27 = vld [vmem:[#allocation2 + $0x10b0] sm:$0xff] }
 0x6b8   :  { %14538 = vmatprep.subr.bf16.mxu0 %v15746_v28  ;;  %14866 = vmatprep.subr.bf16.mxu1 %v15748_v31  ;;  %v621_v28 = vld [vmem:[#allocation2 + $0x10f0] sm:$0xff]  ;;  %v614_v31 = vld [vmem:[#allocation2 + $0x10b8] sm:$0xff] }
 0x6b9   :  { %v15842_v37 = vcombine.high %v613_v27, %v621_v28  ;;  %v15841_v44 = vcombine.low %v613_v27, %v621_v28  ;;  %v15843_v45 = vcombine.low %v614_v31, %v622_v32  ;;  %v693_v14 = vld [vmem:[#allocation2 + $0x1330] sm:$0xff] }
 0x6bb   :  { %14539 = vmatpush1.bf16.msra.mxu0 %v15745_v38  ;;  %14867 = vmatpush1.bf16.msra.mxu1 %v15747_v40  ;;  %v15844_v38 = vcombine.high %v614_v31, %v622_v32  ;;  %v629_v40 = vld [vmem:[#allocation2 + $0x1130] sm:$0xff] }
 0x6bc   :  { %14540 = vmatprep.subr.bf16.mxu0 %v15762_v41  ;;  %14868 = vmatprep.subr.bf16.mxu1 %v15764_v42  ;;  %v637_v41 = vld [vmem:[#allocation2 + $0x1170] sm:$0xff]  ;;  %v630_v42 = vld [vmem:[#allocation2 + $0x1138] sm:$0xff] }
 0x6bd   :  { %v15858_v47 = vcombine.high %v629_v40, %v637_v41  ;;  %v15857_v56 = vcombine.low %v629_v40, %v637_v41  ;;  %v709_v32 = vld [vmem:[#allocation2 + $0x13b0] sm:$0xff] }
 0x6bf   :  { %14541 = vmatpush1.bf16.msra.mxu0 %v15761_v48  ;;  %14869 = vmatpush1.bf16.msra.mxu1 %v15763_v50  ;;  %v15860_v48 = vcombine.high %v630_v42, %v638_v43  ;;  %v645_v50 = vld [vmem:[#allocation2 + $0x11b0] sm:$0xff] }
 0x6c0   :  { %14542 = vmatprep.subr.bf16.mxu0 %v15778_v51  ;;  %14870 = vmatprep.subr.bf16.mxu1 %v15780_v52  ;;  %v653_v51 = vld [vmem:[#allocation2 + $0x11f0] sm:$0xff]  ;;  %v646_v52 = vld [vmem:[#allocation2 + $0x11b8] sm:$0xff] }
 0x6c1   :  { %v15874_v58 = vcombine.high %v645_v50, %v653_v51  ;;  %v15876_v12 = vcombine.high %v646_v52, %v654_v54  ;;  %v15873_v4 = vcombine.low %v645_v50, %v653_v51  ;;  %v15875_v57 = vcombine.low %v646_v52, %v654_v54  ;;  %v741_v54 = vld [vmem:[#allocation2 + $0x14b0] sm:$0xff] }
 0x6c3   :  { %14543 = vmatpush1.bf16.msra.mxu0 %v15777_v60  ;;  %14871 = vmatpush1.bf16.msra.mxu1 %v15779_v62  ;;  %v661_v60 = vld [vmem:[#allocation2 + $0x1230] sm:$0xff] }
 0x6c4   :  { %14544 = vmatprep.subr.bf16.mxu0 %v15794_v63  ;;  %14872 = vmatprep.subr.bf16.mxu1 %v15796_v1  ;;  %v669_v62 = vld [vmem:[#allocation2 + $0x1270] sm:$0xff]  ;;  %v662_v63 = vld [vmem:[#allocation2 + $0x1238] sm:$0xff] }
 0x6c5   :  { %v670_v1 = vld [vmem:[#allocation2 + $0x1278] sm:$0xff]  ;;  %v15890_v5 = vcombine.high %v661_v60, %v669_v62 }
 0x6c6   :  { %v15891_v24 = vcombine.low %v662_v63, %v670_v1 }
 0x6c7   :  { %14545 = vmatpush1.bf16.msra.mxu0 %v15793_v8  ;;  %14873 = vmatpush1.bf16.msra.mxu1 %v15795_v53  ;;  %v685_v8 = vld [vmem:[#allocation2 + $0x12f0] sm:$0xff]  ;;  %v678_v53 = vld [vmem:[#allocation2 + $0x12b8] sm:$0xff] }
 0x6c8   :  { %14546 = vmatprep.subr.bf16.mxu0 %v15810_v9  ;;  %14874 = vmatprep.subr.bf16.mxu1 %v15812_v10  ;;  %v686_v9 = vld [vmem:[#allocation2 + $0x12f8] sm:$0xff]  ;;  %v15889_v10 = vcombine.low %v661_v60, %v669_v62  ;;  %v15906_v11 = vcombine.high %v677_v7, %v685_v8 }
 0x6c9   :  { %v15908_v13 = vcombine.high %v678_v53, %v686_v9  ;;  %v15907_v27 = vcombine.low %v678_v53, %v686_v9  ;;  %v773_v9 = vld [vmem:[#allocation2 + $0x15b0] sm:$0xff] }
 0x6cb   :  { %14547 = vmatpush1.bf16.msra.mxu0 %v15809_v17  ;;  %14875 = vmatpush1.bf16.msra.mxu1 %v15811_v18  ;;  %v701_v17 = vld [vmem:[#allocation2 + $0x1370] sm:$0xff]  ;;  %v694_v18 = vld [vmem:[#allocation2 + $0x1338] sm:$0xff] }
 0x6cc   :  { %14557 = vmatprep.subr.bf16.mxu0 %v15826_v21  ;;  %14885 = vmatprep.subr.bf16.mxu1 %v15828_v26  ;;  %v702_v21 = vld [vmem:[#allocation2 + $0x1378] sm:$0xff]  ;;  %v15905_v26 = vcombine.low %v677_v7, %v685_v8  ;;  %v15922_v28 = vcombine.high %v693_v14, %v701_v17 }
 0x6cd   :  { %v15924_v31 = vcombine.high %v694_v18, %v702_v21  ;;  %v15923_v40 = vcombine.low %v694_v18, %v702_v21  ;;  %v789_v21 = vld [vmem:[#allocation2 + $0x1630] sm:$0xff] }
 0x6ce   :  { %14549 = vmatmul.mubr.bf16.vlgmr.msra.gmra.mrb[12].mxu0 %v17918_v22  ;;  %14877 = vmatmul.mubr.bf16.vlgmr.msra.gmra.mrb[12].mxu1 %v17918_v22  ;;  %v15859_v22 = vcombine.low %v630_v42, %v638_v43  ;;  %v725_v43 = vld [vmem:[#allocation2 + $0x1430] sm:$0xff] }
 0x6cf   :  { %14558 = vmatpush1.bf16.msra.mxu0 %v15825_v34  ;;  %14886 = vmatpush1.bf16.msra.mxu1 %v15827_v35  ;;  %v717_v34 = vld [vmem:[#allocation2 + $0x13f0] sm:$0xff]  ;;  %v710_v35 = vld [vmem:[#allocation2 + $0x13b8] sm:$0xff] }
 0x6d0   :  { %14559 = vmatprep.subr.bf16.mxu0 %v15842_v37  ;;  %14887 = vmatprep.subr.bf16.mxu1 %v15844_v38  ;;  %v718_v37 = vld [vmem:[#allocation2 + $0x13f8] sm:$0xff]  ;;  %v15921_v38 = vcombine.low %v693_v14, %v701_v17  ;;  %v15938_v41 = vcombine.high %v709_v32, %v717_v34 }
 0x6d1   :  { %14589 = vmatprep.mubr.bf16.mxu0 %v17927_v15  ;;  %14917 = vmatprep.mubr.bf16.mxu1 %v17927_v15  ;;  %v15892_v15 = vcombine.high %v662_v63, %v670_v1  ;;  %v15940_v42 = vcombine.high %v710_v35, %v718_v37  ;;  %v15939_v50 = vcombine.low %v710_v35, %v718_v37  ;;  %v757_v1 = vld [vmem:[#allocation2 + $0x1530] sm:$0xff] }
 0x6d2   :  { %v805_v37 = vld [vmem:[#allocation2 + $0x16b0] sm:$0xff] }
 0x6d3   :  { %14560 = vmatpush1.bf16.msra.mxu0 %v15841_v44  ;;  %14888 = vmatpush1.bf16.msra.mxu1 %v15843_v45  ;;  %v733_v44 = vld [vmem:[#allocation2 + $0x1470] sm:$0xff]  ;;  %v726_v45 = vld [vmem:[#allocation2 + $0x1438] sm:$0xff] }
 0x6d4   :  { %14561 = vmatprep.subr.bf16.mxu0 %v15858_v47  ;;  %14889 = vmatprep.subr.bf16.mxu1 %v15860_v48  ;;  %v734_v47 = vld [vmem:[#allocation2 + $0x1478] sm:$0xff]  ;;  %v15937_v48 = vcombine.low %v709_v32, %v717_v34  ;;  %v15954_v51 = vcombine.high %v725_v43, %v733_v44 }
 0x6d5   :  { %v15956_v52 = vcombine.high %v726_v45, %v734_v47  ;;  %v15955_v60 = vcombine.low %v726_v45, %v734_v47  ;;  %v821_v47 = vld [vmem:[#allocation2 + $0x1730] sm:$0xff] }
 0x6d7   :  { %14562 = vmatpush1.bf16.msra.mxu0 %v15857_v56  ;;  %14890 = vmatpush1.bf16.msra.mxu1 %v15859_v22  ;;  %v749_v56 = vld [vmem:[#allocation2 + $0x14f0] sm:$0xff]  ;;  %v742_v22 = vld [vmem:[#allocation2 + $0x14b8] sm:$0xff] }
 0x6d8   :  { %14563 = vmatprep.subr.bf16.mxu0 %v15874_v58  ;;  %14891 = vmatprep.subr.bf16.mxu1 %v15876_v12  ;;  %v750_v58 = vld [vmem:[#allocation2 + $0x14f8] sm:$0xff]  ;;  %v15953_v12 = vcombine.low %v725_v43, %v733_v44  ;;  %v15970_v62 = vcombine.high %v741_v54, %v749_v56 }
 0x6d9   :  { %v15972_v63 = vcombine.high %v742_v22, %v750_v58  ;;  %v15971_v7 = vcombine.low %v742_v22, %v750_v58  ;;  %v837_v58 = vld [vmem:[#allocation2 + $0x17b0] sm:$0xff] }
 0x6db   :  { %14564 = vmatpush1.bf16.msra.mxu0 %v15873_v4  ;;  %14892 = vmatpush1.bf16.msra.mxu1 %v15875_v57  ;;  %v765_v4 = vld [vmem:[#allocation2 + $0x1570] sm:$0xff]  ;;  %v758_v57 = vld [vmem:[#allocation2 + $0x1538] sm:$0xff] }
 0x6dc   :  { %14565 = vmatprep.subr.bf16.mxu0 %v15890_v5  ;;  %14893 = vmatprep.subr.bf16.mxu1 %v15892_v15  ;;  %v766_v5 = vld [vmem:[#allocation2 + $0x1578] sm:$0xff]  ;;  %v15969_v15 = vcombine.low %v741_v54, %v749_v56  ;;  %v15986_v8 = vcombine.high %v757_v1, %v765_v4 }
 0x6dd   :  { %v15988_v53 = vcombine.high %v758_v57, %v766_v5  ;;  %v15987_v14 = vcombine.low %v758_v57, %v766_v5  ;;  %v853_v5 = vld [vmem:[#allocation2 + $0x1830] sm:$0xff] }
 0x6df   :  { %14566 = vmatpush1.bf16.msra.mxu0 %v15889_v10  ;;  %14894 = vmatpush1.bf16.msra.mxu1 %v15891_v24  ;;  %v781_v10 = vld [vmem:[#allocation2 + $0x15f0] sm:$0xff]  ;;  %v774_v24 = vld [vmem:[#allocation2 + $0x15b8] sm:$0xff] }
 0x6e0   :  { %14567 = vmatprep.subr.bf16.mxu0 %v15906_v11  ;;  %14895 = vmatprep.subr.bf16.mxu1 %v15908_v13  ;;  %v782_v11 = vld [vmem:[#allocation2 + $0x15f8] sm:$0xff]  ;;  %v15985_v13 = vcombine.low %v757_v1, %v765_v4  ;;  %v16002_v17 = vcombine.high %v773_v9, %v781_v10 }
 0x6e1   :  { %v16004_v18 = vcombine.high %v774_v24, %v782_v11  ;;  %v16003_v32 = vcombine.low %v774_v24, %v782_v11  ;;  %v869_v11 = vld [vmem:[#allocation2 + $0x18b0] sm:$0xff] }
 0x6e3   :  { %14568 = vmatpush1.bf16.msra.mxu0 %v15905_v26  ;;  %14896 = vmatpush1.bf16.msra.mxu1 %v15907_v27  ;;  %v797_v26 = vld [vmem:[#allocation2 + $0x1670] sm:$0xff]  ;;  %v790_v27 = vld [vmem:[#allocation2 + $0x1638] sm:$0xff] }
 0x6e4   :  { %14569 = vmatprep.subr.bf16.mxu0 %v15922_v28  ;;  %14897 = vmatprep.subr.bf16.mxu1 %v15924_v31  ;;  %v798_v28 = vld [vmem:[#allocation2 + $0x1678] sm:$0xff]  ;;  %v16001_v31 = vcombine.low %v773_v9, %v781_v10  ;;  %v16018_v34 = vcombine.high %v789_v21, %v797_v26 }
 0x6e5   :  { %v16020_v35 = vcombine.high %v790_v27, %v798_v28  ;;  %v16019_v43 = vcombine.low %v790_v27, %v798_v28  ;;  %v885_v28 = vld [vmem:[#allocation2 + $0x1930] sm:$0xff] }
 0x6e7   :  { %14570 = vmatpush1.bf16.msra.mxu0 %v15921_v38  ;;  %14898 = vmatpush1.bf16.msra.mxu1 %v15923_v40  ;;  %v813_v38 = vld [vmem:[#allocation2 + $0x16f0] sm:$0xff]  ;;  %v806_v40 = vld [vmem:[#allocation2 + $0x16b8] sm:$0xff] }
 0x6e8   :  { %14571 = vmatprep.subr.bf16.mxu0 %v15938_v41  ;;  %14899 = vmatprep.subr.bf16.mxu1 %v15940_v42  ;;  %v814_v41 = vld [vmem:[#allocation2 + $0x16f8] sm:$0xff]  ;;  %v16017_v42 = vcombine.low %v789_v21, %v797_v26  ;;  %v16034_v44 = vcombine.high %v805_v37, %v813_v38 }
 0x6e9   :  { %v16036_v45 = vcombine.high %v806_v40, %v814_v41  ;;  %v16035_v54 = vcombine.low %v806_v40, %v814_v41  ;;  %v901_v41 = vld [vmem:[#allocation2 + $0x19b0] sm:$0xff] }
 0x6eb   :  { %14572 = vmatpush1.bf16.msra.mxu0 %v15937_v48  ;;  %14900 = vmatpush1.bf16.msra.mxu1 %v15939_v50  ;;  %v829_v48 = vld [vmem:[#allocation2 + $0x1770] sm:$0xff]  ;;  %v822_v50 = vld [vmem:[#allocation2 + $0x1738] sm:$0xff] }
 0x6ec   :  { %14573 = vmatprep.subr.bf16.mxu0 %v15954_v51  ;;  %14901 = vmatprep.subr.bf16.mxu1 %v15956_v52  ;;  %v830_v51 = vld [vmem:[#allocation2 + $0x1778] sm:$0xff]  ;;  %v16033_v52 = vcombine.low %v805_v37, %v813_v38  ;;  %v16050_v56 = vcombine.high %v821_v47, %v829_v48 }
 0x6ed   :  { %v16052_v22 = vcombine.high %v822_v50, %v830_v51  ;;  %v16051_v1 = vcombine.low %v822_v50, %v830_v51  ;;  %v917_v50 = vld [vmem:[#allocation2 + $0x1a30] sm:$0xff] }
 0x6ee   :  { %v925_v51 = vld [vmem:[#allocation2 + $0x1a70] sm:$0xff] }
 0x6ef   :  { %14574 = vmatpush1.bf16.msra.mxu0 %v15953_v12  ;;  %14902 = vmatpush1.bf16.msra.mxu1 %v15955_v60  ;;  %v845_v12 = vld [vmem:[#allocation2 + $0x17f0] sm:$0xff]  ;;  %v838_v60 = vld [vmem:[#allocation2 + $0x17b8] sm:$0xff] }
 0x6f0   :  { %14575 = vmatprep.subr.bf16.mxu0 %v15970_v62  ;;  %14903 = vmatprep.subr.bf16.mxu1 %v15972_v63  ;;  %v846_v62 = vld [vmem:[#allocation2 + $0x17f8] sm:$0xff]  ;;  %v16049_v63 = vcombine.low %v821_v47, %v829_v48  ;;  %v16066_v4 = vcombine.high %v837_v58, %v845_v12 }
 0x6f1   :  { %v16068_v57 = vcombine.high %v838_v60, %v846_v62  ;;  %v16067_v9 = vcombine.low %v838_v60, %v846_v62  ;;  %v941_v60 = vld [vmem:[#allocation2 + $0x1af0] sm:$0xff]  ;;  %v934_v62 = vld [vmem:[#allocation2 + $0x1ab8] sm:$0xff] }
 0x6f3   :  { %14576 = vmatpush1.bf16.msra.mxu0 %v15969_v15  ;;  %14904 = vmatpush1.bf16.msra.mxu1 %v15971_v7  ;;  %v861_v15 = vld [vmem:[#allocation2 + $0x1870] sm:$0xff]  ;;  %v854_v7 = vld [vmem:[#allocation2 + $0x1838] sm:$0xff] }
 0x6f4   :  { %14577 = vmatprep.subr.bf16.mxu0 %v15986_v8  ;;  %14905 = vmatprep.subr.bf16.mxu1 %v15988_v53  ;;  %v862_v8 = vld [vmem:[#allocation2 + $0x1878] sm:$0xff]  ;;  %v16065_v53 = vcombine.low %v837_v58, %v845_v12  ;;  %v16082_v10 = vcombine.high %v853_v5, %v861_v15  ;;  %v16146_v58 = vcombine.high %v917_v50, %v925_v51  ;;  %v933_v12 = vld [vmem:[#allocation2 + $0x1ab0] sm:$0xff] }
 0x6f5   :  { %v16084_v24 = vcombine.high %v854_v7, %v862_v8  ;;  %v16083_v21 = vcombine.low %v854_v7, %v862_v8  ;;  %v957_v7 = vld [vmem:[#allocation2 + $0x1b70] sm:$0xff]  ;;  %v950_v8 = vld [vmem:[#allocation2 + $0x1b38] sm:$0xff] }
 0x6f7   :  { %14578 = vmatpush1.bf16.msra.mxu0 %v15985_v13  ;;  %14906 = vmatpush1.bf16.msra.mxu1 %v15987_v14  ;;  %v877_v13 = vld [vmem:[#allocation2 + $0x18f0] sm:$0xff]  ;;  %v870_v14 = vld [vmem:[#allocation2 + $0x18b8] sm:$0xff] }
 0x6f8   :  { %14579 = vmatprep.subr.bf16.mxu0 %v16002_v17  ;;  %14907 = vmatprep.subr.bf16.mxu1 %v16004_v18  ;;  %v878_v17 = vld [vmem:[#allocation2 + $0x18f8] sm:$0xff]  ;;  %v16081_v18 = vcombine.low %v853_v5, %v861_v15  ;;  %v16098_v26 = vcombine.high %v869_v11, %v877_v13  ;;  %v949_v15 = vld [vmem:[#allocation2 + $0x1b30] sm:$0xff] }
 0x6f9   :  { %v16100_v27 = vcombine.high %v870_v14, %v878_v17  ;;  %v16099_v37 = vcombine.low %v870_v14, %v878_v17  ;;  %v965_v14 = vld [vmem:[#allocation2 + $0x1bb0] sm:$0xff] }
 0x6fa   :  { %v973_v17 = vld [vmem:[#allocation2 + $0x1bf0] sm:$0xff] }
 0x6fb   :  { %14580 = vmatpush1.bf16.msra.mxu0 %v16001_v31  ;;  %14908 = vmatpush1.bf16.msra.mxu1 %v16003_v32  ;;  %v893_v31 = vld [vmem:[#allocation2 + $0x1970] sm:$0xff]  ;;  %v886_v32 = vld [vmem:[#allocation2 + $0x1938] sm:$0xff] }
 0x6fc   :  { %14581 = vmatprep.subr.bf16.mxu0 %v16018_v34  ;;  %14909 = vmatprep.subr.bf16.mxu1 %v16020_v35  ;;  %v894_v34 = vld [vmem:[#allocation2 + $0x1978] sm:$0xff]  ;;  %v16097_v35 = vcombine.low %v869_v11, %v877_v13  ;;  %v16114_v38 = vcombine.high %v885_v28, %v893_v31 }
 0x6fd   :  { %v16116_v40 = vcombine.high %v886_v32, %v894_v34 }
 0x6ff   :  { %14582 = vmatpush1.bf16.msra.mxu0 %v16017_v42  ;;  %14910 = vmatpush1.bf16.msra.mxu1 %v16019_v43  ;;  %v909_v42 = vld [vmem:[#allocation2 + $0x19f0] sm:$0xff]  ;;  %v902_v43 = vld [vmem:[#allocation2 + $0x19b8] sm:$0xff] }
 0x700   :  { %14583 = vmatprep.subr.bf16.mxu0 %v16034_v44  ;;  %14911 = vmatprep.subr.bf16.mxu1 %v16036_v45  ;;  %v910_v44 = vld [vmem:[#allocation2 + $0x19f8] sm:$0xff]  ;;  %v16113_v45 = vcombine.low %v885_v28, %v893_v31  ;;  %v16130_v47 = vcombine.high %v901_v41, %v909_v42 }
 0x701   :  { %v16132_v48 = vcombine.high %v902_v43, %v910_v44 }
 0x703   :  { %14584 = vmatpush1.bf16.msra.mxu0 %v16033_v52  ;;  %14912 = vmatpush1.bf16.msra.mxu1 %v16035_v54  ;;  %v918_v52 = vld [vmem:[#allocation2 + $0x1a38] sm:$0xff] }
 0x704   :  { %14585 = vmatprep.subr.bf16.mxu0 %v16050_v56  ;;  %14913 = vmatprep.subr.bf16.mxu1 %v16052_v22  ;;  %v926_v54 = vld [vmem:[#allocation2 + $0x1a78] sm:$0xff]  ;;  %v16129_v56 = vcombine.low %v901_v41, %v909_v42  ;;  %v16131_v22 = vcombine.low %v902_v43, %v910_v44  ;;  %v981_v42 = vld [vmem:[#allocation2 + $0x1c30] sm:$0xff] }
 0x705   :  { %v989_v43 = vld [vmem:[#allocation2 + $0x1c70] sm:$0xff]  ;;  %v982_v44 = vld [vmem:[#allocation2 + $0x1c38] sm:$0xff] }
 0x707   :  { %14586 = vmatpush1.bf16.msra.mxu0 %v16049_v63  ;;  %14914 = vmatpush1.bf16.msra.mxu1 %v16051_v1  ;;  %v942_v63 = vld [vmem:[#allocation2 + $0x1af8] sm:$0xff]  ;;  %v16145_v1 = vcombine.low %v917_v50, %v925_v51  ;;  %v997_v51 = vld [vmem:[#allocation2 + $0x1cb0] sm:$0xff] }
 0x708   :  { %14587 = vmatprep.subr.bf16.mxu0 %v16066_v4  ;;  %14915 = vmatprep.subr.bf16.mxu1 %v16068_v57  ;;  %v16147_v4 = vcombine.low %v918_v52, %v926_v54  ;;  %v16162_v57 = vcombine.high %v933_v12, %v941_v60  ;;  %v16164_v5 = vcombine.high %v934_v62, %v942_v63 }
 0x70b   :  { %14588 = vmatpush1.bf16.msra.mxu0 %v16065_v53  ;;  %14916 = vmatpush1.bf16.msra.mxu1 %v16067_v9  ;;  %v958_v53 = vld [vmem:[#allocation2 + $0x1b78] sm:$0xff]  ;;  %v16161_v9 = vcombine.low %v933_v12, %v941_v60  ;;  %v1013_v60 = vld [vmem:[#allocation2 + $0x1d30] sm:$0xff] }
 0x70c   :  { %14598 = vmatprep.subr.bf16.mxu0 %v16082_v10  ;;  %14926 = vmatprep.subr.bf16.mxu1 %v16084_v24  ;;  %v16163_v10 = vcombine.low %v934_v62, %v942_v63  ;;  %v16178_v24 = vcombine.high %v949_v15, %v957_v7  ;;  %v16180_v13 = vcombine.high %v950_v8, %v958_v53  ;;  %v1021_v62 = vld [vmem:[#allocation2 + $0x1d70] sm:$0xff]  ;;  %v1014_v63 = vld [vmem:[#allocation2 + $0x1d38] sm:$0xff] }
 0x70e   :  { %14590 = vmatmul.mubr.bf16.vlgmr.msra.gmra.mrb[12].mxu0 %v17935_v36  ;;  %14918 = vmatmul.mubr.bf16.vlgmr.msra.gmra.mrb[12].mxu1 %v17935_v36  ;;  %v16115_v36 = vcombine.low %v886_v32, %v894_v34  ;;  %v16177_v32 = vcombine.low %v949_v15, %v957_v7  ;;  %v1029_v7 = vld [vmem:[#allocation2 + $0x1db0] sm:$0xff] }
 0x70f   :  { %14599 = vmatpush1.bf16.msra.mxu0 %v16081_v18  ;;  %14927 = vmatpush1.bf16.msra.mxu1 %v16083_v21 }
 0x710   :  { %14600 = vmatprep.subr.bf16.mxu0 %v16098_v26  ;;  %14928 = vmatprep.subr.bf16.mxu1 %v16100_v27  ;;  %v966_v26 = vld [vmem:[#allocation2 + $0x1bb8] sm:$0xff] }
 0x711   :  { %14630 = vmatprep.mubr.bf16.mxu0 %v17944_v25  ;;  %14958 = vmatprep.mubr.bf16.mxu1 %v17944_v25  ;;  %v16148_v25 = vcombine.high %v918_v52, %v926_v54  ;;  %v974_v27 = vld [vmem:[#allocation2 + $0x1bf8] sm:$0xff]  ;;  %v1005_v52 = vld [vmem:[#allocation2 + $0x1cf0] sm:$0xff] }
 0x712   :  { %v16196_v41 = vcombine.high %v966_v26, %v974_v27  ;;  %v998_v54 = vld [vmem:[#allocation2 + $0x1cb8] sm:$0xff] }
 0x713   :  { %14601 = vmatpush1.bf16.msra.mxu0 %v16097_v35  ;;  %14929 = vmatpush1.bf16.msra.mxu1 %v16099_v37  ;;  %v16179_v37 = vcombine.low %v950_v8, %v958_v53  ;;  %v1037_v8 = vld [vmem:[#allocation2 + $0x1df0] sm:$0xff]  ;;  %v1030_v53 = vld [vmem:[#allocation2 + $0x1db8] sm:$0xff] }
 0x714   :  { %14602 = vmatprep.subr.bf16.mxu0 %v16114_v38  ;;  %14930 = vmatprep.subr.bf16.mxu1 %v16116_v40  ;;  %v16194_v38 = vcombine.high %v965_v14, %v973_v17 }
 0x717   :  { %14603 = vmatpush1.bf16.msra.mxu0 %v16113_v45  ;;  %14931 = vmatpush1.bf16.msra.mxu1 %v16115_v36  ;;  %v990_v45 = vld [vmem:[#allocation2 + $0x1c78] sm:$0xff]  ;;  %v16193_v36 = vcombine.low %v965_v14, %v973_v17  ;;  %v1045_v17 = vld [vmem:[#allocation2 + $0x1e30] sm:$0xff] }
 0x718   :  { %14604 = vmatprep.subr.bf16.mxu0 %v16130_v47  ;;  %14932 = vmatprep.subr.bf16.mxu1 %v16132_v48  ;;  %v16195_v47 = vcombine.low %v966_v26, %v974_v27  ;;  %v16210_v48 = vcombine.high %v981_v42, %v989_v43  ;;  %v16212_v50 = vcombine.high %v982_v44, %v990_v45  ;;  %v1053_v26 = vld [vmem:[#allocation2 + $0x1e70] sm:$0xff]  ;;  %v1046_v27 = vld [vmem:[#allocation2 + $0x1e38] sm:$0xff] }
 0x71b   :  { %14605 = vmatpush1.bf16.msra.mxu0 %v16129_v56  ;;  %14933 = vmatpush1.bf16.msra.mxu1 %v16131_v22  ;;  %v1006_v56 = vld [vmem:[#allocation2 + $0x1cf8] sm:$0xff]  ;;  %v16209_v22 = vcombine.low %v981_v42, %v989_v43  ;;  %v16273_v43 = vcombine.low %v1045_v17, %v1053_v26 }
 0x71c   :  { %14606 = vmatprep.subr.bf16.mxu0 %v16146_v58  ;;  %14934 = vmatprep.subr.bf16.mxu1 %v16148_v25  ;;  %v16211_v58 = vcombine.low %v982_v44, %v990_v45  ;;  %v16226_v25 = vcombine.high %v997_v51, %v1005_v52  ;;  %v16228_v12 = vcombine.high %v998_v54, %v1006_v56  ;;  %v1070_v42 = vld [vmem:[#allocation2 + $0x1ef8] sm:$0xff] }
 0x71f   :  { %14607 = vmatpush1.bf16.msra.mxu0 %v16145_v1  ;;  %14935 = vmatpush1.bf16.msra.mxu1 %v16147_v4  ;;  %v1022_v1 = vld [vmem:[#allocation2 + $0x1d78] sm:$0xff]  ;;  %v16225_v4 = vcombine.low %v997_v51, %v1005_v52 }
 0x720   :  { %14608 = vmatprep.subr.bf16.mxu0 %v16162_v57  ;;  %14936 = vmatprep.subr.bf16.mxu1 %v16164_v5  ;;  %v16227_v57 = vcombine.low %v998_v54, %v1006_v56  ;;  %v16242_v5 = vcombine.high %v1013_v60, %v1021_v62  ;;  %v16244_v15 = vcombine.high %v1014_v63, %v1022_v1  ;;  %v1086_v51 = vld [vmem:[#allocation2 + $0x1f78] sm:$0xff] }
 0x721   :  { %v18118_v11 = vpop.f32.mrb[8].mxu0  ;;  %v18120_v18 = vpop.f32.mrb[8].mxu1 }
 0x722   :  { %v18122_v21 = vpop.f32.mrb[9].mxu0  ;;  %v18124_v28 = vpop.f32.mrb[9].mxu1 }
 0x723   :  { %v14144_v31 = vpop.f32.mrb[10].mxu0  ;;  %14609 = vmatpush1.bf16.msra.mxu0 %v16161_v9  ;;  %v14472_v34 = vpop.f32.mrb[10].mxu1  ;;  %14937 = vmatpush1.bf16.msra.mxu1 %v16163_v10  ;;  %v1038_v9 = vld [vmem:[#allocation2 + $0x1df8] sm:$0xff]  ;;  %v16241_v10 = vcombine.low %v1013_v60, %v1021_v62 }
 0x724   :  { %v14145_v35 = vpop.f32.mrb[11].mxu0  ;;  %14610 = vmatprep.subr.bf16.mxu0 %v16178_v24  ;;  %v14473_v40 = vpop.f32.mrb[11].mxu1  ;;  %14938 = vmatprep.subr.bf16.mxu1 %v16180_v13  ;;  %v16243_v24 = vcombine.low %v1014_v63, %v1022_v1  ;;  %v16258_v13 = vcombine.high %v1029_v7, %v1037_v8  ;;  %v16260_v14 = vcombine.high %v1030_v53, %v1038_v9  ;;  %v1054_v31 = vld [vmem:[#allocation2 + $0x1e78] sm:$0xff] }
 0x725   :  { %v16259_v34 = vcombine.low %v1030_v53, %v1038_v9  ;;  %v16274_v35 = vcombine.high %v1045_v17, %v1053_v26  ;;  %v1069_v40 = vld [vmem:[#allocation2 + $0x1ef0] sm:$0xff]  ;;  %v16275_v44 = vcombine.low %v1046_v27, %v1054_v31  ;;  %v1102_v60 = vld [vmem:[#allocation2 + $0x1ff8] sm:$0xff] }
 0x726   :  { %v1134_v17 = vld [vmem:[#allocation2 + $0x20f8] sm:$0xff] }
 0x727   :  { %14611 = vmatpush1.bf16.msra.mxu0 %v16177_v32  ;;  %14939 = vmatpush1.bf16.msra.mxu1 %v16179_v37  ;;  %v16257_v32 = vcombine.low %v1029_v7, %v1037_v8  ;;  %v16276_v37 = vcombine.high %v1046_v27, %v1054_v31  ;;  %v1118_v7 = vld [vmem:[#allocation2 + $0x2078] sm:$0xff] }
 0x728   :  { %14612 = vmatprep.subr.bf16.mxu0 %v16194_v38  ;;  %14940 = vmatprep.subr.bf16.mxu1 %v16196_v41  ;;  %v1061_v38 = vld [vmem:[#allocation2 + $0x1eb0] sm:$0xff]  ;;  %v1062_v41 = vld [vmem:[#allocation2 + $0x1eb8] sm:$0xff] }
 0x729   :  { %v16290_v45 = vcombine.high %v1061_v38, %v1069_v40  ;;  %v16289_v52 = vcombine.low %v1061_v38, %v1069_v40  ;;  %v16291_v54 = vcombine.low %v1062_v41, %v1070_v42  ;;  %v1150_v38 = vld [vmem:[#allocation2 + $0x2178] sm:$0xff] }
 0x72b   :  { %14613 = vmatpush1.bf16.msra.mxu0 %v16193_v36  ;;  %14941 = vmatpush1.bf16.msra.mxu1 %v16195_v47  ;;  %v16292_v36 = vcombine.high %v1062_v41, %v1070_v42  ;;  %v1077_v47 = vld [vmem:[#allocation2 + $0x1f30] sm:$0xff] }
 0x72c   :  { %14614 = vmatprep.subr.bf16.mxu0 %v16210_v48  ;;  %14942 = vmatprep.subr.bf16.mxu1 %v16212_v50  ;;  %v1085_v48 = vld [vmem:[#allocation2 + $0x1f70] sm:$0xff]  ;;  %v1078_v50 = vld [vmem:[#allocation2 + $0x1f38] sm:$0xff] }
 0x72d   :  { %v16306_v56 = vcombine.high %v1077_v47, %v1085_v48  ;;  %v16305_v62 = vcombine.low %v1077_v47, %v1085_v48  ;;  %v16307_v63 = vcombine.low %v1078_v50, %v1086_v51  ;;  %v1166_v47 = vld [vmem:[#allocation2 + $0x21f8] sm:$0xff] }
 0x72f   :  { %14615 = vmatpush1.bf16.msra.mxu0 %v16209_v22  ;;  %14943 = vmatpush1.bf16.msra.mxu1 %v16211_v58  ;;  %v16308_v22 = vcombine.high %v1078_v50, %v1086_v51  ;;  %v1093_v58 = vld [vmem:[#allocation2 + $0x1fb0] sm:$0xff] }
 0x730   :  { %14616 = vmatprep.subr.bf16.mxu0 %v16226_v25  ;;  %14944 = vmatprep.subr.bf16.mxu1 %v16228_v12  ;;  %v1101_v25 = vld [vmem:[#allocation2 + $0x1ff0] sm:$0xff]  ;;  %v1094_v12 = vld [vmem:[#allocation2 + $0x1fb8] sm:$0xff] }
 0x731   :  { %v16322_v1 = vcombine.high %v1093_v58, %v1101_v25  ;;  %v16321_v8 = vcombine.low %v1093_v58, %v1101_v25  ;;  %v16323_v53 = vcombine.low %v1094_v12, %v1102_v60 }
 0x733   :  { %14617 = vmatpush1.bf16.msra.mxu0 %v16225_v4  ;;  %14945 = vmatpush1.bf16.msra.mxu1 %v16227_v57  ;;  %v16324_v4 = vcombine.high %v1094_v12, %v1102_v60  ;;  %v1109_v57 = vld [vmem:[#allocation2 + $0x2030] sm:$0xff] }
 0x734   :  { %14618 = vmatprep.subr.bf16.mxu0 %v16242_v5  ;;  %14946 = vmatprep.subr.bf16.mxu1 %v16244_v15  ;;  %v1117_v5 = vld [vmem:[#allocation2 + $0x2070] sm:$0xff]  ;;  %v1110_v15 = vld [vmem:[#allocation2 + $0x2038] sm:$0xff] }
 0x735   :  { %v16338_v9 = vcombine.high %v1109_v57, %v1117_v5  ;;  %v16337_v26 = vcombine.low %v1109_v57, %v1117_v5  ;;  %v16339_v27 = vcombine.low %v1110_v15, %v1118_v7  ;;  %v1189_v60 = vld [vmem:[#allocation2 + $0x22b0] sm:$0xff] }
 0x737   :  { %14619 = vmatpush1.bf16.msra.mxu0 %v16241_v10  ;;  %14947 = vmatpush1.bf16.msra.mxu1 %v16243_v24  ;;  %v16340_v10 = vcombine.high %v1110_v15, %v1118_v7  ;;  %v1125_v24 = vld [vmem:[#allocation2 + $0x20b0] sm:$0xff] }
 0x738   :  { %14620 = vmatprep.subr.bf16.mxu0 %v16258_v13  ;;  %14948 = vmatprep.subr.bf16.mxu1 %v16260_v14  ;;  %v1133_v13 = vld [vmem:[#allocation2 + $0x20f0] sm:$0xff]  ;;  %v1126_v14 = vld [vmem:[#allocation2 + $0x20b8] sm:$0xff] }
 0x739   :  { %v16354_v31 = vcombine.high %v1125_v24, %v1133_v13  ;;  %v16353_v40 = vcombine.low %v1125_v24, %v1133_v13  ;;  %v16355_v41 = vcombine.low %v1126_v14, %v1134_v17  ;;  %v1205_v7 = vld [vmem:[#allocation2 + $0x2330] sm:$0xff] }
 0x73b   :  { %14621 = vmatpush1.bf16.msra.mxu0 %v16257_v32  ;;  %14949 = vmatpush1.bf16.msra.mxu1 %v16259_v34  ;;  %v16356_v32 = vcombine.high %v1126_v14, %v1134_v17  ;;  %v1141_v34 = vld [vmem:[#allocation2 + $0x2130] sm:$0xff] }
 0x73c   :  { %14622 = vmatprep.subr.bf16.mxu0 %v16274_v35  ;;  %14950 = vmatprep.subr.bf16.mxu1 %v16276_v37  ;;  %v1149_v35 = vld [vmem:[#allocation2 + $0x2170] sm:$0xff]  ;;  %v1142_v37 = vld [vmem:[#allocation2 + $0x2138] sm:$0xff] }
 0x73d   :  { %v16370_v42 = vcombine.high %v1141_v34, %v1149_v35  ;;  %v16369_v48 = vcombine.low %v1141_v34, %v1149_v35  ;;  %v1221_v17 = vld [vmem:[#allocation2 + $0x23b0] sm:$0xff] }
 0x73f   :  { %14623 = vmatpush1.bf16.msra.mxu0 %v16273_v43  ;;  %14951 = vmatpush1.bf16.msra.mxu1 %v16275_v44  ;;  %v16372_v43 = vcombine.high %v1142_v37, %v1150_v38  ;;  %v1157_v44 = vld [vmem:[#allocation2 + $0x21b0] sm:$0xff] }
 0x740   :  { %14624 = vmatprep.subr.bf16.mxu0 %v16290_v45  ;;  %14952 = vmatprep.subr.bf16.mxu1 %v16292_v36  ;;  %v1165_v45 = vld [vmem:[#allocation2 + $0x21f0] sm:$0xff]  ;;  %v1158_v36 = vld [vmem:[#allocation2 + $0x21b8] sm:$0xff] }
 0x741   :  { %v16386_v50 = vcombine.high %v1157_v44, %v1165_v45  ;;  %v16388_v51 = vcombine.high %v1158_v36, %v1166_v47  ;;  %v16385_v58 = vcombine.low %v1157_v44, %v1165_v45  ;;  %v16387_v25 = vcombine.low %v1158_v36, %v1166_v47  ;;  %v1253_v47 = vld [vmem:[#allocation2 + $0x24b0] sm:$0xff] }
 0x743   :  { %14625 = vmatpush1.bf16.msra.mxu0 %v16289_v52  ;;  %14953 = vmatpush1.bf16.msra.mxu1 %v16291_v54  ;;  %v1173_v52 = vld [vmem:[#allocation2 + $0x2230] sm:$0xff] }
 0x744   :  { %14626 = vmatprep.subr.bf16.mxu0 %v16306_v56  ;;  %14954 = vmatprep.subr.bf16.mxu1 %v16308_v22  ;;  %v1181_v54 = vld [vmem:[#allocation2 + $0x2270] sm:$0xff]  ;;  %v1174_v56 = vld [vmem:[#allocation2 + $0x2238] sm:$0xff] }
 0x745   :  { %v1182_v22 = vld [vmem:[#allocation2 + $0x2278] sm:$0xff]  ;;  %v16402_v12 = vcombine.high %v1173_v52, %v1181_v54 }
 0x746   :  { %v16403_v57 = vcombine.low %v1174_v56, %v1182_v22 }
 0x747   :  { %14627 = vmatpush1.bf16.msra.mxu0 %v16305_v62  ;;  %14955 = vmatpush1.bf16.msra.mxu1 %v16307_v63  ;;  %v1197_v62 = vld [vmem:[#allocation2 + $0x22f0] sm:$0xff]  ;;  %v1190_v63 = vld [vmem:[#allocation2 + $0x22b8] sm:$0xff] }
 0x748   :  { %14628 = vmatprep.subr.bf16.mxu0 %v16322_v1  ;;  %14956 = vmatprep.subr.bf16.mxu1 %v16324_v4  ;;  %v1198_v1 = vld [vmem:[#allocation2 + $0x22f8] sm:$0xff]  ;;  %v16401_v4 = vcombine.low %v1173_v52, %v1181_v54  ;;  %v16418_v5 = vcombine.high %v1189_v60, %v1197_v62 }
 0x749   :  { %v16420_v15 = vcombine.high %v1190_v63, %v1198_v1  ;;  %v16419_v24 = vcombine.low %v1190_v63, %v1198_v1  ;;  %v1285_v1 = vld [vmem:[#allocation2 + $0x25b0] sm:$0xff] }
 0x74b   :  { %14629 = vmatpush1.bf16.msra.mxu0 %v16321_v8  ;;  %14957 = vmatpush1.bf16.msra.mxu1 %v16323_v53  ;;  %v1213_v8 = vld [vmem:[#allocation2 + $0x2370] sm:$0xff]  ;;  %v1206_v53 = vld [vmem:[#allocation2 + $0x2338] sm:$0xff] }
 0x74c   :  { %14639 = vmatprep.subr.bf16.mxu0 %v16338_v9  ;;  %14967 = vmatprep.subr.bf16.mxu1 %v16340_v10  ;;  %v1214_v9 = vld [vmem:[#allocation2 + $0x2378] sm:$0xff]  ;;  %v16417_v10 = vcombine.low %v1189_v60, %v1197_v62  ;;  %v16434_v13 = vcombine.high %v1205_v7, %v1213_v8 }
 0x74d   :  { %v16436_v14 = vcombine.high %v1206_v53, %v1214_v9  ;;  %v16435_v34 = vcombine.low %v1206_v53, %v1214_v9  ;;  %v1301_v9 = vld [vmem:[#allocation2 + $0x2630] sm:$0xff] }
 0x74e   :  { %14631 = vmatmul.mubr.bf16.vlgmr.msra.gmra.mrb[12].mxu0 %v17952_v55  ;;  %14959 = vmatmul.mubr.bf16.vlgmr.msra.gmra.mrb[12].mxu1 %v17952_v55  ;;  %v16371_v55 = vcombine.low %v1142_v37, %v1150_v38  ;;  %v1237_v38 = vld [vmem:[#allocation2 + $0x2430] sm:$0xff] }
 0x74f   :  { %14640 = vmatpush1.bf16.msra.mxu0 %v16337_v26  ;;  %14968 = vmatpush1.bf16.msra.mxu1 %v16339_v27  ;;  %v1229_v26 = vld [vmem:[#allocation2 + $0x23f0] sm:$0xff]  ;;  %v1222_v27 = vld [vmem:[#allocation2 + $0x23b8] sm:$0xff] }
 0x750   :  { %14641 = vmatprep.subr.bf16.mxu0 %v16354_v31  ;;  %14969 = vmatprep.subr.bf16.mxu1 %v16356_v32  ;;  %v1230_v31 = vld [vmem:[#allocation2 + $0x23f8] sm:$0xff]  ;;  %v16433_v32 = vcombine.low %v1205_v7, %v1213_v8  ;;  %v16450_v35 = vcombine.high %v1221_v17, %v1229_v26 }
 0x751   :  { %14671 = vmatprep.mubr.bf16.mxu0 %v17961_v39  ;;  %14999 = vmatprep.mubr.bf16.mxu1 %v17961_v39  ;;  %v16404_v39 = vcombine.high %v1174_v56, %v1182_v22  ;;  %v16452_v37 = vcombine.high %v1222_v27, %v1230_v31  ;;  %v16451_v44 = vcombine.low %v1222_v27, %v1230_v31  ;;  %v1269_v22 = vld [vmem:[#allocation2 + $0x2530] sm:$0xff] }
 0x752   :  { %v1317_v31 = vld [vmem:[#allocation2 + $0x26b0] sm:$0xff] }
 0x753   :  { %14642 = vmatpush1.bf16.msra.mxu0 %v16353_v40  ;;  %14970 = vmatpush1.bf16.msra.mxu1 %v16355_v41  ;;  %v1245_v40 = vld [vmem:[#allocation2 + $0x2470] sm:$0xff]  ;;  %v1238_v41 = vld [vmem:[#allocation2 + $0x2438] sm:$0xff] }
 0x754   :  { %14643 = vmatprep.subr.bf16.mxu0 %v16370_v42  ;;  %14971 = vmatprep.subr.bf16.mxu1 %v16372_v43  ;;  %v1246_v42 = vld [vmem:[#allocation2 + $0x2478] sm:$0xff]  ;;  %v16449_v43 = vcombine.low %v1221_v17, %v1229_v26  ;;  %v16466_v45 = vcombine.high %v1237_v38, %v1245_v40 }
 0x755   :  { %v16468_v36 = vcombine.high %v1238_v41, %v1246_v42  ;;  %v16467_v52 = vcombine.low %v1238_v41, %v1246_v42  ;;  %v1333_v42 = vld [vmem:[#allocation2 + $0x2730] sm:$0xff] }
 0x757   :  { %14644 = vmatpush1.bf16.msra.mxu0 %v16369_v48  ;;  %14972 = vmatpush1.bf16.msra.mxu1 %v16371_v55  ;;  %v1261_v48 = vld [vmem:[#allocation2 + $0x24f0] sm:$0xff]  ;;  %v1254_v55 = vld [vmem:[#allocation2 + $0x24b8] sm:$0xff] }
 0x758   :  { %14645 = vmatprep.subr.bf16.mxu0 %v16386_v50  ;;  %14973 = vmatprep.subr.bf16.mxu1 %v16388_v51  ;;  %v1262_v50 = vld [vmem:[#allocation2 + $0x24f8] sm:$0xff]  ;;  %v16465_v51 = vcombine.low %v1237_v38, %v1245_v40  ;;  %v16482_v54 = vcombine.high %v1253_v47, %v1261_v48 }
 0x759   :  { %v16484_v56 = vcombine.high %v1254_v55, %v1262_v50  ;;  %v16483_v60 = vcombine.low %v1254_v55, %v1262_v50  ;;  %v1349_v50 = vld [vmem:[#allocation2 + $0x27b0] sm:$0xff] }
 0x75b   :  { %14646 = vmatpush1.bf16.msra.mxu0 %v16385_v58  ;;  %14974 = vmatpush1.bf16.msra.mxu1 %v16387_v25  ;;  %v1277_v58 = vld [vmem:[#allocation2 + $0x2570] sm:$0xff]  ;;  %v1270_v25 = vld [vmem:[#allocation2 + $0x2538] sm:$0xff] }
 0x75c   :  { %14647 = vmatprep.subr.bf16.mxu0 %v16402_v12  ;;  %14975 = vmatprep.subr.bf16.mxu1 %v16404_v39  ;;  %v1278_v12 = vld [vmem:[#allocation2 + $0x2578] sm:$0xff]  ;;  %v16481_v39 = vcombine.low %v1253_v47, %v1261_v48  ;;  %v16498_v62 = vcombine.high %v1269_v22, %v1277_v58 }
 0x75d   :  { %v16500_v63 = vcombine.high %v1270_v25, %v1278_v12  ;;  %v16499_v7 = vcombine.low %v1270_v25, %v1278_v12  ;;  %v1365_v12 = vld [vmem:[#allocation2 + $0x2830] sm:$0xff] }
 0x75f   :  { %14648 = vmatpush1.bf16.msra.mxu0 %v16401_v4  ;;  %14976 = vmatpush1.bf16.msra.mxu1 %v16403_v57  ;;  %v1293_v4 = vld [vmem:[#allocation2 + $0x25f0] sm:$0xff]  ;;  %v1286_v57 = vld [vmem:[#allocation2 + $0x25b8] sm:$0xff] }
 0x760   :  { %14649 = vmatprep.subr.bf16.mxu0 %v16418_v5  ;;  %14977 = vmatprep.subr.bf16.mxu1 %v16420_v15  ;;  %v1294_v5 = vld [vmem:[#allocation2 + $0x25f8] sm:$0xff]  ;;  %v16497_v15 = vcombine.low %v1269_v22, %v1277_v58  ;;  %v16514_v8 = vcombine.high %v1285_v1, %v1293_v4 }
 0x761   :  { %v16516_v53 = vcombine.high %v1286_v57, %v1294_v5  ;;  %v16515_v17 = vcombine.low %v1286_v57, %v1294_v5  ;;  %v1381_v5 = vld [vmem:[#allocation2 + $0x28b0] sm:$0xff] }
 0x763   :  { %14650 = vmatpush1.bf16.msra.mxu0 %v16417_v10  ;;  %14978 = vmatpush1.bf16.msra.mxu1 %v16419_v24  ;;  %v1309_v10 = vld [vmem:[#allocation2 + $0x2670] sm:$0xff]  ;;  %v1302_v24 = vld [vmem:[#allocation2 + $0x2638] sm:$0xff] }
 0x764   :  { %14651 = vmatprep.subr.bf16.mxu0 %v16434_v13  ;;  %14979 = vmatprep.subr.bf16.mxu1 %v16436_v14  ;;  %v1310_v13 = vld [vmem:[#allocation2 + $0x2678] sm:$0xff]  ;;  %v16513_v14 = vcombine.low %v1285_v1, %v1293_v4  ;;  %v16530_v26 = vcombine.high %v1301_v9, %v1309_v10 }
 0x765   :  { %v16532_v27 = vcombine.high %v1302_v24, %v1310_v13  ;;  %v16531_v38 = vcombine.low %v1302_v24, %v1310_v13  ;;  %v1397_v13 = vld [vmem:[#allocation2 + $0x2930] sm:$0xff] }
 0x767   :  { %14652 = vmatpush1.bf16.msra.mxu0 %v16433_v32  ;;  %14980 = vmatpush1.bf16.msra.mxu1 %v16435_v34  ;;  %v1325_v32 = vld [vmem:[#allocation2 + $0x26f0] sm:$0xff]  ;;  %v1318_v34 = vld [vmem:[#allocation2 + $0x26b8] sm:$0xff] }
 0x768   :  { %14653 = vmatprep.subr.bf16.mxu0 %v16450_v35  ;;  %14981 = vmatprep.subr.bf16.mxu1 %v16452_v37  ;;  %v1326_v35 = vld [vmem:[#allocation2 + $0x26f8] sm:$0xff]  ;;  %v16529_v37 = vcombine.low %v1301_v9, %v1309_v10  ;;  %v16546_v40 = vcombine.high %v1317_v31, %v1325_v32 }
 0x769   :  { %v16548_v41 = vcombine.high %v1318_v34, %v1326_v35  ;;  %v16547_v47 = vcombine.low %v1318_v34, %v1326_v35  ;;  %v1413_v35 = vld [vmem:[#allocation2 + $0x29b0] sm:$0xff] }
 0x76b   :  { %14654 = vmatpush1.bf16.msra.mxu0 %v16449_v43  ;;  %14982 = vmatpush1.bf16.msra.mxu1 %v16451_v44  ;;  %v1341_v43 = vld [vmem:[#allocation2 + $0x2770] sm:$0xff]  ;;  %v1334_v44 = vld [vmem:[#allocation2 + $0x2738] sm:$0xff] }
 0x76c   :  { %14655 = vmatprep.subr.bf16.mxu0 %v16466_v45  ;;  %14983 = vmatprep.subr.bf16.mxu1 %v16468_v36  ;;  %v1342_v45 = vld [vmem:[#allocation2 + $0x2778] sm:$0xff]  ;;  %v16545_v36 = vcombine.low %v1317_v31, %v1325_v32  ;;  %v16562_v48 = vcombine.high %v1333_v42, %v1341_v43 }
 0x76d   :  { %v16564_v55 = vcombine.high %v1334_v44, %v1342_v45  ;;  %v16563_v22 = vcombine.low %v1334_v44, %v1342_v45  ;;  %v1429_v44 = vld [vmem:[#allocation2 + $0x2a30] sm:$0xff] }
 0x76e   :  { %v1437_v45 = vld [vmem:[#allocation2 + $0x2a70] sm:$0xff] }
 0x76f   :  { %14656 = vmatpush1.bf16.msra.mxu0 %v16465_v51  ;;  %14984 = vmatpush1.bf16.msra.mxu1 %v16467_v52  ;;  %v1357_v51 = vld [vmem:[#allocation2 + $0x27f0] sm:$0xff]  ;;  %v1350_v52 = vld [vmem:[#allocation2 + $0x27b8] sm:$0xff] }
 0x770   :  { %14657 = vmatprep.subr.bf16.mxu0 %v16482_v54  ;;  %14985 = vmatprep.subr.bf16.mxu1 %v16484_v56  ;;  %v1358_v54 = vld [vmem:[#allocation2 + $0x27f8] sm:$0xff]  ;;  %v16561_v56 = vcombine.low %v1333_v42, %v1341_v43  ;;  %v16578_v58 = vcombine.high %v1349_v50, %v1357_v51 }
 0x771   :  { %v16580_v25 = vcombine.high %v1350_v52, %v1358_v54  ;;  %v16579_v1 = vcombine.low %v1350_v52, %v1358_v54  ;;  %v1453_v52 = vld [vmem:[#allocation2 + $0x2af0] sm:$0xff]  ;;  %v1446_v54 = vld [vmem:[#allocation2 + $0x2ab8] sm:$0xff] }
 0x773   :  { %14658 = vmatpush1.bf16.msra.mxu0 %v16481_v39  ;;  %14986 = vmatpush1.bf16.msra.mxu1 %v16483_v60  ;;  %v1373_v39 = vld [vmem:[#allocation2 + $0x2870] sm:$0xff]  ;;  %v1366_v60 = vld [vmem:[#allocation2 + $0x2838] sm:$0xff] }
 0x774   :  { %14659 = vmatprep.subr.bf16.mxu0 %v16498_v62  ;;  %14987 = vmatprep.subr.bf16.mxu1 %v16500_v63  ;;  %v1374_v62 = vld [vmem:[#allocation2 + $0x2878] sm:$0xff]  ;;  %v16577_v63 = vcombine.low %v1349_v50, %v1357_v51  ;;  %v16594_v4 = vcombine.high %v1365_v12, %v1373_v39  ;;  %v16658_v50 = vcombine.high %v1429_v44, %v1437_v45  ;;  %v1445_v51 = vld [vmem:[#allocation2 + $0x2ab0] sm:$0xff] }
 0x775   :  { %v16596_v57 = vcombine.high %v1366_v60, %v1374_v62  ;;  %v16595_v9 = vcombine.low %v1366_v60, %v1374_v62  ;;  %v1469_v60 = vld [vmem:[#allocation2 + $0x2b70] sm:$0xff]  ;;  %v1462_v62 = vld [vmem:[#allocation2 + $0x2b38] sm:$0xff] }
 0x777   :  { %14660 = vmatpush1.bf16.msra.mxu0 %v16497_v15  ;;  %14988 = vmatpush1.bf16.msra.mxu1 %v16499_v7  ;;  %v1389_v15 = vld [vmem:[#allocation2 + $0x28f0] sm:$0xff]  ;;  %v1382_v7 = vld [vmem:[#allocation2 + $0x28b8] sm:$0xff] }
 0x778   :  { %14661 = vmatprep.subr.bf16.mxu0 %v16514_v8  ;;  %14989 = vmatprep.subr.bf16.mxu1 %v16516_v53  ;;  %v1390_v8 = vld [vmem:[#allocation2 + $0x28f8] sm:$0xff]  ;;  %v16593_v53 = vcombine.low %v1365_v12, %v1373_v39  ;;  %v16610_v10 = vcombine.high %v1381_v5, %v1389_v15  ;;  %v1461_v39 = vld [vmem:[#allocation2 + $0x2b30] sm:$0xff] }
 0x779   :  { %v16612_v24 = vcombine.high %v1382_v7, %v1390_v8  ;;  %v16611_v31 = vcombine.low %v1382_v7, %v1390_v8  ;;  %v1485_v7 = vld [vmem:[#allocation2 + $0x2bf0] sm:$0xff]  ;;  %v1478_v8 = vld [vmem:[#allocation2 + $0x2bb8] sm:$0xff] }
 0x77b   :  { %14662 = vmatpush1.bf16.msra.mxu0 %v16513_v14  ;;  %14990 = vmatpush1.bf16.msra.mxu1 %v16515_v17  ;;  %v1405_v14 = vld [vmem:[#allocation2 + $0x2970] sm:$0xff]  ;;  %v1398_v17 = vld [vmem:[#allocation2 + $0x2938] sm:$0xff] }
 0x77c   :  { %14663 = vmatprep.subr.bf16.mxu0 %v16530_v26  ;;  %14991 = vmatprep.subr.bf16.mxu1 %v16532_v27  ;;  %v1406_v26 = vld [vmem:[#allocation2 + $0x2978] sm:$0xff]  ;;  %v16609_v27 = vcombine.low %v1381_v5, %v1389_v15  ;;  %v16626_v32 = vcombine.high %v1397_v13, %v1405_v14  ;;  %v1477_v15 = vld [vmem:[#allocation2 + $0x2bb0] sm:$0xff] }
 0x77d   :  { %v16628_v34 = vcombine.high %v1398_v17, %v1406_v26 }
 0x77f   :  { %14664 = vmatpush1.bf16.msra.mxu0 %v16529_v37  ;;  %14992 = vmatpush1.bf16.msra.mxu1 %v16531_v38  ;;  %v1421_v37 = vld [vmem:[#allocation2 + $0x29f0] sm:$0xff]  ;;  %v1414_v38 = vld [vmem:[#allocation2 + $0x29b8] sm:$0xff] }
 0x780   :  { %14665 = vmatprep.subr.bf16.mxu0 %v16546_v40  ;;  %14993 = vmatprep.subr.bf16.mxu1 %v16548_v41  ;;  %v1422_v40 = vld [vmem:[#allocation2 + $0x29f8] sm:$0xff]  ;;  %v16625_v41 = vcombine.low %v1397_v13, %v1405_v14  ;;  %v16642_v42 = vcombine.high %v1413_v35, %v1421_v37  ;;  %v1493_v14 = vld [vmem:[#allocation2 + $0x2c30] sm:$0xff] }
 0x781   :  { %v16644_v43 = vcombine.high %v1414_v38, %v1422_v40 }
 0x783   :  { %14666 = vmatpush1.bf16.msra.mxu0 %v16545_v36  ;;  %14994 = vmatpush1.bf16.msra.mxu1 %v16547_v47  ;;  %v1430_v36 = vld [vmem:[#allocation2 + $0x2a38] sm:$0xff] }
 0x784   :  { %14667 = vmatprep.subr.bf16.mxu0 %v16562_v48  ;;  %14995 = vmatprep.subr.bf16.mxu1 %v16564_v55  ;;  %v1438_v47 = vld [vmem:[#allocation2 + $0x2a78] sm:$0xff]  ;;  %v16641_v48 = vcombine.low %v1413_v35, %v1421_v37  ;;  %v16643_v55 = vcombine.low %v1414_v38, %v1422_v40  ;;  %v1509_v37 = vld [vmem:[#allocation2 + $0x2cb0] sm:$0xff] }
 0x785   :  { %v1517_v38 = vld [vmem:[#allocation2 + $0x2cf0] sm:$0xff]  ;;  %v1510_v40 = vld [vmem:[#allocation2 + $0x2cb8] sm:$0xff] }
 0x787   :  { %14668 = vmatpush1.bf16.msra.mxu0 %v16561_v56  ;;  %14996 = vmatpush1.bf16.msra.mxu1 %v16563_v22  ;;  %v1454_v56 = vld [vmem:[#allocation2 + $0x2af8] sm:$0xff]  ;;  %v16657_v22 = vcombine.low %v1429_v44, %v1437_v45  ;;  %v1525_v45 = vld [vmem:[#allocation2 + $0x2d30] sm:$0xff] }
 0x788   :  { %14669 = vmatprep.subr.bf16.mxu0 %v16578_v58  ;;  %14997 = vmatprep.subr.bf16.mxu1 %v16580_v25  ;;  %v16659_v58 = vcombine.low %v1430_v36, %v1438_v47  ;;  %v16674_v25 = vcombine.high %v1445_v51, %v1453_v52  ;;  %v16676_v12 = vcombine.high %v1446_v54, %v1454_v56 }
 0x78b   :  { %14670 = vmatpush1.bf16.msra.mxu0 %v16577_v63  ;;  %14998 = vmatpush1.bf16.msra.mxu1 %v16579_v1  ;;  %v1470_v63 = vld [vmem:[#allocation2 + $0x2b78] sm:$0xff]  ;;  %v16673_v1 = vcombine.low %v1445_v51, %v1453_v52  ;;  %v1541_v52 = vld [vmem:[#allocation2 + $0x2db0] sm:$0xff] }
 0x78c   :  { %14680 = vmatprep.subr.bf16.mxu0 %v16594_v4  ;;  %15008 = vmatprep.subr.bf16.mxu1 %v16596_v57  ;;  %v16675_v4 = vcombine.low %v1446_v54, %v1454_v56  ;;  %v16690_v57 = vcombine.high %v1461_v39, %v1469_v60  ;;  %v16692_v5 = vcombine.high %v1462_v62, %v1470_v63  ;;  %v1549_v54 = vld [vmem:[#allocation2 + $0x2df0] sm:$0xff]  ;;  %v1542_v56 = vld [vmem:[#allocation2 + $0x2db8] sm:$0xff] }
 0x78e   :  { %14672 = vmatmul.mubr.bf16.vlgmr.msra.gmra.mrb[12].mxu0 %v17969_v16  ;;  %15000 = vmatmul.mubr.bf16.vlgmr.msra.gmra.mrb[12].mxu1 %v17969_v16  ;;  %v16627_v16 = vcombine.low %v1398_v17, %v1406_v26  ;;  %v1501_v17 = vld [vmem:[#allocation2 + $0x2c70] sm:$0xff]  ;;  %v1494_v26 = vld [vmem:[#allocation2 + $0x2c38] sm:$0xff] }
 0x78f   :  { %14681 = vmatpush1.bf16.msra.mxu0 %v16593_v53  ;;  %15009 = vmatpush1.bf16.msra.mxu1 %v16595_v9  ;;  %v1486_v53 = vld [vmem:[#allocation2 + $0x2bf8] sm:$0xff]  ;;  %v16689_v9 = vcombine.low %v1461_v39, %v1469_v60  ;;  %v1557_v60 = vld [vmem:[#allocation2 + $0x2e30] sm:$0xff] }
 0x790   :  { %14682 = vmatprep.subr.bf16.mxu0 %v16610_v10  ;;  %15010 = vmatprep.subr.bf16.mxu1 %v16612_v24  ;;  %v16691_v10 = vcombine.low %v1462_v62, %v1470_v63  ;;  %v16706_v24 = vcombine.high %v1477_v15, %v1485_v7  ;;  %v16708_v13 = vcombine.high %v1478_v8, %v1486_v53  ;;  %v1565_v62 = vld [vmem:[#allocation2 + $0x2e70] sm:$0xff]  ;;  %v1558_v63 = vld [vmem:[#allocation2 + $0x2e38] sm:$0xff] }
 0x791   :  { %14712 = vmatprep.mubr.bf16.mxu0 %v17978_v59  ;;  %15040 = vmatprep.mubr.bf16.mxu1 %v17978_v59  ;;  %v16660_v59 = vcombine.high %v1430_v36, %v1438_v47  ;;  %v1533_v36 = vld [vmem:[#allocation2 + $0x2d70] sm:$0xff]  ;;  %v1526_v47 = vld [vmem:[#allocation2 + $0x2d38] sm:$0xff] }
 0x793   :  { %14683 = vmatpush1.bf16.msra.mxu0 %v16609_v27  ;;  %15011 = vmatpush1.bf16.msra.mxu1 %v16611_v31  ;;  %v1502_v27 = vld [vmem:[#allocation2 + $0x2c78] sm:$0xff]  ;;  %v16705_v31 = vcombine.low %v1477_v15, %v1485_v7  ;;  %v1573_v7 = vld [vmem:[#allocation2 + $0x2eb0] sm:$0xff] }
 0x794   :  { %14684 = vmatprep.subr.bf16.mxu0 %v16626_v32  ;;  %15012 = vmatprep.subr.bf16.mxu1 %v16628_v34  ;;  %v16707_v32 = vcombine.low %v1478_v8, %v1486_v53  ;;  %v16722_v34 = vcombine.high %v1493_v14, %v1501_v17  ;;  %v16724_v35 = vcombine.high %v1494_v26, %v1502_v27  ;;  %v1581_v8 = vld [vmem:[#allocation2 + $0x2ef0] sm:$0xff]  ;;  %v1574_v53 = vld [vmem:[#allocation2 + $0x2eb8] sm:$0xff] }
 0x797   :  { %14685 = vmatpush1.bf16.msra.mxu0 %v16625_v41  ;;  %15013 = vmatpush1.bf16.msra.mxu1 %v16627_v16  ;;  %v1518_v41 = vld [vmem:[#allocation2 + $0x2cf8] sm:$0xff]  ;;  %v16721_v16 = vcombine.low %v1493_v14, %v1501_v17  ;;  %v1589_v17 = vld [vmem:[#allocation2 + $0x2f30] sm:$0xff] }
 0x798   :  { %14686 = vmatprep.subr.bf16.mxu0 %v16642_v42  ;;  %15014 = vmatprep.subr.bf16.mxu1 %v16644_v43  ;;  %v16723_v42 = vcombine.low %v1494_v26, %v1502_v27  ;;  %v16738_v43 = vcombine.high %v1509_v37, %v1517_v38  ;;  %v16740_v44 = vcombine.high %v1510_v40, %v1518_v41  ;;  %v1597_v26 = vld [vmem:[#allocation2 + $0x2f70] sm:$0xff]  ;;  %v1590_v27 = vld [vmem:[#allocation2 + $0x2f38] sm:$0xff] }
 0x79b   :  { %14687 = vmatpush1.bf16.msra.mxu0 %v16641_v48  ;;  %15015 = vmatpush1.bf16.msra.mxu1 %v16643_v55  ;;  %v1534_v48 = vld [vmem:[#allocation2 + $0x2d78] sm:$0xff]  ;;  %v16737_v55 = vcombine.low %v1509_v37, %v1517_v38  ;;  %v1605_v38 = vld [vmem:[#allocation2 + $0x2fb0] sm:$0xff] }
 0x79c   :  { %14688 = vmatprep.subr.bf16.mxu0 %v16658_v50  ;;  %15016 = vmatprep.subr.bf16.mxu1 %v16660_v59  ;;  %v16739_v50 = vcombine.low %v1510_v40, %v1518_v41  ;;  %v16754_v59 = vcombine.high %v1525_v45, %v1533_v36  ;;  %v16756_v51 = vcombine.high %v1526_v47, %v1534_v48  ;;  %v1613_v40 = vld [vmem:[#allocation2 + $0x2ff0] sm:$0xff]  ;;  %v1606_v41 = vld [vmem:[#allocation2 + $0x2fb8] sm:$0xff] }
 0x79f   :  { %14689 = vmatpush1.bf16.msra.mxu0 %v16657_v22  ;;  %15017 = vmatpush1.bf16.msra.mxu1 %v16659_v58  ;;  %v1550_v22 = vld [vmem:[#allocation2 + $0x2df8] sm:$0xff]  ;;  %v16753_v58 = vcombine.low %v1525_v45, %v1533_v36  ;;  %v1621_v36 = vld [vmem:[#allocation2 + $0x3030] sm:$0xff] }
 0x7a0   :  { %14690 = vmatprep.subr.bf16.mxu0 %v16674_v25  ;;  %15018 = vmatprep.subr.bf16.mxu1 %v16676_v12  ;;  %v16755_v25 = vcombine.low %v1526_v47, %v1534_v48  ;;  %v16770_v12 = vcombine.high %v1541_v52, %v1549_v54  ;;  %v16772_v39 = vcombine.high %v1542_v56, %v1550_v22  ;;  %v1629_v47 = vld [vmem:[#allocation2 + $0x3070] sm:$0xff]  ;;  %v1622_v48 = vld [vmem:[#allocation2 + $0x3038] sm:$0xff] }
 0x7a3   :  { %14691 = vmatpush1.bf16.msra.mxu0 %v16673_v1  ;;  %15019 = vmatpush1.bf16.msra.mxu1 %v16675_v4  ;;  %v1566_v1 = vld [vmem:[#allocation2 + $0x2e78] sm:$0xff]  ;;  %v16769_v4 = vcombine.low %v1541_v52, %v1549_v54  ;;  %v1637_v54 = vld [vmem:[#allocation2 + $0x30b0] sm:$0xff] }
 0x7a4   :  { %14692 = vmatprep.subr.bf16.mxu0 %v16690_v57  ;;  %15020 = vmatprep.subr.bf16.mxu1 %v16692_v5  ;;  %v16771_v57 = vcombine.low %v1542_v56, %v1550_v22  ;;  %v16786_v5 = vcombine.high %v1557_v60, %v1565_v62  ;;  %v16788_v15 = vcombine.high %v1558_v63, %v1566_v1  ;;  %v1645_v56 = vld [vmem:[#allocation2 + $0x30f0] sm:$0xff]  ;;  %v1638_v22 = vld [vmem:[#allocation2 + $0x30b8] sm:$0xff] }
 0x7a7   :  { %14693 = vmatpush1.bf16.msra.mxu0 %v16689_v9  ;;  %15021 = vmatpush1.bf16.msra.mxu1 %v16691_v10  ;;  %v1582_v9 = vld [vmem:[#allocation2 + $0x2ef8] sm:$0xff]  ;;  %v16785_v10 = vcombine.low %v1557_v60, %v1565_v62  ;;  %v1653_v62 = vld [vmem:[#allocation2 + $0x3130] sm:$0xff] }
 0x7a8   :  { %14694 = vmatprep.subr.bf16.mxu0 %v16706_v24  ;;  %15022 = vmatprep.subr.bf16.mxu1 %v16708_v13  ;;  %v16787_v24 = vcombine.low %v1558_v63, %v1566_v1  ;;  %v16802_v13 = vcombine.high %v1573_v7, %v1581_v8  ;;  %v16804_v14 = vcombine.high %v1574_v53, %v1582_v9  ;;  %v1661_v63 = vld [vmem:[#allocation2 + $0x3170] sm:$0xff]  ;;  %v1654_v1 = vld [vmem:[#allocation2 + $0x3138] sm:$0xff] }
 0x7ab   :  { %14695 = vmatpush1.bf16.msra.mxu0 %v16705_v31  ;;  %15023 = vmatpush1.bf16.msra.mxu1 %v16707_v32  ;;  %v1598_v31 = vld [vmem:[#allocation2 + $0x2f78] sm:$0xff]  ;;  %v16801_v32 = vcombine.low %v1573_v7, %v1581_v8  ;;  %v1669_v8 = vld [vmem:[#allocation2 + $0x31b0] sm:$0xff] }
 0x7ac   :  { %14696 = vmatprep.subr.bf16.mxu0 %v16722_v34  ;;  %15024 = vmatprep.subr.bf16.mxu1 %v16724_v35  ;;  %v16803_v34 = vcombine.low %v1574_v53, %v1582_v9  ;;  %v16818_v35 = vcombine.high %v1589_v17, %v1597_v26  ;;  %v16820_v37 = vcombine.high %v1590_v27, %v1598_v31  ;;  %v1677_v53 = vld [vmem:[#allocation2 + $0x31f0] sm:$0xff]  ;;  %v1670_v9 = vld [vmem:[#allocation2 + $0x31b8] sm:$0xff] }
 0x7af   :  { %14697 = vmatpush1.bf16.msra.mxu0 %v16721_v16  ;;  %15025 = vmatpush1.bf16.msra.mxu1 %v16723_v42  ;;  %v1614_v16 = vld [vmem:[#allocation2 + $0x2ff8] sm:$0xff]  ;;  %v16817_v42 = vcombine.low %v1589_v17, %v1597_v26  ;;  %v1685_v17 = vld [vmem:[#allocation2 + $0x3230] sm:$0xff] }
 0x7b0   :  { %14698 = vmatprep.subr.bf16.mxu0 %v16738_v43  ;;  %15026 = vmatprep.subr.bf16.mxu1 %v16740_v44  ;;  %v16819_v43 = vcombine.low %v1590_v27, %v1598_v31  ;;  %v16834_v44 = vcombine.high %v1605_v38, %v1613_v40  ;;  %v16836_v45 = vcombine.high %v1606_v41, %v1614_v16  ;;  %v1693_v26 = vld [vmem:[#allocation2 + $0x3270] sm:$0xff]  ;;  %v1686_v27 = vld [vmem:[#allocation2 + $0x3238] sm:$0xff] }
 0x7b1   :  { %v1694_v31 = vld [vmem:[#allocation2 + $0x3278] sm:$0xff] }
 0x7b3   :  { %14699 = vmatpush1.bf16.msra.mxu0 %v16737_v55  ;;  %15027 = vmatpush1.bf16.msra.mxu1 %v16739_v50  ;;  %v1630_v55 = vld [vmem:[#allocation2 + $0x3078] sm:$0xff]  ;;  %v16833_v50 = vcombine.low %v1605_v38, %v1613_v40  ;;  %v1709_v38 = vld [vmem:[#allocation2 + $0x32f0] sm:$0xff] }
 0x7b4   :  { %14700 = vmatprep.subr.bf16.mxu0 %v16754_v59  ;;  %15028 = vmatprep.subr.bf16.mxu1 %v16756_v51  ;;  %v16835_v59 = vcombine.low %v1606_v41, %v1614_v16  ;;  %v16850_v51 = vcombine.high %v1621_v36, %v1629_v47  ;;  %v16852_v52 = vcombine.high %v1622_v48, %v1630_v55  ;;  %v1702_v40 = vld [vmem:[#allocation2 + $0x32b8] sm:$0xff] }
 0x7b5   :  { %v1710_v41 = vld [vmem:[#allocation2 + $0x32f8] sm:$0xff]  ;;  %v16913_v16 = vcombine.low %v1685_v17, %v1693_v26 }
 0x7b7   :  { %14701 = vmatpush1.bf16.msra.mxu0 %v16753_v58  ;;  %15029 = vmatpush1.bf16.msra.mxu1 %v16755_v25  ;;  %v1646_v58 = vld [vmem:[#allocation2 + $0x30f8] sm:$0xff]  ;;  %v16849_v25 = vcombine.low %v1621_v36, %v1629_v47  ;;  %v1725_v36 = vld [vmem:[#allocation2 + $0x3370] sm:$0xff] }
 0x7b8   :  { %14702 = vmatprep.subr.bf16.mxu0 %v16770_v12  ;;  %15030 = vmatprep.subr.bf16.mxu1 %v16772_v39  ;;  %v16851_v12 = vcombine.low %v1622_v48, %v1630_v55  ;;  %v16866_v39 = vcombine.high %v1637_v54, %v1645_v56  ;;  %v16868_v60 = vcombine.high %v1638_v22, %v1646_v58  ;;  %v1718_v47 = vld [vmem:[#allocation2 + $0x3338] sm:$0xff] }
 0x7b9   :  { %v1726_v48 = vld [vmem:[#allocation2 + $0x3378] sm:$0xff] }
 0x7bb   :  { %14703 = vmatpush1.bf16.msra.mxu0 %v16769_v4  ;;  %15031 = vmatpush1.bf16.msra.mxu1 %v16771_v57  ;;  %v1662_v4 = vld [vmem:[#allocation2 + $0x3178] sm:$0xff]  ;;  %v16865_v57 = vcombine.low %v1637_v54, %v1645_v56  ;;  %v1741_v54 = vld [vmem:[#allocation2 + $0x33f0] sm:$0xff] }
 0x7bc   :  { %14704 = vmatprep.subr.bf16.mxu0 %v16786_v5  ;;  %15032 = vmatprep.subr.bf16.mxu1 %v16788_v15  ;;  %v16867_v5 = vcombine.low %v1638_v22, %v1646_v58  ;;  %v16882_v15 = vcombine.high %v1653_v62, %v1661_v63  ;;  %v16884_v7 = vcombine.high %v1654_v1, %v1662_v4  ;;  %v1734_v56 = vld [vmem:[#allocation2 + $0x33b8] sm:$0xff] }
 0x7bd   :  { %v1742_v22 = vld [vmem:[#allocation2 + $0x33f8] sm:$0xff] }
 0x7bf   :  { %14705 = vmatpush1.bf16.msra.mxu0 %v16785_v10  ;;  %15033 = vmatpush1.bf16.msra.mxu1 %v16787_v24  ;;  %v1678_v10 = vld [vmem:[#allocation2 + $0x31f8] sm:$0xff]  ;;  %v16881_v24 = vcombine.low %v1653_v62, %v1661_v63  ;;  %v1757_v62 = vld [vmem:[#allocation2 + $0x3470] sm:$0xff] }
 0x7c0   :  { %14706 = vmatprep.subr.bf16.mxu0 %v16802_v13  ;;  %15034 = vmatprep.subr.bf16.mxu1 %v16804_v14  ;;  %v16898_v13 = vcombine.high %v1669_v8, %v1677_v53  ;;  %v16900_v14 = vcombine.high %v1670_v9, %v1678_v10  ;;  %v1750_v63 = vld [vmem:[#allocation2 + $0x3438] sm:$0xff] }
 0x7c3   :  { %14707 = vmatpush1.bf16.msra.mxu0 %v16801_v32  ;;  %15035 = vmatpush1.bf16.msra.mxu1 %v16803_v34  ;;  %v16897_v32 = vcombine.low %v1669_v8, %v1677_v53  ;;  %v16899_v34 = vcombine.low %v1670_v9, %v1678_v10  ;;  %v1773_v8 = vld [vmem:[#allocation2 + $0x34f0] sm:$0xff]  ;;  %v1766_v53 = vld [vmem:[#allocation2 + $0x34b8] sm:$0xff] }
 0x7c4   :  { %14708 = vmatprep.subr.bf16.mxu0 %v16818_v35  ;;  %15036 = vmatprep.subr.bf16.mxu1 %v16820_v37  ;;  %v16914_v35 = vcombine.high %v1685_v17, %v1693_v26  ;;  %v1701_v37 = vld [vmem:[#allocation2 + $0x32b0] sm:$0xff]  ;;  %v1774_v9 = vld [vmem:[#allocation2 + $0x34f8] sm:$0xff] }
 0x7c5   :  { %v16929_v55 = vcombine.low %v1701_v37, %v1709_v38  ;;  %v1789_v17 = vld [vmem:[#allocation2 + $0x3570] sm:$0xff]  ;;  %v1782_v26 = vld [vmem:[#allocation2 + $0x3538] sm:$0xff] }
 0x7c7   :  { %14709 = vmatpush1.bf16.msra.mxu0 %v16817_v42  ;;  %15037 = vmatpush1.bf16.msra.mxu1 %v16819_v43  ;;  %v16915_v42 = vcombine.low %v1686_v27, %v1694_v31  ;;  %v16930_v43 = vcombine.high %v1701_v37, %v1709_v38  ;;  %v1805_v37 = vld [vmem:[#allocation2 + $0x35f0] sm:$0xff]  ;;  %v1798_v38 = vld [vmem:[#allocation2 + $0x35b8] sm:$0xff] }
 0x7c8   :  { %14710 = vmatprep.subr.bf16.mxu0 %v16834_v44  ;;  %15038 = vmatprep.subr.bf16.mxu1 %v16836_v45  ;;  %v16932_v44 = vcombine.high %v1702_v40, %v1710_v41  ;;  %v1717_v45 = vld [vmem:[#allocation2 + $0x3330] sm:$0xff] }
 0x7c9   :  { %v16945_v58 = vcombine.low %v1717_v45, %v1725_v36 }
 0x7cb   :  { %14711 = vmatpush1.bf16.msra.mxu0 %v16833_v50  ;;  %15039 = vmatpush1.bf16.msra.mxu1 %v16835_v59  ;;  %v16931_v50 = vcombine.low %v1702_v40, %v1710_v41  ;;  %v16946_v59 = vcombine.high %v1717_v45, %v1725_v36  ;;  %v1806_v40 = vld [vmem:[#allocation2 + $0x35f8] sm:$0xff]  ;;  %v1821_v45 = vld [vmem:[#allocation2 + $0x3670] sm:$0xff] }
 0x7cc   :  { %14721 = vmatprep.subr.bf16.mxu0 %v16850_v51  ;;  %15049 = vmatprep.subr.bf16.mxu1 %v16852_v52  ;;  %v16948_v51 = vcombine.high %v1718_v47, %v1726_v48  ;;  %v1733_v52 = vld [vmem:[#allocation2 + $0x33b0] sm:$0xff]  ;;  %v1814_v36 = vld [vmem:[#allocation2 + $0x3638] sm:$0xff] }
 0x7ce   :  { %14713 = vmatmul.mubr.bf16.vlgmr.msra.gmra.mrb[12].mxu0 %v17986_v46  ;;  %15041 = vmatmul.mubr.bf16.vlgmr.msra.gmra.mrb[12].mxu1 %v17986_v46  ;;  %v16883_v46 = vcombine.low %v1654_v1, %v1662_v4  ;;  %v1758_v1 = vld [vmem:[#allocation2 + $0x3478] sm:$0xff]  ;;  %v16961_v4 = vcombine.low %v1733_v52, %v1741_v54 }
 0x7cf   :  { %14722 = vmatpush1.bf16.msra.mxu0 %v16849_v25  ;;  %15050 = vmatpush1.bf16.msra.mxu1 %v16851_v12  ;;  %v16947_v25 = vcombine.low %v1718_v47, %v1726_v48  ;;  %v16962_v12 = vcombine.high %v1733_v52, %v1741_v54  ;;  %v1822_v47 = vld [vmem:[#allocation2 + $0x3678] sm:$0xff]  ;;  %v1837_v52 = vld [vmem:[#allocation2 + $0x36f0] sm:$0xff] }
 0x7d0   :  { %14723 = vmatprep.subr.bf16.mxu0 %v16866_v39  ;;  %15051 = vmatprep.subr.bf16.mxu1 %v16868_v60  ;;  %v16964_v39 = vcombine.high %v1734_v56, %v1742_v22  ;;  %v1749_v60 = vld [vmem:[#allocation2 + $0x3430] sm:$0xff]  ;;  %v1830_v54 = vld [vmem:[#allocation2 + $0x36b8] sm:$0xff] }
 0x7d1   :  { %14753 = vmatprep.mubr.bf16.mxu0 %v17995_v19  ;;  %15081 = vmatprep.mubr.bf16.mxu1 %v17995_v19  ;;  %v16916_v19 = vcombine.high %v1686_v27, %v1694_v31  ;;  %v16977_v10 = vcombine.low %v1749_v60, %v1757_v62  ;;  %v1790_v27 = vld [vmem:[#allocation2 + $0x3578] sm:$0xff] }
 0x7d3   :  { %14724 = vmatpush1.bf16.msra.mxu0 %v16865_v57  ;;  %15052 = vmatpush1.bf16.msra.mxu1 %v16867_v5  ;;  %v16963_v57 = vcombine.low %v1734_v56, %v1742_v22  ;;  %v16978_v5 = vcombine.high %v1749_v60, %v1757_v62  ;;  %v1838_v56 = vld [vmem:[#allocation2 + $0x36f8] sm:$0xff]  ;;  %v1853_v60 = vld [vmem:[#allocation2 + $0x3770] sm:$0xff] }
 0x7d4   :  { %14725 = vmatprep.subr.bf16.mxu0 %v16882_v15  ;;  %15053 = vmatprep.subr.bf16.mxu1 %v16884_v7  ;;  %v16980_v15 = vcombine.high %v1750_v63, %v1758_v1  ;;  %v1765_v7 = vld [vmem:[#allocation2 + $0x34b0] sm:$0xff]  ;;  %v1846_v62 = vld [vmem:[#allocation2 + $0x3738] sm:$0xff] }
 0x7d5   :  { %v16993_v31 = vcombine.low %v1765_v7, %v1773_v8 }
 0x7d7   :  { %14726 = vmatpush1.bf16.msra.mxu0 %v16881_v24  ;;  %15054 = vmatpush1.bf16.msra.mxu1 %v16883_v46  ;;  %v16979_v24 = vcombine.low %v1750_v63, %v1758_v1  ;;  %v16994_v46 = vcombine.high %v1765_v7, %v1773_v8  ;;  %v1854_v63 = vld [vmem:[#allocation2 + $0x3778] sm:$0xff]  ;;  %v1869_v7 = vld [vmem:[#allocation2 + $0x37f0] sm:$0xff] }
 0x7d8   :  { %14727 = vmatprep.subr.bf16.mxu0 %v16898_v13  ;;  %15055 = vmatprep.subr.bf16.mxu1 %v16900_v14  ;;  %v16996_v13 = vcombine.high %v1766_v53, %v1774_v9  ;;  %v1781_v14 = vld [vmem:[#allocation2 + $0x3530] sm:$0xff]  ;;  %v1862_v8 = vld [vmem:[#allocation2 + $0x37b8] sm:$0xff] }
 0x7d9   :  { %v17009_v41 = vcombine.low %v1781_v14, %v1789_v17 }
 0x7db   :  { %14728 = vmatpush1.bf16.msra.mxu0 %v16897_v32  ;;  %15056 = vmatpush1.bf16.msra.mxu1 %v16899_v34  ;;  %v16995_v32 = vcombine.low %v1766_v53, %v1774_v9  ;;  %v17010_v34 = vcombine.high %v1781_v14, %v1789_v17  ;;  %v1870_v53 = vld [vmem:[#allocation2 + $0x37f8] sm:$0xff]  ;;  %v1885_v14 = vld [vmem:[#allocation2 + $0x3870] sm:$0xff] }
 0x7dc   :  { %14729 = vmatprep.subr.bf16.mxu0 %v16914_v35  ;;  %15057 = vmatprep.subr.bf16.mxu1 %v16916_v19  ;;  %v17012_v35 = vcombine.high %v1782_v26, %v1790_v27  ;;  %v1797_v19 = vld [vmem:[#allocation2 + $0x35b0] sm:$0xff]  ;;  %v1878_v17 = vld [vmem:[#allocation2 + $0x3838] sm:$0xff] }
 0x7dd   :  { %v17025_v48 = vcombine.low %v1797_v19, %v1805_v37 }
 0x7df   :  { %14730 = vmatpush1.bf16.msra.mxu0 %v16913_v16  ;;  %15058 = vmatpush1.bf16.msra.mxu1 %v16915_v42  ;;  %v17011_v16 = vcombine.low %v1782_v26, %v1790_v27  ;;  %v17026_v42 = vcombine.high %v1797_v19, %v1805_v37  ;;  %v1886_v26 = vld [vmem:[#allocation2 + $0x3878] sm:$0xff]  ;;  %v1901_v19 = vld [vmem:[#allocation2 + $0x38f0] sm:$0xff] }
 0x7e0   :  { %14731 = vmatprep.subr.bf16.mxu0 %v16930_v43  ;;  %15059 = vmatprep.subr.bf16.mxu1 %v16932_v44  ;;  %v17028_v43 = vcombine.high %v1798_v38, %v1806_v40  ;;  %v1813_v44 = vld [vmem:[#allocation2 + $0x3630] sm:$0xff]  ;;  %v1894_v37 = vld [vmem:[#allocation2 + $0x38b8] sm:$0xff] }
 0x7e1   :  { %v17041_v22 = vcombine.low %v1813_v44, %v1821_v45 }
 0x7e3   :  { %14732 = vmatpush1.bf16.msra.mxu0 %v16929_v55  ;;  %15060 = vmatpush1.bf16.msra.mxu1 %v16931_v50  ;;  %v17027_v55 = vcombine.low %v1798_v38, %v1806_v40  ;;  %v17042_v50 = vcombine.high %v1813_v44, %v1821_v45  ;;  %v1902_v38 = vld [vmem:[#allocation2 + $0x38f8] sm:$0xff]  ;;  %v1917_v44 = vld [vmem:[#allocation2 + $0x3970] sm:$0xff] }
 0x7e4   :  { %14733 = vmatprep.subr.bf16.mxu0 %v16946_v59  ;;  %15061 = vmatprep.subr.bf16.mxu1 %v16948_v51  ;;  %v17044_v59 = vcombine.high %v1814_v36, %v1822_v47  ;;  %v1829_v51 = vld [vmem:[#allocation2 + $0x36b0] sm:$0xff]  ;;  %v1910_v45 = vld [vmem:[#allocation2 + $0x3938] sm:$0xff] }
 0x7e5   :  { %v17057_v1 = vcombine.low %v1829_v51, %v1837_v52 }
 0x7e7   :  { %14734 = vmatpush1.bf16.msra.mxu0 %v16945_v58  ;;  %15062 = vmatpush1.bf16.msra.mxu1 %v16947_v25  ;;  %v17043_v58 = vcombine.low %v1814_v36, %v1822_v47  ;;  %v17058_v25 = vcombine.high %v1829_v51, %v1837_v52  ;;  %v1918_v36 = vld [vmem:[#allocation2 + $0x3978] sm:$0xff]  ;;  %v1933_v51 = vld [vmem:[#allocation2 + $0x39f0] sm:$0xff] }
 0x7e8   :  { %14735 = vmatprep.subr.bf16.mxu0 %v16962_v12  ;;  %15063 = vmatprep.subr.bf16.mxu1 %v16964_v39  ;;  %v17060_v12 = vcombine.high %v1830_v54, %v1838_v56  ;;  %v1845_v39 = vld [vmem:[#allocation2 + $0x3730] sm:$0xff]  ;;  %v1926_v52 = vld [vmem:[#allocation2 + $0x39b8] sm:$0xff] }
 0x7e9   :  { %v17073_v9 = vcombine.low %v1845_v39, %v1853_v60 }
 0x7eb   :  { %14736 = vmatpush1.bf16.msra.mxu0 %v16961_v4  ;;  %15064 = vmatpush1.bf16.msra.mxu1 %v16963_v57  ;;  %v17059_v4 = vcombine.low %v1830_v54, %v1838_v56  ;;  %v17074_v57 = vcombine.high %v1845_v39, %v1853_v60  ;;  %v1934_v54 = vld [vmem:[#allocation2 + $0x39f8] sm:$0xff] }
 0x7ec   :  { %14737 = vmatprep.subr.bf16.mxu0 %v16978_v5  ;;  %15065 = vmatprep.subr.bf16.mxu1 %v16980_v15  ;;  %v17076_v5 = vcombine.high %v1846_v62, %v1854_v63  ;;  %v1861_v15 = vld [vmem:[#allocation2 + $0x37b0] sm:$0xff]  ;;  %v1942_v39 = vld [vmem:[#allocation2 + $0x3a38] sm:$0xff] }
 0x7ed   :  { %v17089_v27 = vcombine.low %v1861_v15, %v1869_v7  ;;  %v1950_v60 = vld [vmem:[#allocation2 + $0x3a78] sm:$0xff] }
 0x7ef   :  { %14738 = vmatpush1.bf16.msra.mxu0 %v16977_v10  ;;  %15066 = vmatpush1.bf16.msra.mxu1 %v16979_v24  ;;  %v17075_v10 = vcombine.low %v1846_v62, %v1854_v63  ;;  %v17090_v24 = vcombine.high %v1861_v15, %v1869_v7  ;;  %v17155_v63 = vcombine.low %v1926_v52, %v1934_v54  ;;  %v1966_v15 = vld [vmem:[#allocation2 + $0x3af8] sm:$0xff] }
 0x7f0   :  { %14739 = vmatprep.subr.bf16.mxu0 %v16994_v46  ;;  %15067 = vmatprep.subr.bf16.mxu1 %v16996_v13  ;;  %v17092_v46 = vcombine.high %v1862_v8, %v1870_v53  ;;  %v1877_v13 = vld [vmem:[#allocation2 + $0x3830] sm:$0xff] }
 0x7f1   :  { %v17105_v40 = vcombine.low %v1877_v13, %v1885_v14 }
 0x7f3   :  { %14740 = vmatpush1.bf16.msra.mxu0 %v16993_v31  ;;  %15068 = vmatpush1.bf16.msra.mxu1 %v16995_v32  ;;  %v17091_v31 = vcombine.low %v1862_v8, %v1870_v53  ;;  %v17106_v32 = vcombine.high %v1877_v13, %v1885_v14  ;;  %v17171_v8 = vcombine.low %v1942_v39, %v1950_v60  ;;  %v1982_v13 = vld [vmem:[#allocation2 + $0x3b78] sm:$0xff] }
 0x7f4   :  { %14741 = vmatprep.subr.bf16.mxu0 %v17010_v34  ;;  %15069 = vmatprep.subr.bf16.mxu1 %v17012_v35  ;;  %v17108_v34 = vcombine.high %v1878_v17, %v1886_v26  ;;  %v1893_v35 = vld [vmem:[#allocation2 + $0x38b0] sm:$0xff] }
 0x7f5   :  { %v17121_v47 = vcombine.low %v1893_v35, %v1901_v19 }
 0x7f7   :  { %14742 = vmatpush1.bf16.msra.mxu0 %v17009_v41  ;;  %15070 = vmatpush1.bf16.msra.mxu1 %v17011_v16  ;;  %v17107_v41 = vcombine.low %v1878_v17, %v1886_v26  ;;  %v17122_v16 = vcombine.high %v1893_v35, %v1901_v19  ;;  %v1998_v35 = vld [vmem:[#allocation2 + $0x3bf8] sm:$0xff] }
 0x7f8   :  { %14743 = vmatprep.subr.bf16.mxu0 %v17026_v42  ;;  %15071 = vmatprep.subr.bf16.mxu1 %v17028_v43  ;;  %v17124_v42 = vcombine.high %v1894_v37, %v1902_v38  ;;  %v1909_v43 = vld [vmem:[#allocation2 + $0x3930] sm:$0xff] }
 0x7f9   :  { %v17137_v56 = vcombine.low %v1909_v43, %v1917_v44 }
 0x7fb   :  { %14744 = vmatpush1.bf16.msra.mxu0 %v17025_v48  ;;  %15072 = vmatpush1.bf16.msra.mxu1 %v17027_v55  ;;  %v17123_v48 = vcombine.low %v1894_v37, %v1902_v38  ;;  %v17138_v55 = vcombine.high %v1909_v43, %v1917_v44  ;;  %v2014_v43 = vld [vmem:[#allocation2 + $0x3c78] sm:$0xff] }
 0x7fc   :  { %14745 = vmatprep.subr.bf16.mxu0 %v17042_v50  ;;  %15073 = vmatprep.subr.bf16.mxu1 %v17044_v59  ;;  %v17140_v50 = vcombine.high %v1910_v45, %v1918_v36  ;;  %v1925_v59 = vld [vmem:[#allocation2 + $0x39b0] sm:$0xff] }
 0x7fd   :  { %v17153_v62 = vcombine.low %v1925_v59, %v1933_v51 }
 0x7ff   :  { %14746 = vmatpush1.bf16.msra.mxu0 %v17041_v22  ;;  %15074 = vmatpush1.bf16.msra.mxu1 %v17043_v58  ;;  %v17154_v22 = vcombine.high %v1925_v59, %v1933_v51  ;;  %v17156_v58 = vcombine.high %v1926_v52, %v1934_v54  ;;  %v2030_v59 = vld [vmem:[#allocation2 + $0x3cf8] sm:$0xff] }
 0x800   :  { %14747 = vmatprep.subr.bf16.mxu0 %v17058_v25  ;;  %15075 = vmatprep.subr.bf16.mxu1 %v17060_v12  ;;  %v1941_v25 = vld [vmem:[#allocation2 + $0x3a30] sm:$0xff] }
 0x801   :  { %v1949_v12 = vld [vmem:[#allocation2 + $0x3a70] sm:$0xff] }
 0x802   :  { %v17169_v7 = vcombine.low %v1941_v25, %v1949_v12 }
 0x803   :  { %14748 = vmatpush1.bf16.msra.mxu0 %v17057_v1  ;;  %15076 = vmatpush1.bf16.msra.mxu1 %v17059_v4  ;;  %v17170_v1 = vcombine.high %v1941_v25, %v1949_v12  ;;  %v1957_v4 = vld [vmem:[#allocation2 + $0x3ab0] sm:$0xff]  ;;  %v2046_v25 = vld [vmem:[#allocation2 + $0x3d78] sm:$0xff] }
 0x804   :  { %14749 = vmatprep.subr.bf16.mxu0 %v17074_v57  ;;  %15077 = vmatprep.subr.bf16.mxu1 %v17076_v5  ;;  %v1965_v57 = vld [vmem:[#allocation2 + $0x3af0] sm:$0xff]  ;;  %v1958_v5 = vld [vmem:[#allocation2 + $0x3ab8] sm:$0xff] }
 0x805   :  { %v17186_v53 = vcombine.high %v1957_v4, %v1965_v57  ;;  %v17185_v14 = vcombine.low %v1957_v4, %v1965_v57  ;;  %v17187_v17 = vcombine.low %v1958_v5, %v1966_v15  ;;  %v2062_v4 = vld [vmem:[#allocation2 + $0x3df8] sm:$0xff] }
 0x807   :  { %14750 = vmatpush1.bf16.msra.mxu0 %v17073_v9  ;;  %15078 = vmatpush1.bf16.msra.mxu1 %v17075_v10  ;;  %v17188_v9 = vcombine.high %v1958_v5, %v1966_v15  ;;  %v1973_v10 = vld [vmem:[#allocation2 + $0x3b30] sm:$0xff] }
 0x808   :  { %14751 = vmatprep.subr.bf16.mxu0 %v17090_v24  ;;  %15079 = vmatprep.subr.bf16.mxu1 %v17092_v46  ;;  %v1981_v24 = vld [vmem:[#allocation2 + $0x3b70] sm:$0xff]  ;;  %v1974_v46 = vld [vmem:[#allocation2 + $0x3b38] sm:$0xff] }
 0x809   :  { %v17202_v26 = vcombine.high %v1973_v10, %v1981_v24  ;;  %v17201_v19 = vcombine.low %v1973_v10, %v1981_v24  ;;  %v17203_v37 = vcombine.low %v1974_v46, %v1982_v13  ;;  %v2078_v10 = vld [vmem:[#allocation2 + $0x3e78] sm:$0xff] }
 0x80b   :  { %14752 = vmatpush1.bf16.msra.mxu0 %v17089_v27  ;;  %15080 = vmatpush1.bf16.msra.mxu1 %v17091_v31  ;;  %v17204_v27 = vcombine.high %v1974_v46, %v1982_v13  ;;  %v1989_v31 = vld [vmem:[#allocation2 + $0x3bb0] sm:$0xff] }
 0x80c   :  { %14762 = vmatprep.subr.bf16.mxu0 %v17106_v32  ;;  %15090 = vmatprep.subr.bf16.mxu1 %v17108_v34  ;;  %v1997_v32 = vld [vmem:[#allocation2 + $0x3bf0] sm:$0xff]  ;;  %v1990_v34 = vld [vmem:[#allocation2 + $0x3bb8] sm:$0xff] }
 0x80d   :  { %v17218_v38 = vcombine.high %v1989_v31, %v1997_v32  ;;  %v17217_v44 = vcombine.low %v1989_v31, %v1997_v32  ;;  %v2094_v31 = vld [vmem:[#allocation2 + $0x3ef8] sm:$0xff] }
 0x80e   :  { %14754 = vmatmul.mubr.bf16.vlgmr.msra.gmra.mrb[12].mxu0 %v18003_v20  ;;  %15082 = vmatmul.mubr.bf16.vlgmr.msra.gmra.mrb[12].mxu1 %v18003_v20  ;;  %v17139_v20 = vcombine.low %v1910_v45, %v1918_v36  ;;  %v17219_v45 = vcombine.low %v1990_v34, %v1998_v35 }
 0x80f   :  { %14763 = vmatpush1.bf16.msra.mxu0 %v17105_v40  ;;  %15091 = vmatpush1.bf16.msra.mxu1 %v17107_v41  ;;  %v17220_v40 = vcombine.high %v1990_v34, %v1998_v35  ;;  %v2005_v41 = vld [vmem:[#allocation2 + $0x3c30] sm:$0xff] }
 0x810   :  { %14764 = vmatprep.subr.bf16.mxu0 %v17122_v16  ;;  %15092 = vmatprep.subr.bf16.mxu1 %v17124_v42  ;;  %v2013_v16 = vld [vmem:[#allocation2 + $0x3c70] sm:$0xff]  ;;  %v2006_v42 = vld [vmem:[#allocation2 + $0x3c38] sm:$0xff] }
 0x811   :  { %14794 = vmatprep.mubr.bf16.mxu0 %v18012_v49  ;;  %15122 = vmatprep.mubr.bf16.mxu1 %v18012_v49  ;;  %v17172_v49 = vcombine.high %v1942_v39, %v1950_v60  ;;  %v17234_v36 = vcombine.high %v2005_v41, %v2013_v16  ;;  %v17233_v51 = vcombine.low %v2005_v41, %v2013_v16  ;;  %v2110_v41 = vld [vmem:[#allocation2 + $0x3f78] sm:$0xff] }
 0x812   :  { %v17235_v52 = vcombine.low %v2006_v42, %v2014_v43 }
 0x813   :  { %14765 = vmatpush1.bf16.msra.mxu0 %v17121_v47  ;;  %15093 = vmatpush1.bf16.msra.mxu1 %v17123_v48  ;;  %v17236_v47 = vcombine.high %v2006_v42, %v2014_v43  ;;  %v2021_v48 = vld [vmem:[#allocation2 + $0x3cb0] sm:$0xff] }
 0x814   :  { %14766 = vmatprep.subr.bf16.mxu0 %v17138_v55  ;;  %15094 = vmatprep.subr.bf16.mxu1 %v17140_v50  ;;  %v2029_v55 = vld [vmem:[#allocation2 + $0x3cf0] sm:$0xff]  ;;  %v2022_v50 = vld [vmem:[#allocation2 + $0x3cb8] sm:$0xff] }
 0x815   :  { %v17250_v54 = vcombine.high %v2021_v48, %v2029_v55  ;;  %v17249_v12 = vcombine.low %v2021_v48, %v2029_v55  ;;  %v17251_v39 = vcombine.low %v2022_v50, %v2030_v59  ;;  %v2126_v48 = vld [vmem:[#allocation2 + $0x3ff8] sm:$0xff] }
 0x817   :  { %14767 = vmatpush1.bf16.msra.mxu0 %v17137_v56  ;;  %15095 = vmatpush1.bf16.msra.mxu1 %v17139_v20  ;;  %v17252_v56 = vcombine.high %v2022_v50, %v2030_v59  ;;  %v2037_v20 = vld [vmem:[#allocation2 + $0x3d30] sm:$0xff] }
 0x818   :  { %14768 = vmatprep.subr.bf16.mxu0 %v17154_v22  ;;  %15096 = vmatprep.subr.bf16.mxu1 %v17156_v58  ;;  %v2045_v22 = vld [vmem:[#allocation2 + $0x3d70] sm:$0xff]  ;;  %v2038_v58 = vld [vmem:[#allocation2 + $0x3d38] sm:$0xff] }
 0x819   :  { %v17266_v60 = vcombine.high %v2037_v20, %v2045_v22  ;;  %v17265_v57 = vcombine.low %v2037_v20, %v2045_v22  ;;  %v17267_v5 = vcombine.low %v2038_v58, %v2046_v25  ;;  %v15148_v20 = vld [vmem:[#allocation6 + $0x8] sm:$0xff] }
 0x81b   :  { %14769 = vmatpush1.bf16.msra.mxu0 %v17153_v62  ;;  %15097 = vmatpush1.bf16.msra.mxu1 %v17155_v63  ;;  %v17268_v62 = vcombine.high %v2038_v58, %v2046_v25  ;;  %v2053_v63 = vld [vmem:[#allocation2 + $0x3db0] sm:$0xff]  ;;  %v17800_v58 = vmov 0.0|0.0   ;;  %v15149_v25 = vld [vmem:[#allocation6 + $0x10] sm:$0xff] }
 0x81c   :  { %14770 = vmatprep.subr.bf16.mxu0 %v17170_v1  ;;  %15098 = vmatprep.subr.bf16.mxu1 %v17172_v49  ;;  %v2061_v1 = vld [vmem:[#allocation2 + $0x3df0] sm:$0xff]  ;;  %v2054_v49 = vld [vmem:[#allocation2 + $0x3db8] sm:$0xff] }
 0x81d   :  { %v17282_v15 = vcombine.high %v2053_v63, %v2061_v1  ;;  %v17281_v24 = vcombine.low %v2053_v63, %v2061_v1  ;;  %v17283_v46 = vcombine.low %v2054_v49, %v2062_v4  ;;  %v15153_v1 = vld [vmem:[#allocation6 + $0x30] sm:$0xff] }
 0x81f   :  { %14771 = vmatpush1.bf16.msra.mxu0 %v17169_v7  ;;  %15099 = vmatpush1.bf16.msra.mxu1 %v17171_v8  ;;  %v17284_v7 = vcombine.high %v2054_v49, %v2062_v4  ;;  %v2069_v8 = vld [vmem:[#allocation2 + $0x3e30] sm:$0xff]  ;;  %v15154_v49 = vld [vmem:[#allocation6 + $0x38] sm:$0xff] }
 0x820   :  { %14772 = vmatprep.subr.bf16.mxu0 %v17186_v53  ;;  %15100 = vmatprep.subr.bf16.mxu1 %v17188_v9  ;;  %v2077_v53 = vld [vmem:[#allocation2 + $0x3e70] sm:$0xff]  ;;  %v2070_v9 = vld [vmem:[#allocation2 + $0x3e38] sm:$0xff]  ;;  %v17413_v4 = vpack.c.bf16 %v15154_v49, %v15153_v1 }
 0x821   :  { %v17298_v13 = vcombine.high %v2069_v8, %v2077_v53  ;;  %v17297_v32 = vcombine.low %v2069_v8, %v2077_v53  ;;  %v17299_v34 = vcombine.low %v2070_v9, %v2078_v10  ;;  %v15159_v53 = vld [vmem:[#allocation6 + $0x60] sm:$0xff] }
 0x823   :  { %14773 = vmatpush1.bf16.msra.mxu0 %v17185_v14  ;;  %15101 = vmatpush1.bf16.msra.mxu1 %v17187_v17  ;;  %v17300_v14 = vcombine.high %v2070_v9, %v2078_v10  ;;  %v2085_v17 = vld [vmem:[#allocation2 + $0x3eb0] sm:$0xff]  ;;  %v15160_v9 = vld [vmem:[#allocation6 + $0x68] sm:$0xff] }
 0x824   :  { %14774 = vmatprep.subr.bf16.mxu0 %v17202_v26  ;;  %15102 = vmatprep.subr.bf16.mxu1 %v17204_v27  ;;  %v2093_v26 = vld [vmem:[#allocation2 + $0x3ef0] sm:$0xff]  ;;  %v2086_v27 = vld [vmem:[#allocation2 + $0x3eb8] sm:$0xff]  ;;  %v17422_v10 = vpack.c.bf16 %v15160_v9, %v15159_v53 }
 0x825   :  { %v17314_v35 = vcombine.high %v2085_v17, %v2093_v26  ;;  %v17313_v16 = vcombine.low %v2085_v17, %v2093_v26  ;;  %v17315_v42 = vcombine.low %v2086_v27, %v2094_v31  ;;  %v2131_v17 = vlaneseq }
 0x827   :  { %14775 = vmatpush1.bf16.msra.mxu0 %v17201_v19  ;;  %15103 = vmatpush1.bf16.msra.mxu1 %v17203_v37  ;;  %v17316_v19 = vcombine.high %v2086_v27, %v2094_v31  ;;  %v2101_v37 = vld [vmem:[#allocation2 + $0x3f30] sm:$0xff]  ;;  %v2132_v26 = vshrl.u32 %v2131_v17, 7 }
 0x828   :  { %14776 = vmatprep.subr.bf16.mxu0 %v17218_v38  ;;  %15104 = vmatprep.subr.bf16.mxu1 %v17220_v40  ;;  %v2109_v38 = vld [vmem:[#allocation2 + $0x3f70] sm:$0xff]  ;;  %v2102_v40 = vld [vmem:[#allocation2 + $0x3f38] sm:$0xff] }
 0x829   :  { %v17330_v43 = vcombine.high %v2101_v37, %v2109_v38  ;;  %v17329_v55 = vcombine.low %v2101_v37, %v2109_v38  ;;  %v17331_v50 = vcombine.low %v2102_v40, %v2110_v41  ;;  %v2133_v27 = vsub.s32 0, %v2132_v26 }
 0x82a   :  { %v2137_v31 = vsub.s32 1, %v2132_v26 }
 0x82b   :  { %14777 = vmatpush1.bf16.msra.mxu0 %v17217_v44  ;;  %15105 = vmatpush1.bf16.msra.mxu1 %v17219_v45  ;;  %v17332_v44 = vcombine.high %v2102_v40, %v2110_v41  ;;  %v2117_v45 = vld [vmem:[#allocation2 + $0x3fb0] sm:$0xff]  ;;  %v2145_v41 = vsub.s32 3, %v2132_v26 }
 0x82c   :  { %14778 = vmatprep.subr.bf16.mxu0 %v17234_v36  ;;  %15106 = vmatprep.subr.bf16.mxu1 %v17236_v47  ;;  %v2125_v36 = vld [vmem:[#allocation2 + $0x3ff0] sm:$0xff]  ;;  %v2118_v47 = vld [vmem:[#allocation2 + $0x3fb8] sm:$0xff] }
 0x82d   :  { %v17346_v59 = vcombine.high %v2117_v45, %v2125_v36 }
 0x82f   :  { %14779 = vmatpush1.bf16.msra.mxu0 %v17233_v51  ;;  %15107 = vmatpush1.bf16.msra.mxu1 %v17235_v52  ;;  %v17348_v51 = vcombine.high %v2118_v47, %v2126_v48  ;;  %v17345_v52 = vcombine.low %v2117_v45, %v2125_v36  ;;  %v2153_v36 = vsub.s32 5, %v2132_v26 }
 0x830   :  { %14780 = vmatprep.subr.bf16.mxu0 %v17250_v54  ;;  %15108 = vmatprep.subr.bf16.mxu1 %v17252_v56  ;;  %v17347_v54 = vcombine.low %v2118_v47, %v2126_v48  ;;  %v15147_v56 = vld [vmem:[#allocation6] sm:$0xff] }
 0x831   :  { %v17404_v22 = vpack.c.bf16 %v15148_v20, %v15147_v56 }
 0x833   :  { %14781 = vmatpush1.bf16.msra.mxu0 %v17249_v12  ;;  %15109 = vmatpush1.bf16.msra.mxu1 %v17251_v39  ;;  %v15150_v12 = vld [vmem:[#allocation6 + $0x18] sm:$0xff] }
 0x834   :  { %14782 = vmatprep.subr.bf16.mxu0 %v17266_v60  ;;  %15110 = vmatprep.subr.bf16.mxu1 %v17268_v62  ;;  %v17407_v39 = vpack.c.bf16 %v15150_v12, %v15149_v25  ;;  %v15151_v60 = vld [vmem:[#allocation6 + $0x20] sm:$0xff]  ;;  %v15152_v62 = vld [vmem:[#allocation6 + $0x28] sm:$0xff] }
 0x835   :  { %v17410_v63 = vpack.c.bf16 %v15152_v62, %v15151_v60 }
 0x837   :  { %14783 = vmatpush1.bf16.msra.mxu0 %v17265_v57  ;;  %15111 = vmatpush1.bf16.msra.mxu1 %v17267_v5  ;;  %v15155_v57 = vld [vmem:[#allocation6 + $0x40] sm:$0xff]  ;;  %v15156_v5 = vld [vmem:[#allocation6 + $0x48] sm:$0xff] }
 0x838   :  { %14784 = vmatprep.subr.bf16.mxu0 %v17282_v15  ;;  %15112 = vmatprep.subr.bf16.mxu1 %v17284_v7  ;;  %v17416_v15 = vpack.c.bf16 %v15156_v5, %v15155_v57  ;;  %v15158_v7 = vld [vmem:[#allocation6 + $0x58] sm:$0xff] }
 0x83b   :  { %14785 = vmatpush1.bf16.msra.mxu0 %v17281_v24  ;;  %15113 = vmatpush1.bf16.msra.mxu1 %v17283_v46  ;;  %v15161_v24 = vld [vmem:[#allocation6 + $0x70] sm:$0xff]  ;;  %v15162_v46 = vld [vmem:[#allocation6 + $0x78] sm:$0xff] }
 0x83c   :  { %14786 = vmatprep.subr.bf16.mxu0 %v17298_v13  ;;  %15114 = vmatprep.subr.bf16.mxu1 %v17300_v14  ;;  %v17425_v13 = vpack.c.bf16 %v15162_v46, %v15161_v24  ;;  %v17802_v14 = vmov 0.0  }
 0x83f   :  { %14787 = vmatpush1.bf16.msra.mxu0 %v17297_v32  ;;  %15115 = vmatpush1.bf16.msra.mxu1 %v17299_v34  ;;  %v2127_v32 = vld [vmem:[#allocation4] sm:$0xff] }
 0x840   :  { %14788 = vmatprep.subr.bf16.mxu0 %v17314_v35  ;;  %15116 = vmatprep.subr.bf16.mxu1 %v17316_v19  ;;  %v2134_v34 = vrot.slane %v2127_v32, %v2133_v27  ;;  %v2138_v35 = vrot.slane %v2127_v32, %v2137_v31  ;;  %v2141_v19 = vsub.s32 2, %v2132_v26  ;;  %v2154_v48 = vrot.slane %v2127_v32, %v2153_v36 }
 0x842   :  { %v18145_v37 = vadd.f32 %v18038_v61, %v2134_v34  ;;  %v18148_v38 = vadd.f32 %v18042_v3, %v2138_v35  ;;  %v2142_v40 = vrot.slane %v2127_v32, %v2141_v19 }
 0x843   :  { %14789 = vmatpush1.bf16.msra.mxu0 %v17313_v16  ;;  %15117 = vmatpush1.bf16.msra.mxu1 %v17315_v42  ;;  %v2149_v16 = vsub.s32 4, %v2132_v26 }
 0x844   :  { %14790 = vmatprep.subr.bf16.mxu0 %v17330_v43  ;;  %15118 = vmatprep.subr.bf16.mxu1 %v17332_v44  ;;  %v15131_v42 = vadd.f32 %v18148_v38, %v18145_v37  ;;  %v18153_v43 = vadd.f32 %v18040_v2, %v2142_v40  ;;  %v2146_v44 = vrot.slane %v2127_v32, %v2145_v41 }
 0x845   :  { %v2150_v45 = vrot.slane %v2127_v32, %v2149_v16  ;;  %v17432_v2 = vadd.f32 %v18082_v30, %v2154_v48 }
 0x846   :  { %v15132_v47 = vadd.f32 %v18153_v43, %v15131_v42  ;;  %v18157_v61 = vadd.f32 %v18044_v6, %v2146_v44 }
 0x847   :  { %14791 = vmatpush1.bf16.msra.mxu0 %v17329_v55  ;;  %15119 = vmatpush1.bf16.msra.mxu1 %v17331_v50  ;;  %v18160_v3 = vadd.f32 %v18078_v23, %v2150_v45  ;;  %v2157_v50 = vsub.s32 6, %v2132_v26 }
 0x848   :  { %14792 = vmatprep.subr.bf16.mxu0 %v17346_v59  ;;  %15120 = vmatprep.subr.bf16.mxu1 %v17348_v51  ;;  %v15133_v55 = vadd.f32 %v18157_v61, %v15132_v47 }
 0x849   :  { %v2158_v51 = vrot.slane %v2127_v32, %v2157_v50 }
 0x84a   :  { %v15134_v59 = vadd.f32 %v18160_v3, %v15133_v55 }
 0x84b   :  { %14793 = vmatpush1.bf16.msra.mxu0 %v17345_v52  ;;  %15121 = vmatpush1.bf16.msra.mxu1 %v17347_v54  ;;  %v2161_v52 = vsub.s32 7, %v2132_v26  ;;  %v2128_v54 = vld [vmem:[#allocation4 + $0x8] sm:$0xff]  ;;  %v17433_v20 = vadd.f32 %v18080_v29, %v2158_v51 }
 0x84c   :  { %17403 = vmatprep.subr.bf16.mxu0 %v17800_v58  ;;  %v15135_v56 = vadd.f32 %v17432_v2, %v15134_v59  ;;  %v2166_v6 = vrot.slane %v2128_v54, %v2133_v27  ;;  %v2170_v12 = vrot.slane %v2128_v54, %v2137_v31  ;;  %v2178_v49 = vrot.slane %v2128_v54, %v2145_v41 }
 0x84d   :  { %v2182_v57 = vrot.slane %v2128_v54, %v2149_v16  ;;  %v2186_v29 = vrot.slane %v2128_v54, %v2153_v36  ;;  %v2194_v24 = vrot.slane %v2128_v54, %v2161_v52 }
 0x84e   :  { %14795 = vmatmul.mubr.bf16.vlgmr.msra.gmra.mrb[12].mxu0 %v18020_v0  ;;  %15123 = vmatmul.mubr.bf16.vlgmr.msra.gmra.mrb[12].mxu1 %v18020_v0  ;;  %v15157_v0 = vld [vmem:[#allocation6 + $0x50] sm:$0xff]  ;;  %v17435_v25 = vadd.f32 %v18118_v11, %v2166_v6  ;;  %v17436_v62 = vadd.f32 %v18122_v21, %v2170_v12  ;;  %v17438_v5 = vadd.f32 %v18124_v28, %v2178_v49 }
 0x84f   :  { %17405 = vmatpush3.bf16.msra.mxu0 %v17404_v22  ;;  %v17419_v8 = vpack.c.bf16 %v15158_v7, %v15157_v0  ;;  %17400 = vmatprep.mubr.msk.f32.mxu0 %vm17801_vm0, %v17802_v14  ;;  %v2162_v22 = vrot.slane %v2127_v32, %v2161_v52  ;;  %v2190_v7 = vrot.slane %v2128_v54, %v2157_v50  ;;  %v17349_v32 = vld [vmem:[#allocation7] ss:$0 sm:$0xff] }
 0x850   :  { %17406 = vmatprep.subr.bf16.mxu0 %v17800_v58 }
 0x851   :  { %v17434_v23 = vadd.f32 %v18084_v33, %v2162_v22 }
 0x853   :  { %17408 = vmatpush3.bf16.msra.mxu0 %v17407_v39 }
 0x854   :  { %17409 = vmatprep.subr.bf16.mxu0 %v17800_v58 }
 0x857   :  { %17411 = vmatpush3.bf16.msra.mxu0 %v17410_v63  ;;  %v2174_v63 = vrot.slane %v2128_v54, %v2141_v19 }
 0x858   :  { %17412 = vmatprep.subr.bf16.mxu0 %v17800_v58 }
 0x859   :  { %v17437_v1 = vadd.f32 %v18120_v18, %v2174_v63 }
 0x85b   :  { %17414 = vmatpush3.bf16.msra.mxu0 %v17413_v4 }
 0x85c   :  { %17415 = vmatprep.subr.bf16.mxu0 %v17800_v58 }
 0x85f   :  { %17417 = vmatpush3.bf16.msra.mxu0 %v17416_v15 }
 0x860   :  { %17418 = vmatprep.subr.bf16.mxu0 %v17800_v58 }
 0x863   :  { %17420 = vmatpush3.bf16.msra.mxu0 %v17419_v8 }
 0x864   :  { %17421 = vmatprep.subr.bf16.mxu0 %v17800_v58 }
 0x867   :  { %17423 = vmatpush3.bf16.msra.mxu0 %v17422_v10 }
 0x868   :  { %17424 = vmatprep.subr.bf16.mxu0 %v17800_v58  ;;  %v15136_v58 = vadd.f32 %v17433_v20, %v15135_v56 }
 0x86a   :  { %v15137_v39 = vadd.f32 %v17434_v23, %v15136_v58 }
 0x86b   :  { %17426 = vmatpush3.bf16.msra.mxu0 %v17425_v13 }
 0x86c   :  { %v15138_v60 = vadd.f32 %v17435_v25, %v15137_v39 }
 0x86e   :  { %v15139_v30 = vadd.f32 %v17436_v62, %v15138_v60 }
 0x870   :  { %v15140_v4 = vadd.f32 %v17437_v1, %v15139_v30 }
 0x872   :  { %v15141_v0 = vadd.f32 %v17438_v5, %v15140_v4 }
 0x921   :  { %v14796_v15 = vpop.f32.mrb[12].mxu0  ;;  %v15124_v11 = vpop.f32.mrb[12].mxu1 }
 0x922   :  { %v17439_v33 = vadd.f32 %v14796_v15, %v2182_v57  ;;  %v14798_v8 = vpop.f32.mrb[13].mxu0  ;;  %v15126_v9 = vpop.f32.mrb[13].mxu1  ;;  %v17441_v14 = vadd.f32 %v15124_v11, %v2190_v7 }
 0x923   :  { %v17440_v53 = vadd.f32 %v14798_v8, %v2186_v29  ;;  %v14800_v10 = vpop.f32.mrb[14].mxu0  ;;  %v15128_v46 = vpop.f32.mrb[14].mxu1  ;;  %v17442_v26 = vadd.f32 %v15126_v9, %v2194_v24 }
 0x924   :  { %v15142_v21 = vadd.f32 %v17439_v33, %v15141_v0  ;;  %v14801_v13 = vpop.f32.mrb[15].mxu0  ;;  %v15129_v18 = vpop.f32.mrb[15].mxu1 }
 0x926   :  { %v15143_v17 = vadd.f32 %v17440_v53, %v15142_v21 }
 0x928   :  { %v15144_v27 = vadd.f32 %v17441_v14, %v15143_v17 }
 0x92a   :  { %v15145_v31 = vadd.f32 %v17442_v26, %v15144_v27 }
 0x92c   :  { %v15146_v28 = vmul.f32 0.0625, %v15145_v31 }
 0x92e   :  { %17401 = vmatmul.mubr.f32.vlgmr.msra.gmra.mrb[16].mxu0 %v15146_v28 }
 0xa01   :  { %v15236_v34 = vpop.f32.mrb[16].mxu0 }
 0xa02   :  { %v15237_v35 = vadd.f32 %v17349_v32, %v15236_v34  ;;  %v17402_v19 = vpop.f32.mrb[17].mxu0 }
 0xa04   :  { %v17350_v40 = vmul.f32 -1.442695, %v15237_v35 }
 0xa06   :  { %17694 = vpow2.f32 %v17350_v40 }
 0xa10   :  { %v17695_v41 = vpop.eup %17694 }
 0xa11   :  { %v15243_v16 = vadd.f32 1.0, %v17695_v41 }
 0xa13   :  { %17696 = vrcp.f32 %v15243_v16 }
 0xa1d   :  { %v17697_v42 = vpop.eup %17696 }
 0xa1e   :  { %v15246_v44 = vmul.f32 %v17697_v42, %v18145_v37  ;;  %v15248_v45 = vmul.f32 %v17697_v42, %v18148_v38  ;;  %v15250_v36 = vmul.f32 %v17697_v42, %v18153_v43  ;;  %v15252_v47 = vmul.f32 %v17697_v42, %v18157_v61 }
 0xa1f   :  { %v15254_v48 = vmul.f32 %v17697_v42, %v18160_v3  ;;  %v15256_v55 = vmul.f32 %v17697_v42, %v17432_v2  ;;  %v15258_v50 = vmul.f32 %v17697_v42, %v17433_v20  ;;  %v15260_v59 = vmul.f32 %v17697_v42, %v17434_v23 }
 0xa20   :  { %15247 = vst [vmem:[%s18229_s5] sm:$0xff] %v15246_v44  ;;  %15249 = vst [vmem:[%s18229_s5 + $0x8] sm:$0xff] %v15248_v45  ;;  %v15262_v37 = vmul.f32 %v17697_v42, %v17435_v25  ;;  %v15264_v38 = vmul.f32 %v17697_v42, %v17436_v62  ;;  %v15266_v43 = vmul.f32 %v17697_v42, %v17437_v1 }
 0xa21   :  { %15251 = vst [vmem:[%s18229_s5 + $0x10] sm:$0xff] %v15250_v36  ;;  %15253 = vst [vmem:[%s18229_s5 + $0x18] sm:$0xff] %v15252_v47  ;;  %v15268_v61 = vmul.f32 %v17697_v42, %v17438_v5  ;;  %v15270_v3 = vmul.f32 %v17697_v42, %v17439_v33  ;;  %v15272_v2 = vmul.f32 %v17697_v42, %v17440_v53 }
 0xa22   :  { %15255 = vst [vmem:[%s18229_s5 + $0x20] sm:$0xff] %v15254_v48  ;;  %15257 = vst [vmem:[%s18229_s5 + $0x28] sm:$0xff] %v15256_v55  ;;  %v15274_v51 = vmul.f32 %v17697_v42, %v17441_v14  ;;  %v15276_v52 = vmul.f32 %v17697_v42, %v17442_v26 }
 0xa23   :  { %15259 = vst [vmem:[%s18229_s5 + $0x30] sm:$0xff] %v15258_v50  ;;  %15261 = vst [vmem:[%s18229_s5 + $0x38] sm:$0xff] %v15260_v59 }
 0xa24   :  { %15263 = vst [vmem:[%s18229_s5 + $0x40] sm:$0xff] %v15262_v37  ;;  %15265 = vst [vmem:[%s18229_s5 + $0x48] sm:$0xff] %v15264_v38 }
 0xa25   :  { %15267 = vst [vmem:[%s18229_s5 + $0x50] sm:$0xff] %v15266_v43  ;;  %15269 = vst [vmem:[%s18229_s5 + $0x58] sm:$0xff] %v15268_v61 }
 0xa26   :  { %15271 = vst [vmem:[%s18229_s5 + $0x60] sm:$0xff] %v15270_v3  ;;  %15273 = vst [vmem:[%s18229_s5 + $0x68] sm:$0xff] %v15272_v2 }
 0xa27   :  { %15275 = vst [vmem:[%s18229_s5 + $0x70] sm:$0xff] %v15274_v51  ;;  %15277 = vst [vmem:[%s18229_s5 + $0x78] sm:$0xff] %v15276_v52 }
 0xa28   :  { %15282 = vsyncpa [#allocation3], 1 }
 0xa29   :  { %15283 = vsyncpa [#allocation5], 1 }
 0xa2a   :  { %15284 = vsyncpa [#allocation8], 1 }

</bundles_post_ra>
